<compile_context>
chip_gen: v7x
topology: tpu7x:2x2x1
jax: 0.10.0
libtpu: 0.0.40
codegen_flags: <defaults>
</compile_context>

<pallas_src>
import jax
import jax.numpy as jnp
from jax.experimental import pallas as pl
from jax.experimental.pallas import tpu as pltpu

# ---- toy DistilBERT-like config (proportional to distilbert-base, lane-dense) ----
BATCH     = 16                     # 16 sequences -> 128 token rows (full MXU M-tile)
SEQ       = 8
TOKENS    = BATCH * SEQ            # 128 rows
VOCAB     = 1000
MAX_POS   = 64
DIM       = 128                    # hidden dim == one full lane tile
N_HEADS   = 2
HEAD_DIM  = DIM // N_HEADS         # 64 (same per-head width as distilbert-base)
FFN_DIM   = 4 * DIM                # 512 (same 4x ratio as distilbert-base)
N_LAYERS  = 2
N_CLASSES = 4
CLS_PAD   = 128                    # logits written as a lane-dense 128-wide slab
LN_EPS    = 1e-12                  # DistilBERT LayerNorm eps
MASK_BIAS = -1e30                  # additive mask bias, kept in the f32 score path
SCALE     = 1.0 / (HEAD_DIM ** 0.5)

# "parallel" grid axis over batch tiles: shards work across v7x's two
# TensorCores; harmless (one TC) on v5e/v6e.
N_ROW_TILES = 2
B_TILE      = BATCH // N_ROW_TILES        # 8 sequences per grid step
T_TILE      = B_TILE * SEQ                # 64 token rows per grid step


# ------------------------------ in-kernel helpers -----------------------------
def _gelu_tanh(x):
    # tanh-approx GELU (EUP tanh slot).  HF uses exact erf GELU; the tanh form
    # deviates by <1e-3 which is fine for inference.
    c = 0.7978845608028654                                   # sqrt(2/pi)
    return 0.5 * x * (1.0 + jnp.tanh(c * (x + 0.044715 * x * x * x)))


def _layernorm(h, g, b):
    # Variance from sum(x) / sum(x*x): the two cross-lane reductions are
    # independent (no serial mean -> centered-square dependency).
    inv_d = 1.0 / DIM
    mu = jnp.sum(h, axis=-1, keepdims=True) * inv_d
    ex2 = jnp.sum(h * h, axis=-1, keepdims=True) * inv_d
    var = jnp.maximum(ex2 - mu * mu, 0.0)
    return (h - mu) * jax.lax.rsqrt(var + LN_EPS) * g + b


# ------------------------- fully fused forward kernel -------------------------
def _fused_forward_kernel(
        emb_ref, mask_ref, eln_g, eln_b,
        wqkv, bqkv, wo, bo, ln1_g, ln1_b,
        w1, b1, w2, b2, ln2_g, ln2_b,
        pre_w, pre_b, cls_w, cls_b,
        out_ref):
    t_tile = emb_ref.shape[0]
    b_tile = t_tile // SEQ

    # ---- embeddings.LayerNorm (dropout = inference no-op) ----
    h = _layernorm(emb_ref[...], eln_g[...], eln_b[...])                 # (T, D) f32

    # Additive attention-mask bias, computed ONCE (hoisted out of the layer and
    # head loops) and kept in f32 so the bf16 MXU cast never touches it.
    mask_bias = jnp.where(mask_ref[...] == 0.0, MASK_BIAS, 0.0)[:, None, :]   # (B,1,S)

    # TODO(synk): at real DistilBERT-base sizes (D=768, 6 layers) replace this
    # static unroll with an "arbitrary" layer grid axis + per-layer bf16 weight
    # BlockSpecs (Buffered(2) streaming on v7x's 64 MiB VMEM, full residency on
    # v5e/v6e with an explicit vmem_limit_bytes), and use flash-style kv tiling
    # (tk=128) for a lane-dense softmax.
    for l in range(N_LAYERS):                                            # static unroll
        x = h
        x_bf = x.astype(jnp.bfloat16)

        # ---- packed QKV projection: one (T,D)x(D,3D) bf16 MXU pass ----
        # Q columns (and Q bias) were pre-scaled by 1/sqrt(head_dim) at init.
        qkv = jnp.dot(x_bf, wqkv[l], preferred_element_type=jnp.float32) + bqkv[l]
        q3 = qkv[:, 0 * DIM:1 * DIM].astype(jnp.bfloat16).reshape(b_tile, SEQ, DIM)
        k3 = qkv[:, 1 * DIM:2 * DIM].astype(jnp.bfloat16).reshape(b_tile, SEQ, DIM)
        v3 = qkv[:, 2 * DIM:3 * DIM].astype(jnp.bfloat16).reshape(b_tile, SEQ, DIM)

        wo_l = wo[l]                                                     # (D, D) bf16

        # ---- self-attention: batched over batch; each head's context is folded
        # directly into the wo contraction (no concat) ----
        attn_out = None
        for hh in range(N_HEADS):                                        # static unroll
            lo = hh * HEAD_DIM
            s = jnp.einsum('bqd,bkd->bqk',
                           q3[:, :, lo:lo + HEAD_DIM], k3[:, :, lo:lo + HEAD_DIM],
                           preferred_element_type=jnp.float32)           # (B,S,S) f32
            s = s + mask_bias
            s = s - jnp.max(s, axis=-1, keepdims=True)
            e = jnp.exp(s)
            p = (e * pl.reciprocal(jnp.sum(e, axis=-1, keepdims=True),
                                   approx=True)).astype(jnp.bfloat16)
            ctx = jnp.einsum('bqk,bkd->bqd', p, v3[:, :, lo:lo + HEAD_DIM],
                             preferred_element_type=jnp.float32)         # (B,S,Dh)
            contrib = jnp.dot(ctx.reshape(t_tile, HEAD_DIM).astype(jnp.bfloat16),
                              wo_l[lo:lo + HEAD_DIM, :],
                              preferred_element_type=jnp.float32)        # (T,D)
            attn_out = contrib if attn_out is None else attn_out + contrib
        attn_out = attn_out + bo[l]

        x1 = _layernorm(x + attn_out, ln1_g[l], ln1_b[l])                # sa_layer_norm

        # ---- GELU FFN ----
        hid = _gelu_tanh(jnp.dot(x1.astype(jnp.bfloat16), w1[l],
                                 preferred_element_type=jnp.float32) + b1[l])
        ffn = jnp.dot(hid.astype(jnp.bfloat16), w2[l],
                      preferred_element_type=jnp.float32) + b2[l]
        h = _layernorm(x1 + ffn, ln2_g[l], ln2_b[l])                     # output_layer_norm

    # ---- classification head on the [CLS] rows only ----
    cls_rows = h.reshape(b_tile, SEQ, DIM)[:, 0, :]                      # (B, D)
    pooled = jnp.maximum(
        jnp.dot(cls_rows.astype(jnp.bfloat16), pre_w[...],
                preferred_element_type=jnp.float32) + pre_b[...], 0.0)
    logits = jnp.dot(pooled.astype(jnp.bfloat16), cls_w[...],
                     preferred_element_type=jnp.float32) + cls_b[...]    # (B, 128)
    out_ref[...] = logits.astype(out_ref.dtype)


def _resident_spec(x):
    # Whole-array VMEM-resident block: constant index_map -> no re-fetch across
    # the parallel row-tile grid axis.
    nd = x.ndim
    return pl.BlockSpec(x.shape, lambda i, _nd=nd: (0,) * _nd)


# --------------------------------- forward ------------------------------------
def distilbert_forward(params, input_ids, attention_mask=None):
    b, s = input_ids.shape
    assert b == BATCH and s == SEQ
    if attention_mask is None:
        attention_mask = jnp.ones((b, s), jnp.float32)
    attention_mask = attention_mask.astype(jnp.float32)

    # Embedding gather stays in plain JAX glue (pure memory lookup, not the
    # compute hot path); LayerNorm and everything downstream run in ONE fused
    # Pallas kernel.
    word = jnp.take(params["word_emb"], input_ids, axis=0)               # (B, S, D)
    pos = params["pos_emb"][:s][None, :, :]                              # (1, S, D)
    emb = (word + pos).reshape(b * s, DIM).astype(jnp.float32)

    args = (emb, attention_mask,
            params["emb_ln_g"], params["emb_ln_b"],
            params["wqkv"], params["bqkv"], params["wo"], params["bo"],
            params["ln1_g"], params["ln1_b"],
            params["w1"], params["b1"], params["w2"], params["b2"],
            params["ln2_g"], params["ln2_b"],
            params["pre_w"], params["pre_b"],
            params["cls_w_pad"], params["cls_b_pad"])

    in_specs = [
        pl.BlockSpec((T_TILE, DIM), lambda i: (i, 0)),        # token activation tile
        pl.BlockSpec((B_TILE, SEQ), lambda i: (i, 0)),        # attention-mask tile
    ] + [_resident_spec(a) for a in args[2:]]                  # weights: VMEM resident

    logits_pad = pl.pallas_call(
        _fused_forward_kernel,
        out_shape=jax.ShapeDtypeStruct((b, CLS_PAD), jnp.float32),
        grid=(N_ROW_TILES,),
        in_specs=in_specs,
        out_specs=pl.BlockSpec((B_TILE, CLS_PAD), lambda i: (i, 0)),
        compiler_params=pltpu.CompilerParams(
            dimension_semantics=("parallel",),                 # shards across v7x's 2 TCs
            vmem_limit_bytes=32 * 1024 * 1024),
    )(*args)

    # Real logits are the first N_CLASSES lanes of the padded [CLS] slab.
    return logits_pad[:, :N_CLASSES]


# ------------------------------ parameter init --------------------------------
def init_params(key):
    std = 0.02

    def nrm(k, shape):
        return jax.random.normal(k, shape, jnp.float32) * std

    keys = iter(jax.random.split(key, 4 + 4 * N_LAYERS))

    word_emb = nrm(next(keys), (VOCAB, DIM))
    pos_emb  = nrm(next(keys), (MAX_POS, DIM))
    pre_w    = nrm(next(keys), (DIM, DIM))
    cls_w    = nrm(next(keys), (DIM, N_CLASSES))
    cls_w_pad = jnp.zeros((DIM, CLS_PAD), jnp.float32).at[:, :N_CLASSES].set(cls_w)

    # Per-layer weights stacked along a leading layer axis; Q/K/V packed.
    wqkv = jnp.stack([nrm(next(keys), (DIM, 3 * DIM)) for _ in range(N_LAYERS)])
    wo   = jnp.stack([nrm(next(keys), (DIM, DIM)) for _ in range(N_LAYERS)])
    w1   = jnp.stack([nrm(next(keys), (DIM, FFN_DIM)) for _ in range(N_LAYERS)])
    w2   = jnp.stack([nrm(next(keys), (FFN_DIM, DIM)) for _ in range(N_LAYERS)])

    # Fold the 1/sqrt(head_dim) attention scale into the Q columns (and Q bias)
    # of the packed QKV projection -> no runtime q*SCALE multiply.
    wqkv = wqkv.at[:, :, :DIM].multiply(SCALE)
    bqkv = jnp.zeros((N_LAYERS, 1, 3 * DIM), jnp.float32)
    bqkv = bqkv.at[:, :, :DIM].multiply(SCALE)

    bf16 = jnp.bfloat16
    return {
        "word_emb": word_emb,
        "pos_emb":  pos_emb,
        "emb_ln_g": jnp.ones((1, DIM), jnp.float32),
        "emb_ln_b": jnp.zeros((1, DIM), jnp.float32),
        # Matmul weights stored bf16 (MXU-native on v5e/v6e/v7x); biases & LN f32.
        "wqkv": wqkv.astype(bf16), "bqkv": bqkv,
        "wo":   wo.astype(bf16),   "bo":   jnp.zeros((N_LAYERS, 1, DIM), jnp.float32),
        "ln1_g": jnp.ones((N_LAYERS, 1, DIM), jnp.float32),
        "ln1_b": jnp.zeros((N_LAYERS, 1, DIM), jnp.float32),
        "w1": w1.astype(bf16), "b1": jnp.zeros((N_LAYERS, 1, FFN_DIM), jnp.float32),
        "w2": w2.astype(bf16), "b2": jnp.zeros((N_LAYERS, 1, DIM), jnp.float32),
        "ln2_g": jnp.ones((N_LAYERS, 1, DIM), jnp.float32),
        "ln2_b": jnp.zeros((N_LAYERS, 1, DIM), jnp.float32),
        "pre_w": pre_w.astype(bf16), "pre_b": jnp.zeros((1, DIM), jnp.float32),
        "cls_w_pad": cls_w_pad.astype(bf16),
        "cls_b_pad": jnp.zeros((1, CLS_PAD), jnp.float32),
    }


if __name__ == "__main__":
    root = jax.random.PRNGKey(0)
    k_params, k_ids = jax.random.split(root)

    params = init_params(k_params)
    input_ids = jax.random.randint(k_ids, (BATCH, SEQ), 0, VOCAB, dtype=jnp.int32)
    # A couple of sequences have trailing padding to exercise the attention mask.
    attention_mask = (jnp.ones((BATCH, SEQ), jnp.float32)
                      .at[1, SEQ - 2:].set(0.0)
                      .at[9, SEQ - 3:].set(0.0))

    logits = distilbert_forward(params, input_ids, attention_mask)
    logits = jax.block_until_ready(logits)
    assert logits.shape == (BATCH, N_CLASSES) and logits.dtype == jnp.float32
    assert bool(jnp.all(jnp.isfinite(logits)))
    print("KERNEL_OK")
</pallas_src>

<mosaic_0001>
module attributes {stable_mosaic.version = 11 : i64} {
  func.func @_fused_forward_kernel(%arg0: i32, %arg1: memref<64x128xf32, #tpu.memory_space<vmem>>, %arg2: memref<8x8xf32, #tpu.memory_space<vmem>>, %arg3: memref<1x128xf32, #tpu.memory_space<vmem>>, %arg4: memref<1x128xf32, #tpu.memory_space<vmem>>, %arg5: memref<2x128x384xbf16, #tpu.memory_space<vmem>>, %arg6: memref<2x1x384xf32, #tpu.memory_space<vmem>>, %arg7: memref<2x128x128xbf16, #tpu.memory_space<vmem>>, %arg8: memref<2x1x128xf32, #tpu.memory_space<vmem>>, %arg9: memref<2x1x128xf32, #tpu.memory_space<vmem>>, %arg10: memref<2x1x128xf32, #tpu.memory_space<vmem>>, %arg11: memref<2x128x512xbf16, #tpu.memory_space<vmem>>, %arg12: memref<2x1x512xf32, #tpu.memory_space<vmem>>, %arg13: memref<2x512x128xbf16, #tpu.memory_space<vmem>>, %arg14: memref<2x1x128xf32, #tpu.memory_space<vmem>>, %arg15: memref<2x1x128xf32, #tpu.memory_space<vmem>>, %arg16: memref<2x1x128xf32, #tpu.memory_space<vmem>>, %arg17: memref<128x128xbf16, #tpu.memory_space<vmem>>, %arg18: memref<1x128xf32, #tpu.memory_space<vmem>>, %arg19: memref<128x128xbf16, #tpu.memory_space<vmem>>, %arg20: memref<1x128xf32, #tpu.memory_space<vmem>>, %arg21: memref<8x128xf32, #tpu.memory_space<vmem>>) attributes {dimension_semantics = [#tpu.dimension_semantics<parallel>], iteration_bounds = array<i64: 2>, scalar_prefetch = 0 : i64, scratch_operands = 0 : i64, tpu.core_type = #tpu.core_type<tc>, window_params = [{transform_indices = @transform_0, window_bounds = array<i64: 64, 128>}, {transform_indices = @transform_1, window_bounds = array<i64: 8, 8>}, {pipeline_mode = #tpu.pipeline_mode<synchronous>, transform_indices = @transform_2, window_bounds = array<i64: 1, 128>}, {pipeline_mode = #tpu.pipeline_mode<synchronous>, transform_indices = @transform_3, window_bounds = array<i64: 1, 128>}, {pipeline_mode = #tpu.pipeline_mode<synchronous>, transform_indices = @transform_4, window_bounds = array<i64: 2, 128, 384>}, {pipeline_mode = #tpu.pipeline_mode<synchronous>, transform_indices = @transform_5, window_bounds = array<i64: 2, 1, 384>}, {pipeline_mode = #tpu.pipeline_mode<synchronous>, transform_indices = @transform_6, window_bounds = array<i64: 2, 128, 128>}, {pipeline_mode = #tpu.pipeline_mode<synchronous>, transform_indices = @transform_7, window_bounds = array<i64: 2, 1, 128>}, {pipeline_mode = #tpu.pipeline_mode<synchronous>, transform_indices = @transform_8, window_bounds = array<i64: 2, 1, 128>}, {pipeline_mode = #tpu.pipeline_mode<synchronous>, transform_indices = @transform_9, window_bounds = array<i64: 2, 1, 128>}, {pipeline_mode = #tpu.pipeline_mode<synchronous>, transform_indices = @transform_10, window_bounds = array<i64: 2, 128, 512>}, {pipeline_mode = #tpu.pipeline_mode<synchronous>, transform_indices = @transform_11, window_bounds = array<i64: 2, 1, 512>}, {pipeline_mode = #tpu.pipeline_mode<synchronous>, transform_indices = @transform_12, window_bounds = array<i64: 2, 512, 128>}, {pipeline_mode = #tpu.pipeline_mode<synchronous>, transform_indices = @transform_13, window_bounds = array<i64: 2, 1, 128>}, {pipeline_mode = #tpu.pipeline_mode<synchronous>, transform_indices = @transform_14, window_bounds = array<i64: 2, 1, 128>}, {pipeline_mode = #tpu.pipeline_mode<synchronous>, transform_indices = @transform_15, window_bounds = array<i64: 2, 1, 128>}, {pipeline_mode = #tpu.pipeline_mode<synchronous>, transform_indices = @transform_16, window_bounds = array<i64: 128, 128>}, {pipeline_mode = #tpu.pipeline_mode<synchronous>, transform_indices = @transform_17, window_bounds = array<i64: 1, 128>}, {pipeline_mode = #tpu.pipeline_mode<synchronous>, transform_indices = @transform_18, window_bounds = array<i64: 128, 128>}, {pipeline_mode = #tpu.pipeline_mode<synchronous>, transform_indices = @transform_19, window_bounds = array<i64: 1, 128>}, {transform_indices = @transform_20, window_bounds = array<i64: 8, 128>}]} {
    %c0 = arith.constant 0 : index
    %c0_0 = arith.constant 0 : index
    %0 = vector.load %arg1[%c0, %c0_0] : memref<64x128xf32, #tpu.memory_space<vmem>>, vector<64x128xf32>
    %c0_1 = arith.constant 0 : index
    %c0_2 = arith.constant 0 : index
    %1 = vector.load %arg3[%c0_1, %c0_2] : memref<1x128xf32, #tpu.memory_space<vmem>>, vector<1x128xf32>
    %c0_3 = arith.constant 0 : index
    %c0_4 = arith.constant 0 : index
    %2 = vector.load %arg4[%c0_3, %c0_4] : memref<1x128xf32, #tpu.memory_space<vmem>>, vector<1x128xf32>
    %cst = arith.constant dense<0.000000e+00> : vector<64xf32>
    %3 = vector.multi_reduction <add>, %0, %cst [1] : vector<64x128xf32> to vector<64xf32>
    %4 = vector.shape_cast %3 : vector<64xf32> to vector<64x1xf32>
    %cst_5 = arith.constant 7.812500e-03 : f32
    %5 = vector.broadcast %cst_5 : f32 to vector<64x1xf32>
    %6 = arith.mulf %4, %5 : vector<64x1xf32>
    %7 = arith.mulf %0, %0 : vector<64x128xf32>
    %cst_6 = arith.constant dense<0.000000e+00> : vector<64xf32>
    %8 = vector.multi_reduction <add>, %7, %cst_6 [1] : vector<64x128xf32> to vector<64xf32>
    %9 = vector.shape_cast %8 : vector<64xf32> to vector<64x1xf32>
    %cst_7 = arith.constant 7.812500e-03 : f32
    %10 = vector.broadcast %cst_7 : f32 to vector<64x1xf32>
    %11 = arith.mulf %9, %10 : vector<64x1xf32>
    %12 = arith.mulf %6, %6 : vector<64x1xf32>
    %13 = arith.subf %11, %12 : vector<64x1xf32>
    %cst_8 = arith.constant 0.000000e+00 : f32
    %14 = vector.broadcast %cst_8 : f32 to vector<64x1xf32>
    %15 = arith.maximumf %13, %14 : vector<64x1xf32>
    %16 = vector.broadcast %6 : vector<64x1xf32> to vector<64x128xf32>
    %17 = arith.subf %0, %16 : vector<64x128xf32>
    %cst_9 = arith.constant 9.99999996E-13 : f32
    %18 = vector.broadcast %cst_9 : f32 to vector<64x1xf32>
    %19 = arith.addf %15, %18 : vector<64x1xf32>
    %20 = math.rsqrt %19 : vector<64x1xf32>
    %21 = vector.broadcast %20 : vector<64x1xf32> to vector<64x128xf32>
    %22 = arith.mulf %17, %21 : vector<64x128xf32>
    %23 = vector.broadcast %1 : vector<1x128xf32> to vector<64x128xf32>
    %24 = arith.mulf %22, %23 : vector<64x128xf32>
    %25 = vector.broadcast %2 : vector<1x128xf32> to vector<64x128xf32>
    %26 = arith.addf %24, %25 : vector<64x128xf32>
    %c0_10 = arith.constant 0 : index
    %c0_11 = arith.constant 0 : index
    %27 = vector.load %arg2[%c0_10, %c0_11] : memref<8x8xf32, #tpu.memory_space<vmem>>, vector<8x8xf32>
    %cst_12 = arith.constant 0.000000e+00 : f32
    %28 = vector.broadcast %cst_12 : f32 to vector<8x8xf32>
    %29 = arith.cmpf oeq, %27, %28 : vector<8x8xf32>
    %cst_13 = arith.constant -1.000000e+30 : f32
    %cst_14 = arith.constant 0.000000e+00 : f32
    %30 = vector.broadcast %cst_13 : f32 to vector<8x8xf32>
    %31 = vector.broadcast %cst_14 : f32 to vector<8x8xf32>
    %32 = arith.select %29, %30, %31 : vector<8x8xi1>, vector<8x8xf32>
    %33 = vector.shape_cast %32 : vector<8x8xf32> to vector<8x1x8xf32>
    %34 = arith.truncf %26 : vector<64x128xf32> to vector<64x128xbf16>
    %c0_15 = arith.constant 0 : index
    %c0_16 = arith.constant 0 : index
    %c0_17 = arith.constant 0 : index
    %35 = vector.load %arg5[%c0_15, %c0_16, %c0_17] : memref<2x128x384xbf16, #tpu.memory_space<vmem>>, vector<1x128x384xbf16>
    %36 = vector.shape_cast %35 : vector<1x128x384xbf16> to vector<128x384xbf16>
    %cst_18 = arith.constant dense<0.000000e+00> : vector<64x384xf32>
    %37 = tpu.matmul %34, %36, %cst_18 {dimension_numbers = #tpu.dot_dimension_numbers<[1], [0], [0], [1], [0, 0, 1, 1], [], []>} : vector<64x128xbf16>, vector<128x384xbf16>, vector<64x384xf32> -> vector<64x384xf32>
    %c0_19 = arith.constant 0 : index
    %c0_20 = arith.constant 0 : index
    %c0_21 = arith.constant 0 : index
    %38 = vector.load %arg6[%c0_19, %c0_20, %c0_21] : memref<2x1x384xf32, #tpu.memory_space<vmem>>, vector<1x1x384xf32>
    %39 = vector.shape_cast %38 : vector<1x1x384xf32> to vector<1x384xf32>
    %40 = vector.broadcast %39 : vector<1x384xf32> to vector<64x384xf32>
    %41 = arith.addf %37, %40 : vector<64x384xf32>
    %42 = vector.extract_strided_slice %41 {offsets = [0, 0], sizes = [64, 128], strides = [1, 1]} : vector<64x384xf32> to vector<64x128xf32>
    %43 = arith.truncf %42 : vector<64x128xf32> to vector<64x128xbf16>
    %44 = vector.shape_cast %43 : vector<64x128xbf16> to vector<8x8x128xbf16>
    %45 = vector.extract_strided_slice %41 {offsets = [0, 128], sizes = [64, 128], strides = [1, 1]} : vector<64x384xf32> to vector<64x128xf32>
    %46 = arith.truncf %45 : vector<64x128xf32> to vector<64x128xbf16>
    %47 = vector.shape_cast %46 : vector<64x128xbf16> to vector<8x8x128xbf16>
    %48 = vector.extract_strided_slice %41 {offsets = [0, 256], sizes = [64, 128], strides = [1, 1]} : vector<64x384xf32> to vector<64x128xf32>
    %49 = arith.truncf %48 : vector<64x128xf32> to vector<64x128xbf16>
    %50 = vector.shape_cast %49 : vector<64x128xbf16> to vector<8x8x128xbf16>
    %c0_22 = arith.constant 0 : index
    %c0_23 = arith.constant 0 : index
    %c0_24 = arith.constant 0 : index
    %51 = vector.load %arg7[%c0_22, %c0_23, %c0_24] : memref<2x128x128xbf16, #tpu.memory_space<vmem>>, vector<1x128x128xbf16>
    %52 = vector.shape_cast %51 : vector<1x128x128xbf16> to vector<128x128xbf16>
    %53 = vector.extract_strided_slice %44 {offsets = [0, 0, 0], sizes = [8, 8, 64], strides = [1, 1, 1]} : vector<8x8x128xbf16> to vector<8x8x64xbf16>
    %54 = vector.extract_strided_slice %47 {offsets = [0, 0, 0], sizes = [8, 8, 64], strides = [1, 1, 1]} : vector<8x8x128xbf16> to vector<8x8x64xbf16>
    "tpu.trace_start"() <{level = 10 : i32, message = "bqd,bkd->bqk"}> : () -> ()
    %cst_25 = arith.constant dense<0.000000e+00> : vector<8x8x8xf32>
    %55 = tpu.matmul %53, %54, %cst_25 {dimension_numbers = #tpu.dot_dimension_numbers<[2], [2], [1], [1], [0, 0, 0, 1, 1, 1], [0], [0]>} : vector<8x8x64xbf16>, vector<8x8x64xbf16>, vector<8x8x8xf32> -> vector<8x8x8xf32>
    "tpu.trace_stop"() : () -> ()
    %56 = vector.broadcast %33 : vector<8x1x8xf32> to vector<8x8x8xf32>
    %57 = arith.addf %55, %56 : vector<8x8x8xf32>
    %cst_26 = arith.constant dense<0xFF800000> : vector<8x8xf32>
    %58 = vector.multi_reduction <maximumf>, %57, %cst_26 [2] : vector<8x8x8xf32> to vector<8x8xf32>
    %59 = vector.shape_cast %58 : vector<8x8xf32> to vector<8x8x1xf32>
    %60 = vector.broadcast %59 : vector<8x8x1xf32> to vector<8x8x8xf32>
    %61 = arith.subf %57, %60 : vector<8x8x8xf32>
    %62 = math.exp %61 : vector<8x8x8xf32>
    %cst_27 = arith.constant dense<0.000000e+00> : vector<8x8xf32>
    %63 = vector.multi_reduction <add>, %62, %cst_27 [2] : vector<8x8x8xf32> to vector<8x8xf32>
    %64 = vector.shape_cast %63 : vector<8x8xf32> to vector<8x8x1xf32>
    %65 = tpu.reciprocal %64 {approx = true} : vector<8x8x1xf32> -> vector<8x8x1xf32>
    %66 = vector.broadcast %65 : vector<8x8x1xf32> to vector<8x8x8xf32>
    %67 = arith.mulf %62, %66 : vector<8x8x8xf32>
    %68 = arith.truncf %67 : vector<8x8x8xf32> to vector<8x8x8xbf16>
    %69 = vector.extract_strided_slice %50 {offsets = [0, 0, 0], sizes = [8, 8, 64], strides = [1, 1, 1]} : vector<8x8x128xbf16> to vector<8x8x64xbf16>
    "tpu.trace_start"() <{level = 10 : i32, message = "bqk,bkd->bqd"}> : () -> ()
    %cst_28 = arith.constant dense<0.000000e+00> : vector<8x8x64xf32>
    %70 = tpu.matmul %68, %69, %cst_28 {dimension_numbers = #tpu.dot_dimension_numbers<[2], [1], [1], [2], [0, 0, 0, 1, 1, 2], [0], [0]>} : vector<8x8x8xbf16>, vector<8x8x64xbf16>, vector<8x8x64xf32> -> vector<8x8x64xf32>
    "tpu.trace_stop"() : () -> ()
    %71 = vector.shape_cast %70 : vector<8x8x64xf32> to vector<64x64xf32>
    %72 = arith.truncf %71 : vector<64x64xf32> to vector<64x64xbf16>
    %73 = vector.extract_strided_slice %52 {offsets = [0, 0], sizes = [64, 128], strides = [1, 1]} : vector<128x128xbf16> to vector<64x128xbf16>
    %cst_29 = arith.constant dense<0.000000e+00> : vector<64x128xf32>
    %74 = tpu.matmul %72, %73, %cst_29 {dimension_numbers = #tpu.dot_dimension_numbers<[1], [0], [0], [1], [0, 0, 1, 1], [], []>} : vector<64x64xbf16>, vector<64x128xbf16>, vector<64x128xf32> -> vector<64x128xf32>
    %75 = vector.extract_strided_slice %44 {offsets = [0, 0, 64], sizes = [8, 8, 64], strides = [1, 1, 1]} : vector<8x8x128xbf16> to vector<8x8x64xbf16>
    %76 = vector.extract_strided_slice %47 {offsets = [0, 0, 64], sizes = [8, 8, 64], strides = [1, 1, 1]} : vector<8x8x128xbf16> to vector<8x8x64xbf16>
    "tpu.trace_start"() <{level = 10 : i32, message = "bqd,bkd->bqk"}> : () -> ()
    %cst_30 = arith.constant dense<0.000000e+00> : vector<8x8x8xf32>
    %77 = tpu.matmul %75, %76, %cst_30 {dimension_numbers = #tpu.dot_dimension_numbers<[2], [2], [1], [1], [0, 0, 0, 1, 1, 1], [0], [0]>} : vector<8x8x64xbf16>, vector<8x8x64xbf16>, vector<8x8x8xf32> -> vector<8x8x8xf32>
    "tpu.trace_stop"() : () -> ()
    %78 = vector.broadcast %33 : vector<8x1x8xf32> to vector<8x8x8xf32>
    %79 = arith.addf %77, %78 : vector<8x8x8xf32>
    %cst_31 = arith.constant dense<0xFF800000> : vector<8x8xf32>
    %80 = vector.multi_reduction <maximumf>, %79, %cst_31 [2] : vector<8x8x8xf32> to vector<8x8xf32>
    %81 = vector.shape_cast %80 : vector<8x8xf32> to vector<8x8x1xf32>
    %82 = vector.broadcast %81 : vector<8x8x1xf32> to vector<8x8x8xf32>
    %83 = arith.subf %79, %82 : vector<8x8x8xf32>
    %84 = math.exp %83 : vector<8x8x8xf32>
    %cst_32 = arith.constant dense<0.000000e+00> : vector<8x8xf32>
    %85 = vector.multi_reduction <add>, %84, %cst_32 [2] : vector<8x8x8xf32> to vector<8x8xf32>
    %86 = vector.shape_cast %85 : vector<8x8xf32> to vector<8x8x1xf32>
    %87 = tpu.reciprocal %86 {approx = true} : vector<8x8x1xf32> -> vector<8x8x1xf32>
    %88 = vector.broadcast %87 : vector<8x8x1xf32> to vector<8x8x8xf32>
    %89 = arith.mulf %84, %88 : vector<8x8x8xf32>
    %90 = arith.truncf %89 : vector<8x8x8xf32> to vector<8x8x8xbf16>
    %91 = vector.extract_strided_slice %50 {offsets = [0, 0, 64], sizes = [8, 8, 64], strides = [1, 1, 1]} : vector<8x8x128xbf16> to vector<8x8x64xbf16>
    "tpu.trace_start"() <{level = 10 : i32, message = "bqk,bkd->bqd"}> : () -> ()
    %cst_33 = arith.constant dense<0.000000e+00> : vector<8x8x64xf32>
    %92 = tpu.matmul %90, %91, %cst_33 {dimension_numbers = #tpu.dot_dimension_numbers<[2], [1], [1], [2], [0, 0, 0, 1, 1, 2], [0], [0]>} : vector<8x8x8xbf16>, vector<8x8x64xbf16>, vector<8x8x64xf32> -> vector<8x8x64xf32>
    "tpu.trace_stop"() : () -> ()
    %93 = vector.shape_cast %92 : vector<8x8x64xf32> to vector<64x64xf32>
    %94 = arith.truncf %93 : vector<64x64xf32> to vector<64x64xbf16>
    %95 = vector.extract_strided_slice %52 {offsets = [64, 0], sizes = [64, 128], strides = [1, 1]} : vector<128x128xbf16> to vector<64x128xbf16>
    %cst_34 = arith.constant dense<0.000000e+00> : vector<64x128xf32>
    %96 = tpu.matmul %94, %95, %cst_34 {dimension_numbers = #tpu.dot_dimension_numbers<[1], [0], [0], [1], [0, 0, 1, 1], [], []>} : vector<64x64xbf16>, vector<64x128xbf16>, vector<64x128xf32> -> vector<64x128xf32>
    %97 = arith.addf %74, %96 : vector<64x128xf32>
    %c0_35 = arith.constant 0 : index
    %c0_36 = arith.constant 0 : index
    %c0_37 = arith.constant 0 : index
    %98 = vector.load %arg8[%c0_35, %c0_36, %c0_37] : memref<2x1x128xf32, #tpu.memory_space<vmem>>, vector<1x1x128xf32>
    %99 = vector.shape_cast %98 : vector<1x1x128xf32> to vector<1x128xf32>
    %100 = vector.broadcast %99 : vector<1x128xf32> to vector<64x128xf32>
    %101 = arith.addf %97, %100 : vector<64x128xf32>
    %102 = arith.addf %26, %101 : vector<64x128xf32>
    %c0_38 = arith.constant 0 : index
    %c0_39 = arith.constant 0 : index
    %c0_40 = arith.constant 0 : index
    %103 = vector.load %arg9[%c0_38, %c0_39, %c0_40] : memref<2x1x128xf32, #tpu.memory_space<vmem>>, vector<1x1x128xf32>
    %104 = vector.shape_cast %103 : vector<1x1x128xf32> to vector<1x128xf32>
    %c0_41 = arith.constant 0 : index
    %c0_42 = arith.constant 0 : index
    %c0_43 = arith.constant 0 : index
    %105 = vector.load %arg10[%c0_41, %c0_42, %c0_43] : memref<2x1x128xf32, #tpu.memory_space<vmem>>, vector<1x1x128xf32>
    %106 = vector.shape_cast %105 : vector<1x1x128xf32> to vector<1x128xf32>
    %cst_44 = arith.constant dense<0.000000e+00> : vector<64xf32>
    %107 = vector.multi_reduction <add>, %102, %cst_44 [1] : vector<64x128xf32> to vector<64xf32>
    %108 = vector.shape_cast %107 : vector<64xf32> to vector<64x1xf32>
    %cst_45 = arith.constant 7.812500e-03 : f32
    %109 = vector.broadcast %cst_45 : f32 to vector<64x1xf32>
    %110 = arith.mulf %108, %109 : vector<64x1xf32>
    %111 = arith.mulf %102, %102 : vector<64x128xf32>
    %cst_46 = arith.constant dense<0.000000e+00> : vector<64xf32>
    %112 = vector.multi_reduction <add>, %111, %cst_46 [1] : vector<64x128xf32> to vector<64xf32>
    %113 = vector.shape_cast %112 : vector<64xf32> to vector<64x1xf32>
    %cst_47 = arith.constant 7.812500e-03 : f32
    %114 = vector.broadcast %cst_47 : f32 to vector<64x1xf32>
    %115 = arith.mulf %113, %114 : vector<64x1xf32>
    %116 = arith.mulf %110, %110 : vector<64x1xf32>
    %117 = arith.subf %115, %116 : vector<64x1xf32>
    %cst_48 = arith.constant 0.000000e+00 : f32
    %118 = vector.broadcast %cst_48 : f32 to vector<64x1xf32>
    %119 = arith.maximumf %117, %118 : vector<64x1xf32>
    %120 = vector.broadcast %110 : vector<64x1xf32> to vector<64x128xf32>
    %121 = arith.subf %102, %120 : vector<64x128xf32>
    %cst_49 = arith.constant 9.99999996E-13 : f32
    %122 = vector.broadcast %cst_49 : f32 to vector<64x1xf32>
    %123 = arith.addf %119, %122 : vector<64x1xf32>
    %124 = math.rsqrt %123 : vector<64x1xf32>
    %125 = vector.broadcast %124 : vector<64x1xf32> to vector<64x128xf32>
    %126 = arith.mulf %121, %125 : vector<64x128xf32>
    %127 = vector.broadcast %104 : vector<1x128xf32> to vector<64x128xf32>
    %128 = arith.mulf %126, %127 : vector<64x128xf32>
    %129 = vector.broadcast %106 : vector<1x128xf32> to vector<64x128xf32>
    %130 = arith.addf %128, %129 : vector<64x128xf32>
    %131 = arith.truncf %130 : vector<64x128xf32> to vector<64x128xbf16>
    %c0_50 = arith.constant 0 : index
    %c0_51 = arith.constant 0 : index
    %c0_52 = arith.constant 0 : index
    %132 = vector.load %arg11[%c0_50, %c0_51, %c0_52] : memref<2x128x512xbf16, #tpu.memory_space<vmem>>, vector<1x128x512xbf16>
    %133 = vector.shape_cast %132 : vector<1x128x512xbf16> to vector<128x512xbf16>
    %cst_53 = arith.constant dense<0.000000e+00> : vector<64x512xf32>
    %134 = tpu.matmul %131, %133, %cst_53 {dimension_numbers = #tpu.dot_dimension_numbers<[1], [0], [0], [1], [0, 0, 1, 1], [], []>} : vector<64x128xbf16>, vector<128x512xbf16>, vector<64x512xf32> -> vector<64x512xf32>
    %c0_54 = arith.constant 0 : index
    %c0_55 = arith.constant 0 : index
    %c0_56 = arith.constant 0 : index
    %135 = vector.load %arg12[%c0_54, %c0_55, %c0_56] : memref<2x1x512xf32, #tpu.memory_space<vmem>>, vector<1x1x512xf32>
    %136 = vector.shape_cast %135 : vector<1x1x512xf32> to vector<1x512xf32>
    %137 = vector.broadcast %136 : vector<1x512xf32> to vector<64x512xf32>
    %138 = arith.addf %134, %137 : vector<64x512xf32>
    %cst_57 = arith.constant 5.000000e-01 : f32
    %139 = vector.broadcast %cst_57 : f32 to vector<64x512xf32>
    %140 = arith.mulf %139, %138 : vector<64x512xf32>
    %cst_58 = arith.constant 4.471500e-02 : f32
    %141 = vector.broadcast %cst_58 : f32 to vector<64x512xf32>
    %142 = arith.mulf %141, %138 : vector<64x512xf32>
    %143 = arith.mulf %142, %138 : vector<64x512xf32>
    %144 = arith.mulf %143, %138 : vector<64x512xf32>
    %145 = arith.addf %138, %144 : vector<64x512xf32>
    %cst_59 = arith.constant 0.797884583 : f32
    %146 = vector.broadcast %cst_59 : f32 to vector<64x512xf32>
    %147 = arith.mulf %146, %145 : vector<64x512xf32>
    %148 = math.tanh %147 : vector<64x512xf32>
    %cst_60 = arith.constant 1.000000e+00 : f32
    %149 = vector.broadcast %cst_60 : f32 to vector<64x512xf32>
    %150 = arith.addf %149, %148 : vector<64x512xf32>
    %151 = arith.mulf %140, %150 : vector<64x512xf32>
    %152 = arith.truncf %151 : vector<64x512xf32> to vector<64x512xbf16>
    %c0_61 = arith.constant 0 : index
    %c0_62 = arith.constant 0 : index
    %c0_63 = arith.constant 0 : index
    %153 = vector.load %arg13[%c0_61, %c0_62, %c0_63] : memref<2x512x128xbf16, #tpu.memory_space<vmem>>, vector<1x512x128xbf16>
    %154 = vector.shape_cast %153 : vector<1x512x128xbf16> to vector<512x128xbf16>
    %cst_64 = arith.constant dense<0.000000e+00> : vector<64x128xf32>
    %155 = tpu.matmul %152, %154, %cst_64 {dimension_numbers = #tpu.dot_dimension_numbers<[1], [0], [0], [1], [0, 0, 1, 1], [], []>} : vector<64x512xbf16>, vector<512x128xbf16>, vector<64x128xf32> -> vector<64x128xf32>
    %c0_65 = arith.constant 0 : index
    %c0_66 = arith.constant 0 : index
    %c0_67 = arith.constant 0 : index
    %156 = vector.load %arg14[%c0_65, %c0_66, %c0_67] : memref<2x1x128xf32, #tpu.memory_space<vmem>>, vector<1x1x128xf32>
    %157 = vector.shape_cast %156 : vector<1x1x128xf32> to vector<1x128xf32>
    %158 = vector.broadcast %157 : vector<1x128xf32> to vector<64x128xf32>
    %159 = arith.addf %155, %158 : vector<64x128xf32>
    %160 = arith.addf %130, %159 : vector<64x128xf32>
    %c0_68 = arith.constant 0 : index
    %c0_69 = arith.constant 0 : index
    %c0_70 = arith.constant 0 : index
    %161 = vector.load %arg15[%c0_68, %c0_69, %c0_70] : memref<2x1x128xf32, #tpu.memory_space<vmem>>, vector<1x1x128xf32>
    %162 = vector.shape_cast %161 : vector<1x1x128xf32> to vector<1x128xf32>
    %c0_71 = arith.constant 0 : index
    %c0_72 = arith.constant 0 : index
    %c0_73 = arith.constant 0 : index
    %163 = vector.load %arg16[%c0_71, %c0_72, %c0_73] : memref<2x1x128xf32, #tpu.memory_space<vmem>>, vector<1x1x128xf32>
    %164 = vector.shape_cast %163 : vector<1x1x128xf32> to vector<1x128xf32>
    %cst_74 = arith.constant dense<0.000000e+00> : vector<64xf32>
    %165 = vector.multi_reduction <add>, %160, %cst_74 [1] : vector<64x128xf32> to vector<64xf32>
    %166 = vector.shape_cast %165 : vector<64xf32> to vector<64x1xf32>
    %cst_75 = arith.constant 7.812500e-03 : f32
    %167 = vector.broadcast %cst_75 : f32 to vector<64x1xf32>
    %168 = arith.mulf %166, %167 : vector<64x1xf32>
    %169 = arith.mulf %160, %160 : vector<64x128xf32>
    %cst_76 = arith.constant dense<0.000000e+00> : vector<64xf32>
    %170 = vector.multi_reduction <add>, %169, %cst_76 [1] : vector<64x128xf32> to vector<64xf32>
    %171 = vector.shape_cast %170 : vector<64xf32> to vector<64x1xf32>
    %cst_77 = arith.constant 7.812500e-03 : f32
    %172 = vector.broadcast %cst_77 : f32 to vector<64x1xf32>
    %173 = arith.mulf %171, %172 : vector<64x1xf32>
    %174 = arith.mulf %168, %168 : vector<64x1xf32>
    %175 = arith.subf %173, %174 : vector<64x1xf32>
    %cst_78 = arith.constant 0.000000e+00 : f32
    %176 = vector.broadcast %cst_78 : f32 to vector<64x1xf32>
    %177 = arith.maximumf %175, %176 : vector<64x1xf32>
    %178 = vector.broadcast %168 : vector<64x1xf32> to vector<64x128xf32>
    %179 = arith.subf %160, %178 : vector<64x128xf32>
    %cst_79 = arith.constant 9.99999996E-13 : f32
    %180 = vector.broadcast %cst_79 : f32 to vector<64x1xf32>
    %181 = arith.addf %177, %180 : vector<64x1xf32>
    %182 = math.rsqrt %181 : vector<64x1xf32>
    %183 = vector.broadcast %182 : vector<64x1xf32> to vector<64x128xf32>
    %184 = arith.mulf %179, %183 : vector<64x128xf32>
    %185 = vector.broadcast %162 : vector<1x128xf32> to vector<64x128xf32>
    %186 = arith.mulf %184, %185 : vector<64x128xf32>
    %187 = vector.broadcast %164 : vector<1x128xf32> to vector<64x128xf32>
    %188 = arith.addf %186, %187 : vector<64x128xf32>
    %189 = arith.truncf %188 : vector<64x128xf32> to vector<64x128xbf16>
    %c1 = arith.constant 1 : index
    %c0_80 = arith.constant 0 : index
    %c0_81 = arith.constant 0 : index
    %190 = vector.load %arg5[%c1, %c0_80, %c0_81] : memref<2x128x384xbf16, #tpu.memory_space<vmem>>, vector<1x128x384xbf16>
    %191 = vector.shape_cast %190 : vector<1x128x384xbf16> to vector<128x384xbf16>
    %cst_82 = arith.constant dense<0.000000e+00> : vector<64x384xf32>
    %192 = tpu.matmul %189, %191, %cst_82 {dimension_numbers = #tpu.dot_dimension_numbers<[1], [0], [0], [1], [0, 0, 1, 1], [], []>} : vector<64x128xbf16>, vector<128x384xbf16>, vector<64x384xf32> -> vector<64x384xf32>
    %c1_83 = arith.constant 1 : index
    %c0_84 = arith.constant 0 : index
    %c0_85 = arith.constant 0 : index
    %193 = vector.load %arg6[%c1_83, %c0_84, %c0_85] : memref<2x1x384xf32, #tpu.memory_space<vmem>>, vector<1x1x384xf32>
    %194 = vector.shape_cast %193 : vector<1x1x384xf32> to vector<1x384xf32>
    %195 = vector.broadcast %194 : vector<1x384xf32> to vector<64x384xf32>
    %196 = arith.addf %192, %195 : vector<64x384xf32>
    %197 = vector.extract_strided_slice %196 {offsets = [0, 0], sizes = [64, 128], strides = [1, 1]} : vector<64x384xf32> to vector<64x128xf32>
    %198 = arith.truncf %197 : vector<64x128xf32> to vector<64x128xbf16>
    %199 = vector.shape_cast %198 : vector<64x128xbf16> to vector<8x8x128xbf16>
    %200 = vector.extract_strided_slice %196 {offsets = [0, 128], sizes = [64, 128], strides = [1, 1]} : vector<64x384xf32> to vector<64x128xf32>
    %201 = arith.truncf %200 : vector<64x128xf32> to vector<64x128xbf16>
    %202 = vector.shape_cast %201 : vector<64x128xbf16> to vector<8x8x128xbf16>
    %203 = vector.extract_strided_slice %196 {offsets = [0, 256], sizes = [64, 128], strides = [1, 1]} : vector<64x384xf32> to vector<64x128xf32>
    %204 = arith.truncf %203 : vector<64x128xf32> to vector<64x128xbf16>
    %205 = vector.shape_cast %204 : vector<64x128xbf16> to vector<8x8x128xbf16>
    %c1_86 = arith.constant 1 : index
    %c0_87 = arith.constant 0 : index
    %c0_88 = arith.constant 0 : index
    %206 = vector.load %arg7[%c1_86, %c0_87, %c0_88] : memref<2x128x128xbf16, #tpu.memory_space<vmem>>, vector<1x128x128xbf16>
    %207 = vector.shape_cast %206 : vector<1x128x128xbf16> to vector<128x128xbf16>
    %208 = vector.extract_strided_slice %199 {offsets = [0, 0, 0], sizes = [8, 8, 64], strides = [1, 1, 1]} : vector<8x8x128xbf16> to vector<8x8x64xbf16>
    %209 = vector.extract_strided_slice %202 {offsets = [0, 0, 0], sizes = [8, 8, 64], strides = [1, 1, 1]} : vector<8x8x128xbf16> to vector<8x8x64xbf16>
    "tpu.trace_start"() <{level = 10 : i32, message = "bqd,bkd->bqk"}> : () -> ()
    %cst_89 = arith.constant dense<0.000000e+00> : vector<8x8x8xf32>
    %210 = tpu.matmul %208, %209, %cst_89 {dimension_numbers = #tpu.dot_dimension_numbers<[2], [2], [1], [1], [0, 0, 0, 1, 1, 1], [0], [0]>} : vector<8x8x64xbf16>, vector<8x8x64xbf16>, vector<8x8x8xf32> -> vector<8x8x8xf32>
    "tpu.trace_stop"() : () -> ()
    %211 = vector.broadcast %33 : vector<8x1x8xf32> to vector<8x8x8xf32>
    %212 = arith.addf %210, %211 : vector<8x8x8xf32>
    %cst_90 = arith.constant dense<0xFF800000> : vector<8x8xf32>
    %213 = vector.multi_reduction <maximumf>, %212, %cst_90 [2] : vector<8x8x8xf32> to vector<8x8xf32>
    %214 = vector.shape_cast %213 : vector<8x8xf32> to vector<8x8x1xf32>
    %215 = vector.broadcast %214 : vector<8x8x1xf32> to vector<8x8x8xf32>
    %216 = arith.subf %212, %215 : vector<8x8x8xf32>
    %217 = math.exp %216 : vector<8x8x8xf32>
    %cst_91 = arith.constant dense<0.000000e+00> : vector<8x8xf32>
    %218 = vector.multi_reduction <add>, %217, %cst_91 [2] : vector<8x8x8xf32> to vector<8x8xf32>
    %219 = vector.shape_cast %218 : vector<8x8xf32> to vector<8x8x1xf32>
    %220 = tpu.reciprocal %219 {approx = true} : vector<8x8x1xf32> -> vector<8x8x1xf32>
    %221 = vector.broadcast %220 : vector<8x8x1xf32> to vector<8x8x8xf32>
    %222 = arith.mulf %217, %221 : vector<8x8x8xf32>
    %223 = arith.truncf %222 : vector<8x8x8xf32> to vector<8x8x8xbf16>
    %224 = vector.extract_strided_slice %205 {offsets = [0, 0, 0], sizes = [8, 8, 64], strides = [1, 1, 1]} : vector<8x8x128xbf16> to vector<8x8x64xbf16>
    "tpu.trace_start"() <{level = 10 : i32, message = "bqk,bkd->bqd"}> : () -> ()
    %cst_92 = arith.constant dense<0.000000e+00> : vector<8x8x64xf32>
    %225 = tpu.matmul %223, %224, %cst_92 {dimension_numbers = #tpu.dot_dimension_numbers<[2], [1], [1], [2], [0, 0, 0, 1, 1, 2], [0], [0]>} : vector<8x8x8xbf16>, vector<8x8x64xbf16>, vector<8x8x64xf32> -> vector<8x8x64xf32>
    "tpu.trace_stop"() : () -> ()
    %226 = vector.shape_cast %225 : vector<8x8x64xf32> to vector<64x64xf32>
    %227 = arith.truncf %226 : vector<64x64xf32> to vector<64x64xbf16>
    %228 = vector.extract_strided_slice %207 {offsets = [0, 0], sizes = [64, 128], strides = [1, 1]} : vector<128x128xbf16> to vector<64x128xbf16>
    %cst_93 = arith.constant dense<0.000000e+00> : vector<64x128xf32>
    %229 = tpu.matmul %227, %228, %cst_93 {dimension_numbers = #tpu.dot_dimension_numbers<[1], [0], [0], [1], [0, 0, 1, 1], [], []>} : vector<64x64xbf16>, vector<64x128xbf16>, vector<64x128xf32> -> vector<64x128xf32>
    %230 = vector.extract_strided_slice %199 {offsets = [0, 0, 64], sizes = [8, 8, 64], strides = [1, 1, 1]} : vector<8x8x128xbf16> to vector<8x8x64xbf16>
    %231 = vector.extract_strided_slice %202 {offsets = [0, 0, 64], sizes = [8, 8, 64], strides = [1, 1, 1]} : vector<8x8x128xbf16> to vector<8x8x64xbf16>
    "tpu.trace_start"() <{level = 10 : i32, message = "bqd,bkd->bqk"}> : () -> ()
    %cst_94 = arith.constant dense<0.000000e+00> : vector<8x8x8xf32>
    %232 = tpu.matmul %230, %231, %cst_94 {dimension_numbers = #tpu.dot_dimension_numbers<[2], [2], [1], [1], [0, 0, 0, 1, 1, 1], [0], [0]>} : vector<8x8x64xbf16>, vector<8x8x64xbf16>, vector<8x8x8xf32> -> vector<8x8x8xf32>
    "tpu.trace_stop"() : () -> ()
    %233 = vector.broadcast %33 : vector<8x1x8xf32> to vector<8x8x8xf32>
    %234 = arith.addf %232, %233 : vector<8x8x8xf32>
    %cst_95 = arith.constant dense<0xFF800000> : vector<8x8xf32>
    %235 = vector.multi_reduction <maximumf>, %234, %cst_95 [2] : vector<8x8x8xf32> to vector<8x8xf32>
    %236 = vector.shape_cast %235 : vector<8x8xf32> to vector<8x8x1xf32>
    %237 = vector.broadcast %236 : vector<8x8x1xf32> to vector<8x8x8xf32>
    %238 = arith.subf %234, %237 : vector<8x8x8xf32>
    %239 = math.exp %238 : vector<8x8x8xf32>
    %cst_96 = arith.constant dense<0.000000e+00> : vector<8x8xf32>
    %240 = vector.multi_reduction <add>, %239, %cst_96 [2] : vector<8x8x8xf32> to vector<8x8xf32>
    %241 = vector.shape_cast %240 : vector<8x8xf32> to vector<8x8x1xf32>
    %242 = tpu.reciprocal %241 {approx = true} : vector<8x8x1xf32> -> vector<8x8x1xf32>
    %243 = vector.broadcast %242 : vector<8x8x1xf32> to vector<8x8x8xf32>
    %244 = arith.mulf %239, %243 : vector<8x8x8xf32>
    %245 = arith.truncf %244 : vector<8x8x8xf32> to vector<8x8x8xbf16>
    %246 = vector.extract_strided_slice %205 {offsets = [0, 0, 64], sizes = [8, 8, 64], strides = [1, 1, 1]} : vector<8x8x128xbf16> to vector<8x8x64xbf16>
    "tpu.trace_start"() <{level = 10 : i32, message = "bqk,bkd->bqd"}> : () -> ()
    %cst_97 = arith.constant dense<0.000000e+00> : vector<8x8x64xf32>
    %247 = tpu.matmul %245, %246, %cst_97 {dimension_numbers = #tpu.dot_dimension_numbers<[2], [1], [1], [2], [0, 0, 0, 1, 1, 2], [0], [0]>} : vector<8x8x8xbf16>, vector<8x8x64xbf16>, vector<8x8x64xf32> -> vector<8x8x64xf32>
    "tpu.trace_stop"() : () -> ()
    %248 = vector.shape_cast %247 : vector<8x8x64xf32> to vector<64x64xf32>
    %249 = arith.truncf %248 : vector<64x64xf32> to vector<64x64xbf16>
    %250 = vector.extract_strided_slice %207 {offsets = [64, 0], sizes = [64, 128], strides = [1, 1]} : vector<128x128xbf16> to vector<64x128xbf16>
    %cst_98 = arith.constant dense<0.000000e+00> : vector<64x128xf32>
    %251 = tpu.matmul %249, %250, %cst_98 {dimension_numbers = #tpu.dot_dimension_numbers<[1], [0], [0], [1], [0, 0, 1, 1], [], []>} : vector<64x64xbf16>, vector<64x128xbf16>, vector<64x128xf32> -> vector<64x128xf32>
    %252 = arith.addf %229, %251 : vector<64x128xf32>
    %c1_99 = arith.constant 1 : index
    %c0_100 = arith.constant 0 : index
    %c0_101 = arith.constant 0 : index
    %253 = vector.load %arg8[%c1_99, %c0_100, %c0_101] : memref<2x1x128xf32, #tpu.memory_space<vmem>>, vector<1x1x128xf32>
    %254 = vector.shape_cast %253 : vector<1x1x128xf32> to vector<1x128xf32>
    %255 = vector.broadcast %254 : vector<1x128xf32> to vector<64x128xf32>
    %256 = arith.addf %252, %255 : vector<64x128xf32>
    %257 = arith.addf %188, %256 : vector<64x128xf32>
    %c1_102 = arith.constant 1 : index
    %c0_103 = arith.constant 0 : index
    %c0_104 = arith.constant 0 : index
    %258 = vector.load %arg9[%c1_102, %c0_103, %c0_104] : memref<2x1x128xf32, #tpu.memory_space<vmem>>, vector<1x1x128xf32>
    %259 = vector.shape_cast %258 : vector<1x1x128xf32> to vector<1x128xf32>
    %c1_105 = arith.constant 1 : index
    %c0_106 = arith.constant 0 : index
    %c0_107 = arith.constant 0 : index
    %260 = vector.load %arg10[%c1_105, %c0_106, %c0_107] : memref<2x1x128xf32, #tpu.memory_space<vmem>>, vector<1x1x128xf32>
    %261 = vector.shape_cast %260 : vector<1x1x128xf32> to vector<1x128xf32>
    %cst_108 = arith.constant dense<0.000000e+00> : vector<64xf32>
    %262 = vector.multi_reduction <add>, %257, %cst_108 [1] : vector<64x128xf32> to vector<64xf32>
    %263 = vector.shape_cast %262 : vector<64xf32> to vector<64x1xf32>
    %cst_109 = arith.constant 7.812500e-03 : f32
    %264 = vector.broadcast %cst_109 : f32 to vector<64x1xf32>
    %265 = arith.mulf %263, %264 : vector<64x1xf32>
    %266 = arith.mulf %257, %257 : vector<64x128xf32>
    %cst_110 = arith.constant dense<0.000000e+00> : vector<64xf32>
    %267 = vector.multi_reduction <add>, %266, %cst_110 [1] : vector<64x128xf32> to vector<64xf32>
    %268 = vector.shape_cast %267 : vector<64xf32> to vector<64x1xf32>
    %cst_111 = arith.constant 7.812500e-03 : f32
    %269 = vector.broadcast %cst_111 : f32 to vector<64x1xf32>
    %270 = arith.mulf %268, %269 : vector<64x1xf32>
    %271 = arith.mulf %265, %265 : vector<64x1xf32>
    %272 = arith.subf %270, %271 : vector<64x1xf32>
    %cst_112 = arith.constant 0.000000e+00 : f32
    %273 = vector.broadcast %cst_112 : f32 to vector<64x1xf32>
    %274 = arith.maximumf %272, %273 : vector<64x1xf32>
    %275 = vector.broadcast %265 : vector<64x1xf32> to vector<64x128xf32>
    %276 = arith.subf %257, %275 : vector<64x128xf32>
    %cst_113 = arith.constant 9.99999996E-13 : f32
    %277 = vector.broadcast %cst_113 : f32 to vector<64x1xf32>
    %278 = arith.addf %274, %277 : vector<64x1xf32>
    %279 = math.rsqrt %278 : vector<64x1xf32>
    %280 = vector.broadcast %279 : vector<64x1xf32> to vector<64x128xf32>
    %281 = arith.mulf %276, %280 : vector<64x128xf32>
    %282 = vector.broadcast %259 : vector<1x128xf32> to vector<64x128xf32>
    %283 = arith.mulf %281, %282 : vector<64x128xf32>
    %284 = vector.broadcast %261 : vector<1x128xf32> to vector<64x128xf32>
    %285 = arith.addf %283, %284 : vector<64x128xf32>
    %286 = arith.truncf %285 : vector<64x128xf32> to vector<64x128xbf16>
    %c1_114 = arith.constant 1 : index
    %c0_115 = arith.constant 0 : index
    %c0_116 = arith.constant 0 : index
    %287 = vector.load %arg11[%c1_114, %c0_115, %c0_116] : memref<2x128x512xbf16, #tpu.memory_space<vmem>>, vector<1x128x512xbf16>
    %288 = vector.shape_cast %287 : vector<1x128x512xbf16> to vector<128x512xbf16>
    %cst_117 = arith.constant dense<0.000000e+00> : vector<64x512xf32>
    %289 = tpu.matmul %286, %288, %cst_117 {dimension_numbers = #tpu.dot_dimension_numbers<[1], [0], [0], [1], [0, 0, 1, 1], [], []>} : vector<64x128xbf16>, vector<128x512xbf16>, vector<64x512xf32> -> vector<64x512xf32>
    %c1_118 = arith.constant 1 : index
    %c0_119 = arith.constant 0 : index
    %c0_120 = arith.constant 0 : index
    %290 = vector.load %arg12[%c1_118, %c0_119, %c0_120] : memref<2x1x512xf32, #tpu.memory_space<vmem>>, vector<1x1x512xf32>
    %291 = vector.shape_cast %290 : vector<1x1x512xf32> to vector<1x512xf32>
    %292 = vector.broadcast %291 : vector<1x512xf32> to vector<64x512xf32>
    %293 = arith.addf %289, %292 : vector<64x512xf32>
    %cst_121 = arith.constant 5.000000e-01 : f32
    %294 = vector.broadcast %cst_121 : f32 to vector<64x512xf32>
    %295 = arith.mulf %294, %293 : vector<64x512xf32>
    %cst_122 = arith.constant 4.471500e-02 : f32
    %296 = vector.broadcast %cst_122 : f32 to vector<64x512xf32>
    %297 = arith.mulf %296, %293 : vector<64x512xf32>
    %298 = arith.mulf %297, %293 : vector<64x512xf32>
    %299 = arith.mulf %298, %293 : vector<64x512xf32>
    %300 = arith.addf %293, %299 : vector<64x512xf32>
    %cst_123 = arith.constant 0.797884583 : f32
    %301 = vector.broadcast %cst_123 : f32 to vector<64x512xf32>
    %302 = arith.mulf %301, %300 : vector<64x512xf32>
    %303 = math.tanh %302 : vector<64x512xf32>
    %cst_124 = arith.constant 1.000000e+00 : f32
    %304 = vector.broadcast %cst_124 : f32 to vector<64x512xf32>
    %305 = arith.addf %304, %303 : vector<64x512xf32>
    %306 = arith.mulf %295, %305 : vector<64x512xf32>
    %307 = arith.truncf %306 : vector<64x512xf32> to vector<64x512xbf16>
    %c1_125 = arith.constant 1 : index
    %c0_126 = arith.constant 0 : index
    %c0_127 = arith.constant 0 : index
    %308 = vector.load %arg13[%c1_125, %c0_126, %c0_127] : memref<2x512x128xbf16, #tpu.memory_space<vmem>>, vector<1x512x128xbf16>
    %309 = vector.shape_cast %308 : vector<1x512x128xbf16> to vector<512x128xbf16>
    %cst_128 = arith.constant dense<0.000000e+00> : vector<64x128xf32>
    %310 = tpu.matmul %307, %309, %cst_128 {dimension_numbers = #tpu.dot_dimension_numbers<[1], [0], [0], [1], [0, 0, 1, 1], [], []>} : vector<64x512xbf16>, vector<512x128xbf16>, vector<64x128xf32> -> vector<64x128xf32>
    %c1_129 = arith.constant 1 : index
    %c0_130 = arith.constant 0 : index
    %c0_131 = arith.constant 0 : index
    %311 = vector.load %arg14[%c1_129, %c0_130, %c0_131] : memref<2x1x128xf32, #tpu.memory_space<vmem>>, vector<1x1x128xf32>
    %312 = vector.shape_cast %311 : vector<1x1x128xf32> to vector<1x128xf32>
    %313 = vector.broadcast %312 : vector<1x128xf32> to vector<64x128xf32>
    %314 = arith.addf %310, %313 : vector<64x128xf32>
    %315 = arith.addf %285, %314 : vector<64x128xf32>
    %c1_132 = arith.constant 1 : index
    %c0_133 = arith.constant 0 : index
    %c0_134 = arith.constant 0 : index
    %316 = vector.load %arg15[%c1_132, %c0_133, %c0_134] : memref<2x1x128xf32, #tpu.memory_space<vmem>>, vector<1x1x128xf32>
    %317 = vector.shape_cast %316 : vector<1x1x128xf32> to vector<1x128xf32>
    %c1_135 = arith.constant 1 : index
    %c0_136 = arith.constant 0 : index
    %c0_137 = arith.constant 0 : index
    %318 = vector.load %arg16[%c1_135, %c0_136, %c0_137] : memref<2x1x128xf32, #tpu.memory_space<vmem>>, vector<1x1x128xf32>
    %319 = vector.shape_cast %318 : vector<1x1x128xf32> to vector<1x128xf32>
    %cst_138 = arith.constant dense<0.000000e+00> : vector<64xf32>
    %320 = vector.multi_reduction <add>, %315, %cst_138 [1] : vector<64x128xf32> to vector<64xf32>
    %321 = vector.shape_cast %320 : vector<64xf32> to vector<64x1xf32>
    %cst_139 = arith.constant 7.812500e-03 : f32
    %322 = vector.broadcast %cst_139 : f32 to vector<64x1xf32>
    %323 = arith.mulf %321, %322 : vector<64x1xf32>
    %324 = arith.mulf %315, %315 : vector<64x128xf32>
    %cst_140 = arith.constant dense<0.000000e+00> : vector<64xf32>
    %325 = vector.multi_reduction <add>, %324, %cst_140 [1] : vector<64x128xf32> to vector<64xf32>
    %326 = vector.shape_cast %325 : vector<64xf32> to vector<64x1xf32>
    %cst_141 = arith.constant 7.812500e-03 : f32
    %327 = vector.broadcast %cst_141 : f32 to vector<64x1xf32>
    %328 = arith.mulf %326, %327 : vector<64x1xf32>
    %329 = arith.mulf %323, %323 : vector<64x1xf32>
    %330 = arith.subf %328, %329 : vector<64x1xf32>
    %cst_142 = arith.constant 0.000000e+00 : f32
    %331 = vector.broadcast %cst_142 : f32 to vector<64x1xf32>
    %332 = arith.maximumf %330, %331 : vector<64x1xf32>
    %333 = vector.broadcast %323 : vector<64x1xf32> to vector<64x128xf32>
    %334 = arith.subf %315, %333 : vector<64x128xf32>
    %cst_143 = arith.constant 9.99999996E-13 : f32
    %335 = vector.broadcast %cst_143 : f32 to vector<64x1xf32>
    %336 = arith.addf %332, %335 : vector<64x1xf32>
    %337 = math.rsqrt %336 : vector<64x1xf32>
    %338 = vector.broadcast %337 : vector<64x1xf32> to vector<64x128xf32>
    %339 = arith.mulf %334, %338 : vector<64x128xf32>
    %340 = vector.broadcast %317 : vector<1x128xf32> to vector<64x128xf32>
    %341 = arith.mulf %339, %340 : vector<64x128xf32>
    %342 = vector.broadcast %319 : vector<1x128xf32> to vector<64x128xf32>
    %343 = arith.addf %341, %342 : vector<64x128xf32>
    %344 = vector.shape_cast %343 : vector<64x128xf32> to vector<8x8x128xf32>
    %345 = vector.extract_strided_slice %344 {offsets = [0, 0, 0], sizes = [8, 1, 128], strides = [1, 1, 1]} : vector<8x8x128xf32> to vector<8x1x128xf32>
    %346 = vector.shape_cast %345 : vector<8x1x128xf32> to vector<8x128xf32>
    %347 = arith.truncf %346 : vector<8x128xf32> to vector<8x128xbf16>
    %c0_144 = arith.constant 0 : index
    %c0_145 = arith.constant 0 : index
    %348 = vector.load %arg17[%c0_144, %c0_145] : memref<128x128xbf16, #tpu.memory_space<vmem>>, vector<128x128xbf16>
    %cst_146 = arith.constant dense<0.000000e+00> : vector<8x128xf32>
    %349 = tpu.matmul %347, %348, %cst_146 {dimension_numbers = #tpu.dot_dimension_numbers<[1], [0], [0], [1], [0, 0, 1, 1], [], []>} : vector<8x128xbf16>, vector<128x128xbf16>, vector<8x128xf32> -> vector<8x128xf32>
    %c0_147 = arith.constant 0 : index
    %c0_148 = arith.constant 0 : index
    %350 = vector.load %arg18[%c0_147, %c0_148] : memref<1x128xf32, #tpu.memory_space<vmem>>, vector<1x128xf32>
    %351 = vector.broadcast %350 : vector<1x128xf32> to vector<8x128xf32>
    %352 = arith.addf %349, %351 : vector<8x128xf32>
    %cst_149 = arith.constant 0.000000e+00 : f32
    %353 = vector.broadcast %cst_149 : f32 to vector<8x128xf32>
    %354 = arith.maximumf %352, %353 : vector<8x128xf32>
    %355 = arith.truncf %354 : vector<8x128xf32> to vector<8x128xbf16>
    %c0_150 = arith.constant 0 : index
    %c0_151 = arith.constant 0 : index
    %356 = vector.load %arg19[%c0_150, %c0_151] : memref<128x128xbf16, #tpu.memory_space<vmem>>, vector<128x128xbf16>
    %cst_152 = arith.constant dense<0.000000e+00> : vector<8x128xf32>
    %357 = tpu.matmul %355, %356, %cst_152 {dimension_numbers = #tpu.dot_dimension_numbers<[1], [0], [0], [1], [0, 0, 1, 1], [], []>} : vector<8x128xbf16>, vector<128x128xbf16>, vector<8x128xf32> -> vector<8x128xf32>
    %c0_153 = arith.constant 0 : index
    %c0_154 = arith.constant 0 : index
    %358 = vector.load %arg20[%c0_153, %c0_154] : memref<1x128xf32, #tpu.memory_space<vmem>>, vector<1x128xf32>
    %359 = vector.broadcast %358 : vector<1x128xf32> to vector<8x128xf32>
    %360 = arith.addf %357, %359 : vector<8x128xf32>
    %c0_155 = arith.constant 0 : index
    %c0_156 = arith.constant 0 : index
    %361 = vector.load %arg21[%c0_155, %c0_156] : memref<8x128xf32, #tpu.memory_space<vmem>>, vector<8x128xf32>
    tpu.vector_store %arg21[%c0_155, %c0_156], %360 {strides = array<i32>} : memref<8x128xf32, #tpu.memory_space<vmem>>, vector<8x128xf32>,
    return
  }
  func.func @transform_0(%arg0: i32) -> (i32, i32) {
    %c0_i32 = arith.constant 0 : i32
    %c0_i32_0 = arith.constant 0 : i32
    return %arg0, %c0_i32 : i32, i32
  }
  func.func @transform_1(%arg0: i32) -> (i32, i32) {
    %c0_i32 = arith.constant 0 : i32
    %c0_i32_0 = arith.constant 0 : i32
    return %arg0, %c0_i32 : i32, i32
  }
  func.func @transform_2(%arg0: i32) -> (i32, i32) {
    %c0_i32 = arith.constant 0 : i32
    %c0_i32_0 = arith.constant 0 : i32
    %c0_i32_1 = arith.constant 0 : i32
    return %c0_i32, %c0_i32_0 : i32, i32
  }
  func.func @transform_3(%arg0: i32) -> (i32, i32) {
    %c0_i32 = arith.constant 0 : i32
    %c0_i32_0 = arith.constant 0 : i32
    %c0_i32_1 = arith.constant 0 : i32
    return %c0_i32, %c0_i32_0 : i32, i32
  }
  func.func @transform_4(%arg0: i32) -> (i32, i32, i32) {
    %c0_i32 = arith.constant 0 : i32
    %c0_i32_0 = arith.constant 0 : i32
    %c0_i32_1 = arith.constant 0 : i32
    %c0_i32_2 = arith.constant 0 : i32
    return %c0_i32, %c0_i32_0, %c0_i32_1 : i32, i32, i32
  }
  func.func @transform_5(%arg0: i32) -> (i32, i32, i32) {
    %c0_i32 = arith.constant 0 : i32
    %c0_i32_0 = arith.constant 0 : i32
    %c0_i32_1 = arith.constant 0 : i32
    %c0_i32_2 = arith.constant 0 : i32
    return %c0_i32, %c0_i32_0, %c0_i32_1 : i32, i32, i32
  }
  func.func @transform_6(%arg0: i32) -> (i32, i32, i32) {
    %c0_i32 = arith.constant 0 : i32
    %c0_i32_0 = arith.constant 0 : i32
    %c0_i32_1 = arith.constant 0 : i32
    %c0_i32_2 = arith.constant 0 : i32
    return %c0_i32, %c0_i32_0, %c0_i32_1 : i32, i32, i32
  }
  func.func @transform_7(%arg0: i32) -> (i32, i32, i32) {
    %c0_i32 = arith.constant 0 : i32
    %c0_i32_0 = arith.constant 0 : i32
    %c0_i32_1 = arith.constant 0 : i32
    %c0_i32_2 = arith.constant 0 : i32
    return %c0_i32, %c0_i32_0, %c0_i32_1 : i32, i32, i32
  }
  func.func @transform_8(%arg0: i32) -> (i32, i32, i32) {
    %c0_i32 = arith.constant 0 : i32
    %c0_i32_0 = arith.constant 0 : i32
    %c0_i32_1 = arith.constant 0 : i32
    %c0_i32_2 = arith.constant 0 : i32
    return %c0_i32, %c0_i32_0, %c0_i32_1 : i32, i32, i32
  }
  func.func @transform_9(%arg0: i32) -> (i32, i32, i32) {
    %c0_i32 = arith.constant 0 : i32
    %c0_i32_0 = arith.constant 0 : i32
    %c0_i32_1 = arith.constant 0 : i32
    %c0_i32_2 = arith.constant 0 : i32
    return %c0_i32, %c0_i32_0, %c0_i32_1 : i32, i32, i32
  }
  func.func @transform_10(%arg0: i32) -> (i32, i32, i32) {
    %c0_i32 = arith.constant 0 : i32
    %c0_i32_0 = arith.constant 0 : i32
    %c0_i32_1 = arith.constant 0 : i32
    %c0_i32_2 = arith.constant 0 : i32
    return %c0_i32, %c0_i32_0, %c0_i32_1 : i32, i32, i32
  }
  func.func @transform_11(%arg0: i32) -> (i32, i32, i32) {
    %c0_i32 = arith.constant 0 : i32
    %c0_i32_0 = arith.constant 0 : i32
    %c0_i32_1 = arith.constant 0 : i32
    %c0_i32_2 = arith.constant 0 : i32
    return %c0_i32, %c0_i32_0, %c0_i32_1 : i32, i32, i32
  }
  func.func @transform_12(%arg0: i32) -> (i32, i32, i32) {
    %c0_i32 = arith.constant 0 : i32
    %c0_i32_0 = arith.constant 0 : i32
    %c0_i32_1 = arith.constant 0 : i32
    %c0_i32_2 = arith.constant 0 : i32
    return %c0_i32, %c0_i32_0, %c0_i32_1 : i32, i32, i32
  }
  func.func @transform_13(%arg0: i32) -> (i32, i32, i32) {
    %c0_i32 = arith.constant 0 : i32
    %c0_i32_0 = arith.constant 0 : i32
    %c0_i32_1 = arith.constant 0 : i32
    %c0_i32_2 = arith.constant 0 : i32
    return %c0_i32, %c0_i32_0, %c0_i32_1 : i32, i32, i32
  }
  func.func @transform_14(%arg0: i32) -> (i32, i32, i32) {
    %c0_i32 = arith.constant 0 : i32
    %c0_i32_0 = arith.constant 0 : i32
    %c0_i32_1 = arith.constant 0 : i32
    %c0_i32_2 = arith.constant 0 : i32
    return %c0_i32, %c0_i32_0, %c0_i32_1 : i32, i32, i32
  }
  func.func @transform_15(%arg0: i32) -> (i32, i32, i32) {
    %c0_i32 = arith.constant 0 : i32
    %c0_i32_0 = arith.constant 0 : i32
    %c0_i32_1 = arith.constant 0 : i32
    %c0_i32_2 = arith.constant 0 : i32
    return %c0_i32, %c0_i32_0, %c0_i32_1 : i32, i32, i32
  }
  func.func @transform_16(%arg0: i32) -> (i32, i32) {
    %c0_i32 = arith.constant 0 : i32
    %c0_i32_0 = arith.constant 0 : i32
    %c0_i32_1 = arith.constant 0 : i32
    return %c0_i32, %c0_i32_0 : i32, i32
  }
  func.func @transform_17(%arg0: i32) -> (i32, i32) {
    %c0_i32 = arith.constant 0 : i32
    %c0_i32_0 = arith.constant 0 : i32
    %c0_i32_1 = arith.constant 0 : i32
    return %c0_i32, %c0_i32_0 : i32, i32
  }
  func.func @transform_18(%arg0: i32) -> (i32, i32) {
    %c0_i32 = arith.constant 0 : i32
    %c0_i32_0 = arith.constant 0 : i32
    %c0_i32_1 = arith.constant 0 : i32
    return %c0_i32, %c0_i32_0 : i32, i32
  }
  func.func @transform_19(%arg0: i32) -> (i32, i32) {
    %c0_i32 = arith.constant 0 : i32
    %c0_i32_0 = arith.constant 0 : i32
    %c0_i32_1 = arith.constant 0 : i32
    return %c0_i32, %c0_i32_0 : i32, i32
  }
  func.func @transform_20(%arg0: i32) -> (i32, i32) {
    %c0_i32 = arith.constant 0 : i32
    %c0_i32_0 = arith.constant 0 : i32
    return %arg0, %c0_i32 : i32, i32
  }
}

</mosaic_0001>

<bundles_post_ra>
// kernel: tpu_custom_call.1
= control target key start
LH: loop header
LB: loop body
LE: loop exit
PB: predicated region body
PF: predicated region fallthrough
CT: control target
= control target key end

     0   :  { %s14344_s0 = inlined_call_operand.hbm [shape: f32[128,128], index: 0, kind: input, shape index: {}]   ;;  %s14345_s1 = inlined_call_operand.vmem [shape: f32[16,8], index: 1, kind: input, shape index: {}]   ;;  %s14346_s2 = inlined_call_operand.hbm [shape: f32[1,128], index: 2, kind: input, shape index: {}]   ;;  %s14347_s3 = inlined_call_operand.hbm [shape: f32[1,128], index: 3, kind: input, shape index: {}]   ;;  %s14348_s4 = inlined_call_operand.hbm [shape: bf16[2,128,384], index: 4, kind: input, shape index: {}]   ;;  %s14349_s5 = inlined_call_operand.vmem [shape: f32[2,1,384], index: 5, kind: input, shape index: {}]   ;;  %s14350_s6 = inlined_call_operand.hbm [shape: bf16[2,128,128], index: 6, kind: input, shape index: {}]   ;;  %s14351_s7 = inlined_call_operand.vmem [shape: f32[2,1,128], index: 7, kind: input, shape index: {}]   ;;  %s14352_s8 = inlined_call_operand.vmem [shape: f32[2,1,128], index: 8, kind: input, shape index: {}]   ;;  %s14353_s9 = inlined_call_operand.vmem [shape: f32[2,1,128], index: 9, kind: input, shape index: {}]   ;;  %s14354_s10 = inlined_call_operand.hbm [shape: bf16[2,128,512], index: 10, kind: input, shape index: {}]   ;;  %s14355_s11 = inlined_call_operand.vmem [shape: f32[2,1,512], index: 11, kind: input, shape index: {}]   ;;  %s14356_s12 = inlined_call_operand.hbm [shape: bf16[2,512,128], index: 12, kind: input, shape index: {}]   ;;  %s14357_s13 = inlined_call_operand.hbm [shape: f32[2,1,128], index: 13, kind: input, shape index: {}]   ;;  %s14358_s14 = inlined_call_operand.hbm [shape: f32[2,1,128], index: 14, kind: input, shape index: {}]   ;;  %s14359_s15 = inlined_call_operand.hbm [shape: f32[2,1,128], index: 15, kind: input, shape index: {}]   ;;  %s14360_s16 = inlined_call_operand.vmem [shape: bf16[128,128], index: 16, kind: input, shape index: {}]   ;;  %s14361_s17 = inlined_call_operand.vmem [shape: f32[1,128], index: 17, kind: input, shape index: {}]   ;;  %s14362_s18 = inlined_call_operand.hbm [shape: bf16[128,128], index: 18, kind: input, shape index: {}]   ;;  %s14363_s19 = inlined_call_operand.vmem [shape: f32[1,128], index: 19, kind: input, shape index: {}]   ;;  %s14364_s20 = inlined_call_operand.hbm [shape: f32[16,128], index: 20, kind: output, shape index: {}]  }
   0x1   :  { %14419 = sst [smem:[#allocation45_spill]] %s14344_s0 }
   0x2   :  { %14420 = sst [smem:[#allocation46_spill]] %s14345_s1 }
   0x3   :  { %14421 = sst [smem:[#allocation47_spill]] %s14346_s2 }
   0x4   :  { %14422 = sst [smem:[#allocation48_spill]] %s14347_s3 }
   0x5   :  { %14423 = sst [smem:[#allocation49_spill]] %s14348_s4 }
   0x6   :  { %14424 = sst [smem:[#allocation50_spill]] %s14349_s5 }
   0x7   :  { %14425 = sst [smem:[#allocation51_spill]] %s14350_s6 }
   0x8   :  { %14426 = sst [smem:[#allocation52_spill]] %s14352_s8 }
   0x9   :  { %14427 = sst [smem:[#allocation53_spill]] %s14353_s9 }
   0xa   :  { %14428 = sst [smem:[#allocation54_spill]] %s14354_s10 }
   0xb   :  { %14429 = sst [smem:[#allocation55_spill]] %s14355_s11 }
   0xc   :  { %14430 = sst [smem:[#allocation56_spill]] %s14360_s16 }
   0xd   :  { %14431 = sst [smem:[#allocation57_spill]] %s14361_s17 }
   0xe   :  { %14432 = sst [smem:[#allocation58_spill]] %s14363_s19 }
   0xf   :  { %14433 = sst [smem:[#allocation59_spill]] %s14364_s20 }
  0x10   :  { %25 = vsyncpa [#allocation3], 0 }
  0x11   :  { %27 = vsyncpa [#allocation3 + $0x1], 0 }
  0x12   :  { %28 = vsyncpa [#allocation6], 0 }
  0x13   :  { %29 = vsyncpa [#allocation9], 0 }
  0x14   :  { %30 = vsyncpa [#allocation12], 0 }
  0x15   :  { %31 = vsyncpa [#allocation15], 0 }
  0x16   :  { %32 = vsyncpa [#allocation18], 0 }
  0x17   :  { %33 = vsyncpa [#allocation4], 0 }
  0x18   :  { %35 = vsyncpa [#allocation4 + $0x1], 0  ;;  %s11575_s1 = smov 0   ;;  %s11577_s22 = smov 0  }
  0x19   :  { %s11579_s23 = smov 0   ;;  %s11581_s24 = smov 0  }
  0x1a LB: > { %s11444_s2 = smov [#allocation5]   ;;  %s11596_s3 = sadd.s32 4294967295, %s11442_s24   ;;  %s11442_s24 = sphi %s11581_s24, %s14531_s24   ;;  %s11438_s23 = sphi %s11579_s23, %s14530_s23   ;;  %s11434_s22 = sphi %s11577_s22, %s14529_s22   ;;  %s11430_s1 = sphi %s11575_s1, %s14528_s1  }
  0x1b   : > { %s515_s25 = sshll.u32 %s11444_s2, 4  ;;  %p8940_p0 = scmp.ge.s32.totalorder %s11442_s24, 1  ;;  %s11601_s25 = int_to_ptr.vmem [resolvable:$true] %s515_s25 }
  0x1c   : > { %p14376_p1 = scmp.eq.s32.totalorder %s11596_s3, 0  ;;  %p502_p2 = scmp.lt.s32.totalorder %s11442_s24, 3 }
  0x1d   : > { %s11445_s27 = smov [#allocation8]   ;;  %s11446_s29 = smov [#allocation11]  }
  0x1e   : > { %p11603_p3 = pnand %p8940_p0, %p502_p2  ;;  %s536_s28 = sshll.u32 %s11445_s27, 4  ;;  %s11610_s28 = int_to_ptr.vmem [resolvable:$true] %s536_s28 }
  0x1f   : > { %s574_s30 = sshll.u32 %s11446_s29, 4  ;;  %s14436_s2 = sld [smem:[#allocation47_spill]]  ;;  %s11618_s30 = int_to_ptr.vmem [resolvable:$true] %s574_s30 }
  0x20   : > { %s14434_s26 = scalar_select %p11603_p3, 1, 0 }
  0x21   : > { %p10337_p5 = pneg %p11603_p3 }
  0x23   : > { %p11614_p6 = pnand %p10337_p5, %p14376_p1 }
  0x25   : > { %s11046_s20 = scalar_lea.hbm %s14436_s2, 16  ;;  %p11628_p8 = pneg %p11614_p6 }
  0x26   : > { %p11047_p7 = scmp.ne.s32.totalorder %s14436_s2, %s11046_s20  ;;  %p11053_p11 = scmp.lt.u32.totalorder %s11046_s20, %s14436_s2 }
  0x28   : > { %p11049_p9 = pnand %p11628_p8, %p11047_p7 }
  0x2a   : > { %p11050_p10 = pneg %p11049_p9 }
  0x2c   : > { %p11055_p12 = pnand %p11053_p11, %p11050_p10 }
  0x2e   : > { %11058 = shalt.err (!%p11055_p12)
}
  0x2f   : > { %s11059_s17 = scalar_lea.vmem %s11601_s25, 16  ;;  %s11066_s19 = scalar_lea.vmem %s11601_s25, 32 }
  0x30   : > { %p11060_p13 = scmp.ne.s32.totalorder %s11601_s25, %s11059_s17  ;;  %p11067_p5 = scmp.lt.s32.totalorder %s11601_s25, %s11601_s25 }
  0x31   : > { %p11068_p7 = scmp.lt.s32.totalorder %s11066_s19, %s11059_s17 }
  0x32   : > { %p11062_p0 = pnand %p11060_p13, %p11628_p8 }
  0x33   : > { %p11069_p9 = por %p11068_p7, %p11067_p5 }
  0x34   : > { %p11063_p2 = pneg %p11062_p0 }
  0x36   : > { %p11070_p4 = pnand %p11069_p9, %p11063_p2 }
  0x38   : > { %11073 = shalt.err (!%p11070_p4)
}
  0x39   : > { %10340 = dma.hbm_to_vmem [thread:$0]  (!%p11614_p6), %s14436_s2, 16, %s11601_s25, [#allocation6]  }
  0x3a   : > { %s14438_s29 = sld [smem:[#allocation49_spill]] }
  0x40   : > { %s11074_s11 = scalar_lea.hbm %s14438_s29, 6144 }
  0x41   : > { %p11075_p10 = scmp.ne.s32.totalorder %s14438_s29, %s11074_s11  ;;  %p11081_p4 = scmp.lt.u32.totalorder %s11074_s11, %s14438_s29 }
  0x43   : > { %p11077_p11 = pnand %p11075_p10, %p11628_p8 }
  0x45   : > { %p11078_p12 = pneg %p11077_p11 }
  0x47   : > { %p11083_p13 = pnand %p11081_p4, %p11078_p12 }
  0x49   : > { %11086 = shalt.err (!%p11083_p13)
}
  0x4a   : > { %s11087_s25 = scalar_lea.vmem %s11610_s28, 6144  ;;  %p11095_p7 = scmp.lt.s32.totalorder %s11610_s28, %s11610_s28 }
  0x4b   : > { %p11088_p0 = scmp.ne.s32.totalorder %s11610_s28, %s11087_s25  ;;  %p11096_p9 = scmp.lt.s32.totalorder %s11087_s25, %s11087_s25 }
  0x4d   : > { %p11090_p2 = pnand %p11088_p0, %p11628_p8  ;;  %p11097_p10 = por %p11096_p9, %p11095_p7 }
  0x4f   : > { %p11091_p5 = pneg %p11090_p2 }
  0x51   : > { %p11098_p11 = pnand %p11097_p10, %p11091_p5 }
  0x53   : > { %11101 = shalt.err (!%p11098_p11)
}
  0x54   : > { %s11447_s8 = smov 192   ;;  %s11448_s9 = smov 12  }
  0x55   : > { %10346 = dma.hbm_to_vmem [thread:$0]  (!%p11614_p6), %s14438_s29, 6144, %s11610_s28, [#allocation9], %s11447_s8, %s11447_s8, %s11448_s9  }
  0x56   : > { %s14439_s10 = sld [smem:[#allocation54_spill]] }
  0x5c   : > { %s11102_s21 = scalar_lea.hbm %s14439_s10, 8192 }
  0x5d   : > { %p11103_p12 = scmp.ne.s32.totalorder %s14439_s10, %s11102_s21  ;;  %p11109_p0 = scmp.lt.u32.totalorder %s11102_s21, %s14439_s10 }
  0x5f   : > { %p11105_p4 = pnand %p11103_p12, %p11628_p8 }
  0x61   : > { %p11106_p13 = pneg %p11105_p4 }
  0x63   : > { %p11111_p2 = pnand %p11109_p0, %p11106_p13 }
  0x65   : > { %11114 = shalt.err (!%p11111_p2)
}
  0x66   : > { %s11115_s28 = scalar_lea.vmem %s11618_s30, 8192  ;;  %p11123_p10 = scmp.lt.s32.totalorder %s11618_s30, %s11618_s30 }
  0x67   : > { %p11116_p5 = scmp.ne.s32.totalorder %s11618_s30, %s11115_s28  ;;  %p11124_p11 = scmp.lt.s32.totalorder %s11115_s28, %s11115_s28 }
  0x69   : > { %p11118_p7 = pnand %p11116_p5, %p11628_p8  ;;  %p11125_p12 = por %p11124_p11, %p11123_p10 }
  0x6b   : > { %p11119_p9 = pneg %p11118_p7 }
  0x6d   : > { %p11126_p4 = pnand %p11125_p12, %p11119_p9 }
  0x6f   : > { %11129 = shalt.err (!%p11126_p4)
}
  0x70   : > { %s11449_s8 = smov 256   ;;  %s14378_s2 = smov 16  }
  0x71   : > { %10352 = dma.hbm_to_vmem [thread:$0]  (!%p11614_p6), %s14439_s10, 8192, %s11618_s30, [#allocation12], %s11449_s8, %s11449_s8, %s14378_s2  }
  0x72   : > { %s11451_s16 = smov [#allocation14]   ;;  %s11130_s17 = scalar_lea.hbm %s14357_s13, 32 }
  0x73   : > { %s603_s20 = sshll.u32 %s11451_s16, 4  ;;  %p11131_p13 = scmp.ne.s32.totalorder %s14357_s13, %s11130_s17  ;;  %s604_s20 = int_to_ptr.vmem [resolvable:$true] %s603_s20 }
  0x74   : > { %p11137_p5 = scmp.lt.u32.totalorder %s11130_s17, %s14357_s13 }
  0x75   : > { %p11133_p0 = pnand %p11131_p13, %p11628_p8 }
  0x77   : > { %p11134_p2 = pneg %p11133_p0 }
  0x79   : > { %p11139_p7 = pnand %p11137_p5, %p11134_p2 }
  0x7b   : > { %11142 = shalt.err (!%p11139_p7)
}
  0x7c   : > { %s11143_s30 = scalar_lea.vmem %s604_s20, 32  ;;  %p11151_p12 = scmp.lt.s32.totalorder %s604_s20, %s604_s20 }
  0x7d   : > { %p11144_p9 = scmp.ne.s32.totalorder %s604_s20, %s11143_s30  ;;  %p11152_p4 = scmp.lt.s32.totalorder %s11143_s30, %s11143_s30 }
  0x7f   : > { %p11146_p10 = pnand %p11144_p9, %p11628_p8  ;;  %p11153_p1 = por %p11152_p4, %p11151_p12 }
  0x81   : > { %p11147_p11 = pneg %p11146_p10 }
  0x83   : > { %p11154_p3 = pnand %p11153_p1, %p11147_p11 }
  0x85   : > { %11157 = shalt.err (!%p11154_p3)
}
  0x86   : > { %s14379_s8 = smov 1   ;;  %s11453_s11 = smov [#allocation17]  }
  0x87   : > { %10358 = dma.hbm_to_vmem [thread:$0]  (!%p11614_p6), %s14357_s13, 32, %s604_s20, [#allocation15], %s14378_s2, %s14378_s2, %s14379_s8  }
  0x88   : > { %s629_s16 = sshll.u32 %s11453_s11, 4  ;;  %s11454_s0 = smov [#allocation7]   ;;  %s630_s16 = int_to_ptr.vmem [resolvable:$true] %s629_s16 }
  0x89   : > { %s526_s21 = sshll.u32 %s11454_s0, 4  ;;  %s11158_s25 = scalar_lea.hbm %s14359_s15, 32  ;;  %s527_s21 = int_to_ptr.vmem [resolvable:$true] %s526_s21 }
  0x8a   : > { %p11159_p1 = scmp.ne.s32.totalorder %s14359_s15, %s11158_s25  ;;  %p11165_p0 = scmp.lt.u32.totalorder %s11158_s25, %s14359_s15 }
  0x8c   : > { %p11161_p3 = pnand %p11159_p1, %p11628_p8 }
  0x8e   : > { %p11162_p13 = pneg %p11161_p3 }
  0x90   : > { %p11167_p2 = pnand %p11165_p0, %p11162_p13 }
  0x92   : > { %11170 = shalt.err (!%p11167_p2)
}
  0x93   : > { %s11171_s20 = scalar_lea.vmem %s630_s16, 32  ;;  %p11179_p10 = scmp.lt.s32.totalorder %s630_s16, %s630_s16 }
  0x94   : > { %p11172_p5 = scmp.ne.s32.totalorder %s630_s16, %s11171_s20  ;;  %p11180_p11 = scmp.lt.s32.totalorder %s11171_s20, %s11171_s20 }
  0x96   : > { %p11174_p7 = pnand %p11172_p5, %p11628_p8  ;;  %p11181_p12 = por %p11180_p11, %p11179_p10 }
  0x98   : > { %p11175_p9 = pneg %p11174_p7 }
  0x9a   : > { %p11182_p4 = pnand %p11181_p12, %p11175_p9 }
  0x9c   : > { %11185 = shalt.err (!%p11182_p4)
}
  0x9d   : > { %10364 = dma.hbm_to_vmem [thread:$0]  (!%p11614_p6), %s14359_s15, 32, %s630_s16, [#allocation18], %s14378_s2, %s14378_s2, %s14379_s8  }
  0x9e   : > { %s14440_s17 = sld [smem:[#allocation48_spill]] }
  0xa4   : > { %s11186_s19 = scalar_lea.hbm %s14440_s17, 16 }
  0xa5   : > { %p11187_p1 = scmp.ne.s32.totalorder %s14440_s17, %s11186_s19  ;;  %p11193_p0 = scmp.lt.u32.totalorder %s11186_s19, %s14440_s17 }
  0xa7   : > { %p11189_p3 = pnand %p11187_p1, %p11628_p8 }
  0xa9   : > { %p11190_p13 = pneg %p11189_p3 }
  0xab   : > { %p11195_p2 = pnand %p11193_p0, %p11190_p13 }
  0xad   : > { %11198 = shalt.err (!%p11195_p2)
}
  0xae   : > { %s11199_s20 = scalar_lea.vmem %s527_s21, 16  ;;  %s11206_s16 = scalar_lea.vmem %s527_s21, 32 }
  0xaf   : > { %p11200_p5 = scmp.ne.s32.totalorder %s527_s21, %s11199_s20  ;;  %p11207_p10 = scmp.lt.s32.totalorder %s527_s21, %s527_s21 }
  0xb0   : > { %p11208_p11 = scmp.lt.s32.totalorder %s11206_s16, %s11199_s20 }
  0xb1   : > { %p11202_p7 = pnand %p11200_p5, %p11628_p8 }
  0xb2   : > { %p11209_p12 = por %p11208_p11, %p11207_p10 }
  0xb3   : > { %p11203_p9 = pneg %p11202_p7 }
  0xb5   : > { %p11210_p4 = pnand %p11209_p12, %p11203_p9 }
  0xb7   : > { %11213 = shalt.err (!%p11210_p4)
}
  0xb8   : > { %10343 = dma.hbm_to_vmem [thread:$0]  (!%p11614_p6), %s14440_s17, 16, %s527_s21, [#allocation6]  }
  0xb9   : > { %s11455_s11 = smov [#allocation10]   ;;  %s14441_s6 = sld [smem:[#allocation51_spill]] }
  0xba   : > { %s552_s0 = sshll.u32 %s11455_s11, 4  ;;  %s553_s0 = int_to_ptr.vmem [resolvable:$true] %s552_s0 }
  0xbf   : > { %s11214_s28 = scalar_lea.hbm %s14441_s6, 2048 }
  0xc0   : > { %p11215_p1 = scmp.ne.s32.totalorder %s14441_s6, %s11214_s28  ;;  %p11221_p0 = scmp.lt.u32.totalorder %s11214_s28, %s14441_s6 }
  0xc2   : > { %p11217_p3 = pnand %p11215_p1, %p11628_p8 }
  0xc4   : > { %p11218_p13 = pneg %p11217_p3 }
  0xc6   : > { %p11223_p2 = pnand %p11221_p0, %p11218_p13 }
  0xc8   : > { %11226 = shalt.err (!%p11223_p2)
}
  0xc9   : > { %s11227_s21 = scalar_lea.vmem %s553_s0, 2048  ;;  %p11235_p10 = scmp.lt.s32.totalorder %s553_s0, %s553_s0 }
  0xca   : > { %p11228_p5 = scmp.ne.s32.totalorder %s553_s0, %s11227_s21  ;;  %p11236_p11 = scmp.lt.s32.totalorder %s11227_s21, %s11227_s21 }
  0xcc   : > { %p11230_p7 = pnand %p11228_p5, %p11628_p8  ;;  %p11237_p12 = por %p11236_p11, %p11235_p10 }
  0xce   : > { %p11231_p9 = pneg %p11230_p7 }
  0xd0   : > { %p11238_p4 = pnand %p11237_p12, %p11231_p9 }
  0xd2   : > { %11241 = shalt.err (!%p11238_p4)
}
  0xd3   : > { %s14380_s10 = smov 64   ;;  %s14381_s9 = smov 4  }
  0xd4   : > { %10349 = dma.hbm_to_vmem [thread:$0]  (!%p11614_p6), %s14441_s6, 2048, %s553_s0, [#allocation9], %s14380_s10, %s14380_s10, %s14381_s9  }
  0xd5   : > { %s11458_s25 = smov [#allocation13]   ;;  %s11459_s30 = smov [#allocation16]  }
  0xd6   : > { %s590_s28 = sshll.u32 %s11458_s25, 4  ;;  %s616_s29 = sshll.u32 %s11459_s30, 4  ;;  %s591_s28 = int_to_ptr.vmem [resolvable:$true] %s590_s28  ;;  %s11778_s29 = int_to_ptr.vmem [resolvable:$true] %s616_s29 }
  0xd7   : > { %s11242_s21 = scalar_lea.hbm %s14356_s12, 8192 }
  0xd8   : > { %p11243_p1 = scmp.ne.s32.totalorder %s14356_s12, %s11242_s21  ;;  %p11249_p0 = scmp.lt.u32.totalorder %s11242_s21, %s14356_s12 }
  0xda   : > { %p11245_p3 = pnand %p11243_p1, %p11628_p8 }
  0xdc   : > { %p11246_p13 = pneg %p11245_p3 }
  0xde   : > { %p11251_p2 = pnand %p11249_p0, %p11246_p13 }
  0xe0   : > { %11254 = shalt.err (!%p11251_p2)
}
  0xe1   : > { %s11255_s19 = scalar_lea.vmem %s591_s28, 8192  ;;  %p11263_p10 = scmp.lt.s32.totalorder %s591_s28, %s591_s28 }
  0xe2   : > { %p11256_p5 = scmp.ne.s32.totalorder %s591_s28, %s11255_s19  ;;  %p11264_p11 = scmp.lt.s32.totalorder %s11255_s19, %s11255_s19 }
  0xe4   : > { %p11258_p7 = pnand %p11256_p5, %p11628_p8  ;;  %p11265_p12 = por %p11264_p11, %p11263_p10 }
  0xe6   : > { %p11259_p9 = pneg %p11258_p7 }
  0xe8   : > { %p11266_p4 = pnand %p11265_p12, %p11259_p9 }
  0xea   : > { %11269 = shalt.err (!%p11266_p4)
}
  0xeb   : > { %10355 = dma.hbm_to_vmem [thread:$0]  (!%p11614_p6), %s14356_s12, 8192, %s591_s28, [#allocation12], %s14380_s10, %s14380_s10, %s14381_s9  }
  0xec   : > { %s11270_s20 = scalar_lea.hbm %s14358_s14, 32 }
  0xed   : > { %p11271_p1 = scmp.ne.s32.totalorder %s14358_s14, %s11270_s20  ;;  %p11277_p0 = scmp.lt.u32.totalorder %s11270_s20, %s14358_s14 }
  0xef   : > { %p11273_p3 = pnand %p11271_p1, %p11628_p8 }
  0xf1   : > { %p11274_p13 = pneg %p11273_p3 }
  0xf3   : > { %p11279_p2 = pnand %p11277_p0, %p11274_p13 }
  0xf5   : > { %11282 = shalt.err (!%p11279_p2)
}
  0xf6   : > { %s11283_s28 = scalar_lea.vmem %s11778_s29, 32  ;;  %p11291_p10 = scmp.lt.s32.totalorder %s11778_s29, %s11778_s29 }
  0xf7   : > { %p11284_p5 = scmp.ne.s32.totalorder %s11778_s29, %s11283_s28  ;;  %p11292_p11 = scmp.lt.s32.totalorder %s11283_s28, %s11283_s28 }
  0xf9   : > { %p11286_p7 = pnand %p11284_p5, %p11628_p8  ;;  %p11293_p12 = por %p11292_p11, %p11291_p10 }
  0xfb   : > { %p11287_p9 = pneg %p11286_p7 }
  0xfd   : > { %p11294_p4 = pnand %p11293_p12, %p11287_p9 }
  0xff   : > { %11297 = shalt.err (!%p11294_p4)
}
 0x100   : > { %s14442_s19 = smov 1   ;;  %s14443_s2 = smov 16  }
 0x101   : > { %10361 = dma.hbm_to_vmem [thread:$0]  (!%p11614_p6), %s14358_s14, 32, %s11778_s29, [#allocation15], %s14443_s2, %s14443_s2, %s14442_s19  }
 0x102   : > { %s11460_s30 = smov [#allocation19]   ;;  %s11298_s11 = scalar_lea.hbm %s14362_s18, 1024 }
 0x103   : > { %s648_s20 = sshll.u32 %s11460_s30, 4  ;;  %p11299_p1 = scmp.ne.s32.totalorder %s14362_s18, %s11298_s11  ;;  %s649_s20 = int_to_ptr.vmem [resolvable:$true] %s648_s20 }
 0x104   : > { %p11305_p0 = scmp.lt.u32.totalorder %s11298_s11, %s14362_s18 }
 0x105   : > { %p11301_p3 = pnand %p11299_p1, %p11628_p8 }
 0x107   : > { %p11302_p13 = pneg %p11301_p3 }
 0x109   : > { %p11307_p2 = pnand %p11305_p0, %p11302_p13 }
 0x10b   : > { %11310 = shalt.err (!%p11307_p2)
}
 0x10c   : > { %s11311_s29 = scalar_lea.vmem %s649_s20, 1024  ;;  %p11319_p10 = scmp.lt.s32.totalorder %s649_s20, %s649_s20 }
 0x10d   : > { %p11312_p5 = scmp.ne.s32.totalorder %s649_s20, %s11311_s29  ;;  %p11320_p11 = scmp.lt.s32.totalorder %s11311_s29, %s11311_s29 }
 0x10f   : > { %p11314_p7 = pnand %p11312_p5, %p11628_p8  ;;  %p11321_p12 = por %p11320_p11, %p11319_p10 }
 0x111   : > { %p11315_p9 = pneg %p11314_p7 }
 0x113   : > { %p11322_p4 = pnand %p11321_p12, %p11315_p9 }
 0x115   : > { %11325 = shalt.err (!%p11322_p4)
}
 0x116   : > { %s14444_s19 = smov 4   ;;  %s14445_s2 = smov 64  }
 0x117   : > { %10367 = dma.hbm_to_vmem [thread:$0]  (!%p11614_p6), %s14362_s18, 1024, %s649_s20, [#allocation18], %s14445_s2, %s14445_s2, %s14444_s19  }
 0x118   : > { %s8939_s4 = sadd.s32 4294967294, %s11442_s24   ;;  %s11850_s27 = sadd.s32 1, %s11442_s24  }
 0x119   : > { %s48_s8 = sadd.s32 1, %s11438_s23  ;;  %s45_s25 = ssub.s32 %s11442_s24, %s11850_s27 }
 0x11a   : > { %p55_p8 = scmp.ne.s32.totalorder %s11438_s23, %s11434_s22  ;;  %p46_p1 = scmp.eq.s32.totalorder %s45_s25, 0 }
 0x11b   : > { %p56_p3 = scmp.eq.s32.totalorder %s11442_s24, 0  ;;  %p61_p13 = scmp.ne.s32.totalorder %s11434_s22, %s11430_s1 }
 0x11c   : > { %p489_p0 = scmp.eq.s32.totalorder %s11596_s3, 1  ;;  %p14446_p5 = scmp.eq.s32.totalorder %s11596_s3, 0 }
 0x11d   : > { %s11862_s30 = scalar_select %p46_p1, %s11438_s23, %s48_s8  }
 0x11e   : > { %p57_p2 = por %p56_p3, %p55_p8  ;;  %p11866_p7 = por %p14446_p5, %p61_p13 }
 0x11f   : > { %p11870_p6 = por %p489_p0, %p55_p8  ;;  %p495_p9 = scmp.eq.s32.totalorder %s8939_s4, 1 }
 0x120   : > { %p10386_p10 = scmp.lt.s32.totalorder %s11442_s24, 2  ;;  %s665_s21 = sand.u32 1, %s11438_s23  }
 0x121   : > { %s14448_s20 = scalar_select %p11870_p6, 1, 0 }
 0x122   : > { %p11876_p11 = por %p495_p9, %p61_p13  ;;  %s8952_s0 = sshll.u32 %s665_s21, 6 }
 0x123   : > { %s9330_s28 = sshll.u32 %s11442_s24, 10  ;;  %s14450_s2 = sld [smem:[#allocation45_spill]] }
 0x124   : > { %s14449_s11 = scalar_select %p11876_p11, 1, 0 }
 0x125   : > { %s669_s9 = scalar_lea.vmem [#allocation2], %s8952_s0  ;;  %p11886_p12 = pnand %p10386_p10, %p57_p2 }
 0x126   : > { %s676_s8 = sshll.u32 %s669_s9, 4  ;;  %s11892_s25 = scalar_lea.sflag [#allocation3], %s665_s21  ;;  %s11890_s8 = int_to_ptr.vmem [resolvable:$true] %s676_s8 }
 0x127   : > { %p11328_p8 = pneg %p11886_p12 }
 0x129   : > { %s11884_s10 = scalar_lea.hbm %s14450_s2, %s9330_s28  ;;  %s11331_s29 = scalar_lea.hbm %s14450_s2, 2048 }
 0x12a   : > { %s11326_s6 = scalar_lea.hbm %s11884_s10, 1024  ;;  %p11332_p13 = scmp.lt.u32.totalorder %s11884_s10, %s14450_s2 }
 0x12b   : > { %p11327_p4 = scmp.ne.s32.totalorder %s11884_s10, %s11326_s6  ;;  %p11333_p0 = scmp.lt.u32.totalorder %s11331_s29, %s11326_s6 }
 0x12c   : > { %p11335_p5 = scmp.lt.u32.totalorder %s11326_s6, %s11884_s10 }
 0x12d   : > { %p11329_p1 = pnand %p11328_p8, %p11327_p4  ;;  %p11334_p2 = por %p11333_p0, %p11332_p13 }
 0x12f   : > { %p11330_p3 = pneg %p11329_p1  ;;  %p11336_p9 = por %p11335_p5, %p11334_p2 }
 0x131   : > { %p11337_p10 = pnand %p11336_p9, %p11330_p3 }
 0x133   : > { %11340 = shalt.err (!%p11337_p10)
}
 0x134   : > { %s11341_s21 = scalar_lea.vmem %s11890_s8, 1024  ;;  %s11461_s0 = smov [#allocation2]  }
 0x135   : > { %p11342_p4 = scmp.ne.s32.totalorder %s11890_s8, %s11341_s21  ;;  %s11346_s28 = sshll.u32 %s11461_s0, 4  ;;  %s11347_s28 = int_to_ptr.vmem [resolvable:$false] %s11346_s28 }
 0x136   : > { %s11348_s19 = scalar_lea.vmem %s11347_s28, 2048  ;;  %p11349_p6 = scmp.lt.s32.totalorder %s11890_s8, %s11347_s28 }
 0x137   : > { %p11344_p1 = pnand %p11342_p4, %p11328_p8  ;;  %p11350_p13 = scmp.lt.s32.totalorder %s11348_s19, %s11341_s21 }
 0x139   : > { %p11345_p11 = pneg %p11344_p1  ;;  %p11351_p0 = por %p11350_p13, %p11349_p6 }
 0x13b   : > { %p11352_p2 = pnand %p11351_p0, %p11345_p11 }
 0x13d   : > { %11355 = shalt.err (!%p11352_p2)
}
 0x13e   : > { %s11462_s6 = smov 128   ;;  %s11463_s29 = smov 8  }
 0x13f   : > { %10371 = dma.hbm_to_vmem [thread:$0]  (!%p11886_p12), %s11884_s10, 1024, %s11890_s8, %s11892_s25, %s11462_s6, %s11462_s6, %s11463_s29  }
 0x140   : > { %p14452_p8 = scmp.ne.s32.totalorder %s14434_s26, 0 }
 0x142   : > { %695 = sbr.rel (%p14452_p8) target bundleno = 6473 (0x1949), region = 100 }
 0x149   : > { %s11923_s9 = sand.u32 1, %s11434_s22  }
 0x14a   : > { %s8956_s21 = sshll.u32 %s11923_s9, 6  ;;  %s698_s0 = scalar_lea.sflag [#allocation3], %s11923_s9 }
 0x14b   : > { %s11927_s28 = scalar_lea.vmem [#allocation2], %s8956_s21 }
 0x14c   : > { %11401 = dma.done.wait (%p11866_p7), %s698_s0, 1024  }
 0x14d   : > { %11403 = vsyncadd (%p11866_p7), %s698_s0, 4294966272  ;;  %p14453_p6 = scmp.eq.s32.totalorder %s11596_s3, 0 }
 0x14f   : > { %11405 = dma.done.wait (%p14453_p6), [#allocation6], 32   ;;  %p14454_p11 = pmov %p14453_p6 }
 0x150   : > { %p14455_p12 = pmov %p14453_p6 }
 0x151   : > { %11407 = vsyncadd (%p14454_p11), [#allocation6], 4294967264 }
 0x152   : > { %11409 = dma.done.wait (%p14455_p12), [#allocation9], 8192   ;;  %p14456_p3 = pmov %p14453_p6 }
 0x154   : > { %11411 = vsyncadd (%p14456_p3), [#allocation9], 4294959104  ;;  %p14457_p5 = pmov %p14456_p3 }
 0x155   : > { %p14458_p9 = pmov %p14456_p3 }
 0x156   : > { %11413 = dma.done.wait (%p14457_p5), [#allocation12], 16384  }
 0x157   : > { %11415 = vsyncadd (%p14458_p9), [#allocation12], 4294950912  ;;  %p14459_p7 = pmov %p14456_p3 }
 0x158   : > { %p14460_p10 = pmov %p14456_p3 }
 0x159   : > { %11417 = dma.done.wait (%p14459_p7), [#allocation15], 64  }
 0x15a   : > { %11419 = vsyncadd (%p14460_p10), [#allocation15], 4294967232  ;;  %p14461_p4 = pmov %p14456_p3 }
 0x15b   : > { %p14462_p1 = pmov %p14456_p3 }
 0x15c   : > { %11421 = dma.done.wait (%p14461_p4), [#allocation18], 1056  }
 0x15d   : > { %11423 = vsyncadd (%p14462_p1), [#allocation18], 4294966240  ;;  %v11954_v0 = vld [vmem:[%s11927_s28] sm:$0xff]  ;;  %v11957_v1 = vld [vmem:[%s11927_s28 + $0x8] sm:$0xff]  ;;  %v14383_v39 = vmov 0   ;;  %vm11466_vm0 = vmmov 0  }
 0x15e   : > { %818 = vadd.xlane.f32.xlu0 %v11954_v0  ;;  %v842_v2 = vmul.f32 %v11954_v0, %v11954_v0  ;;  %v843_v3 = vmul.f32 %v11957_v1, %v11957_v1  ;;  %v11965_v4 = vld [vmem:[%s11927_s28 + $0x10] sm:$0xff]  ;;  %v11969_v5 = vld [vmem:[%s11927_s28 + $0x18] sm:$0xff]  ;;  %v11978_v8 = vld [vmem:[%s11927_s28 + $0x20] sm:$0xff]  ;;  %1224 = vmatprep.mubr.bf16.mxu0 %v14383_v39  ;;  %s14465_s5 = sld [smem:[#allocation50_spill]]  ;;  %vm1458_vm1 = vcmask 523264   ;;  %vm1927_vm2 = vcmask 1043456  }
 0x15f   : > { %v844_v6 = vmul.f32 %v11965_v4, %v11965_v4  ;;  %v845_v7 = vmul.f32 %v11969_v5, %v11969_v5  ;;  %v11981_v9 = vld [vmem:[%s11927_s28 + $0x28] sm:$0xff]  ;;  %v10456_v11 = vld [vmem:[#allocation8] ss:$12 sps:$4 sm:$0xff]   ;;  %v846_v12 = vmul.f32 %v11978_v8, %v11978_v8  ;;  %v11993_v17 = vld [vmem:[%s11927_s28 + $0x38] sm:$0xff]  ;;  %p803_p13 = scmp.lt.s32.totalorder %s11596_s3, 1  ;;  %s14468_s19 = sld [smem:[#allocation46_spill]] }
 0x160   : > { %850 = vadd.xlane.f32.xlu1 %v842_v2  ;;  %v10454_v10 = vld [vmem:[#allocation8 + $0x4] ss:$12 sps:$4 sm:$0xff]   ;;  %v10457_v13 = vld [vmem:[#allocation8 + $0x1c] ss:$12 sps:$4 sm:$0xff]   ;;  %v847_v14 = vmul.f32 %v11981_v9, %v11981_v9  ;;  %v10460_v18 = vld [vmem:[#allocation8 + $0x34] ss:$12 sps:$4 sm:$0xff]   ;;  %v849_v24 = vmul.f32 %v11993_v17, %v11993_v17 }
 0x161   : > { %1192 = vmatprep.subr.bf16.mxu0 %v10454_v10  ;;  %v10459_v15 = vld [vmem:[#allocation8 + $0x18] ss:$12 sps:$4 sm:$0xff]   ;;  %v11990_v16 = vld [vmem:[%s11927_s28 + $0x30] sm:$0xff]  ;;  %v10462_v19 = vld [vmem:[#allocation8 + $0x8] ss:$12 sps:$4 sm:$0xff]   ;;  %s804_s10 = scalar_select %p803_p13, %s11596_s3, 1 }
 0x162   : > { %820 = vadd.xlane.f32.xlu0 %v11957_v1  ;;  %1193 = vmatpush1.bf16.msra.mxu0 %v10456_v11  ;;  %v10463_v20 = vld [vmem:[#allocation8 + $0x30] ss:$12 sps:$4 sm:$0xff]   ;;  %v848_v21 = vmul.f32 %v11990_v16, %v11990_v16  ;;  %v10464_v22 = vld [vmem:[#allocation8 + $0x4c] ss:$12 sps:$4 sm:$0xff]   ;;  %v10467_v25 = vld [vmem:[#allocation8 + $0x48] ss:$12 sps:$4 sm:$0xff]  }
 0x163   : > { %1194 = vmatprep.subr.bf16.mxu0 %v10457_v13  ;;  %9741 = vmatprep.subr.bf16.mxu1 %v10462_v19  ;;  %v10466_v23 = vld [vmem:[#allocation8 + $0x20] ss:$12 sps:$4 sm:$0xff]   ;;  %v10468_v26 = vld [vmem:[#allocation8 + $0x64] ss:$12 sps:$4 sm:$0xff]   ;;  %v10472_v29 = vld [vmem:[#allocation8 + $0x7c] ss:$12 sps:$4 sm:$0xff]  }
 0x164   : > { %852 = vadd.xlane.f32.xlu1 %v843_v3  ;;  %9742 = vmatpush3.bf16.msra.mxu1 %v10462_v19  ;;  %v10470_v27 = vld [vmem:[#allocation8 + $0x38] ss:$12 sps:$4 sm:$0xff]   ;;  %v10471_v28 = vld [vmem:[#allocation8 + $0x60] ss:$12 sps:$4 sm:$0xff]   ;;  %v10474_v30 = vld [vmem:[#allocation8 + $0x50] ss:$12 sps:$4 sm:$0xff]  }
 0x165   : > { %9743 = vmatprep.subr.bf16.mxu1 %v10466_v23  ;;  %v10475_v31 = vld [vmem:[#allocation8 + $0x78] ss:$12 sps:$4 sm:$0xff]   ;;  %v10476_v32 = vld [vmem:[#allocation8 + $0x94] ss:$12 sps:$4 sm:$0xff]   ;;  %v10479_v34 = vld [vmem:[#allocation8 + $0x90] ss:$12 sps:$4 sm:$0xff]  }
 0x166   : > { %822 = vadd.xlane.f32.xlu0 %v11965_v4  ;;  %1195 = vmatpush1.bf16.msra.mxu0 %v10459_v15  ;;  %v10478_v33 = vld [vmem:[#allocation8 + $0x68] ss:$12 sps:$4 sm:$0xff]   ;;  %v10480_v35 = vld [vmem:[#allocation8 + $0xac] ss:$12 sps:$4 sm:$0xff]   ;;  %v10485_v40 = vld [vmem:[#allocation8 + $0xb0] ss:$12 sps:$4 sm:$0xff]  }
 0x167   : > { %1196 = vmatprep.subr.bf16.mxu0 %v10460_v18  ;;  %v10482_v36 = vld [vmem:[#allocation8 + $0x80] ss:$12 sps:$4 sm:$0xff]   ;;  %v10483_v37 = vld [vmem:[#allocation8 + $0xa8] ss:$12 sps:$4 sm:$0xff]   ;;  %v10484_v38 = vld [vmem:[#allocation8 + $0x98] ss:$12 sps:$4 sm:$0xff]  }
 0x168   : > { %824 = vadd.xlane.f32.xlu1 %v11969_v5  ;;  %9744 = vmatpush3.bf16.msra.mxu1 %v10466_v23  ;;  %s8968_s8 = sshll.u32 %s804_s10, 3  ;;  %vm1827_vm4 = vcmask 64512   ;;  %s11468_s29 = smov 64   ;;  %vm8524_vm5 = vcmask 1041409   ;;  %vm8527_vm6 = vcmask 1042434   ;;  %vm8530_vm7 = vcmask 1043459  }
 0x169   : > { %9745 = vmatprep.subr.bf16.mxu1 %v10470_v27  ;;  %s806_s6 = scalar_lea.vmem %s14468_s19, %s8968_s8  ;;  %s14474_s16 = sld [smem:[#allocation52_spill]]  ;;  %vm8533_vm8 = vcmask 1044484   ;;  %vm8536_vm9 = vcmask 1045509   ;;  %vm8539_vm10 = vcmask 1046534   ;;  %vm8542_vm11 = vcmask 1047559  }
 0x16a   : > { %854 = vadd.xlane.f32.xlu0 %v844_v6  ;;  %1197 = vmatpush1.bf16.msra.mxu0 %v10463_v20  ;;  %s14475_s4 = sld [smem:[#allocation53_spill]]  ;;  %s14521_s28 = sld [smem:[#allocation56_spill]] }
 0x16b   : > { %1198 = vmatprep.subr.bf16.mxu0 %v10464_v22  ;;  %s14522_s26 = sld [smem:[#allocation57_spill]]  ;;  %s8967_s10 = sshll.u32 %s11923_s9, 3 }
 0x16c   : > { %856 = vadd.xlane.f32.xlu1 %v845_v7  ;;  %9746 = vmatpush3.bf16.msra.mxu1 %v10470_v27  ;;  %s14523_s19 = sld [smem:[#allocation58_spill]]  ;;  %s9327_s21 = sshll.u32 %s11596_s3, 7 }
 0x16d   : > { %9747 = vmatprep.subr.bf16.mxu1 %v10474_v30  ;;  %s801_s2 = scalar_lea.vmem [#allocation20], %s8967_s10  ;;  %s8749_s8 = scalar_lea.sflag [#allocation4], %s11923_s9 }
 0x16e   : > { %826 = vadd.xlane.f32.xlu0 %v11978_v8  ;;  %1199 = vmatpush1.bf16.msra.mxu0 %v10467_v25  ;;  %p14525_p2 = scmp.ne.s32.totalorder %s14448_s20, 0  ;;  %s11469_s10 = smov [#allocation20]  }
 0x16f   : > { %1200 = vmatprep.subr.bf16.mxu0 %v10468_v26  ;;  %s11360_s25 = sshll.u32 %s11469_s10, 4  ;;  %s11361_s25 = int_to_ptr.vmem [resolvable:$false] %s11360_s25 }
 0x170   : > { %828 = vadd.xlane.f32.xlu1 %v11981_v9  ;;  %9748 = vmatpush3.bf16.msra.mxu1 %v10474_v30 }
 0x171   : > { %9749 = vmatprep.subr.bf16.mxu1 %v10478_v33 }
 0x172   : > { %858 = vadd.xlane.f32.xlu0 %v846_v12  ;;  %1201 = vmatpush1.bf16.msra.mxu0 %v10471_v28 }
 0x173   : > { %1202 = vmatprep.subr.bf16.mxu0 %v10472_v29 }
 0x174   : > { %860 = vadd.xlane.f32.xlu1 %v847_v14  ;;  %9750 = vmatpush3.bf16.msra.mxu1 %v10478_v33 }
 0x175   : > { %9751 = vmatprep.subr.bf16.mxu1 %v10482_v36 }
 0x176   : > { %830 = vadd.xlane.f32.xlu0 %v11990_v16  ;;  %1203 = vmatpush1.bf16.msra.mxu0 %v10475_v31  ;;  %v12019_v31 = vld [vmem:[#allocation5] ss:$0 sm:$0xff] }
 0x177   : > { %1204 = vmatprep.subr.bf16.mxu0 %v10476_v32 }
 0x178   : > { %832 = vadd.xlane.f32.xlu1 %v11993_v17  ;;  %9752 = vmatpush3.bf16.msra.mxu1 %v10482_v36 }
 0x179   : > { %9753 = vmatprep.subr.bf16.mxu1 %v10484_v38 }
 0x17a   : > { %862 = vadd.xlane.f32.xlu0 %v848_v21  ;;  %1205 = vmatpush1.bf16.msra.mxu0 %v10479_v34 }
 0x17b   : > { %1206 = vmatprep.subr.bf16.mxu0 %v10480_v35 }
 0x17c   : > { %864 = vadd.xlane.f32.xlu1 %v849_v24  ;;  %9754 = vmatpush3.bf16.msra.mxu1 %v10484_v38 }
 0x17d   : > { %9755 = vmatprep.subr.bf16.mxu1 %v10485_v40 }
 0x17e   : > { %1207 = vmatpush1.bf16.msra.mxu0 %v10483_v37 }
 0x180   : > { %9756 = vmatpush3.bf16.msra.mxu1 %v10485_v40 }
 0x1eb   : > { %v819_v41 = vpop.xlane.xlu0 %818 }
 0x1ec   : > { %v834_v42 = vmul.f32 0.0078125, %v819_v41 }
 0x1ed   : > { %v851_v43 = vpop.xlane.xlu1 %850 }
 0x1ee   : > { %v874_v44 = vmul.f32 %v834_v42, %v834_v42  ;;  %v866_v45 = vmul.f32 0.0078125, %v851_v43  ;;  %v898_v20 = vsub.f32 %v11954_v0, %v834_v42 }
 0x1ef   : > { %v821_v46 = vpop.xlane.xlu0 %820 }
 0x1f0   : > { %v882_v47 = vsub.f32 %v866_v45, %v874_v44  ;;  %v835_v48 = vmul.f32 0.0078125, %v821_v46  ;;  %v8970_v44 = vld [vmem:[#allocation7] ss:$0 sm:$0xff] }
 0x1f1   : > { %v853_v49 = vpop.xlane.xlu1 %852 }
 0x1f2   : > { %v890_v50 = vmax.f32 %v882_v47, 0.0  ;;  %v875_v51 = vmul.f32 %v835_v48, %v835_v48  ;;  %v867_v52 = vmul.f32 0.0078125, %v853_v49  ;;  %v899_v32 = vsub.f32 %v11957_v1, %v835_v48 }
 0x1f3   : > { %v823_v53 = vpop.xlane.xlu0 %822 }
 0x1f4   : > { %v906_v54 = vadd.f32 1e-12, %v890_v50  ;;  %v883_v55 = vsub.f32 %v867_v52, %v875_v51  ;;  %v12002_v56 = vmul.f32 0.0078125, %v823_v53 }
 0x1f5   : > { %v825_v57 = vpop.xlane.xlu1 %824 }
 0x1f6   : > { %10710 = vrsqrt.f32 %v906_v54  ;;  %v891_v58 = vmax.f32 %v883_v55, 0.0  ;;  %v876_v59 = vmul.f32 %v12002_v56, %v12002_v56  ;;  %v12006_v60 = vmul.f32 0.0078125, %v825_v57 }
 0x1f7   : > { %v855_v61 = vpop.xlane.xlu0 %854  ;;  %v900_v48 = vsub.f32 %v11965_v4, %v12002_v56 }
 0x1f8   : > { %v907_v62 = vadd.f32 1e-12, %v891_v58  ;;  %v868_v63 = vmul.f32 0.0078125, %v855_v61  ;;  %v877_v2 = vmul.f32 %v12006_v60, %v12006_v60  ;;  %v901_v58 = vsub.f32 %v11969_v5, %v12006_v60 }
 0x1f9   : > { %v857_v3 = vpop.xlane.xlu1 %856 }
 0x1fa   : > { %10712 = vrsqrt.f32 %v907_v62  ;;  %v884_v6 = vsub.f32 %v868_v63, %v876_v59  ;;  %v869_v7 = vmul.f32 0.0078125, %v857_v3 }
 0x1fb   : > { %v827_v10 = vpop.xlane.xlu0 %826 }
 0x1fc   : > { %v892_v11 = vmax.f32 %v884_v6, 0.0  ;;  %v885_v12 = vsub.f32 %v869_v7, %v877_v2  ;;  %v12010_v13 = vmul.f32 0.0078125, %v827_v10 }
 0x1fd   : > { %v829_v14 = vpop.xlane.xlu1 %828 }
 0x1fe   : > { %v908_v15 = vadd.f32 1e-12, %v892_v11  ;;  %v893_v18 = vmax.f32 %v885_v12, 0.0  ;;  %v878_v19 = vmul.f32 %v12010_v13, %v12010_v13  ;;  %v12015_v21 = vmul.f32 0.0078125, %v829_v14 }
 0x1ff   : > { %v859_v22 = vpop.xlane.xlu0 %858  ;;  %v902_v60 = vsub.f32 %v11978_v8, %v12010_v13 }
 0x200   : > { %v10711_v23 = vpop.eup %10710  ;;  %10714 = vrsqrt.f32 %v908_v15  ;;  %v909_v24 = vadd.f32 1e-12, %v893_v18  ;;  %v870_v25 = vmul.f32 0.0078125, %v859_v22  ;;  %v879_v26 = vmul.f32 %v12015_v21, %v12015_v21 }
 0x201   : > { %v861_v27 = vpop.xlane.xlu1 %860  ;;  %v922_v28 = vmul.f32 %v10711_v23, %v898_v20  ;;  %v903_v14 = vsub.f32 %v11981_v9, %v12015_v21 }
 0x202   : > { %10716 = vrsqrt.f32 %v909_v24  ;;  %v886_v29 = vsub.f32 %v870_v25, %v878_v19  ;;  %v871_v30 = vmul.f32 0.0078125, %v861_v27 }
 0x203   : > { %v831_v0 = vpop.xlane.xlu0 %830  ;;  %v936_v40 = vmul.f32 %v12019_v31, %v922_v28 }
 0x204   : > { %v10713_v33 = vpop.eup %10712  ;;  %v894_v34 = vmax.f32 %v886_v29, 0.0  ;;  %v887_v35 = vsub.f32 %v871_v30, %v879_v26  ;;  %v840_v36 = vmul.f32 0.0078125, %v831_v0  ;;  %v14385_v0 = vmov 0.0  }
 0x205   : > { %v833_v37 = vpop.xlane.xlu1 %832  ;;  %v923_v38 = vmul.f32 %v10713_v33, %v899_v32  ;;  %v12026_v52 = vadd.f32 %v8970_v44, %v936_v40  ;;  %9765 = vmatprep.subr.bf16.mxu1 %v14385_v0  ;;  %9777 = vmatprep.subr.bf16.mxu0 %v14385_v0 }
 0x206   : > { %v910_v41 = vadd.f32 1e-12, %v894_v34  ;;  %v895_v42 = vmax.f32 %v887_v35, 0.0  ;;  %v880_v43 = vmul.f32 %v840_v36, %v840_v36  ;;  %v841_v45 = vmul.f32 0.0078125, %v833_v37  ;;  %v1047_v35 = vld [vmem:[%s14465_s5] sm:$0x7] }
 0x207   : > { %v863_v46 = vpop.xlane.xlu0 %862  ;;  %v937_v47 = vmul.f32 %v12019_v31, %v923_v38  ;;  %v904_v8 = vsub.f32 %v11990_v16, %v840_v36 }
 0x208   : > { %10718 = vrsqrt.f32 %v910_v41  ;;  %v911_v49 = vadd.f32 1e-12, %v895_v42  ;;  %v872_v1 = vmul.f32 0.0078125, %v863_v46  ;;  %v881_v50 = vmul.f32 %v841_v45, %v841_v45 }
 0x209   : > { %v865_v51 = vpop.xlane.xlu1 %864  ;;  %v12028_v53 = vadd.f32 %v8970_v44, %v937_v47  ;;  %v905_v23 = vsub.f32 %v11993_v17, %v841_v45 }
 0x20a   : > { %v10715_v54 = vpop.eup %10714  ;;  %10720 = vrsqrt.f32 %v911_v49  ;;  %v888_v55 = vsub.f32 %v872_v1, %v880_v43  ;;  %v873_v57 = vmul.f32 0.0078125, %v865_v51 }
 0x20b   : > { %v1011_v59 = vpack.c.bf16 %v12028_v53, %v12026_v52  ;;  %v924_v61 = vmul.f32 %v10715_v54, %v900_v48 }
 0x20c   : > { %v10717_v62 = vpop.eup %10716  ;;  %v896_v63 = vmax.f32 %v888_v55, 0.0  ;;  %v889_v4 = vsub.f32 %v873_v57, %v881_v50 }
 0x20d   : > { %1225 = vmatmul.mubr.bf16.vlgmr.msra.gmra.mrb[0].mxu0 %v1011_v59  ;;  %9757 = vmatprep.mubr.bf16.mxu1 %v1011_v59  ;;  %v925_v56 = vmul.f32 %v10717_v62, %v901_v58  ;;  %v938_v2 = vmul.f32 %v12019_v31, %v924_v61 }
 0x20e   : > { %v912_v3 = vadd.f32 1e-12, %v896_v63  ;;  %v897_v6 = vmax.f32 %v889_v4, 0.0  ;;  %1234 = vmatprep.mubr.bf16.mxu0 %v14383_v39 }
 0x20f   : > { %v939_v7 = vmul.f32 %v12019_v31, %v925_v56  ;;  %v12039_v10 = vadd.f32 %v8970_v44, %v938_v2 }
 0x210   : > { %10722 = vrsqrt.f32 %v912_v3  ;;  %v913_v5 = vadd.f32 1e-12, %v897_v6 }
 0x211   : > { %v12041_v11 = vadd.f32 %v8970_v44, %v939_v7 }
 0x212   : > { %v10719_v12 = vpop.eup %10718  ;;  %10724 = vrsqrt.f32 %v913_v5 }
 0x213   : > { %v1012_v15 = vpack.c.bf16 %v12041_v11, %v12039_v10  ;;  %v926_v18 = vmul.f32 %v10719_v12, %v902_v60 }
 0x214   : > { %v10721_v19 = vpop.eup %10720 }
 0x215   : > { %1235 = vmatmul.mubr.bf16.gmra.mrb[4].mxu0 %v1012_v15  ;;  %9758 = vmatmul.mubr.bf16.vlgmr.msra.gmra.mrb[0].mxu1 %v1012_v15  ;;  %v927_v20 = vmul.f32 %v10721_v19, %v903_v14  ;;  %v940_v22 = vmul.f32 %v12019_v31, %v926_v18 }
 0x216   : > { %1244 = vmatprep.mubr.bf16.mxu0 %v14383_v39 }
 0x217   : > { %v941_v13 = vmul.f32 %v12019_v31, %v927_v20  ;;  %v12052_v24 = vadd.f32 %v8970_v44, %v940_v22 }
 0x219   : > { %v12054_v9 = vadd.f32 %v8970_v44, %v941_v13 }
 0x21a   : > { %v10723_v21 = vpop.eup %10722 }
 0x21b   : > { %v1013_v25 = vpack.c.bf16 %v12054_v9, %v12052_v24  ;;  %v928_v26 = vmul.f32 %v10723_v21, %v904_v8 }
 0x21c   : > { %v10725_v27 = vpop.eup %10724 }
 0x21d   : > { %1245 = vmatmul.mubr.bf16.gmra.mrb[8].mxu0 %v1013_v25  ;;  %9761 = vmatprep.mubr.bf16.mxu1 %v1013_v25  ;;  %v929_v28 = vmul.f32 %v10725_v27, %v905_v23  ;;  %v942_v29 = vmul.f32 %v12019_v31, %v928_v26 }
 0x21e   : > { %1254 = vmatprep.mubr.bf16.mxu0 %v14383_v39 }
 0x21f   : > { %v943_v16 = vmul.f32 %v12019_v31, %v929_v28  ;;  %v12061_v17 = vadd.f32 %v8970_v44, %v942_v29  ;;  %v966_v31 = vlaneseq }
 0x221   : > { %v12063_v30 = vadd.f32 %v8970_v44, %v943_v16  ;;  %v12073_v33 = vshrl.u32 %v966_v31, 7 }
 0x223   : > { %v1014_v32 = vpack.c.bf16 %v12063_v30, %v12061_v17  ;;  %14463 = vst [vmem:[#allocation28_spill] sm:$0xff] %v12073_v33  ;;  %v12076_v34 = vsub.s32 1, %v12073_v33  ;;  %v12085_v37 = vsub.s32 0, %v12073_v33  ;;  %v12088_v41 = vsub.s32 2, %v12073_v33 }
 0x225   : > { %1255 = vmatmul.mubr.bf16.gmra.mrb[12].mxu0 %v1014_v32  ;;  %9762 = vmatmul.mubr.bf16.gmra.mrb[4].mxu1 %v1014_v32  ;;  %14464 = vst [vmem:[#allocation29_spill] sm:$0xff] %v12076_v34  ;;  %v12082_v36 = vrot.slane %v1047_v35, %v12076_v34  ;;  %14466 = vst [vmem:[#allocation30_spill] sm:$0xff] %v12085_v37  ;;  %v12092_v45 = vrot.slane %v1047_v35, %v12085_v37 }
 0x226   : > { %9767 = vmatprep.mubr.msk.bf16.mxu1 %vm11466_vm0, %v14385_v0  ;;  %9779 = vmatprep.mubr.msk.bf16.mxu0 %vm11466_vm0, %v14385_v0  ;;  %14467 = vst [vmem:[#allocation31_spill] sm:$0xff] %v12088_v41  ;;  %v12097_v47 = vrot.slane %v1047_v35, %v12088_v41 }
 0x2e0   : > { %v1226_v38 = vpop.f32.mrb[0].mxu0 }
 0x2e1   : > { %v1228_v40 = vpop.f32.mrb[1].mxu0  ;;  %v1227_v48 = vadd.f32 %v1226_v38, %v12092_v45 }
 0x2e2   : > { %v1229_v42 = vadd.f32 %v1228_v40, %v12082_v36  ;;  %v1230_v43 = vpop.f32.mrb[2].mxu0 }
 0x2e3   : > { %v1232_v44 = vpop.f32.mrb[3].mxu0  ;;  %v12115_v2 = vpack.c.bf16 %v1227_v48, %v1227_v48  ;;  %v1231_v60 = vadd.f32 %v1230_v43, %v12092_v45 }
 0x2e4   : > { %v12094_v46 = vpack.c.bf16 %v1229_v42, %v1229_v42  ;;  %v1233_v1 = vadd.f32 %v1232_v44, %v12082_v36 }
 0x2e5   : > { %v12135_v8 = vpack.c.bf16 %v1231_v60, %v1231_v60 }
 0x2e6   : > { %v1463_v49 = vsel %vm1458_vm1, %v12094_v46, 0  ;;  %v12107_v58 = vpack.c.bf16 %v1233_v1, %v1233_v1 }
 0x2e7   : > { %9766 = vmatpush3.bf16.xpose.msra.mxu1 %v1463_v49 }
 0x2e8   : > { %v1236_v50 = vpop.f32.mrb[4].mxu0  ;;  %v9759_v51 = vpop.f32.mrb[0].mxu1  ;;  %9771 = vmatprep.subr.bf16.mxu1 %v14385_v0  ;;  %v1509_v6 = vsel %vm1458_vm1, %v12107_v58, 0 }
 0x2e9   : > { %v12105_v54 = vadd.f32 %v9759_v51, %v12097_v47  ;;  %v1238_v55 = vpop.f32.mrb[5].mxu0  ;;  %v1299_v57 = vpop.f32.mrb[1].mxu1  ;;  %v1237_v12 = vadd.f32 %v1236_v50, %v12092_v45 }
 0x2ea   : > { %v1239_v59 = vadd.f32 %v1238_v55, %v12082_v36  ;;  %v1240_v61 = vpop.f32.mrb[6].mxu0  ;;  %v9760_v62 = vpop.f32.mrb[2].mxu1 }
 0x2eb   : > { %v12111_v63 = vadd.f32 %v9760_v62, %v12097_v47  ;;  %v1242_v4 = vpop.f32.mrb[7].mxu0  ;;  %v12113_v56 = vpop.f32.mrb[3].mxu1  ;;  %v12137_v13 = vpack.c.bf16 %v1237_v12, %v1237_v12  ;;  %v1241_v27 = vadd.f32 %v1240_v61, %v12092_v45  ;;  %v1300_v62 = vadd.f32 %v1299_v57, %v12097_v47 }
 0x2ec   : > { %v12117_v3 = vpack.c.bf16 %v1239_v59, %v1239_v59  ;;  %v1243_v5 = vadd.f32 %v1242_v4, %v12082_v36 }
 0x2ed   : > { %v12167_v49 = vpack.c.bf16 %v1241_v27, %v1241_v27  ;;  %v12199_v57 = vpack.c.bf16 %v1300_v62, %v1300_v62 }
 0x2ee   : > { %v1555_v7 = vsel %vm1458_vm1, %v12117_v3, 0  ;;  %9768 = vmatmul.mubr.msk.bf16.vlgmr.msra.gmra.mrb[8].mxu1 %vm1458_vm1, %v12115_v2  ;;  %v12132_v18 = vpack.c.bf16 %v1243_v5, %v1243_v5 }
 0x2ef   : > { %9772 = vmatpush3.bf16.xpose.msra.mxu1 %v1509_v6  ;;  %9778 = vmatpush3.bf16.xpose.msra.mxu0 %v1555_v7 }
 0x2f0   : > { %v1246_v14 = vpop.f32.mrb[8].mxu0  ;;  %9773 = vmatprep.mubr.msk.bf16.mxu1 %vm11466_vm0, %v14385_v0  ;;  %9783 = vmatprep.subr.bf16.mxu1 %v14385_v0  ;;  %v1601_v21 = vsel %vm1458_vm1, %v12132_v18, 0 }
 0x2f1   : > { %v1248_v15 = vpop.f32.mrb[9].mxu0  ;;  %9789 = vmatprep.subr.bf16.mxu0 %v14385_v0  ;;  %v1247_v28 = vadd.f32 %v1246_v14, %v12092_v45 }
 0x2f2   : > { %v1249_v19 = vadd.f32 %v1248_v15, %v12082_v36  ;;  %v1250_v20 = vpop.f32.mrb[10].mxu0  ;;  %v1929_v15 = vsel %vm1927_vm2, %v12199_v57, 0 }
 0x2f3   : > { %v1252_v22 = vpop.f32.mrb[11].mxu0  ;;  %v12172_v51 = vpack.c.bf16 %v1247_v28, %v1247_v28 }
 0x2f4   : > { %v12139_v23 = vpack.c.bf16 %v1249_v19, %v1249_v19  ;;  %v1253_v26 = vadd.f32 %v1252_v22, %v12082_v36  ;;  %v1303_v19 = vadd.f32 %v12113_v56, %v12097_v47  ;;  %v11467_v22 = vmov 1966171168  }
 0x2f6   : > { %v1647_v25 = vsel %vm1458_vm1, %v12139_v23, 0  ;;  %9774 = vmatmul.mubr.msk.bf16.vlgmr.msra.gmra.mrb[12].mxu1 %vm1458_vm1, %v12135_v8  ;;  %9780 = vmatmul.mubr.msk.bf16.vlgmr.msra.gmra.mrb[16].mxu0 %vm1458_vm1, %v12137_v13  ;;  %v12161_v38 = vpack.c.bf16 %v1253_v26, %v1253_v26 }
 0x2f7   : > { %9784 = vmatpush3.bf16.xpose.msra.mxu1 %v1601_v21  ;;  %9790 = vmatpush3.bf16.xpose.msra.mxu0 %v1647_v25  ;;  %v964_v21 = vunpack.c.l.s4 %v11467_v22  ;;  %v958_v25 = vld [vmem:[%s806_s6] sm:$0xff]  ;;  %s14476_s6 = sld [smem:[#allocation55_spill]] }
 0x2f8   : > { %v1256_v29 = vpop.f32.mrb[12].mxu0  ;;  %9785 = vmatprep.mubr.msk.bf16.mxu1 %vm11466_vm0, %v14385_v0  ;;  %9791 = vmatprep.mubr.msk.bf16.mxu0 %vm11466_vm0, %v14385_v0  ;;  %v9763_v16 = vpop.f32.mrb[4].mxu1  ;;  %v1693_v4 = vsel %vm1458_vm1, %v12161_v38, 0  ;;  %vm959_vm3 = vcmp.eq.f32.partialorder %v958_v25, 0.0 }
 0x2f9   : > { %v1258_v32 = vpop.f32.mrb[13].mxu0  ;;  %9795 = vmatprep.subr.bf16.mxu1 %v14385_v0  ;;  %9801 = vmatprep.subr.bf16.mxu0 %v14385_v0  ;;  %v12159_v31 = vadd.f32 %v9763_v16, %v12097_v47  ;;  %v1315_v35 = vpop.f32.mrb[5].mxu1  ;;  %v1257_v6 = vadd.f32 %v1256_v29, %v12092_v45  ;;  %v965_v26 = vunpack.c.0.s8 %v964_v21  ;;  %v960_v28 = vsel %vm959_vm3, -1e+30, %v14385_v0 }
 0x2fa   : > { %v1259_v40 = vadd.f32 %v1258_v32, %v12082_v36  ;;  %v1260_v42 = vpop.f32.mrb[14].mxu0  ;;  %v12165_v43 = vadd.f32 %v1315_v35, %v12097_v47  ;;  %v9764_v44 = vpop.f32.mrb[6].mxu1 }
 0x2fb   : > { %v1262_v1 = vpop.f32.mrb[15].mxu0  ;;  %v12170_v48 = vadd.f32 %v9764_v44, %v12097_v47  ;;  %v1318_v50 = vpop.f32.mrb[7].mxu1  ;;  %v12201_v60 = vpack.c.bf16 %v1257_v6, %v1257_v6  ;;  %v968_v27 = vsub.s32 %v965_v26, %v12073_v33 }
 0x2fc   : > { %v12174_v55 = vpack.c.bf16 %v1259_v40, %v1259_v40  ;;  %v1263_v59 = vadd.f32 %v1262_v1, %v12082_v36  ;;  %v12178_v61 = vadd.f32 %v1318_v50, %v12097_v47  ;;  %v1251_v36 = vadd.f32 %v1250_v20, %v12092_v45 }
 0x2fd   : > { %v1261_v20 = vadd.f32 %v1260_v42, %v12092_v45  ;;  %v12222_v45 = vpack.c.bf16 %v1303_v19, %v1303_v19  ;;  %v969_v29 = vrot.slane %v960_v28, %v968_v27 }
 0x2fe   : > { %v1739_v7 = vsel %vm1458_vm1, %v12174_v55, 0  ;;  %9786 = vmatmul.mubr.msk.bf16.vlgmr.msra.gmra.mrb[16].mxu1 %vm1458_vm1, %v12167_v49  ;;  %9792 = vmatmul.mubr.msk.bf16.vlgmr.msra.gmra.mrb[20].mxu0 %vm1458_vm1, %v12172_v51  ;;  %v12191_v5 = vpack.c.bf16 %v1263_v59, %v1263_v59  ;;  %v12203_v12 = vpack.c.bf16 %v1251_v36, %v1251_v36  ;;  %v962_v59 = vcombine.high %v960_v28, %v960_v28 }
 0x2ff   : > { %9796 = vmatpush3.bf16.xpose.msra.mxu1 %v1693_v4  ;;  %9802 = vmatpush3.bf16.xpose.msra.mxu0 %v1739_v7  ;;  %v12224_v47 = vpack.c.bf16 %v1261_v20, %v1261_v20  ;;  %v1975_v56 = vsel %vm1927_vm2, %v12222_v45, 0  ;;  %v985_v16 = vrot.slane %v969_v29, %v968_v27  ;;  %v977_v35 = vcombine.high %v969_v29, %v969_v29 }
 0x300   : > { %9797 = vmatprep.mubr.msk.bf16.mxu1 %vm11466_vm0, %v14385_v0  ;;  %9803 = vmatprep.mubr.msk.bf16.mxu0 %vm11466_vm0, %v14385_v0  ;;  %v1785_v14 = vsel %vm1458_vm1, %v12191_v5, 0 }
 0x301   : > { %9807 = vmatprep.subr.bf16.mxu1 %v14385_v0  ;;  %9813 = vmatprep.subr.bf16.mxu0 %v14385_v0  ;;  %v12241_v32 = vrot.slane %v985_v16, %v12085_v37  ;;  %v999_v1 = vrot.slane %v977_v35, %v968_v27  ;;  %v1007_v50 = vcombine.high %v985_v16, %v985_v16 }
 0x303   : > { %v12249_v7 = vrot.slane %v999_v1, %v12085_v37  ;;  %v12252_v36 = vrot.slane %v1007_v50, %v12085_v37  ;;  %v1009_v25 = vcombine.high %v999_v1, %v999_v1 }
 0x305   : > { %v12265_v50 = vrot.slane %v1009_v25, %v12085_v37 }
 0x306   : > { %9798 = vmatmul.mubr.msk.bf16.vlgmr.msra.gmra.mrb[20].mxu1 %vm1458_vm1, %v12203_v12  ;;  %9804 = vmatmul.mubr.msk.bf16.vlgmr.msra.gmra.mrb[24].mxu0 %vm1458_vm1, %v12201_v60 }
 0x307   : > { %9808 = vmatpush3.bf16.xpose.msra.mxu1 %v1785_v14  ;;  %9814 = vmatpush3.bf16.msra.mxu0 %v1929_v15  ;;  %v976_v14 = vrot.slane %v962_v59, %v968_v27 }
 0x308   : > { %9809 = vmatprep.mubr.msk.bf16.mxu1 %vm11466_vm0, %v14385_v0  ;;  %9819 = vmatprep.subr.bf16.mxu1 %v14385_v0 }
 0x309   : > { %9815 = vmatprep.mubr.msk.bf16.mxu0 %vm11466_vm0, %v14385_v0  ;;  %9825 = vmatprep.subr.bf16.mxu0 %v14385_v0  ;;  %v992_v26 = vrot.slane %v976_v14, %v968_v27  ;;  %v978_v1 = vcombine.high %v976_v14, %v976_v14 }
 0x30b   : > { %v12268_v59 = vrot.slane %v992_v26, %v12085_v37 }
 0x30e   : > { %9810 = vmatmul.mubr.msk.bf16.vlgmr.msra.gmra.mrb[24].mxu1 %vm1458_vm1, %v12224_v47 }
 0x30f   : > { %9820 = vmatpush3.bf16.msra.mxu1 %v1975_v56  ;;  %9821 = vmatprep.mubr.msk.bf16.mxu1 %vm11466_vm0, %v14385_v0 }
 0x310   : > { %9831 = vmatprep.subr.bf16.mxu1 %v14385_v0 }
 0x3c1   : > { %v1499_v40 = vpop.f32.mrb[8].mxu1 }
 0x3c2   : > { %v12244_v42 = vadd.f32 %v1499_v40, %v12241_v32  ;;  %v9769_v44 = vpop.f32.mrb[9].mxu1 }
 0x3c3   : > { %v1502_v62 = vpop.f32.mrb[10].mxu1 }
 0x3c4   : > { %v9770_v4 = vpop.f32.mrb[11].mxu1  ;;  %v1828_v6 = vsel %vm1827_vm4, %v12244_v42, -inf }
 0x3c5   : > { %1829 = vmax.xlane.f32.xlu0 %v1828_v6 }
 0x3c9   : > { %v1545_v15 = vpop.f32.mrb[12].mxu1  ;;  %v1591_v19 = vpop.f32.mrb[16].mxu0 }
 0x3ca   : > { %v12255_v20 = vadd.f32 %v1545_v15, %v12249_v7  ;;  %v12258_v56 = vadd.f32 %v1591_v19, %v12252_v36  ;;  %v9775_v22 = vpop.f32.mrb[13].mxu1  ;;  %v9781_v21 = vpop.f32.mrb[17].mxu0 }
 0x3cb   : > { %v1548_v28 = vpop.f32.mrb[14].mxu1  ;;  %v1594_v29 = vpop.f32.mrb[18].mxu0  ;;  %v1006_v21 = vrot.slane %v978_v1, %v968_v27 }
 0x3cc   : > { %v9776_v16 = vpop.f32.mrb[15].mxu1  ;;  %v9782_v35 = vpop.f32.mrb[19].mxu0  ;;  %v1831_v40 = vsel %vm1827_vm4, %v12255_v20, -inf  ;;  %v1834_v44 = vsel %vm1827_vm4, %v12258_v56, -inf  ;;  %v1008_v28 = vcombine.high %v992_v26, %v992_v26 }
 0x3cd   : > { %1832 = vmax.xlane.f32.xlu1 %v1831_v40  ;;  %1835 = vmax.xlane.f32.xlu0 %v1834_v44  ;;  %v12275_v14 = vrot.slane %v1006_v21, %v12085_v37 }
 0x3cf   : > { %14469 = vst [vmem:[#allocation32_spill] sm:$0xff] %v12275_v14 }
 0x3d1   : > { %v1637_v62 = vpop.f32.mrb[16].mxu1  ;;  %v1683_v4 = vpop.f32.mrb[20].mxu0 }
 0x3d2   : > { %v1638_v6 = vadd.f32 %v1637_v62, %v12265_v50  ;;  %v1684_v15 = vadd.f32 %v1683_v4, %v12268_v59  ;;  %v9787_v19 = vpop.f32.mrb[17].mxu1  ;;  %v9793_v22 = vpop.f32.mrb[21].mxu0  ;;  %v12278_v62 = vrot.slane %v1008_v28, %v12085_v37 }
 0x3d3   : > { %v1640_v29 = vpop.f32.mrb[18].mxu1  ;;  %v1686_v16 = vpop.f32.mrb[22].mxu0  ;;  %v1010_v22 = vcombine.high %v1006_v21, %v1006_v21 }
 0x3d4   : > { %v9788_v35 = vpop.f32.mrb[19].mxu1  ;;  %v9794_v40 = vpop.f32.mrb[23].mxu0  ;;  %v1837_v25 = vsel %vm1827_vm4, %v1638_v6, -inf  ;;  %v1840_v44 = vsel %vm1827_vm4, %v1684_v15, -inf  ;;  %14470 = vst [vmem:[#allocation33_spill] sm:$0xff] %v12278_v62 }
 0x3d5   : > { %1838 = vmax.xlane.f32.xlu1 %v1837_v25  ;;  %1841 = vmax.xlane.f32.xlu0 %v1840_v44  ;;  %v12285_v28 = vrot.slane %v1010_v22, %v12085_v37 }
 0x3d7   : > { %14471 = vst [vmem:[#allocation34_spill] sm:$0xff] %v12285_v28 }
 0x3d9   : > { %v1729_v4 = vpop.f32.mrb[20].mxu1  ;;  %v1775_v19 = vpop.f32.mrb[24].mxu0 }
 0x3da   : > { %v1730_v27 = vadd.f32 %v1729_v4, %v12275_v14  ;;  %v1776_v26 = vadd.f32 %v1775_v19, %v12278_v62  ;;  %v9799_v1 = vpop.f32.mrb[21].mxu1  ;;  %v9805_v29 = vpop.f32.mrb[25].mxu0 }
 0x3db   : > { %v1732_v16 = vpop.f32.mrb[22].mxu1  ;;  %v1778_v35 = vpop.f32.mrb[26].mxu0 }
 0x3dc   : > { %v9800_v40 = vpop.f32.mrb[23].mxu1  ;;  %v1843_v25 = vsel %vm1827_vm4, %v1730_v27, -inf  ;;  %v1846_v44 = vsel %vm1827_vm4, %v1776_v26, -inf  ;;  %v9806_v39 = vpop.f32.mrb[27].mxu0 }
 0x3dd   : > { %1844 = vmax.xlane.f32.xlu1 %v1843_v25  ;;  %1847 = vmax.xlane.f32.xlu0 %v1846_v44 }
 0x3e1   : > { %v1821_v0 = vpop.f32.mrb[24].mxu1 }
 0x3e2   : > { %v12288_v4 = vadd.f32 %v1821_v0, %v12285_v28  ;;  %v9811_v19 = vpop.f32.mrb[25].mxu1 }
 0x3e3   : > { %v1824_v21 = vpop.f32.mrb[26].mxu1 }
 0x3e4   : > { %v1849_v1 = vsel %vm1827_vm4, %v12288_v4, -inf  ;;  %v9812_v29 = vpop.f32.mrb[27].mxu1 }
 0x3e5   : > { %1850 = vmax.xlane.f32.xlu1 %v1849_v1 }
 0x452   : > { %v1830_v16 = vpop.xlane.xlu0 %1829 }
 0x453   : > { %v1852_v35 = vsub.f32 %v12244_v42, %v1830_v16 }
 0x455   : > { %v1860_v39 = vmul.f32 1.442695, %v1852_v35 }
 0x457   : > { %10726 = vpow2.f32 %v1860_v39 }
 0x45a   : > { %v1833_v40 = vpop.xlane.xlu1 %1832  ;;  %v1836_v25 = vpop.xlane.xlu0 %1835 }
 0x45b   : > { %v1853_v22 = vsub.f32 %v12255_v20, %v1833_v40  ;;  %v1854_v44 = vsub.f32 %v12258_v56, %v1836_v25 }
 0x45d   : > { %v1862_v0 = vmul.f32 1.442695, %v1853_v22  ;;  %v1864_v34 = vmul.f32 1.442695, %v1854_v44 }
 0x45f   : > { %10728 = vpow2.f32 %v1862_v0 }
 0x460   : > { %10730 = vpow2.f32 %v1864_v34 }
 0x461   : > { %v12295_v19 = vpop.eup %10726 }
 0x462   : > { %v1839_v21 = vpop.xlane.xlu1 %1838  ;;  %v1842_v29 = vpop.xlane.xlu0 %1841  ;;  %v1876_v1 = vsel %vm1827_vm4, %v12295_v19, 0.0 }
 0x463   : > { %v1855_v42 = vsub.f32 %v1638_v6, %v1839_v21  ;;  %v1856_v16 = vsub.f32 %v1684_v15, %v1842_v29  ;;  %1877 = vadd.xlane.f32.xlu0 %v1876_v1 }
 0x465   : > { %v1866_v35 = vmul.f32 1.442695, %v1855_v42  ;;  %v1868_v39 = vmul.f32 1.442695, %v1856_v16 }
 0x467   : > { %10732 = vpow2.f32 %v1866_v35 }
 0x468   : > { %10734 = vpow2.f32 %v1868_v39 }
 0x469   : > { %v12299_v20 = vpop.eup %10728 }
 0x46a   : > { %v12301_v56 = vpop.eup %10730  ;;  %v1845_v40 = vpop.xlane.xlu1 %1844  ;;  %v1879_v25 = vsel %vm1827_vm4, %v12299_v20, 0.0 }
 0x46b   : > { %v1848_v34 = vpop.xlane.xlu0 %1847  ;;  %v1857_v22 = vsub.f32 %v1730_v27, %v1845_v40  ;;  %1880 = vadd.xlane.f32.xlu1 %v1879_v25  ;;  %v1882_v6 = vsel %vm1827_vm4, %v12301_v56, 0.0 }
 0x46c   : > { %v1858_v44 = vsub.f32 %v1776_v26, %v1848_v34  ;;  %1883 = vadd.xlane.f32.xlu0 %v1882_v6 }
 0x46d   : > { %v1870_v15 = vmul.f32 1.442695, %v1857_v22 }
 0x46e   : > { %v1872_v0 = vmul.f32 1.442695, %v1858_v44 }
 0x46f   : > { %10736 = vpow2.f32 %v1870_v15  ;;  %v12394_v15 = vpack.c.bf16 %v12178_v61, %v12178_v61 }
 0x470   : > { %10738 = vpow2.f32 %v1872_v0 }
 0x471   : > { %v12307_v21 = vpop.eup %10732 }
 0x472   : > { %v12309_v29 = vpop.eup %10734  ;;  %v1885_v1 = vsel %vm1827_vm4, %v12307_v21, 0.0  ;;  %v1851_v39 = vpop.xlane.xlu1 %1850 }
 0x473   : > { %1886 = vadd.xlane.f32.xlu1 %v1885_v1  ;;  %v1888_v27 = vsel %vm1827_vm4, %v12309_v29, 0.0  ;;  %v1859_v40 = vsub.f32 %v12288_v4, %v1851_v39  ;;  %v12378_v4 = vpack.c.bf16 %v12165_v43, %v12165_v43  ;;  %v12400_v1 = vpack.c.bf16 %v12159_v31, %v12159_v31 }
 0x474   : > { %1889 = vadd.xlane.f32.xlu0 %v1888_v27  ;;  %v2159_v39 = vsel %vm1927_vm2, %v12394_v15, 0 }
 0x475   : > { %v1874_v34 = vmul.f32 1.442695, %v1859_v40  ;;  %v2205_v61 = vsel %vm1927_vm2, %v12400_v1, 0 }
 0x477   : > { %10740 = vpow2.f32 %v1874_v34 }
 0x479   : > { %v12315_v26 = vpop.eup %10736 }
 0x47a   : > { %v12317_v42 = vpop.eup %10738  ;;  %v1891_v16 = vsel %vm1827_vm4, %v12315_v26, 0.0 }
 0x47b   : > { %1892 = vadd.xlane.f32.xlu1 %v1891_v16  ;;  %v1894_v35 = vsel %vm1827_vm4, %v12317_v42, 0.0 }
 0x47c   : > { %1895 = vadd.xlane.f32.xlu0 %v1894_v35 }
 0x48c   : > { %2349 = vrot.lane.b32.xlu1 %v12107_v58, %s11468_s29 }
 0x490   : > { %2297 = vrot.lane.b32.xlu1 %v12115_v2, %s11468_s29 }
 0x492   : > { %2299 = vrot.lane.b32.xlu0 %v12094_v46, %s11468_s29  ;;  %v12342_v46 = vpop.eup %10740 }
 0x493   : > { %v1897_v58 = vsel %vm1827_vm4, %v12342_v46, 0.0 }
 0x496   : > { %2399 = vrot.lane.b32.xlu0 %v12117_v3, %s11468_s29 }
 0x49a   : > { %2397 = vrot.lane.b32.xlu0 %v12137_v13, %s11468_s29  ;;  %v12362_v13 = vpack.c.bf16 %v12105_v54, %v12105_v54 }
 0x49e   : > { %2499 = vrot.lane.b32.xlu0 %v12139_v23, %s11468_s29 }
 0x4a2   : > { %2497 = vrot.lane.b32.xlu0 %v12172_v51, %s11468_s29 }
 0x4a6   : > { %2599 = vrot.lane.b32.xlu0 %v12174_v55, %s11468_s29 }
 0x4aa   : > { %2597 = vrot.lane.b32.xlu0 %v12201_v60, %s11468_s29 }
 0x4b4   : > { %1898 = vadd.xlane.f32.xlu1 %v1897_v58 }
 0x4c5   : > { %2347 = vrot.lane.b32.xlu1 %v12135_v8, %s11468_s29 }
 0x4c9   : > { %2449 = vrot.lane.b32.xlu1 %v12132_v18, %s11468_s29 }
 0x4cd   : > { %2447 = vrot.lane.b32.xlu1 %v12167_v49, %s11468_s29  ;;  %v2021_v49 = vsel %vm1927_vm2, %v12362_v13, 0 }
 0x4d1   : > { %2549 = vrot.lane.b32.xlu1 %v12161_v38, %s11468_s29 }
 0x4d5   : > { %2547 = vrot.lane.b32.xlu1 %v12203_v12, %s11468_s29  ;;  %v12373_v12 = vpack.c.bf16 %v12111_v63, %v12111_v63  ;;  %v2113_v63 = vsel %vm1927_vm2, %v12378_v4, 0 }
 0x4d7   : > { %v2067_v44 = vsel %vm1927_vm2, %v12373_v12, 0 }
 0x4d9   : > { %2649 = vrot.lane.b32.xlu1 %v12191_v5, %s11468_s29  ;;  %v14472_v5 = vmov 0.0  }
 0x4dd   : > { %2647 = vrot.lane.b32.xlu1 %v12224_v47, %s11468_s29 }
 0x4f0   : > { %v1878_v2 = vpop.xlane.xlu0 %1877 }
 0x4f1   : > { %10742 = vrcp.f32 %v1878_v2 }
 0x4f8   : > { %v1881_v3 = vpop.xlane.xlu1 %1880 }
 0x4f9   : > { %10744 = vrcp.f32 %v1881_v3  ;;  %v1884_v18 = vpop.xlane.xlu0 %1883 }
 0x4fa   : > { %10746 = vrcp.f32 %v1884_v18 }
 0x4fb   : > { %v10743_v8 = vpop.eup %10742 }
 0x4fc   : > { %v1908_v23 = vmul.f32 %v10743_v8, %v12295_v19 }
 0x4fe   : > { %v1916_v38 = vpack.c.bf16 %v1908_v23, %v1908_v23 }
 0x500   : > { %v1887_v51 = vpop.xlane.xlu1 %1886  ;;  %9816 = vmatmul.mubr.msk.bf16.vlgmr.msra.gmra.mrb[28].mxu0 %vm1827_vm4, %v1916_v38 }
 0x501   : > { %10748 = vrcp.f32 %v1887_v51  ;;  %9826 = vmatpush3.bf16.msra.mxu0 %v2021_v49  ;;  %v1890_v55 = vpop.xlane.xlu0 %1889  ;;  %9827 = vmatprep.mubr.msk.bf16.mxu0 %vm11466_vm0, %v14472_v5 }
 0x502   : > { %10750 = vrcp.f32 %v1890_v55  ;;  %9837 = vmatprep.subr.bf16.mxu0 %v14472_v5 }
 0x503   : > { %v10745_v54 = vpop.eup %10744 }
 0x504   : > { %v10747_v60 = vpop.eup %10746  ;;  %v1909_v47 = vmul.f32 %v10745_v54, %v12299_v20 }
 0x505   : > { %v1910_v19 = vmul.f32 %v10747_v60, %v12301_v56 }
 0x506   : > { %v1917_v25 = vpack.c.bf16 %v1909_v47, %v1909_v47 }
 0x507   : > { %v1918_v22 = vpack.c.bf16 %v1910_v19, %v1910_v19 }
 0x508   : > { %9822 = vmatmul.mubr.msk.bf16.vlgmr.msra.gmra.mrb[28].mxu1 %vm1827_vm4, %v1917_v25  ;;  %v1893_v6 = vpop.xlane.xlu1 %1892 }
 0x509   : > { %9832 = vmatpush3.bf16.msra.mxu1 %v2067_v44  ;;  %10752 = vrcp.f32 %v1893_v6  ;;  %9828 = vmatmul.mubr.msk.bf16.vlgmr.msra.gmra.mrb[32].mxu0 %vm1827_vm4, %v1918_v22  ;;  %v1896_v20 = vpop.xlane.xlu0 %1895 }
 0x50a   : > { %9838 = vmatpush3.bf16.msra.mxu0 %v2113_v63  ;;  %10754 = vrcp.f32 %v1896_v20  ;;  %9833 = vmatprep.mubr.msk.bf16.mxu1 %vm11466_vm0, %v14472_v5 }
 0x50b   : > { %v10749_v43 = vpop.eup %10748  ;;  %9839 = vmatprep.mubr.msk.bf16.mxu0 %vm11466_vm0, %v14472_v5  ;;  %9843 = vmatprep.subr.bf16.mxu1 %v14472_v5 }
 0x50c   : > { %v10751_v56 = vpop.eup %10750  ;;  %9849 = vmatprep.subr.bf16.mxu0 %v14472_v5  ;;  %v1911_v0 = vmul.f32 %v10749_v43, %v12307_v21 }
 0x50d   : > { %v1912_v27 = vmul.f32 %v10751_v56, %v12309_v29  ;;  %v2300_v40 = vpop.permute.xlu0 %2299  ;;  %v12416_v29 = vpack.c.bf16 %v12170_v48, %v12170_v48 }
 0x50e   : > { %v1919_v16 = vpack.c.bf16 %v1911_v0, %v1911_v0  ;;  %v2305_v48 = vsel %vm1458_vm1, %v2300_v40, 0 }
 0x50f   : > { %v1920_v35 = vpack.c.bf16 %v1912_v27, %v1912_v27  ;;  %v2251_v8 = vsel %vm1927_vm2, %v12416_v29, 0 }
 0x510   : > { %9834 = vmatmul.mubr.msk.bf16.vlgmr.msra.gmra.mrb[32].mxu1 %vm1827_vm4, %v1919_v16 }
 0x511   : > { %9844 = vmatpush3.bf16.msra.mxu1 %v2159_v39  ;;  %9840 = vmatmul.mubr.msk.bf16.vlgmr.msra.gmra.mrb[36].mxu0 %vm1827_vm4, %v1920_v35  ;;  %v2400_v3 = vpop.permute.xlu0 %2399 }
 0x512   : > { %9850 = vmatpush3.bf16.msra.mxu0 %v2205_v61  ;;  %9845 = vmatprep.mubr.msk.bf16.mxu1 %vm11466_vm0, %v14472_v5  ;;  %v2405_v38 = vsel %vm1458_vm1, %v2400_v3, 0 }
 0x513   : > { %v10753_v31 = vpop.eup %10752  ;;  %9851 = vmatprep.mubr.msk.bf16.mxu0 %vm11466_vm0, %v14472_v5  ;;  %9855 = vmatprep.subr.bf16.mxu1 %v14472_v5 }
 0x514   : > { %v10755_v21 = vpop.eup %10754  ;;  %v1913_v34 = vmul.f32 %v10753_v31, %v12315_v26  ;;  %9861 = vmatprep.subr.bf16.mxu0 %v14472_v5  ;;  %v2350_v26 = vpop.permute.xlu1 %2349 }
 0x515   : > { %v1914_v58 = vmul.f32 %v10755_v21, %v12317_v42  ;;  %v2398_v42 = vpop.permute.xlu0 %2397  ;;  %v2355_v20 = vsel %vm1458_vm1, %v2350_v26, 0 }
 0x516   : > { %v1921_v2 = vpack.c.bf16 %v1913_v34, %v1913_v34 }
 0x517   : > { %v1922_v18 = vpack.c.bf16 %v1914_v58, %v1914_v58 }
 0x518   : > { %9846 = vmatmul.mubr.msk.bf16.vlgmr.msra.gmra.mrb[36].mxu1 %vm1827_vm4, %v1921_v2  ;;  %v2298_v23 = vpop.permute.xlu1 %2297 }
 0x519   : > { %9852 = vmatmul.mubr.msk.bf16.vlgmr.msra.gmra.mrb[40].mxu0 %vm1827_vm4, %v1922_v18  ;;  %9856 = vmatpush3.bf16.msra.mxu1 %v2251_v8  ;;  %v2500_v49 = vpop.permute.xlu0 %2499 }
 0x51a   : > { %9863 = vmatprep.mubr.msk.bf16.mxu0 %vm11466_vm0, %v14472_v5  ;;  %9857 = vmatprep.mubr.msk.bf16.mxu1 %vm11466_vm0, %v14472_v5  ;;  %v2505_v55 = vsel %vm1458_vm1, %v2500_v49, 0 }
 0x51b   : > { %9862 = vmatpush3.bf16.xpose.msra.mxu0 %v2305_v48  ;;  %9867 = vmatprep.subr.bf16.mxu1 %v14472_v5 }
 0x51c   : > { %9873 = vmatprep.subr.bf16.mxu0 %v14472_v5 }
 0x51d   : > { %v2498_v51 = vpop.permute.xlu0 %2497 }
 0x521   : > { %v2600_v54 = vpop.permute.xlu0 %2599 }
 0x522   : > { %9864 = vmatmul.mubr.msk.bf16.vlgmr.msra.gmra.mrb[44].mxu0 %vm1458_vm1, %v2298_v23  ;;  %v2605_v60 = vsel %vm1458_vm1, %v2600_v54, 0 }
 0x523   : > { %9874 = vmatpush3.bf16.xpose.msra.mxu0 %v2405_v38  ;;  %9875 = vmatprep.mubr.msk.bf16.mxu0 %vm11466_vm0, %v14472_v5 }
 0x524   : > { %9885 = vmatprep.subr.bf16.mxu0 %v14472_v5 }
 0x525   : > { %v2598_v47 = vpop.permute.xlu0 %2597 }
 0x52a   : > { %9876 = vmatmul.mubr.msk.bf16.vlgmr.msra.gmra.mrb[48].mxu0 %vm1458_vm1, %v2398_v42 }
 0x52b   : > { %9886 = vmatpush3.bf16.xpose.msra.mxu0 %v2505_v55  ;;  %9887 = vmatprep.mubr.msk.bf16.mxu0 %vm11466_vm0, %v14472_v5 }
 0x52c   : > { %9897 = vmatprep.subr.bf16.mxu0 %v14472_v5 }
 0x532   : > { %9888 = vmatmul.mubr.msk.bf16.vlgmr.msra.gmra.mrb[52].mxu0 %vm1458_vm1, %v2498_v51 }
 0x533   : > { %9898 = vmatpush3.bf16.xpose.msra.mxu0 %v2605_v60  ;;  %9899 = vmatprep.mubr.msk.bf16.mxu0 %vm11466_vm0, %v14472_v5 }
 0x534   : > { %9909 = vmatprep.subr.bf16.mxu0 %v14472_v5 }
 0x53a   : > { %9900 = vmatmul.mubr.msk.bf16.vlgmr.msra.gmra.mrb[56].mxu0 %vm1458_vm1, %v2598_v47 }
 0x53b   : > { %9911 = vmatprep.mubr.msk.bf16.mxu0 %vm11466_vm0, %v14472_v5 }
 0x541   : > { %v1899_v19 = vpop.xlane.xlu1 %1898 }
 0x542   : > { %10756 = vrcp.f32 %v1899_v19 }
 0x545   : > { %v2348_v25 = vpop.permute.xlu1 %2347 }
 0x549   : > { %v2450_v6 = vpop.permute.xlu1 %2449 }
 0x54a   : > { %v2455_v56 = vsel %vm1458_vm1, %v2450_v6, 0 }
 0x54c   : > { %v10757_v22 = vpop.eup %10756 }
 0x54d   : > { %v1915_v44 = vmul.f32 %v10757_v22, %v12342_v46  ;;  %v2448_v43 = vpop.permute.xlu1 %2447 }
 0x54f   : > { %v1923_v63 = vpack.c.bf16 %v1915_v44, %v1915_v44 }
 0x551   : > { %9858 = vmatmul.mubr.msk.bf16.vlgmr.msra.gmra.mrb[40].mxu1 %vm1827_vm4, %v1923_v63  ;;  %v2550_v0 = vpop.permute.xlu1 %2549 }
 0x552   : > { %9868 = vmatpush3.bf16.xpose.msra.mxu1 %v2355_v20  ;;  %9869 = vmatprep.mubr.msk.bf16.mxu1 %vm11466_vm0, %v14472_v5  ;;  %v2555_v27 = vsel %vm1458_vm1, %v2550_v0, 0 }
 0x553   : > { %9879 = vmatprep.subr.bf16.mxu1 %v14472_v5 }
 0x555   : > { %v2548_v46 = vpop.permute.xlu1 %2547 }
 0x559   : > { %9870 = vmatmul.mubr.msk.bf16.vlgmr.msra.gmra.mrb[44].mxu1 %vm1458_vm1, %v2348_v25  ;;  %v2650_v16 = vpop.permute.xlu1 %2649 }
 0x55a   : > { %9880 = vmatpush3.bf16.xpose.msra.mxu1 %v2455_v56  ;;  %9881 = vmatprep.mubr.msk.bf16.mxu1 %vm11466_vm0, %v14472_v5  ;;  %v2655_v35 = vsel %vm1458_vm1, %v2650_v16, 0 }
 0x55b   : > { %9891 = vmatprep.subr.bf16.mxu1 %v14472_v5 }
 0x55d   : > { %v2648_v39 = vpop.permute.xlu1 %2647 }
 0x561   : > { %9882 = vmatmul.mubr.msk.bf16.vlgmr.msra.gmra.mrb[48].mxu1 %vm1458_vm1, %v2448_v43 }
 0x562   : > { %9892 = vmatpush3.bf16.xpose.msra.mxu1 %v2555_v27  ;;  %9893 = vmatprep.mubr.msk.bf16.mxu1 %vm11466_vm0, %v14472_v5 }
 0x563   : > { %9903 = vmatprep.subr.bf16.mxu1 %v14472_v5 }
 0x569   : > { %9894 = vmatmul.mubr.msk.bf16.vlgmr.msra.gmra.mrb[52].mxu1 %vm1458_vm1, %v2548_v46 }
 0x56a   : > { %9904 = vmatpush3.bf16.xpose.msra.mxu1 %v2655_v35  ;;  %9905 = vmatprep.mubr.msk.bf16.mxu1 %vm11466_vm0, %v14472_v5 }
 0x56b   : > { %9915 = vmatprep.subr.bf16.mxu1 %v14472_v5 }
 0x571   : > { %9906 = vmatmul.mubr.msk.bf16.vlgmr.msra.gmra.mrb[56].mxu1 %vm1458_vm1, %v2648_v39 }
 0x572   : > { %9917 = vmatprep.mubr.msk.bf16.mxu1 %vm11466_vm0, %v14472_v5 }
 0x5d3   : > { %v12474_v61 = vpop.f32.mrb[28].mxu0 }
 0x5d4   : > { %v9817_v40 = vpop.f32.mrb[29].mxu0 }
 0x5d5   : > { %v1968_v31 = vpop.f32.mrb[30].mxu0 }
 0x5d6   : > { %v9818_v21 = vpop.f32.mrb[31].mxu0 }
 0x5db   : > { %v12476_v34 = vpop.f32.mrb[28].mxu1 }
 0x5dc   : > { %v2293_v58 = vpack.c.bf16 %v12476_v34, %v12474_v61  ;;  %v12480_v2 = vpop.f32.mrb[32].mxu0  ;;  %v9823_v3 = vpop.f32.mrb[29].mxu1  ;;  %v14473_v61 = vmov 0  }
 0x5dd   : > { %v9829_v18 = vpop.f32.mrb[33].mxu0  ;;  %v2014_v8 = vpop.f32.mrb[30].mxu1 }
 0x5de   : > { %v2060_v48 = vpop.f32.mrb[34].mxu0  ;;  %v9824_v26 = vpop.f32.mrb[31].mxu1 }
 0x5df   : > { %v9830_v42 = vpop.f32.mrb[35].mxu0 }
 0x5e3   : > { %v12482_v23 = vpop.f32.mrb[32].mxu1 }
 0x5e4   : > { %v2294_v38 = vpack.c.bf16 %v12482_v23, %v12480_v2  ;;  %v12486_v49 = vpop.f32.mrb[36].mxu0  ;;  %v9835_v51 = vpop.f32.mrb[33].mxu1 }
 0x5e5   : > { %v9841_v55 = vpop.f32.mrb[37].mxu0  ;;  %v2106_v54 = vpop.f32.mrb[34].mxu1 }
 0x5e6   : > { %v2152_v60 = vpop.f32.mrb[38].mxu0  ;;  %v9836_v47 = vpop.f32.mrb[35].mxu1 }
 0x5e7   : > { %v9842_v19 = vpop.f32.mrb[39].mxu0 }
 0x5eb   : > { %v12488_v25 = vpop.f32.mrb[36].mxu1 }
 0x5ec   : > { %v2295_v22 = vpack.c.bf16 %v12488_v25, %v12486_v49  ;;  %v12492_v44 = vpop.f32.mrb[40].mxu0  ;;  %v9847_v6 = vpop.f32.mrb[37].mxu1 }
 0x5ed   : > { %v9853_v63 = vpop.f32.mrb[41].mxu0  ;;  %v2198_v20 = vpop.f32.mrb[38].mxu1 }
 0x5ee   : > { %v2244_v43 = vpop.f32.mrb[42].mxu0  ;;  %v9848_v56 = vpop.f32.mrb[39].mxu1 }
 0x5ef   : > { %v9854_v0 = vpop.f32.mrb[43].mxu0 }
 0x5f5   : > { %v2341_v46 = vpop.f32.mrb[44].mxu0 }
 0x5f6   : > { %v12495_v27 = vadd.f32 %v2341_v46, %v12241_v32  ;;  %v9865_v16 = vpop.f32.mrb[45].mxu0 }
 0x5f7   : > { %v2344_v35 = vpop.f32.mrb[46].mxu0 }
 0x5f8   : > { %v9866_v39 = vpop.f32.mrb[47].mxu0  ;;  %v2697_v40 = vsel %vm1827_vm4, %v12495_v27, -inf }
 0x5f9   : > { %2698 = vmax.xlane.f32.xlu0 %v2697_v40 }
 0x5fd   : > { %v2441_v31 = vpop.f32.mrb[48].mxu0 }
 0x5fe   : > { %v2442_v21 = vadd.f32 %v2441_v31, %v12252_v36  ;;  %v9877_v3 = vpop.f32.mrb[49].mxu0 }
 0x5ff   : > { %v2444_v18 = vpop.f32.mrb[50].mxu0 }
 0x600   : > { %v9878_v8 = vpop.f32.mrb[51].mxu0  ;;  %v2703_v48 = vsel %vm1827_vm4, %v2442_v21, -inf }
 0x601   : > { %2704 = vmax.xlane.f32.xlu0 %v2703_v48 }
 0x605   : > { %v2541_v26 = vpop.f32.mrb[52].mxu0 }
 0x606   : > { %v9889_v42 = vpop.f32.mrb[53].mxu0  ;;  %v2542_v48 = vadd.f32 %v2541_v26, %v12268_v59 }
 0x607   : > { %v2544_v51 = vpop.f32.mrb[54].mxu0 }
 0x608   : > { %v9890_v55 = vpop.f32.mrb[55].mxu0 }
 0x60d   : > { %v2641_v54 = vpop.f32.mrb[56].mxu0 }
 0x60e   : > { %v9901_v60 = vpop.f32.mrb[57].mxu0  ;;  %v12514_v55 = vadd.f32 %v2641_v54, %v12278_v62 }
 0x60f   : > { %v2644_v47 = vpop.f32.mrb[58].mxu0  ;;  %v2709_v60 = vsel %vm1827_vm4, %v2542_v48, -inf }
 0x610   : > { %v9902_v19 = vpop.f32.mrb[59].mxu0 }
 0x624   : > { %v12501_v6 = vpop.f32.mrb[40].mxu1 }
 0x625   : > { %v2296_v63 = vpack.c.bf16 %v12501_v6, %v12492_v44  ;;  %v9859_v20 = vpop.f32.mrb[41].mxu1 }
 0x626   : > { %v2290_v43 = vpop.f32.mrb[42].mxu1 }
 0x627   : > { %v9860_v56 = vpop.f32.mrb[43].mxu1 }
 0x62c   : > { %v2391_v0 = vpop.f32.mrb[44].mxu1 }
 0x62d   : > { %v2392_v46 = vadd.f32 %v2391_v0, %v12249_v7  ;;  %v9871_v16 = vpop.f32.mrb[45].mxu1  ;;  %v2715_v0 = vsel %vm1827_vm4, %v12514_v55, -inf }
 0x62e   : > { %v2394_v35 = vpop.f32.mrb[46].mxu1 }
 0x62f   : > { %v9872_v39 = vpop.f32.mrb[47].mxu1  ;;  %v2700_v40 = vsel %vm1827_vm4, %v2392_v46, -inf }
 0x630   : > { %2701 = vmax.xlane.f32.xlu1 %v2700_v40 }
 0x634   : > { %v2491_v31 = vpop.f32.mrb[48].mxu1 }
 0x635   : > { %v12508_v3 = vadd.f32 %v2491_v31, %v12265_v50  ;;  %v9883_v18 = vpop.f32.mrb[49].mxu1 }
 0x636   : > { %v2494_v8 = vpop.f32.mrb[50].mxu1 }
 0x637   : > { %v9884_v42 = vpop.f32.mrb[51].mxu1  ;;  %v2706_v51 = vsel %vm1827_vm4, %v12508_v3, -inf }
 0x638   : > { %2707 = vmax.xlane.f32.xlu0 %v2706_v51 }
 0x63c   : > { %v2591_v47 = vpop.f32.mrb[52].mxu1  ;;  %2710 = vmax.xlane.f32.xlu0 %v2709_v60 }
 0x63d   : > { %v12518_v19 = vadd.f32 %v2591_v47, %v12275_v14  ;;  %v9895_v20 = vpop.f32.mrb[53].mxu1 }
 0x63e   : > { %v2594_v43 = vpop.f32.mrb[54].mxu1 }
 0x63f   : > { %v9896_v56 = vpop.f32.mrb[55].mxu1  ;;  %v2712_v26 = vsel %vm1827_vm4, %v12518_v19, -inf }
 0x640   : > { %2713 = vmax.xlane.f32.xlu1 %v2712_v26  ;;  %2716 = vmax.xlane.f32.xlu0 %v2715_v0 }
 0x644   : > { %v2691_v54 = vpop.f32.mrb[56].mxu1 }
 0x645   : > { %v9907_v16 = vpop.f32.mrb[57].mxu1  ;;  %v2692_v40 = vadd.f32 %v2691_v54, %v12285_v28 }
 0x646   : > { %v2694_v35 = vpop.f32.mrb[58].mxu1 }
 0x647   : > { %v9908_v39 = vpop.f32.mrb[59].mxu1  ;;  %v2718_v31 = vsel %vm1827_vm4, %v2692_v40, -inf }
 0x651   : > { %2841 = vrot.lane.b32.xlu1 %v12222_v45, %s11468_s29 }
 0x656   : > { %2793 = vrot.lane.b32.xlu0 %v12199_v57, %s11468_s29 }
 0x675   : > { %2719 = vmax.xlane.f32.xlu1 %v2718_v31 }
 0x686   : > { %v2699_v18 = vpop.xlane.xlu0 %2698 }
 0x687   : > { %v2721_v8 = vsub.f32 %v12495_v27, %v2699_v18 }
 0x689   : > { %v2729_v42 = vmul.f32 1.442695, %v2721_v8 }
 0x68b   : > { %10758 = vpow2.f32 %v2729_v42 }
 0x68e   : > { %v2705_v51 = vpop.xlane.xlu0 %2704 }
 0x68f   : > { %v2723_v60 = vsub.f32 %v2442_v21, %v2705_v51 }
 0x691   : > { %v2733_v47 = vmul.f32 1.442695, %v2723_v60 }
 0x693   : > { %10760 = vpow2.f32 %v2733_v47 }
 0x695   : > { %v10759_v20 = vpop.eup %10758 }
 0x696   : > { %v2745_v45 = vsel %vm1827_vm4, %v10759_v20, 0.0 }
 0x697   : > { %2746 = vadd.xlane.f32.xlu0 %v2745_v45 }
 0x69d   : > { %v12532_v43 = vpop.eup %10760 }
 0x69e   : > { %v2751_v57 = vsel %vm1827_vm4, %v12532_v43, 0.0 }
 0x69f   : > { %2752 = vadd.xlane.f32.xlu0 %v2751_v57 }
 0x6b5   : > { %2889 = vrot.lane.b32.xlu0 %v12362_v13, %s11468_s29 }
 0x6bd   : > { %v2702_v27 = vpop.xlane.xlu1 %2701 }
 0x6be   : > { %v2722_v56 = vsub.f32 %v2392_v46, %v2702_v27 }
 0x6c0   : > { %v2731_v26 = vmul.f32 1.442695, %v2722_v56 }
 0x6c2   : > { %10762 = vpow2.f32 %v2731_v26 }
 0x6c5   : > { %v2708_v21 = vpop.xlane.xlu0 %2707 }
 0x6c6   : > { %v2724_v60 = vsub.f32 %v12508_v3, %v2708_v21 }
 0x6c8   : > { %v2735_v47 = vmul.f32 1.442695, %v2724_v60 }
 0x6c9   : > { %v2711_v0 = vpop.xlane.xlu0 %2710 }
 0x6ca   : > { %v2725_v54 = vsub.f32 %v2542_v48, %v2711_v0 }
 0x6cc   : > { %v12538_v16 = vpop.eup %10762  ;;  %v2737_v35 = vmul.f32 1.442695, %v2725_v54 }
 0x6cd   : > { %v2714_v39 = vpop.xlane.xlu1 %2713  ;;  %v2717_v31 = vpop.xlane.xlu0 %2716  ;;  %v2748_v18 = vsel %vm1827_vm4, %v12538_v16, 0.0 }
 0x6ce   : > { %10764 = vpow2.f32 %v2737_v35  ;;  %2749 = vadd.xlane.f32.xlu1 %v2748_v18  ;;  %v2726_v3 = vsub.f32 %v12518_v19, %v2714_v39  ;;  %v2727_v21 = vsub.f32 %v12514_v55, %v2717_v31 }
 0x6cf   : > { %10766 = vpow2.f32 %v2735_v47 }
 0x6d0   : > { %v2741_v35 = vmul.f32 1.442695, %v2727_v21 }
 0x6d1   : > { %v2842_v8 = vpop.permute.xlu1 %2841  ;;  %v2794_v42 = vpop.permute.xlu0 %2793 }
 0x6d2   : > { %v2847_v13 = vsel %vm1927_vm2, %v2842_v8, 0  ;;  %v2799_v46 = vsel %vm1927_vm2, %v2794_v42, 0 }
 0x6d3   : > { %9910 = vmatpush3.bf16.msra.mxu0 %v2799_v46  ;;  %9916 = vmatpush3.bf16.msra.mxu1 %v2847_v13 }
 0x6d4   : > { %9921 = vmatprep.subr.bf16.mxu0 %v14472_v5  ;;  %9927 = vmatprep.subr.bf16.mxu1 %v14472_v5 }
 0x6d8   : > { %v12546_v48 = vpop.eup %10764 }
 0x6d9   : > { %v2757_v51 = vsel %vm1827_vm4, %v12546_v48, 0.0  ;;  %v12555_v57 = vpop.eup %10766 }
 0x6da   : > { %2758 = vadd.xlane.f32.xlu0 %v2757_v51  ;;  %v2754_v26 = vsel %vm1827_vm4, %v12555_v57, 0.0 }
 0x6df   : > { %2937 = vrot.lane.b32.xlu1 %v12373_v12, %s11468_s29 }
 0x6e3   : > { %2985 = vrot.lane.b32.xlu1 %v12378_v4, %s11468_s29 }
 0x702   : > { %v2720_v45 = vpop.xlane.xlu1 %2719 }
 0x703   : > { %v2728_v27 = vsub.f32 %v2692_v40, %v2720_v45  ;;  %v2739_v40 = vmul.f32 1.442695, %v2726_v3 }
 0x705   : > { %v2743_v56 = vmul.f32 1.442695, %v2728_v27 }
 0x707   : > { %10768 = vpow2.f32 %v2743_v56  ;;  %2755 = vadd.xlane.f32.xlu1 %v2754_v26 }
 0x711   : > { %v12559_v0 = vpop.eup %10768 }
 0x712   : > { %v2766_v12 = vsel %vm1827_vm4, %v12559_v0, 0.0 }
 0x713   : > { %2767 = vadd.xlane.f32.xlu0 %v2766_v12 }
 0x718   : > { %3033 = vrot.lane.b32.xlu1 %v12394_v15, %s11468_s29 }
 0x724   : > { %v2747_v4 = vpop.xlane.xlu0 %2746 }
 0x725   : > { %10770 = vrcp.f32 %v2747_v4 }
 0x729   : > { %3081 = vrot.lane.b32.xlu0 %v12400_v1, %s11468_s29 }
 0x72c   : > { %v2753_v54 = vpop.xlane.xlu0 %2752 }
 0x72d   : > { %10772 = vrcp.f32 %v2753_v54 }
 0x72e   : > { %10774 = vpow2.f32 %v2739_v40 }
 0x72f   : > { %v10771_v18 = vpop.eup %10770  ;;  %10776 = vpow2.f32 %v2741_v35 }
 0x730   : > { %v2777_v8 = vmul.f32 %v10771_v18, %v10759_v20  ;;  %v2890_v42 = vpop.permute.xlu0 %2889 }
 0x731   : > { %v2895_v15 = vsel %vm1927_vm2, %v2890_v42, 0 }
 0x732   : > { %v2785_v13 = vpack.c.bf16 %v2777_v8, %v2777_v8  ;;  %v10486_v8 = vld [vmem:[#allocation10] sm:$0xff]  }
 0x734   : > { %9912 = vmatmul.mubr.msk.bf16.vlgmr.msra.gmra.mrb[60].mxu0 %vm1827_vm4, %v2785_v13 }
 0x735   : > { %9922 = vmatpush3.bf16.msra.mxu0 %v2895_v15  ;;  %9923 = vmatprep.mubr.msk.bf16.mxu0 %vm11466_vm0, %v14472_v5 }
 0x736   : > { %9933 = vmatprep.subr.bf16.mxu0 %v14472_v5 }
 0x737   : > { %v10773_v1 = vpop.eup %10772 }
 0x738   : > { %v10775_v55 = vpop.eup %10774  ;;  %v2779_v19 = vmul.f32 %v10773_v1, %v12532_v43 }
 0x739   : > { %v2760_v20 = vsel %vm1827_vm4, %v10775_v55, 0.0  ;;  %v10777_v31 = vpop.eup %10776 }
 0x73a   : > { %v2787_v39 = vpack.c.bf16 %v2779_v19, %v2779_v19  ;;  %v2763_v46 = vsel %vm1827_vm4, %v10777_v31, 0.0 }
 0x73c   : > { %9924 = vmatmul.mubr.msk.bf16.vlgmr.msra.gmra.mrb[64].mxu0 %vm1827_vm4, %v2787_v39  ;;  %2761 = vadd.xlane.f32.xlu1 %v2760_v20 }
 0x73d   : > { %9935 = vmatprep.mubr.msk.bf16.mxu0 %vm11466_vm0, %v14472_v5 }
 0x740   : > { %2764 = vadd.xlane.f32.xlu1 %v2763_v46 }
 0x751   : > { %3129 = vrot.lane.b32.xlu1 %v12416_v29, %s11468_s29 }
 0x75b   : > { %v2750_v51 = vpop.xlane.xlu1 %2749 }
 0x75c   : > { %10778 = vrcp.f32 %v2750_v51  ;;  %v10490_v51 = vld [vmem:[#allocation10 + $0x20] sm:$0xff]  }
 0x75f   : > { %v2938_v60 = vpop.permute.xlu1 %2937 }
 0x760   : > { %v2943_v12 = vsel %vm1927_vm2, %v2938_v60, 0 }
 0x763   : > { %v2986_v43 = vpop.permute.xlu1 %2985 }
 0x764   : > { %v2991_v47 = vsel %vm1927_vm2, %v2986_v43, 0 }
 0x765   : > { %9934 = vmatpush3.bf16.msra.mxu0 %v2991_v47 }
 0x766   : > { %v10779_v45 = vpop.eup %10778  ;;  %9945 = vmatprep.subr.bf16.mxu0 %v14472_v5 }
 0x767   : > { %v2759_v27 = vpop.xlane.xlu0 %2758  ;;  %v2778_v56 = vmul.f32 %v10779_v45, %v12538_v16 }
 0x768   : > { %10780 = vrcp.f32 %v2759_v27  ;;  %v10487_v27 = vld [vmem:[#allocation10 + $0x8] sm:$0xff]  }
 0x769   : > { %v2786_v26 = vpack.c.bf16 %v2778_v56, %v2778_v56 }
 0x76b   : > { %9918 = vmatmul.mubr.msk.bf16.vlgmr.msra.gmra.mrb[60].mxu1 %vm1827_vm4, %v2786_v26  ;;  %v10491_v26 = vld [vmem:[#allocation10 + $0x28] sm:$0xff]  }
 0x76c   : > { %9928 = vmatpush3.bf16.msra.mxu1 %v2943_v12  ;;  %9929 = vmatprep.mubr.msk.bf16.mxu1 %vm11466_vm0, %v14472_v5  ;;  %v10489_v12 = vld [vmem:[#allocation10 + $0x18] sm:$0xff]  }
 0x76d   : > { %9939 = vmatprep.subr.bf16.mxu1 %v14472_v5 }
 0x772   : > { %v10781_v29 = vpop.eup %10780 }
 0x773   : > { %v2781_v4 = vmul.f32 %v10781_v29, %v12546_v48  ;;  %v10493_v29 = vld [vmem:[#allocation10 + $0x38] sm:$0xff]  }
 0x775   : > { %v2789_v3 = vpack.c.bf16 %v2781_v4, %v2781_v4 }
 0x777   : > { %9936 = vmatmul.mubr.msk.bf16.vlgmr.msra.gmra.mrb[68].mxu0 %vm1827_vm4, %v2789_v3 }
 0x778   : > { %9947 = vmatprep.mubr.msk.bf16.mxu0 %vm11466_vm0, %v14472_v5 }
 0x794   : > { %v2756_v16 = vpop.xlane.xlu1 %2755 }
 0x795   : > { %10782 = vrcp.f32 %v2756_v16 }
 0x798   : > { %v3034_v35 = vpop.permute.xlu1 %3033 }
 0x799   : > { %v3039_v42 = vsel %vm1927_vm2, %v3034_v35, 0 }
 0x79f   : > { %v10783_v40 = vpop.eup %10782 }
 0x7a0   : > { %v2768_v21 = vpop.xlane.xlu0 %2767  ;;  %v2780_v54 = vmul.f32 %v10783_v40, %v12555_v57 }
 0x7a2   : > { %v2788_v18 = vpack.c.bf16 %v2780_v54, %v2780_v54 }
 0x7a4   : > { %9930 = vmatmul.mubr.msk.bf16.vlgmr.msra.gmra.mrb[64].mxu1 %vm1827_vm4, %v2788_v18  ;;  %v3082_v48 = vpop.permute.xlu0 %3081 }
 0x7a5   : > { %9940 = vmatpush3.bf16.msra.mxu1 %v3039_v42  ;;  %v3087_v13 = vsel %vm1927_vm2, %v3082_v48, 0  ;;  %9941 = vmatprep.mubr.msk.bf16.mxu1 %vm11466_vm0, %v14472_v5 }
 0x7a6   : > { %9946 = vmatpush3.bf16.msra.mxu0 %v3087_v13  ;;  %9951 = vmatprep.subr.bf16.mxu1 %v14472_v5 }
 0x7a7   : > { %9973 = vmatprep.subr.bf16.mxu0 %v10486_v8 }
 0x7c9   : > { %v2762_v15 = vpop.xlane.xlu1 %2761 }
 0x7ca   : > { %10784 = vrcp.f32 %v2762_v15 }
 0x7cb   : > { %10786 = vrcp.f32 %v2768_v21 }
 0x7cd   : > { %v2765_v57 = vpop.xlane.xlu1 %2764 }
 0x7ce   : > { %10788 = vrcp.f32 %v2765_v57 }
 0x7d1   : > { %v3130_v39 = vpop.permute.xlu1 %3129 }
 0x7d2   : > { %v3135_v43 = vsel %vm1927_vm2, %v3130_v39, 0 }
 0x7d4   : > { %v10785_v1 = vpop.eup %10784 }
 0x7d5   : > { %v2782_v19 = vmul.f32 %v10785_v1, %v10775_v55  ;;  %v10787_v20 = vpop.eup %10786 }
 0x7d6   : > { %v2784_v56 = vmul.f32 %v10787_v20, %v12559_v0  ;;  %v10492_v0 = vld [vmem:[#allocation10 + $0x30] sm:$0xff]  }
 0x7d7   : > { %v2790_v46 = vpack.c.bf16 %v2782_v19, %v2782_v19 }
 0x7d8   : > { %v10789_v60 = vpop.eup %10788  ;;  %v2792_v55 = vpack.c.bf16 %v2784_v56, %v2784_v56 }
 0x7d9   : > { %9942 = vmatmul.mubr.msk.bf16.vlgmr.msra.gmra.mrb[68].mxu1 %vm1827_vm4, %v2790_v46  ;;  %v2783_v47 = vmul.f32 %v10789_v60, %v10777_v31  ;;  %v10488_v31 = vld [vmem:[#allocation10 + $0x10] sm:$0xff]  }
 0x7da   : > { %9952 = vmatpush3.bf16.msra.mxu1 %v3135_v43  ;;  %9953 = vmatprep.mubr.msk.bf16.mxu1 %vm11466_vm0, %v14472_v5 }
 0x7db   : > { %v2791_v45 = vpack.c.bf16 %v2783_v47, %v2783_v47  ;;  %9957 = vmatprep.subr.bf16.mxu1 %v10490_v51 }
 0x7dd   : > { %9948 = vmatmul.mubr.msk.bf16.vlgmr.msra.gmra.mrb[72].mxu0 %vm1827_vm4, %v2791_v45 }
 0x7de   : > { %9974 = vmatpush3.bf16.msra.mxu0 %v10486_v8  ;;  %9981 = vmatprep.mubr.msk.bf16.mxu0 %vm1458_vm1, %v2293_v58 }
 0x7df   : > { %9975 = vmatprep.subr.bf16.mxu0 %v10487_v27 }
 0x7e1   : > { %9954 = vmatmul.mubr.msk.bf16.vlgmr.msra.gmra.mrb[72].mxu1 %vm1827_vm4, %v2792_v55 }
 0x7e2   : > { %9976 = vmatpush3.bf16.msra.mxu0 %v10487_v27  ;;  %9958 = vmatpush3.bf16.msra.mxu1 %v10490_v51 }
 0x7e3   : > { %9977 = vmatprep.subr.bf16.mxu0 %v10488_v31  ;;  %9959 = vmatprep.subr.bf16.mxu1 %v10491_v26 }
 0x7e6   : > { %9978 = vmatpush3.bf16.msra.mxu0 %v10488_v31  ;;  %9960 = vmatpush3.bf16.msra.mxu1 %v10491_v26 }
 0x7e7   : > { %9979 = vmatprep.subr.bf16.mxu0 %v10489_v12  ;;  %9961 = vmatprep.subr.bf16.mxu1 %v10492_v0 }
 0x7ea   : > { %9980 = vmatpush3.bf16.msra.mxu0 %v10489_v12  ;;  %9962 = vmatpush3.bf16.msra.mxu1 %v10492_v0 }
 0x7eb   : > { %9963 = vmatprep.subr.bf16.mxu1 %v10493_v29 }
 0x7ed   : > { %9982 = vmatmul.mubr.msk.bf16.vlgmr.msra.gmra.mrb[76].mxu0 %vm1458_vm1, %v2294_v38 }
 0x7ee   : > { %9985 = vmatprep.mubr.msk.bf16.mxu0 %vm1458_vm1, %v2295_v22  ;;  %9964 = vmatpush3.bf16.msra.mxu1 %v10493_v29 }
 0x7f5   : > { %9986 = vmatmul.mubr.msk.bf16.gmra.mrb[80].mxu0 %vm1458_vm1, %v2296_v63 }
 0x7f6   : > { %3871 = vmatprep.mubr.bf16.mxu0 %v14473_v61 }
 0x807   : > { %v2835_v34 = vpop.f32.mrb[60].mxu0 }
 0x808   : > { %v9913_v58 = vpop.f32.mrb[61].mxu0 }
 0x809   : > { %v2838_v4 = vpop.f32.mrb[62].mxu0 }
 0x80a   : > { %v9914_v3 = vpop.f32.mrb[63].mxu0 }
 0x80b   : > { %v12641_v3 = vld [vmem:[%s14351_s7] ss:$0 sm:$0xff] }
 0x80f   : > { %v2931_v2 = vpop.f32.mrb[64].mxu0 }
 0x810   : > { %v9925_v23 = vpop.f32.mrb[65].mxu0 }
 0x811   : > { %v2934_v38 = vpop.f32.mrb[66].mxu0 }
 0x812   : > { %v9926_v16 = vpop.f32.mrb[67].mxu0 }
 0x83e   : > { %v2883_v40 = vpop.f32.mrb[60].mxu1 }
 0x83f   : > { %v3177_v49 = vpack.c.bf16 %v2883_v40, %v2835_v34  ;;  %v9919_v25 = vpop.f32.mrb[61].mxu1 }
 0x840   : > { %v2886_v22 = vpop.f32.mrb[62].mxu1 }
 0x841   : > { %v9920_v21 = vpop.f32.mrb[63].mxu1  ;;  %9965 = vmatprep.mubr.msk.bf16.mxu1 %vm1458_vm1, %v3177_v49 }
 0x84a   : > { %v3027_v44 = vpop.f32.mrb[68].mxu0 }
 0x84b   : > { %v9937_v6 = vpop.f32.mrb[69].mxu0 }
 0x84c   : > { %v3030_v63 = vpop.f32.mrb[70].mxu0 }
 0x84d   : > { %v9938_v54 = vpop.f32.mrb[71].mxu0 }
 0x877   : > { %v2979_v35 = vpop.f32.mrb[64].mxu1 }
 0x878   : > { %v3178_v18 = vpack.c.bf16 %v2979_v35, %v2931_v2  ;;  %v9931_v8 = vpop.f32.mrb[65].mxu1 }
 0x879   : > { %v2982_v42 = vpop.f32.mrb[66].mxu1  ;;  %v10494_v8 = vld [vmem:[#allocation11] ss:$16 sps:$4 sm:$0xff]  }
 0x87a   : > { %v9932_v48 = vpop.f32.mrb[67].mxu1  ;;  %9966 = vmatmul.mubr.msk.bf16.vlgmr.msra.gmra.mrb[76].mxu1 %vm1458_vm1, %v3178_v18  ;;  %v10496_v42 = vld [vmem:[#allocation11 + $0x4] ss:$16 sps:$4 sm:$0xff]  }
 0x87b   : > { %v10497_v48 = vld [vmem:[#allocation11 + $0x8] ss:$16 sps:$4 sm:$0xff]   ;;  %3766 = vmatprep.subr.bf16.mxu1 %v10496_v42 }
 0x87c   : > { %3767 = vmatpush1.bf16.msra.mxu1 %v10494_v8 }
 0x8ac   : > { %v3075_v13 = vpop.f32.mrb[68].mxu1 }
 0x8ad   : > { %v3179_v15 = vpack.c.bf16 %v3075_v13, %v3027_v44  ;;  %v9943_v57 = vpop.f32.mrb[69].mxu1  ;;  %v10499_v13 = vld [vmem:[#allocation11 + $0xc] ss:$16 sps:$4 sm:$0xff]  }
 0x8ae   : > { %v3078_v1 = vpop.f32.mrb[70].mxu1  ;;  %3839 = vmatprep.subr.bf16.mxu0 %v10499_v13  ;;  %v10505_v57 = vld [vmem:[#allocation11 + $0x2c] ss:$16 sps:$4 sm:$0xff]  }
 0x8af   : > { %v9944_v19 = vpop.f32.mrb[71].mxu1  ;;  %9969 = vmatprep.mubr.msk.bf16.mxu1 %vm1458_vm1, %v3179_v15  ;;  %3840 = vmatpush1.bf16.msra.mxu0 %v10497_v48  ;;  %v10502_v15 = vld [vmem:[#allocation11 + $0x24] ss:$16 sps:$4 sm:$0xff]   ;;  %v10500_v1 = vld [vmem:[#allocation11 + $0x20] ss:$16 sps:$4 sm:$0xff]  }
 0x8b0   : > { %v3123_v39 = vpop.f32.mrb[72].mxu0  ;;  %v10503_v19 = vld [vmem:[#allocation11 + $0x28] ss:$16 sps:$4 sm:$0xff]   ;;  %3768 = vmatprep.subr.bf16.mxu1 %v10502_v15  ;;  %3841 = vmatprep.subr.bf16.mxu0 %v10505_v57 }
 0x8b1   : > { %v9949_v20 = vpop.f32.mrb[73].mxu0  ;;  %3769 = vmatpush1.bf16.msra.mxu1 %v10500_v1 }
 0x8b2   : > { %v3126_v46 = vpop.f32.mrb[74].mxu0  ;;  %v10506_v20 = vld [vmem:[#allocation11 + $0x40] ss:$16 sps:$4 sm:$0xff]  }
 0x8b3   : > { %v9950_v51 = vpop.f32.mrb[75].mxu0  ;;  %3842 = vmatpush1.bf16.msra.mxu0 %v10503_v19  ;;  %v10509_v46 = vld [vmem:[#allocation11 + $0x48] ss:$16 sps:$4 sm:$0xff]  }
 0x8b4   : > { %v3171_v60 = vpop.f32.mrb[72].mxu1  ;;  %v10514_v51 = vld [vmem:[#allocation11 + $0x64] ss:$16 sps:$4 sm:$0xff]  }
 0x8b5   : > { %v3180_v43 = vpack.c.bf16 %v3171_v60, %v3123_v39  ;;  %v9955_v47 = vpop.f32.mrb[73].mxu1  ;;  %v10511_v39 = vld [vmem:[#allocation11 + $0x4c] ss:$16 sps:$4 sm:$0xff]  }
 0x8b6   : > { %v3174_v45 = vpop.f32.mrb[74].mxu1  ;;  %3843 = vmatprep.subr.bf16.mxu0 %v10511_v39  ;;  %v10517_v60 = vld [vmem:[#allocation11 + $0x6c] ss:$16 sps:$4 sm:$0xff]   ;;  %v10515_v47 = vld [vmem:[#allocation11 + $0x68] ss:$16 sps:$4 sm:$0xff]  }
 0x8b7   : > { %v9956_v27 = vpop.f32.mrb[75].mxu1  ;;  %9970 = vmatmul.mubr.msk.bf16.gmra.mrb[80].mxu1 %vm1458_vm1, %v3180_v43  ;;  %3844 = vmatpush1.bf16.msra.mxu0 %v10509_v46  ;;  %v10512_v43 = vld [vmem:[#allocation11 + $0x60] ss:$16 sps:$4 sm:$0xff]   ;;  %v10520_v45 = vld [vmem:[#allocation11 + $0x84] ss:$16 sps:$4 sm:$0xff]  }
 0x8b8   : > { %3798 = vmatprep.mubr.bf16.mxu1 %v14473_v61  ;;  %3845 = vmatprep.subr.bf16.mxu0 %v10517_v60  ;;  %v10523_v27 = vld [vmem:[#allocation11 + $0x8c] ss:$16 sps:$4 sm:$0xff]  }
 0x8bb   : > { %3846 = vmatpush1.bf16.msra.mxu0 %v10515_v47 }
 0x8bc   : > { %3847 = vmatprep.subr.bf16.mxu0 %v10523_v27 }
 0x8c0   : > { %v9983_v56 = vpop.f32.mrb[76].mxu0 }
 0x8c1   : > { %v3352_v55 = vpop.f32.mrb[77].mxu0 }
 0x8c2   : > { %v9984_v31 = vpop.f32.mrb[78].mxu0 }
 0x8c3   : > { %v3355_v26 = vpop.f32.mrb[79].mxu0 }
 0x8c8   : > { %v12630_v12 = vpop.f32.mrb[80].mxu0 }
 0x8c9   : > { %v12632_v0 = vpop.f32.mrb[81].mxu0 }
 0x8ca   : > { %v12634_v29 = vpop.f32.mrb[82].mxu0 }
 0x8cb   : > { %v12636_v34 = vpop.f32.mrb[83].mxu0 }
 0x94d   : > { %v9967_v58 = vpop.f32.mrb[76].mxu1 }
 0x94e   : > { %v3361_v4 = vadd.f32 %v9983_v56, %v9967_v58  ;;  %v3251_v2 = vpop.f32.mrb[77].mxu1  ;;  %v10518_v56 = vld [vmem:[#allocation11 + $0x80] ss:$16 sps:$4 sm:$0xff]  }
 0x94f   : > { %v3353_v23 = vadd.f32 %v3352_v55, %v3251_v2  ;;  %v9968_v38 = vpop.f32.mrb[78].mxu1  ;;  %v10521_v55 = vld [vmem:[#allocation11 + $0x88] ss:$16 sps:$4 sm:$0xff]   ;;  %v10524_v58 = vld [vmem:[#allocation11 + $0xa0] ss:$16 sps:$4 sm:$0xff]  }
 0x950   : > { %v3364_v16 = vadd.f32 %v9984_v31, %v9968_v38  ;;  %v3254_v40 = vpop.f32.mrb[79].mxu1  ;;  %v3392_v35 = vadd.f32 %v12641_v3, %v3361_v4  ;;  %3848 = vmatpush1.bf16.msra.mxu0 %v10521_v55  ;;  %v10526_v31 = vld [vmem:[#allocation11 + $0xa4] ss:$16 sps:$4 sm:$0xff]   ;;  %v10527_v4 = vld [vmem:[#allocation11 + $0xa8] ss:$16 sps:$4 sm:$0xff]  }
 0x951   : > { %v3390_v49 = vadd.f32 %v12641_v3, %v3353_v23  ;;  %v3356_v25 = vadd.f32 %v3355_v26, %v3254_v40  ;;  %v10529_v26 = vld [vmem:[#allocation11 + $0xac] ss:$16 sps:$4 sm:$0xff]   ;;  %v10530_v2 = vld [vmem:[#allocation11 + $0xc0] ss:$16 sps:$4 sm:$0xff]   ;;  %v10532_v23 = vld [vmem:[#allocation11 + $0xc4] ss:$16 sps:$4 sm:$0xff]  }
 0x952   : > { %v3393_v44 = vadd.f32 %v12641_v3, %v3364_v16  ;;  %v12666_v18 = vadd.f32 %v3392_v35, %v12039_v10  ;;  %v10508_v10 = vld [vmem:[#allocation11 + $0x44] ss:$16 sps:$4 sm:$0xff]   ;;  %3849 = vmatprep.subr.bf16.mxu0 %v10529_v26  ;;  %v10533_v38 = vld [vmem:[#allocation11 + $0xc8] ss:$16 sps:$4 sm:$0xff]   ;;  %v10535_v16 = vld [vmem:[#allocation11 + $0xcc] ss:$16 sps:$4 sm:$0xff]  }
 0x953   : > { %v3391_v22 = vadd.f32 %v12641_v3, %v3356_v25  ;;  %v12646_v21 = vadd.f32 %v3390_v49, %v12026_v52  ;;  %3770 = vmatprep.subr.bf16.mxu1 %v10508_v10  ;;  %v10538_v40 = vld [vmem:[#allocation11 + $0xe4] ss:$16 sps:$4 sm:$0xff]   ;;  %v10541_v49 = vld [vmem:[#allocation11 + $0xec] ss:$16 sps:$4 sm:$0xff]   ;;  %v10536_v25 = vld [vmem:[#allocation11 + $0xe0] ss:$16 sps:$4 sm:$0xff]  }
 0x954   : > { %v12657_v54 = vadd.f32 %v3393_v44, %v12041_v11  ;;  %v3434_v11 = vmul.f32 %v12666_v18, %v12666_v18  ;;  %3771 = vmatpush1.bf16.msra.mxu1 %v10506_v20  ;;  %3850 = vmatpush1.bf16.msra.mxu0 %v10527_v4 }
 0x955   : > { %3408 = vadd.xlane.f32.xlu0 %v12646_v21  ;;  %v12651_v6 = vadd.f32 %v3391_v22, %v12028_v53  ;;  %v3432_v63 = vmul.f32 %v12646_v21, %v12646_v21  ;;  %3772 = vmatprep.subr.bf16.mxu1 %v10514_v51  ;;  %v10539_v22 = vld [vmem:[#allocation11 + $0xe8] ss:$16 sps:$4 sm:$0xff]  }
 0x956   : > { %v3435_v53 = vmul.f32 %v12657_v54, %v12657_v54  ;;  %3851 = vmatprep.subr.bf16.mxu0 %v10535_v16 }
 0x957   : > { %3410 = vadd.xlane.f32.xlu1 %v12651_v6  ;;  %v3433_v52 = vmul.f32 %v12651_v6, %v12651_v6 }
 0x958   : > { %3773 = vmatpush1.bf16.msra.mxu1 %v10512_v43  ;;  %3852 = vmatpush1.bf16.msra.mxu0 %v10533_v38 }
 0x959   : > { %3440 = vadd.xlane.f32.xlu0 %v3432_v63  ;;  %3774 = vmatprep.subr.bf16.mxu1 %v10520_v45 }
 0x95a   : > { %3853 = vmatprep.subr.bf16.mxu0 %v10541_v49 }
 0x95b   : > { %3414 = vadd.xlane.f32.xlu1 %v12657_v54 }
 0x95c   : > { %3775 = vmatpush1.bf16.msra.mxu1 %v10518_v56  ;;  %3854 = vmatpush1.bf16.msra.mxu0 %v10539_v22 }
 0x95d   : > { %3442 = vadd.xlane.f32.xlu0 %v3433_v52  ;;  %3776 = vmatprep.subr.bf16.mxu1 %v10526_v31 }
 0x95f   : > { %3446 = vadd.xlane.f32.xlu1 %v3435_v53 }
 0x960   : > { %3777 = vmatpush1.bf16.msra.mxu1 %v10524_v58 }
 0x961   : > { %3412 = vadd.xlane.f32.xlu0 %v12666_v18  ;;  %3778 = vmatprep.subr.bf16.mxu1 %v10532_v23 }
 0x964   : > { %3779 = vmatpush1.bf16.msra.mxu1 %v10530_v2 }
 0x965   : > { %3444 = vadd.xlane.f32.xlu0 %v3434_v11  ;;  %3780 = vmatprep.subr.bf16.mxu1 %v10538_v40 }
 0x968   : > { %3781 = vmatpush1.bf16.msra.mxu1 %v10536_v25 }
 0x98a   : > { %v9971_v44 = vpop.f32.mrb[80].mxu1 }
 0x98b   : > { %v3377_v63 = vadd.f32 %v12630_v12, %v9971_v44  ;;  %v3267_v35 = vpop.f32.mrb[81].mxu1 }
 0x98c   : > { %v3369_v52 = vadd.f32 %v12632_v0, %v3267_v35  ;;  %v9972_v53 = vpop.f32.mrb[82].mxu1 }
 0x98d   : > { %v3396_v11 = vadd.f32 %v12641_v3, %v3377_v63  ;;  %v3380_v8 = vadd.f32 %v12634_v29, %v9972_v53  ;;  %v3270_v42 = vpop.f32.mrb[83].mxu1 }
 0x98e   : > { %v3394_v48 = vadd.f32 %v12641_v3, %v3369_v52  ;;  %v3372_v13 = vadd.f32 %v12636_v34, %v3270_v42 }
 0x98f   : > { %v3397_v15 = vadd.f32 %v12641_v3, %v3380_v8  ;;  %v12692_v34 = vadd.f32 %v3396_v11, %v12061_v17 }
 0x990   : > { %v3395_v57 = vadd.f32 %v12641_v3, %v3372_v13  ;;  %v12680_v1 = vadd.f32 %v3394_v48, %v12052_v24  ;;  %v12707_v48 = vld [vmem:[%s14474_s16] ss:$0 sm:$0xff] }
 0x991   : > { %v12696_v24 = vadd.f32 %v3397_v15, %v12063_v30 }
 0x992   : > { %3416 = vadd.xlane.f32.xlu0 %v12680_v1  ;;  %v12684_v12 = vadd.f32 %v3395_v57, %v12054_v9  ;;  %v3436_v0 = vmul.f32 %v12680_v1, %v12680_v1  ;;  %v3438_v9 = vmul.f32 %v12692_v34, %v12692_v34 }
 0x993   : > { %v3439_v3 = vmul.f32 %v12696_v24, %v12696_v24 }
 0x994   : > { %3418 = vadd.xlane.f32.xlu1 %v12684_v12  ;;  %v3437_v29 = vmul.f32 %v12684_v12, %v12684_v12 }
 0x996   : > { %3448 = vadd.xlane.f32.xlu0 %v3436_v0 }
 0x998   : > { %3450 = vadd.xlane.f32.xlu1 %v3437_v29 }
 0x99a   : > { %3420 = vadd.xlane.f32.xlu0 %v12692_v34 }
 0x99c   : > { %3422 = vadd.xlane.f32.xlu1 %v12696_v24 }
 0x99e   : > { %3452 = vadd.xlane.f32.xlu0 %v3438_v9 }
 0x9a0   : > { %3454 = vadd.xlane.f32.xlu1 %v3439_v3 }
 0x9e2   : > { %v3409_v19 = vpop.xlane.xlu0 %3408 }
 0x9e3   : > { %v3424_v10 = vmul.f32 0.0078125, %v3409_v19 }
 0x9e4   : > { %v3411_v39 = vpop.xlane.xlu1 %3410 }
 0x9e5   : > { %v3464_v20 = vmul.f32 %v3424_v10, %v3424_v10  ;;  %v3425_v46 = vmul.f32 0.0078125, %v3411_v39  ;;  %v3488_v53 = vsub.f32 %v12646_v21, %v3424_v10  ;;  %v12714_v21 = vld [vmem:[%s14475_s4] ss:$0 sm:$0xff] }
 0x9e6   : > { %v3441_v17 = vpop.xlane.xlu0 %3440 }
 0x9e7   : > { %v3456_v51 = vmul.f32 0.0078125, %v3441_v17  ;;  %v3465_v45 = vmul.f32 %v3425_v46, %v3425_v46  ;;  %v3489_v13 = vsub.f32 %v12651_v6, %v3425_v46 }
 0x9e8   : > { %v3415_v60 = vpop.xlane.xlu1 %3414 }
 0x9e9   : > { %v3472_v30 = vsub.f32 %v3456_v51, %v3464_v20  ;;  %v3427_v43 = vmul.f32 0.0078125, %v3415_v60 }
 0x9ea   : > { %v3443_v47 = vpop.xlane.xlu0 %3442 }
 0x9eb   : > { %v3480_v27 = vmax.f32 %v3472_v30, 0.0  ;;  %v3457_v56 = vmul.f32 0.0078125, %v3443_v47  ;;  %v3467_v26 = vmul.f32 %v3427_v43, %v3427_v43  ;;  %v3491_v9 = vsub.f32 %v12657_v54, %v3427_v43 }
 0x9ec   : > { %v3447_v55 = vpop.xlane.xlu1 %3446 }
 0x9ed   : > { %v3496_v31 = vadd.f32 1e-12, %v3480_v27  ;;  %v3473_v58 = vsub.f32 %v3457_v56, %v3465_v45  ;;  %v3459_v4 = vmul.f32 0.0078125, %v3447_v55 }
 0x9ee   : > { %v3413_v2 = vpop.xlane.xlu0 %3412 }
 0x9ef   : > { %10790 = vrsqrt.f32 %v3496_v31  ;;  %v3481_v23 = vmax.f32 %v3473_v58, 0.0  ;;  %v3475_v38 = vsub.f32 %v3459_v4, %v3467_v26  ;;  %v3426_v16 = vmul.f32 0.0078125, %v3413_v2 }
 0x9f1   : > { %v3497_v40 = vadd.f32 1e-12, %v3481_v23  ;;  %v3483_v49 = vmax.f32 %v3475_v38, 0.0  ;;  %v3466_v44 = vmul.f32 %v3426_v16, %v3426_v16  ;;  %v3490_v39 = vsub.f32 %v12666_v18, %v3426_v16 }
 0x9f2   : > { %v3445_v25 = vpop.xlane.xlu0 %3444 }
 0x9f3   : > { %10792 = vrsqrt.f32 %v3497_v40  ;;  %v3499_v22 = vadd.f32 1e-12, %v3483_v49  ;;  %v3458_v63 = vmul.f32 0.0078125, %v3445_v25 }
 0x9f5   : > { %10794 = vrsqrt.f32 %v3499_v22  ;;  %v3474_v35 = vsub.f32 %v3458_v63, %v3466_v44 }
 0x9f7   : > { %v3482_v52 = vmax.f32 %v3474_v35, 0.0 }
 0x9f9   : > { %v10791_v11 = vpop.eup %10790  ;;  %v3498_v8 = vadd.f32 1e-12, %v3482_v52 }
 0x9fa   : > { %v3512_v42 = vmul.f32 %v10791_v11, %v3488_v53 }
 0x9fb   : > { %10796 = vrsqrt.f32 %v3498_v8 }
 0x9fc   : > { %v3526_v0 = vmul.f32 %v12707_v48, %v3512_v42 }
 0x9fd   : > { %v10793_v15 = vpop.eup %10792 }
 0x9fe   : > { %v3513_v57 = vmul.f32 %v10793_v15, %v3489_v13  ;;  %v12719_v19 = vadd.f32 %v12714_v21, %v3526_v0 }
 0x9ff   : > { %v10795_v29 = vpop.eup %10794 }
 0xa00   : > { %v3527_v3 = vmul.f32 %v12707_v48, %v3513_v57  ;;  %v3515_v6 = vmul.f32 %v10795_v29, %v3491_v9 }
 0xa02   : > { %v12722_v10 = vadd.f32 %v12714_v21, %v3527_v3  ;;  %v3529_v54 = vmul.f32 %v12707_v48, %v3515_v6 }
 0xa04   : > { %v3548_v17 = vpack.c.bf16 %v12722_v10, %v12719_v19  ;;  %v12735_v18 = vadd.f32 %v12714_v21, %v3529_v54 }
 0xa05   : > { %v10797_v20 = vpop.eup %10796 }
 0xa06   : > { %3799 = vmatmul.mubr.bf16.vlgmr.msra.gmra.mrb[84].mxu1 %v3548_v17  ;;  %3872 = vmatmul.mubr.bf16.vlgmr.msra.gmra.mrb[84].mxu0 %v3548_v17  ;;  %v3514_v46 = vmul.f32 %v10797_v20, %v3490_v39 }
 0xa07   : > { %3808 = vmatprep.mubr.bf16.mxu1 %v14473_v61  ;;  %3881 = vmatprep.mubr.bf16.mxu0 %v14473_v61 }
 0xa08   : > { %v3528_v51 = vmul.f32 %v12707_v48, %v3514_v46 }
 0xa0a   : > { %v12732_v60 = vadd.f32 %v12714_v21, %v3528_v51 }
 0xa0c   : > { %v3549_v30 = vpack.c.bf16 %v12735_v18, %v12732_v60 }
 0xa0e   : > { %3809 = vmatmul.mubr.bf16.gmra.mrb[88].mxu1 %v3549_v30  ;;  %3882 = vmatmul.mubr.bf16.gmra.mrb[88].mxu0 %v3549_v30 }
 0xa0f   : > { %3818 = vmatprep.mubr.bf16.mxu1 %v14473_v61  ;;  %3891 = vmatprep.mubr.bf16.mxu0 %v14473_v61 }
 0xa1f   : > { %v3417_v43 = vpop.xlane.xlu0 %3416 }
 0xa20   : > { %v3428_v47 = vmul.f32 0.0078125, %v3417_v43 }
 0xa21   : > { %v3419_v45 = vpop.xlane.xlu1 %3418 }
 0xa22   : > { %v3429_v27 = vmul.f32 0.0078125, %v3419_v45  ;;  %v3468_v55 = vmul.f32 %v3428_v47, %v3428_v47  ;;  %v3492_v3 = vsub.f32 %v12680_v1, %v3428_v47 }
 0xa23   : > { %v3449_v56 = vpop.xlane.xlu0 %3448 }
 0xa24   : > { %v3460_v31 = vmul.f32 0.0078125, %v3449_v56  ;;  %v3469_v58 = vmul.f32 %v3429_v27, %v3429_v27  ;;  %v3493_v39 = vsub.f32 %v12684_v12, %v3429_v27 }
 0xa25   : > { %v3451_v26 = vpop.xlane.xlu1 %3450 }
 0xa26   : > { %v3476_v4 = vsub.f32 %v3460_v31, %v3468_v55  ;;  %v3461_v2 = vmul.f32 0.0078125, %v3451_v26 }
 0xa27   : > { %v3421_v23 = vpop.xlane.xlu0 %3420 }
 0xa28   : > { %v3484_v38 = vmax.f32 %v3476_v4, 0.0  ;;  %v3477_v16 = vsub.f32 %v3461_v2, %v3469_v58  ;;  %v3430_v40 = vmul.f32 0.0078125, %v3421_v23  ;;  %v10542_v4 = vld [vmem:[#allocation13 + $0x40] sm:$0xff]  }
 0xa29   : > { %v3423_v49 = vpop.xlane.xlu1 %3422  ;;  %v10543_v2 = vld [vmem:[#allocation13 + $0xc0] sm:$0xff]   ;;  %9471 = vmatprep.subr.bf16.mxu1 %v10542_v4 }
 0xa2a   : > { %v3500_v25 = vadd.f32 1e-12, %v3484_v38  ;;  %v3485_v22 = vmax.f32 %v3477_v16, 0.0  ;;  %v3431_v44 = vmul.f32 0.0078125, %v3423_v49  ;;  %v3470_v52 = vmul.f32 %v3430_v40, %v3430_v40  ;;  %v10544_v23 = vld [vmem:[#allocation13] sm:$0xff]   ;;  %9511 = vmatprep.subr.bf16.mxu0 %v10543_v2  ;;  %v10547_v16 = vld [vmem:[#allocation13 + $0xc8] sm:$0xff]  }
 0xa2b   : > { %v3453_v63 = vpop.xlane.xlu0 %3452  ;;  %v3494_v30 = vsub.f32 %v12692_v34, %v3430_v40  ;;  %v10545_v38 = vld [vmem:[#allocation13 + $0x80] sm:$0xff]   ;;  %9472 = vmatpush3.bf16.msra.mxu1 %v10544_v23  ;;  %v10548_v40 = vld [vmem:[#allocation13 + $0x8] sm:$0xff]  }
 0xa2c   : > { %10798 = vrsqrt.f32 %v3500_v25  ;;  %v3501_v35 = vadd.f32 1e-12, %v3485_v22  ;;  %v3462_v53 = vmul.f32 0.0078125, %v3453_v63  ;;  %v3471_v8 = vmul.f32 %v3431_v44, %v3431_v44  ;;  %9512 = vmatpush3.bf16.msra.mxu0 %v10545_v38  ;;  %v10549_v49 = vld [vmem:[#allocation13 + $0x88] sm:$0xff]   ;;  %v10551_v25 = vld [vmem:[#allocation13 + $0xd0] sm:$0xff]   ;;  %v10554_v63 = vld [vmem:[#allocation13 + $0x58] sm:$0xff]  }
 0xa2d   : > { %v3455_v11 = vpop.xlane.xlu1 %3454  ;;  %v3495_v47 = vsub.f32 %v12696_v24, %v3431_v44  ;;  %9513 = vmatprep.subr.bf16.mxu0 %v10547_v16  ;;  %v10552_v22 = vld [vmem:[#allocation13 + $0x10] sm:$0xff]  }
 0xa2e   : > { %10800 = vrsqrt.f32 %v3501_v35  ;;  %v3478_v42 = vsub.f32 %v3462_v53, %v3470_v52  ;;  %v3463_v13 = vmul.f32 0.0078125, %v3455_v11  ;;  %v10553_v44 = vld [vmem:[#allocation13 + $0x90] sm:$0xff]   ;;  %v10555_v35 = vld [vmem:[#allocation13 + $0xd8] sm:$0xff]   ;;  %v10558_v11 = vld [vmem:[#allocation13 + $0x60] sm:$0xff]  }
 0xa2f   : > { %v10556_v52 = vld [vmem:[#allocation13 + $0x18] sm:$0xff]  }
 0xa30   : > { %v3486_v15 = vmax.f32 %v3478_v42, 0.0  ;;  %v3479_v57 = vsub.f32 %v3463_v13, %v3471_v8  ;;  %9514 = vmatpush3.bf16.msra.mxu0 %v10549_v49  ;;  %v10557_v53 = vld [vmem:[#allocation13 + $0x98] sm:$0xff]   ;;  %v10559_v8 = vld [vmem:[#allocation13 + $0xe0] sm:$0xff]  }
 0xa31   : > { %9515 = vmatprep.subr.bf16.mxu0 %v10551_v25  ;;  %v10560_v42 = vld [vmem:[#allocation13 + $0x20] sm:$0xff]  }
 0xa32   : > { %v3502_v0 = vadd.f32 1e-12, %v3486_v15  ;;  %v3487_v29 = vmax.f32 %v3479_v57, 0.0  ;;  %v10561_v13 = vld [vmem:[#allocation13 + $0xa0] sm:$0xff]   ;;  %v10562_v15 = vld [vmem:[#allocation13 + $0x68] sm:$0xff]  }
 0xa33   : > { %v10563_v57 = vld [vmem:[#allocation13 + $0xe8] sm:$0xff]  }
 0xa34   : > { %10802 = vrsqrt.f32 %v3502_v0  ;;  %v3503_v9 = vadd.f32 1e-12, %v3487_v29  ;;  %9516 = vmatpush3.bf16.msra.mxu0 %v10553_v44  ;;  %v10564_v0 = vld [vmem:[#allocation13 + $0x28] sm:$0xff]  }
 0xa35   : > { %9517 = vmatprep.subr.bf16.mxu0 %v10555_v35  ;;  %v10565_v29 = vld [vmem:[#allocation13 + $0xa8] sm:$0xff]  }
 0xa36   : > { %v10799_v6 = vpop.eup %10798  ;;  %10804 = vrsqrt.f32 %v3503_v9  ;;  %v10566_v9 = vld [vmem:[#allocation13 + $0x70] sm:$0xff]  }
 0xa37   : > { %v3516_v17 = vmul.f32 %v10799_v6, %v3492_v3  ;;  %v10567_v3 = vld [vmem:[#allocation13 + $0xf0] sm:$0xff]  }
 0xa38   : > { %v10801_v20 = vpop.eup %10800  ;;  %9518 = vmatpush3.bf16.msra.mxu0 %v10557_v53  ;;  %v10568_v6 = vld [vmem:[#allocation13 + $0x30] sm:$0xff]  }
 0xa39   : > { %v3517_v46 = vmul.f32 %v10801_v20, %v3493_v39  ;;  %v3530_v54 = vmul.f32 %v12707_v48, %v3516_v17  ;;  %9519 = vmatprep.subr.bf16.mxu0 %v10559_v8  ;;  %v10569_v39 = vld [vmem:[#allocation13 + $0xb0] sm:$0xff]   ;;  %v10570_v17 = vld [vmem:[#allocation13 + $0x78] sm:$0xff]  }
 0xa3a   : > { %v10571_v20 = vld [vmem:[#allocation13 + $0xf8] sm:$0xff]  }
 0xa3b   : > { %v3531_v51 = vmul.f32 %v12707_v48, %v3517_v46  ;;  %v12747_v43 = vadd.f32 %v12714_v21, %v3530_v54  ;;  %v10572_v46 = vld [vmem:[#allocation13 + $0x38] sm:$0xff]  }
 0xa3c   : > { %9520 = vmatpush3.bf16.msra.mxu0 %v10561_v13  ;;  %v10573_v54 = vld [vmem:[#allocation13 + $0xb8] sm:$0xff]  }
 0xa3d   : > { %v12750_v45 = vadd.f32 %v12714_v21, %v3531_v51  ;;  %9521 = vmatprep.subr.bf16.mxu0 %v10563_v57  ;;  %v3584_v51 = vld [vmem:[%s14476_s6] sm:$0xf] }
 0xa3e   : > { %v10803_v1 = vpop.eup %10802 }
 0xa3f   : > { %v3550_v12 = vpack.c.bf16 %v12750_v45, %v12747_v43  ;;  %v3518_v27 = vmul.f32 %v10803_v1, %v3494_v30  ;;  %v12771_v30 = vrot.slane %v3584_v51, %v12085_v37  ;;  %v12774_v1 = vrot.slane %v3584_v51, %v12088_v41 }
 0xa40   : > { %v10805_v56 = vpop.eup %10804  ;;  %9522 = vmatpush3.bf16.msra.mxu0 %v10565_v29 }
 0xa41   : > { %3819 = vmatmul.mubr.bf16.gmra.mrb[92].mxu1 %v3550_v12  ;;  %3892 = vmatmul.mubr.bf16.gmra.mrb[92].mxu0 %v3550_v12  ;;  %v3519_v55 = vmul.f32 %v10805_v56, %v3495_v47  ;;  %v3532_v31 = vmul.f32 %v12707_v48, %v3518_v27  ;;  %v14389_v47 = vsub.s32 3, %v12073_v33  ;;  %v14477_v56 = vld [vmem:[#allocation29_spill] sm:$0xff] }
 0xa42   : > { %3828 = vmatprep.mubr.bf16.mxu1 %v14473_v61  ;;  %3901 = vmatprep.mubr.bf16.mxu0 %v14473_v61 }
 0xa43   : > { %v3533_v34 = vmul.f32 %v12707_v48, %v3519_v55  ;;  %v12760_v26 = vadd.f32 %v12714_v21, %v3532_v31  ;;  %v10546_v48 = vld [vmem:[#allocation13 + $0x48] sm:$0xff]   ;;  %9523 = vmatprep.subr.bf16.mxu0 %v10567_v3  ;;  %v12778_v55 = vrot.slane %v3584_v51, %v14477_v56  ;;  %v12784_v2 = vrot.slane %v3584_v51, %v14389_v47 }
 0xa44   : > { %9473 = vmatprep.subr.bf16.mxu1 %v10546_v48  ;;  %9524 = vmatpush3.bf16.msra.mxu0 %v10569_v39 }
 0xa45   : > { %v12763_v24 = vadd.f32 %v12714_v21, %v3533_v34  ;;  %9474 = vmatpush3.bf16.msra.mxu1 %v10548_v40  ;;  %v10550_v21 = vld [vmem:[#allocation13 + $0x50] sm:$0xff]   ;;  %9525 = vmatprep.subr.bf16.mxu0 %v10571_v20 }
 0xa46   : > { %9475 = vmatprep.subr.bf16.mxu1 %v10550_v21 }
 0xa47   : > { %v3551_v58 = vpack.c.bf16 %v12763_v24, %v12760_v26 }
 0xa48   : > { %9526 = vmatpush3.bf16.msra.mxu0 %v10573_v54 }
 0xa49   : > { %3829 = vmatmul.mubr.bf16.gmra.mrb[96].mxu1 %v3551_v58  ;;  %3902 = vmatmul.mubr.bf16.gmra.mrb[96].mxu0 %v3551_v58 }
 0xa4a   : > { %9476 = vmatpush3.bf16.msra.mxu1 %v10552_v22 }
 0xa4b   : > { %9477 = vmatprep.subr.bf16.mxu1 %v10554_v63 }
 0xa4e   : > { %9478 = vmatpush3.bf16.msra.mxu1 %v10556_v52 }
 0xa4f   : > { %9479 = vmatprep.subr.bf16.mxu1 %v10558_v11 }
 0xa52   : > { %9480 = vmatpush3.bf16.msra.mxu1 %v10560_v42 }
 0xa53   : > { %9481 = vmatprep.subr.bf16.mxu1 %v10562_v15 }
 0xa56   : > { %9482 = vmatpush3.bf16.msra.mxu1 %v10564_v0 }
 0xa57   : > { %9483 = vmatprep.subr.bf16.mxu1 %v10566_v9 }
 0xa5a   : > { %9484 = vmatpush3.bf16.msra.mxu1 %v10568_v6 }
 0xa5b   : > { %9485 = vmatprep.subr.bf16.mxu1 %v10570_v17 }
 0xa5e   : > { %9486 = vmatpush3.bf16.msra.mxu1 %v10572_v46 }
 0xad9   : > { %v3800_v12 = vpop.f32.mrb[84].mxu1  ;;  %v3873_v27 = vpop.f32.mrb[84].mxu0 }
 0xada   : > { %v3801_v31 = vadd.f32 %v3800_v12, %v12771_v30  ;;  %v3874_v34 = vadd.f32 %v3873_v27, %v12774_v1  ;;  %v3802_v58 = vpop.f32.mrb[85].mxu1  ;;  %v3875_v4 = vpop.f32.mrb[85].mxu0 }
 0xadb   : > { %v3804_v23 = vpop.f32.mrb[86].mxu1  ;;  %v3877_v38 = vpop.f32.mrb[86].mxu0  ;;  %v12787_v40 = vadd.f32 %v3802_v58, %v12778_v55  ;;  %v12797_v52 = vadd.f32 %v3875_v4, %v12784_v2 }
 0xadc   : > { %v3944_v48 = vmul.f32 0.044715, %v3801_v31  ;;  %v3946_v16 = vmul.f32 0.044715, %v3874_v34  ;;  %v3805_v49 = vadd.f32 %v3804_v23, %v12771_v30  ;;  %v12791_v21 = vadd.f32 %v3877_v38, %v12774_v1  ;;  %v3806_v25 = vpop.f32.mrb[87].mxu1  ;;  %v3879_v22 = vpop.f32.mrb[87].mxu0 }
 0xadd   : > { %v12794_v35 = vadd.f32 %v3806_v25, %v12778_v55  ;;  %v12800_v11 = vadd.f32 %v3879_v22, %v12784_v2  ;;  %v12802_v8 = vmul.f32 0.5, %v3801_v31  ;;  %v3945_v57 = vmul.f32 0.044715, %v12787_v40 }
 0xade   : > { %v3976_v44 = vmul.f32 %v3944_v48, %v3801_v31  ;;  %v3978_v63 = vmul.f32 %v3946_v16, %v3874_v34  ;;  %v3948_v53 = vmul.f32 0.044715, %v3805_v49  ;;  %v3950_v15 = vmul.f32 0.044715, %v12791_v21 }
 0xadf   : > { %v3949_v29 = vmul.f32 0.044715, %v12794_v35  ;;  %v12807_v39 = vmul.f32 0.5, %v3874_v34  ;;  %v3947_v51 = vmul.f32 0.044715, %v12797_v52  ;;  %v3977_v25 = vmul.f32 %v3945_v57, %v12787_v40 }
 0xae0   : > { %v4008_v42 = vmul.f32 %v3976_v44, %v3801_v31  ;;  %v4010_v13 = vmul.f32 %v3978_v63, %v3874_v34  ;;  %v3980_v0 = vmul.f32 %v3948_v53, %v3805_v49  ;;  %v3982_v20 = vmul.f32 %v3950_v15, %v12791_v21 }
 0xae1   : > { %v3810_v9 = vpop.f32.mrb[88].mxu1  ;;  %v3883_v3 = vpop.f32.mrb[88].mxu0  ;;  %v3951_v27 = vmul.f32 0.044715, %v12800_v11  ;;  %v3981_v44 = vmul.f32 %v3949_v29, %v12794_v35  ;;  %v3979_v15 = vmul.f32 %v3947_v51, %v12797_v52 }
 0xae2   : > { %v4040_v6 = vadd.f32 %v4008_v42, %v3801_v31  ;;  %v4042_v17 = vadd.f32 %v4010_v13, %v3874_v34  ;;  %v3812_v46 = vpop.f32.mrb[89].mxu1  ;;  %v3885_v54 = vpop.f32.mrb[89].mxu0  ;;  %v4012_v12 = vmul.f32 %v3980_v0, %v3805_v49  ;;  %v12813_v58 = vadd.f32 %v3810_v9, %v12771_v30 }
 0xae3   : > { %v3814_v4 = vpop.f32.mrb[90].mxu1  ;;  %v3887_v23 = vpop.f32.mrb[90].mxu0  ;;  %v4014_v31 = vmul.f32 %v3982_v20, %v12791_v21  ;;  %v12819_v63 = vadd.f32 %v3883_v3, %v12774_v1  ;;  %v12824_v13 = vadd.f32 %v3812_v46, %v12778_v55  ;;  %v3983_v57 = vmul.f32 %v3951_v27, %v12800_v11 }
 0xae4   : > { %v4072_v38 = vmul.f32 0.7978846, %v4040_v6  ;;  %v4074_v48 = vmul.f32 0.7978846, %v4042_v17  ;;  %v3816_v16 = vpop.f32.mrb[91].mxu1  ;;  %v3889_v34 = vpop.f32.mrb[91].mxu0  ;;  %v4044_v22 = vadd.f32 %v4012_v12, %v3805_v49  ;;  %v12830_v3 = vadd.f32 %v3885_v54, %v12784_v2 }
 0xae5   : > { %v4046_v53 = vadd.f32 %v4014_v31, %v12791_v21  ;;  %v3952_v42 = vmul.f32 0.044715, %v12813_v58  ;;  %v3953_v29 = vmul.f32 0.044715, %v12824_v13  ;;  %v12833_v6 = vadd.f32 %v3814_v4, %v12771_v30 }
 0xae6   : > { %10806 = vtanh.f32 %v4072_v38  ;;  %v4076_v0 = vmul.f32 0.7978846, %v4044_v22  ;;  %v4009_v17 = vmul.f32 %v3977_v25, %v12787_v40  ;;  %v4013_v20 = vmul.f32 %v3981_v44, %v12794_v35 }
 0xae7   : > { %10808 = vtanh.f32 %v4074_v48  ;;  %v4078_v9 = vmul.f32 0.7978846, %v4046_v53  ;;  %v12838_v46 = vadd.f32 %v3887_v23, %v12774_v1  ;;  %v3984_v51 = vmul.f32 %v3952_v42, %v12813_v58 }
 0xae8   : > { %10810 = vtanh.f32 %v4076_v0  ;;  %v3954_v12 = vmul.f32 0.044715, %v12819_v63  ;;  %v3955_v27 = vmul.f32 0.044715, %v12830_v3  ;;  %v3916_v54 = vmul.f32 0.5, %v3805_v49 }
 0xae9   : > { %10812 = vtanh.f32 %v4078_v9  ;;  %v3985_v38 = vmul.f32 %v3953_v29, %v12824_v13  ;;  %v12845_v4 = vadd.f32 %v3816_v16, %v12778_v55  ;;  %v12848_v48 = vadd.f32 %v3889_v34, %v12784_v2 }
 0xaea   : > { %v4011_v31 = vmul.f32 %v3979_v15, %v12797_v52  ;;  %v4015_v23 = vmul.f32 %v3983_v57, %v12800_v11  ;;  %v3956_v25 = vmul.f32 0.044715, %v12833_v6  ;;  %v3958_v22 = vmul.f32 0.044715, %v12838_v46 }
 0xaeb   : > { %v3987_v44 = vmul.f32 %v3955_v27, %v12830_v3  ;;  %v3957_v49 = vmul.f32 0.044715, %v12845_v4  ;;  %v3959_v53 = vmul.f32 0.044715, %v12848_v48  ;;  %v4041_v16 = vadd.f32 %v4009_v17, %v12787_v40 }
 0xaec   : > { %v3918_v42 = vmul.f32 0.5, %v12791_v21  ;;  %v4016_v34 = vmul.f32 %v3984_v51, %v12813_v58  ;;  %v3986_v15 = vmul.f32 %v3954_v12, %v12819_v63  ;;  %v4045_v0 = vadd.f32 %v4013_v20, %v12794_v35 }
 0xaed   : > { %v4017_v57 = vmul.f32 %v3985_v38, %v12824_v13  ;;  %v3989_v9 = vmul.f32 %v3957_v49, %v12845_v4  ;;  %v3991_v29 = vmul.f32 %v3959_v53, %v12848_v48  ;;  %v4073_v27 = vmul.f32 0.7978846, %v4041_v16 }
 0xaee   : > { %v3988_v33 = vmul.f32 %v3956_v25, %v12833_v6  ;;  %v4077_v28 = vmul.f32 0.7978846, %v4045_v0  ;;  %v4043_v17 = vadd.f32 %v4011_v31, %v12797_v52  ;;  %v4047_v21 = vadd.f32 %v4015_v23, %v12800_v11 }
 0xaef   : > { %v4019_v12 = vmul.f32 %v3987_v44, %v12830_v3  ;;  %v3990_v20 = vmul.f32 %v3958_v22, %v12838_v46  ;;  %v4021_v38 = vmul.f32 %v3989_v9, %v12845_v4  ;;  %10814 = vtanh.f32 %v4073_v27 }
 0xaf0   : > { %v10807_v47 = vpop.eup %10806  ;;  %10816 = vtanh.f32 %v4077_v28  ;;  %v4075_v49 = vmul.f32 0.7978846, %v4043_v17  ;;  %v4079_v53 = vmul.f32 0.7978846, %v4047_v21  ;;  %v4018_v25 = vmul.f32 %v3986_v15, %v12819_v63 }
 0xaf1   : > { %v10809_v51 = vpop.eup %10808  ;;  %v4136_v16 = vadd.f32 1.0, %v10807_v47  ;;  %v4023_v0 = vmul.f32 %v3991_v29, %v12848_v48  ;;  %v4049_v23 = vadd.f32 %v4017_v57, %v12824_v13  ;;  %v4020_v44 = vmul.f32 %v3988_v33, %v12833_v6 }
 0xaf2   : > { %v10811_v62 = vpop.eup %10810  ;;  %v4138_v31 = vadd.f32 1.0, %v10809_v51  ;;  %10818 = vtanh.f32 %v4075_v49  ;;  %v4053_v9 = vadd.f32 %v4021_v38, %v12845_v4  ;;  %v4022_v28 = vmul.f32 %v3990_v20, %v12838_v46 }
 0xaf3   : > { %v10813_v14 = vpop.eup %10812  ;;  %v4140_v22 = vadd.f32 1.0, %v10811_v62  ;;  %10820 = vtanh.f32 %v4079_v53  ;;  %v4081_v47 = vmul.f32 0.7978846, %v4049_v23  ;;  %v4168_v17 = vmul.f32 %v4136_v16, %v12802_v8 }
 0xaf4   : > { %v4142_v27 = vadd.f32 1.0, %v10813_v14  ;;  %v4085_v21 = vmul.f32 0.7978846, %v4053_v9  ;;  %v4051_v29 = vadd.f32 %v4019_v12, %v12830_v3  ;;  %v4170_v57 = vmul.f32 %v4138_v31, %v12807_v39 }
 0xaf5   : > { %v4172_v15 = vmul.f32 %v4140_v22, %v3916_v54  ;;  %10822 = vtanh.f32 %v4081_v47  ;;  %v4055_v33 = vadd.f32 %v4023_v0, %v12848_v48  ;;  %v4048_v14 = vadd.f32 %v4016_v34, %v12813_v58 }
 0xaf6   : > { %v4174_v51 = vmul.f32 %v4142_v27, %v3918_v42  ;;  %10824 = vtanh.f32 %v4085_v21  ;;  %v4083_v38 = vmul.f32 0.7978846, %v4051_v29  ;;  %v4052_v53 = vadd.f32 %v4020_v44, %v12833_v6 }
 0xaf7   : > { %v4200_v62 = vpack.c.bf16 %v4172_v15, %v4168_v17  ;;  %v4087_v20 = vmul.f32 0.7978846, %v4055_v33  ;;  %v4050_v8 = vadd.f32 %v4018_v25, %v12819_v63  ;;  %v4080_v12 = vmul.f32 0.7978846, %v4048_v14 }
 0xaf8   : > { %v4202_v49 = vpack.c.bf16 %v4174_v51, %v4170_v57  ;;  %10826 = vtanh.f32 %v4083_v38  ;;  %v4084_v39 = vmul.f32 0.7978846, %v4052_v53  ;;  %v4054_v42 = vadd.f32 %v4022_v28, %v12838_v46 }
 0xaf9   : > { %v10815_v54 = vpop.eup %10814  ;;  %10828 = vtanh.f32 %v4087_v20  ;;  %v3913_v0 = vmul.f32 0.5, %v12787_v40  ;;  %v4082_v23 = vmul.f32 0.7978846, %v4050_v8  ;;  %v3917_v22 = vmul.f32 0.5, %v12794_v35 }
 0xafa   : > { %v10817_v16 = vpop.eup %10816  ;;  %v4137_v31 = vadd.f32 1.0, %v10815_v54  ;;  %10830 = vtanh.f32 %v4080_v12  ;;  %v4086_v34 = vmul.f32 0.7978846, %v4054_v42  ;;  %v3915_v15 = vmul.f32 0.5, %v12797_v52 }
 0xafb   : > { %v4141_v9 = vadd.f32 1.0, %v10817_v16  ;;  %10832 = vtanh.f32 %v4084_v39  ;;  %v3919_v28 = vmul.f32 0.5, %v12800_v11  ;;  %v3921_v38 = vmul.f32 0.5, %v12824_v13 }
 0xafc   : > { %v10819_v44 = vpop.eup %10818  ;;  %v4169_v25 = vmul.f32 %v4137_v31, %v3913_v0  ;;  %10834 = vtanh.f32 %v4082_v23  ;;  %v3925_v20 = vmul.f32 0.5, %v12845_v4  ;;  %v3923_v39 = vmul.f32 0.5, %v12830_v3 }
 0xafd   : > { %v10821_v27 = vpop.eup %10820  ;;  %v4173_v47 = vmul.f32 %v4141_v9, %v3917_v22  ;;  %v4139_v17 = vadd.f32 1.0, %v10819_v44  ;;  %10836 = vtanh.f32 %v4086_v34  ;;  %v3927_v42 = vmul.f32 0.5, %v12848_v48 }
 0xafe   : > { %v4143_v21 = vadd.f32 1.0, %v10821_v27  ;;  %v3924_v34 = vmul.f32 0.5, %v12833_v6  ;;  %v3922_v3 = vmul.f32 0.5, %v12819_v63 }
 0xaff   : > { %v10823_v40 = vpop.eup %10822  ;;  %v4201_v29 = vpack.c.bf16 %v4173_v47, %v4169_v25  ;;  %v4171_v35 = vmul.f32 %v4139_v17, %v3915_v15 }
 0xb00   : > { %v10825_v57 = vpop.eup %10824  ;;  %v4175_v51 = vmul.f32 %v4143_v21, %v3919_v28  ;;  %v4145_v33 = vadd.f32 1.0, %v10823_v40 }
 0xb01   : > { %4511 = vmatprep.mubr.bf16.mxu1 %v4201_v29  ;;  %v4149_v14 = vadd.f32 1.0, %v10825_v57 }
 0xb02   : > { %v10827_v53 = vpop.eup %10826  ;;  %v4203_v8 = vpack.c.bf16 %v4175_v51, %v4171_v35  ;;  %4512 = vmatmul.mubr.bf16.vlgmr.msra.gmra.mrb[100].mxu1 %v4200_v62  ;;  %v4177_v54 = vmul.f32 %v4145_v33, %v3921_v38  ;;  %v3920_v62 = vmul.f32 0.5, %v12813_v58 }
 0xb03   : > { %v10829_v52 = vpop.eup %10828  ;;  %v4181_v11 = vmul.f32 %v4149_v14, %v3925_v20  ;;  %v4147_v12 = vadd.f32 1.0, %v10827_v53 }
 0xb04   : > { %4576 = vmatprep.mubr.bf16.mxu0 %v4203_v8  ;;  %v4151_v16 = vadd.f32 1.0, %v10829_v52  ;;  %v10831_v0 = vpop.eup %10830 }
 0xb05   : > { %4577 = vmatmul.mubr.bf16.vlgmr.msra.gmra.mrb[100].mxu0 %v4202_v49  ;;  %v4205_v31 = vpack.c.bf16 %v4181_v11, %v4177_v54  ;;  %v10833_v13 = vpop.eup %10832  ;;  %v4179_v23 = vmul.f32 %v4147_v12, %v3923_v39  ;;  %v4144_v22 = vadd.f32 1.0, %v10831_v0  ;;  %v3926_v49 = vmul.f32 0.5, %v12838_v46 }
 0xb06   : > { %v4183_v4 = vmul.f32 %v4151_v16, %v3927_v42  ;;  %v10835_v9 = vpop.eup %10834  ;;  %v4148_v44 = vadd.f32 1.0, %v10833_v13 }
 0xb07   : > { %4519 = vmatprep.mubr.bf16.mxu1 %v4205_v31  ;;  %v10837_v27 = vpop.eup %10836  ;;  %v4146_v48 = vadd.f32 1.0, %v10835_v9  ;;  %v4176_v47 = vmul.f32 %v4144_v22, %v3920_v62 }
 0xb08   : > { %v4207_v25 = vpack.c.bf16 %v4183_v4, %v4179_v23  ;;  %v4180_v17 = vmul.f32 %v4148_v44, %v3924_v34  ;;  %v4150_v15 = vadd.f32 1.0, %v10837_v27 }
 0xb09   : > { %v4178_v21 = vmul.f32 %v4146_v48, %v3922_v3 }
 0xb0a   : > { %4584 = vmatprep.mubr.bf16.mxu0 %v4207_v25  ;;  %v4204_v28 = vpack.c.bf16 %v4180_v17, %v4176_v47  ;;  %v4182_v40 = vmul.f32 %v4150_v15, %v3926_v49 }
 0xb0c   : > { %4520 = vmatmul.mubr.bf16.gmra.mrb[104].mxu1 %v4204_v28  ;;  %v4206_v29 = vpack.c.bf16 %v4182_v40, %v4178_v21 }
 0xb0e   : > { %4585 = vmatmul.mubr.bf16.gmra.mrb[104].mxu0 %v4206_v29 }
 0xb14   : > { %v3820_v58 = vpop.f32.mrb[92].mxu1  ;;  %v3893_v6 = vpop.f32.mrb[92].mxu0 }
 0xb15   : > { %v12898_v57 = vadd.f32 %v3820_v58, %v12771_v30  ;;  %v3822_v35 = vpop.f32.mrb[93].mxu1  ;;  %v3895_v63 = vpop.f32.mrb[93].mxu0  ;;  %v12901_v51 = vadd.f32 %v3893_v6, %v12774_v1 }
 0xb16   : > { %v12904_v46 = vadd.f32 %v3822_v35, %v12778_v55  ;;  %v3824_v33 = vpop.f32.mrb[94].mxu1  ;;  %v3897_v38 = vpop.f32.mrb[94].mxu0  ;;  %v12907_v20 = vadd.f32 %v3895_v63, %v12784_v2 }
 0xb17   : > { %v3826_v14 = vpop.f32.mrb[95].mxu1  ;;  %v3899_v53 = vpop.f32.mrb[95].mxu0  ;;  %v3960_v8 = vmul.f32 0.044715, %v12898_v57  ;;  %v12911_v52 = vadd.f32 %v3824_v33, %v12771_v30  ;;  %v12921_v39 = vadd.f32 %v3897_v38, %v12774_v1  ;;  %v3962_v42 = vmul.f32 0.044715, %v12901_v51 }
 0xb18   : > { %v12914_v54 = vadd.f32 %v3826_v14, %v12778_v55  ;;  %v12917_v11 = vadd.f32 %v3899_v53, %v12784_v2  ;;  %v3961_v12 = vmul.f32 0.044715, %v12904_v46  ;;  %v3963_v0 = vmul.f32 0.044715, %v12907_v20 }
 0xb19   : > { %v3992_v13 = vmul.f32 %v3960_v8, %v12898_v57  ;;  %v3964_v23 = vmul.f32 0.044715, %v12911_v52  ;;  %v3966_v62 = vmul.f32 0.044715, %v12921_v39  ;;  %v3994_v3 = vmul.f32 %v3962_v42, %v12901_v51 }
 0xb1a   : > { %v3965_v16 = vmul.f32 0.044715, %v12914_v54  ;;  %v3967_v31 = vmul.f32 0.044715, %v12917_v11  ;;  %v3993_v9 = vmul.f32 %v3961_v12, %v12904_v46  ;;  %v3995_v28 = vmul.f32 %v3963_v0, %v12907_v20 }
 0xb1b   : > { %v3996_v35 = vmul.f32 %v3964_v23, %v12911_v52  ;;  %v4024_v23 = vmul.f32 %v3992_v13, %v12898_v57 }
 0xb1c   : > { %v3830_v4 = vpop.f32.mrb[96].mxu1  ;;  %v3903_v22 = vpop.f32.mrb[96].mxu0  ;;  %v3997_v48 = vmul.f32 %v3965_v16, %v12914_v54  ;;  %v3999_v21 = vmul.f32 %v3967_v31, %v12917_v11  ;;  %v4025_v14 = vmul.f32 %v3993_v9, %v12904_v46  ;;  %v4027_v16 = vmul.f32 %v3995_v28, %v12907_v20 }
 0xb1d   : > { %v12932_v34 = vadd.f32 %v3830_v4, %v12771_v30  ;;  %v12935_v44 = vadd.f32 %v3903_v22, %v12774_v1  ;;  %v3832_v27 = vpop.f32.mrb[97].mxu1  ;;  %v3905_v25 = vpop.f32.mrb[97].mxu0  ;;  %v4026_v4 = vmul.f32 %v3994_v3, %v12901_v51 }
 0xb1e   : > { %v12940_v47 = vadd.f32 %v3832_v27, %v12778_v55  ;;  %v12943_v17 = vadd.f32 %v3905_v25, %v12784_v2  ;;  %v3834_v49 = vpop.f32.mrb[98].mxu1  ;;  %v3907_v15 = vpop.f32.mrb[98].mxu0  ;;  %v4029_v8 = vmul.f32 %v3997_v48, %v12914_v54  ;;  %v4057_v13 = vadd.f32 %v4025_v14, %v12904_v46 }
 0xb1f   : > { %v12948_v40 = vadd.f32 %v3834_v49, %v12771_v30  ;;  %v12951_v29 = vadd.f32 %v3907_v15, %v12774_v1  ;;  %v3836_v58 = vpop.f32.mrb[99].mxu1  ;;  %v3909_v6 = vpop.f32.mrb[99].mxu0  ;;  %v3998_v30 = vmul.f32 %v3966_v62, %v12921_v39  ;;  %v3968_v53 = vmul.f32 0.044715, %v12932_v34 }
 0xb20   : > { %v3969_v63 = vmul.f32 0.044715, %v12940_v47  ;;  %v12956_v33 = vadd.f32 %v3836_v58, %v12778_v55  ;;  %v12959_v38 = vadd.f32 %v3909_v6, %v12784_v2  ;;  %v3970_v1 = vmul.f32 0.044715, %v12935_v44 }
 0xb21   : > { %v3971_v12 = vmul.f32 0.044715, %v12943_v17  ;;  %v4031_v2 = vmul.f32 %v3999_v21, %v12917_v11  ;;  %v3972_v0 = vmul.f32 0.044715, %v12948_v40  ;;  %v3974_v31 = vmul.f32 0.044715, %v12951_v29 }
 0xb22   : > { %v3973_v42 = vmul.f32 0.044715, %v12956_v33  ;;  %v3975_v55 = vmul.f32 0.044715, %v12959_v38  ;;  %v4001_v22 = vmul.f32 %v3969_v63, %v12940_v47  ;;  %v4028_v62 = vmul.f32 %v3996_v35, %v12911_v52 }
 0xb23   : > { %v4030_v27 = vmul.f32 %v3998_v30, %v12921_v39  ;;  %v4000_v25 = vmul.f32 %v3968_v53, %v12932_v34  ;;  %v4002_v48 = vmul.f32 %v3970_v1, %v12935_v44  ;;  %v4003_v49 = vmul.f32 %v3971_v12, %v12943_v17 }
 0xb24   : > { %v4005_v9 = vmul.f32 %v3973_v42, %v12956_v33  ;;  %v4007_v15 = vmul.f32 %v3975_v55, %v12959_v38  ;;  %v4061_v3 = vadd.f32 %v4029_v8, %v12914_v54  ;;  %v4004_v28 = vmul.f32 %v3972_v0, %v12948_v40 }
 0xb25   : > { %v4006_v21 = vmul.f32 %v3974_v31, %v12951_v29  ;;  %v4059_v58 = vadd.f32 %v4027_v16, %v12907_v20  ;;  %v4063_v6 = vadd.f32 %v4031_v2, %v12917_v11  ;;  %v4033_v35 = vmul.f32 %v4001_v22, %v12940_v47 }
 0xb26   : > { %v4037_v63 = vmul.f32 %v4005_v9, %v12956_v33  ;;  %v4089_v30 = vmul.f32 0.7978846, %v4057_v13  ;;  %v4093_v53 = vmul.f32 0.7978846, %v4061_v3  ;;  %v4056_v14 = vadd.f32 %v4024_v23, %v12898_v57 }
 0xb27   : > { %v4091_v1 = vmul.f32 0.7978846, %v4059_v58  ;;  %v4095_v12 = vmul.f32 0.7978846, %v4063_v6  ;;  %v4060_v8 = vadd.f32 %v4028_v62, %v12911_v52  ;;  %v4035_v42 = vmul.f32 %v4003_v49, %v12943_v17 }
 0xb28   : > { %v4039_v55 = vmul.f32 %v4007_v15, %v12959_v38  ;;  %10838 = vtanh.f32 %v4089_v30  ;;  %v4058_v16 = vadd.f32 %v4026_v4, %v12901_v51  ;;  %v4088_v2 = vmul.f32 0.7978846, %v4056_v14 }
 0xb29   : > { %10840 = vtanh.f32 %v4093_v53  ;;  %v4092_v0 = vmul.f32 0.7978846, %v4060_v8  ;;  %v4062_v31 = vadd.f32 %v4030_v27, %v12921_v39  ;;  %v4032_v22 = vmul.f32 %v4000_v25, %v12932_v34 }
 0xb2a   : > { %v4036_v9 = vmul.f32 %v4004_v28, %v12948_v40  ;;  %10842 = vtanh.f32 %v4091_v1  ;;  %v4090_v23 = vmul.f32 0.7978846, %v4058_v16  ;;  %v4065_v49 = vadd.f32 %v4033_v35, %v12940_v47 }
 0xb2b   : > { %10844 = vtanh.f32 %v4095_v12  ;;  %v4094_v62 = vmul.f32 0.7978846, %v4062_v31  ;;  %v4069_v15 = vadd.f32 %v4037_v63, %v12956_v33  ;;  %v4034_v13 = vmul.f32 %v4002_v48, %v12935_v44 }
 0xb2c   : > { %v4038_v4 = vmul.f32 %v4006_v21, %v12951_v29  ;;  %10846 = vtanh.f32 %v4088_v2  ;;  %v4067_v3 = vadd.f32 %v4035_v42, %v12943_v17  ;;  %v4097_v27 = vmul.f32 0.7978846, %v4065_v49 }
 0xb2d   : > { %10848 = vtanh.f32 %v4092_v0  ;;  %v4101_v25 = vmul.f32 0.7978846, %v4069_v15  ;;  %v4071_v28 = vadd.f32 %v4039_v55, %v12959_v38  ;;  %v4064_v35 = vadd.f32 %v4032_v22, %v12932_v34 }
 0xb2e   : > { %10850 = vtanh.f32 %v4090_v23  ;;  %v4099_v58 = vmul.f32 0.7978846, %v4067_v3  ;;  %v4068_v63 = vadd.f32 %v4036_v9, %v12948_v40  ;;  %v4066_v48 = vadd.f32 %v4034_v13, %v12935_v44 }
 0xb2f   : > { %10852 = vtanh.f32 %v4094_v62  ;;  %v4103_v6 = vmul.f32 0.7978846, %v4071_v28  ;;  %v4096_v21 = vmul.f32 0.7978846, %v4064_v35  ;;  %v4070_v53 = vadd.f32 %v4038_v4, %v12951_v29 }
 0xb30   : > { %10854 = vtanh.f32 %v4097_v27  ;;  %v4100_v30 = vmul.f32 0.7978846, %v4068_v63  ;;  %v4098_v12 = vmul.f32 0.7978846, %v4066_v48  ;;  %v3929_v16 = vmul.f32 0.5, %v12904_v46 }
 0xb31   : > { %10856 = vtanh.f32 %v4101_v25  ;;  %v4102_v42 = vmul.f32 0.7978846, %v4070_v53  ;;  %v3933_v2 = vmul.f32 0.5, %v12914_v54  ;;  %v3931_v22 = vmul.f32 0.5, %v12907_v20 }
 0xb32   : > { %v10839_v1 = vpop.eup %10838  ;;  %10858 = vtanh.f32 %v4099_v58  ;;  %v3935_v9 = vmul.f32 0.5, %v12917_v11  ;;  %v3928_v3 = vmul.f32 0.5, %v12898_v57  ;;  %v3932_v46 = vmul.f32 0.5, %v12911_v52 }
 0xb33   : > { %v10841_v14 = vpop.eup %10840  ;;  %v4153_v8 = vadd.f32 1.0, %v10839_v1  ;;  %10860 = vtanh.f32 %v4103_v6  ;;  %v3930_v6 = vmul.f32 0.5, %v12901_v51  ;;  %v3934_v35 = vmul.f32 0.5, %v12921_v39 }
 0xb34   : > { %v10843_v55 = vpop.eup %10842  ;;  %v4157_v0 = vadd.f32 1.0, %v10841_v14  ;;  %10862 = vtanh.f32 %v4096_v21  ;;  %v3937_v1 = vmul.f32 0.5, %v12940_v47 }
 0xb35   : > { %v10845_v31 = vpop.eup %10844  ;;  %v4155_v23 = vadd.f32 1.0, %v10843_v55  ;;  %10864 = vtanh.f32 %v4100_v30  ;;  %v4185_v49 = vmul.f32 %v4153_v8, %v3929_v16 }
 0xb36   : > { %v10847_v62 = vpop.eup %10846  ;;  %v4189_v15 = vmul.f32 %v4157_v0, %v3933_v2  ;;  %v4159_v13 = vadd.f32 1.0, %v10845_v31  ;;  %10866 = vtanh.f32 %v4098_v12  ;;  %v3941_v12 = vmul.f32 0.5, %v12956_v33 }
 0xb37   : > { %v10849_v4 = vpop.eup %10848  ;;  %v4152_v54 = vadd.f32 1.0, %v10847_v62  ;;  %10868 = vtanh.f32 %v4102_v42  ;;  %v4187_v28 = vmul.f32 %v4155_v23, %v3931_v22  ;;  %v3939_v2 = vmul.f32 0.5, %v12943_v17 }
 0xb38   : > { %v10851_v27 = vpop.eup %10850  ;;  %v4209_v25 = vpack.c.bf16 %v4189_v15, %v4185_v49  ;;  %v4191_v20 = vmul.f32 %v4159_v13, %v3935_v9  ;;  %v4156_v58 = vadd.f32 1.0, %v10849_v4  ;;  %v3943_v0 = vmul.f32 0.5, %v12959_v38 }
 0xb39   : > { %v10853_v11 = vpop.eup %10852  ;;  %v4154_v63 = vadd.f32 1.0, %v10851_v27  ;;  %v4184_v30 = vmul.f32 %v4152_v54, %v3928_v3  ;;  %v3936_v49 = vmul.f32 0.5, %v12932_v34  ;;  %v3940_v15 = vmul.f32 0.5, %v12948_v40 }
 0xb3a   : > { %v10855_v48 = vpop.eup %10854  ;;  %4527 = vmatprep.mubr.bf16.mxu1 %v4209_v25  ;;  %v4211_v21 = vpack.c.bf16 %v4191_v20, %v4187_v28  ;;  %v4188_v57 = vmul.f32 %v4156_v58, %v3932_v46  ;;  %v4158_v53 = vadd.f32 1.0, %v10853_v11  ;;  %v3938_v27 = vmul.f32 0.5, %v12935_v44 }
 0xb3b   : > { %v10857_v52 = vpop.eup %10856  ;;  %v4161_v14 = vadd.f32 1.0, %v10855_v48  ;;  %v4186_v55 = vmul.f32 %v4154_v63, %v3930_v6  ;;  %v3942_v25 = vmul.f32 0.5, %v12951_v29 }
 0xb3c   : > { %v10859_v8 = vpop.eup %10858  ;;  %4592 = vmatprep.mubr.bf16.mxu0 %v4211_v21  ;;  %v4208_v42 = vpack.c.bf16 %v4188_v57, %v4184_v30  ;;  %v4190_v51 = vmul.f32 %v4158_v53, %v3934_v35  ;;  %v4165_v16 = vadd.f32 1.0, %v10857_v52  ;;  %v13026_v21 = vld [vmem:[#allocation14] ss:$0 sm:$0xff] }
 0xb3d   : > { %v10861_v39 = vpop.eup %10860  ;;  %v4163_v31 = vadd.f32 1.0, %v10859_v8  ;;  %v4193_v23 = vmul.f32 %v4161_v14, %v3937_v1 }
 0xb3e   : > { %v10863_v22 = vpop.eup %10862  ;;  %4528 = vmatmul.mubr.bf16.gmra.mrb[108].mxu1 %v4208_v42  ;;  %v4210_v9 = vpack.c.bf16 %v4190_v51, %v4186_v55  ;;  %v4197_v47 = vmul.f32 %v4165_v16, %v3941_v12  ;;  %v4167_v62 = vadd.f32 1.0, %v10861_v39 }
 0xb3f   : > { %v10865_v33 = vpop.eup %10864  ;;  %v4160_v13 = vadd.f32 1.0, %v10863_v22  ;;  %v4195_v46 = vmul.f32 %v4163_v31, %v3939_v2 }
 0xb40   : > { %v10867_v4 = vpop.eup %10866  ;;  %4593 = vmatmul.mubr.bf16.gmra.mrb[108].mxu0 %v4210_v9  ;;  %v4213_v3 = vpack.c.bf16 %v4197_v47, %v4193_v23  ;;  %v4199_v17 = vmul.f32 %v4167_v62, %v3943_v0  ;;  %v4164_v54 = vadd.f32 1.0, %v10865_v33 }
 0xb41   : > { %v10869_v38 = vpop.eup %10868  ;;  %v4162_v28 = vadd.f32 1.0, %v10867_v4  ;;  %v4192_v58 = vmul.f32 %v4160_v13, %v3936_v49 }
 0xb42   : > { %4535 = vmatprep.mubr.bf16.mxu1 %v4213_v3  ;;  %v4215_v20 = vpack.c.bf16 %v4199_v17, %v4195_v46  ;;  %v4196_v11 = vmul.f32 %v4164_v54, %v3940_v15  ;;  %v4166_v34 = vadd.f32 1.0, %v10869_v38 }
 0xb43   : > { %v4194_v6 = vmul.f32 %v4162_v28, %v3938_v27 }
 0xb44   : > { %4600 = vmatprep.mubr.bf16.mxu0 %v4215_v20  ;;  %v4212_v40 = vpack.c.bf16 %v4196_v11, %v4192_v58  ;;  %v4198_v35 = vmul.f32 %v4166_v34, %v3942_v25  ;;  %v10574_v58 = vld [vmem:[#allocation8 + $0xc0] ss:$12 sps:$4 sm:$0xff]   ;;  %v10576_v11 = vld [vmem:[#allocation8 + $0xc4] ss:$12 sps:$4 sm:$0xff]  }
 0xb45   : > { %4942 = vmatprep.subr.bf16.mxu1 %v10576_v11  ;;  %v10577_v34 = vld [vmem:[#allocation8 + $0xd8] ss:$12 sps:$4 sm:$0xff]  }
 0xb46   : > { %4536 = vmatmul.mubr.bf16.gmra.mrb[112].mxu1 %v4212_v40  ;;  %v4214_v63 = vpack.c.bf16 %v4198_v35, %v4194_v6  ;;  %v10583_v40 = vld [vmem:[#allocation8 + $0xc8] ss:$12 sps:$4 sm:$0xff]   ;;  %v10580_v6 = vld [vmem:[#allocation8 + $0xf0] ss:$12 sps:$4 sm:$0xff]   ;;  %v10586_v35 = vld [vmem:[#allocation8 + $0x10c] ss:$12 sps:$4 sm:$0xff]  }
 0xb47   : > { %4974 = vmatprep.mubr.bf16.mxu1 %v14473_v61  ;;  %4943 = vmatpush1.bf16.msra.mxu1 %v10574_v58 }
 0xb48   : > { %4601 = vmatmul.mubr.bf16.gmra.mrb[112].mxu0 %v4214_v63  ;;  %9989 = vmatprep.subr.bf16.mxu0 %v10583_v40  ;;  %v10587_v63 = vld [vmem:[#allocation8 + $0xe0] ss:$12 sps:$4 sm:$0xff]  }
 0xb49   : > { %9990 = vmatpush3.bf16.msra.mxu0 %v10583_v40 }
 0xb4a   : > { %9991 = vmatprep.subr.bf16.mxu0 %v10587_v63 }
 0xb4d   : > { %9992 = vmatpush3.bf16.msra.mxu0 %v10587_v63 }
 0xbd5   : > { %v9487_v48 = vpop.f32.mrb[100].mxu1 }
 0xbd6   : > { %v9488_v44 = vpop.f32.mrb[101].mxu1 }
 0xbd7   : > { %v9489_v29 = vadd.f32 %v9488_v44, %v9487_v48  ;;  %v9490_v30 = vpop.f32.mrb[102].mxu1  ;;  %v10584_v48 = vld [vmem:[#allocation8 + $0x108] ss:$12 sps:$4 sm:$0xff]   ;;  %v10590_v44 = vld [vmem:[#allocation8 + $0x124] ss:$12 sps:$4 sm:$0xff]  }
 0xbd8   : > { %v9527_v57 = vpop.f32.mrb[100].mxu0  ;;  %v9491_v53 = vpop.f32.mrb[103].mxu1 }
 0xbd9   : > { %v4514_v52 = vadd.f32 %v9489_v29, %v13026_v21  ;;  %v9528_v1 = vpop.f32.mrb[101].mxu0  ;;  %v9492_v12 = vadd.f32 %v9491_v53, %v9490_v30  ;;  %v10591_v29 = vld [vmem:[#allocation8 + $0xf8] ss:$12 sps:$4 sm:$0xff]   ;;  %v10588_v30 = vld [vmem:[#allocation8 + $0x120] ss:$12 sps:$4 sm:$0xff]  }
 0xbda   : > { %v9529_v14 = vadd.f32 %v9528_v1, %v9527_v57  ;;  %v9530_v8 = vpop.f32.mrb[102].mxu0  ;;  %9993 = vmatprep.subr.bf16.mxu0 %v10591_v29  ;;  %v10594_v57 = vld [vmem:[#allocation8 + $0x13c] ss:$12 sps:$4 sm:$0xff]   ;;  %v10598_v1 = vld [vmem:[#allocation8 + $0x154] ss:$12 sps:$4 sm:$0xff]  }
 0xbdb   : > { %v4517_v42 = vadd.f32 %v9492_v12, %v13026_v21  ;;  %v9531_v55 = vpop.f32.mrb[103].mxu0  ;;  %v10595_v53 = vld [vmem:[#allocation8 + $0x110] ss:$12 sps:$4 sm:$0xff]   ;;  %9994 = vmatpush3.bf16.msra.mxu0 %v10591_v29  ;;  %v10599_v12 = vld [vmem:[#allocation8 + $0x128] ss:$12 sps:$4 sm:$0xff]  }
 0xbdc   : > { %v4579_v51 = vadd.f32 %v9529_v14, %v4514_v52  ;;  %v9532_v16 = vadd.f32 %v9531_v55, %v9530_v8  ;;  %v10592_v52 = vld [vmem:[#allocation8 + $0x138] ss:$12 sps:$4 sm:$0xff]   ;;  %9995 = vmatprep.subr.bf16.mxu0 %v10595_v53  ;;  %v10596_v14 = vld [vmem:[#allocation8 + $0x150] ss:$12 sps:$4 sm:$0xff]   ;;  %v10603_v55 = vld [vmem:[#allocation8 + $0x140] ss:$12 sps:$4 sm:$0xff]  }
 0xbde   : > { %v4582_v39 = vadd.f32 %v9532_v16, %v4517_v42  ;;  %v13031_v2 = vadd.f32 %v4579_v51, %v12719_v19  ;;  %v10602_v42 = vld [vmem:[#allocation8 + $0x16c] ss:$12 sps:$4 sm:$0xff]  }
 0xbdf   : > { %v9493_v0 = vpop.f32.mrb[104].mxu1  ;;  %9996 = vmatpush3.bf16.msra.mxu0 %v10595_v53 }
 0xbe0   : > { %4619 = vadd.xlane.f32.xlu0 %v13031_v2  ;;  %v13035_v31 = vadd.f32 %v4582_v39, %v12722_v10  ;;  %v9494_v22 = vpop.f32.mrb[105].mxu1  ;;  %v4643_v62 = vmul.f32 %v13031_v2, %v13031_v2  ;;  %9997 = vmatprep.subr.bf16.mxu0 %v10599_v12 }
 0xbe1   : > { %v9533_v9 = vpop.f32.mrb[104].mxu0  ;;  %v9495_v23 = vadd.f32 %v9494_v22, %v9493_v0  ;;  %v9496_v47 = vpop.f32.mrb[106].mxu1 }
 0xbe2   : > { %4621 = vadd.xlane.f32.xlu1 %v13035_v31  ;;  %v9534_v33 = vpop.f32.mrb[105].mxu0  ;;  %v9497_v49 = vpop.f32.mrb[107].mxu1  ;;  %v4644_v10 = vmul.f32 %v13035_v31, %v13035_v31 }
 0xbe3   : > { %v4522_v19 = vadd.f32 %v9495_v23, %v13026_v21  ;;  %v9535_v15 = vadd.f32 %v9534_v33, %v9533_v9  ;;  %v9536_v13 = vpop.f32.mrb[106].mxu0  ;;  %v9498_v4 = vadd.f32 %v9497_v49, %v9496_v47  ;;  %9998 = vmatpush3.bf16.msra.mxu0 %v10599_v12  ;;  %v10600_v23 = vld [vmem:[#allocation8 + $0x168] ss:$12 sps:$4 sm:$0xff]  }
 0xbe4   : > { %4651 = vadd.xlane.f32.xlu0 %v4643_v62  ;;  %v9537_v3 = vpop.f32.mrb[107].mxu0  ;;  %9999 = vmatprep.subr.bf16.mxu0 %v10603_v55 }
 0xbe5   : > { %v4587_v46 = vadd.f32 %v9535_v15, %v4522_v19  ;;  %v4525_v17 = vadd.f32 %v9498_v4, %v13026_v21  ;;  %v9538_v54 = vadd.f32 %v9537_v3, %v9536_v13  ;;  %v10604_v19 = vld [vmem:[#allocation8 + $0x158] ss:$12 sps:$4 sm:$0xff]  }
 0xbe6   : > { %4653 = vadd.xlane.f32.xlu1 %v4644_v10 }
 0xbe7   : > { %v4590_v38 = vadd.f32 %v9538_v54, %v4525_v17  ;;  %v13045_v27 = vadd.f32 %v4587_v46, %v12732_v60  ;;  %v10579_v60 = vld [vmem:[#allocation8 + $0xdc] ss:$12 sps:$4 sm:$0xff]   ;;  %10000 = vmatpush3.bf16.msra.mxu0 %v10603_v55 }
 0xbe8   : > { %4944 = vmatprep.subr.bf16.mxu1 %v10579_v60  ;;  %10001 = vmatprep.subr.bf16.mxu0 %v10604_v19 }
 0xbe9   : > { %4623 = vadd.xlane.f32.xlu0 %v13045_v27  ;;  %v13049_v25 = vadd.f32 %v4590_v38, %v12735_v18  ;;  %v4645_v28 = vmul.f32 %v13045_v27, %v13045_v27  ;;  %4945 = vmatpush1.bf16.msra.mxu1 %v10577_v34  ;;  %v10582_v18 = vld [vmem:[#allocation8 + $0xf4] ss:$12 sps:$4 sm:$0xff]   ;;  %v10605_v38 = vld [vmem:[#allocation8 + $0x170] ss:$12 sps:$4 sm:$0xff]  }
 0xbea   : > { %4946 = vmatprep.subr.bf16.mxu1 %v10582_v18 }
 0xbeb   : > { %4625 = vadd.xlane.f32.xlu1 %v13049_v25  ;;  %v4646_v20 = vmul.f32 %v13049_v25, %v13049_v25  ;;  %10002 = vmatpush3.bf16.msra.mxu0 %v10604_v19 }
 0xbec   : > { %10003 = vmatprep.subr.bf16.mxu0 %v10605_v38 }
 0xbed   : > { %4655 = vadd.xlane.f32.xlu0 %v4645_v28  ;;  %4947 = vmatpush1.bf16.msra.mxu1 %v10580_v6 }
 0xbee   : > { %4948 = vmatprep.subr.bf16.mxu1 %v10586_v35 }
 0xbef   : > { %4657 = vadd.xlane.f32.xlu1 %v4646_v20  ;;  %10004 = vmatpush3.bf16.msra.mxu0 %v10605_v38 }
 0xbf0   : > { %10025 = vmatprep.subr.bf16.mxu0 %v14472_v5 }
 0xbf1   : > { %4949 = vmatpush1.bf16.msra.mxu1 %v10584_v48 }
 0xbf2   : > { %4950 = vmatprep.subr.bf16.mxu1 %v10590_v44 }
 0xbf5   : > { %4951 = vmatpush1.bf16.msra.mxu1 %v10588_v30 }
 0xbf6   : > { %4952 = vmatprep.subr.bf16.mxu1 %v10594_v57 }
 0xbf9   : > { %4953 = vmatpush1.bf16.msra.mxu1 %v10592_v52 }
 0xbfa   : > { %4954 = vmatprep.subr.bf16.mxu1 %v10598_v1 }
 0xbfd   : > { %4955 = vmatpush1.bf16.msra.mxu1 %v10596_v14 }
 0xbfe   : > { %4956 = vmatprep.subr.bf16.mxu1 %v10602_v42 }
 0xc01   : > { %4957 = vmatpush1.bf16.msra.mxu1 %v10600_v23 }
 0xc02   : > { %10013 = vmatprep.subr.bf16.mxu1 %v14472_v5 }
 0xc11   : > { %v9499_v8 = vpop.f32.mrb[108].mxu1 }
 0xc12   : > { %v9500_v51 = vpop.f32.mrb[109].mxu1 }
 0xc13   : > { %v9539_v16 = vpop.f32.mrb[108].mxu0  ;;  %v9501_v39 = vadd.f32 %v9500_v51, %v9499_v8  ;;  %v9502_v0 = vpop.f32.mrb[110].mxu1 }
 0xc14   : > { %v9540_v22 = vpop.f32.mrb[109].mxu0  ;;  %v9503_v9 = vpop.f32.mrb[111].mxu1 }
 0xc15   : > { %v4530_v47 = vadd.f32 %v9501_v39, %v13026_v21  ;;  %v9541_v62 = vadd.f32 %v9540_v22, %v9539_v16  ;;  %v9542_v33 = vpop.f32.mrb[110].mxu0  ;;  %v9504_v49 = vadd.f32 %v9503_v9, %v9502_v0 }
 0xc16   : > { %v9543_v15 = vpop.f32.mrb[111].mxu0 }
 0xc17   : > { %v4595_v13 = vadd.f32 %v9541_v62, %v4530_v47  ;;  %v4533_v4 = vadd.f32 %v9504_v49, %v13026_v21  ;;  %v9544_v10 = vadd.f32 %v9543_v15, %v9542_v33 }
 0xc19   : > { %v4598_v3 = vadd.f32 %v9544_v10, %v4533_v4  ;;  %v9505_v46 = vpop.f32.mrb[112].mxu1  ;;  %v13059_v17 = vadd.f32 %v4595_v13, %v12747_v43 }
 0xc1a   : > { %v9506_v54 = vpop.f32.mrb[113].mxu1 }
 0xc1b   : > { %v9545_v28 = vpop.f32.mrb[112].mxu0  ;;  %v9507_v20 = vadd.f32 %v9506_v54, %v9505_v46  ;;  %4627 = vadd.xlane.f32.xlu0 %v13059_v17  ;;  %v9508_v58 = vpop.f32.mrb[114].mxu1  ;;  %v13064_v11 = vadd.f32 %v4598_v3, %v12750_v45  ;;  %v4647_v35 = vmul.f32 %v13059_v17, %v13059_v17 }
 0xc1c   : > { %v9546_v60 = vpop.f32.mrb[113].mxu0  ;;  %v9509_v34 = vpop.f32.mrb[115].mxu1 }
 0xc1d   : > { %v4538_v18 = vadd.f32 %v9507_v20, %v13026_v21  ;;  %v9547_v43 = vadd.f32 %v9546_v60, %v9545_v28  ;;  %v9548_v40 = vpop.f32.mrb[114].mxu0  ;;  %v9510_v6 = vadd.f32 %v9509_v34, %v9508_v58  ;;  %4629 = vadd.xlane.f32.xlu1 %v13064_v11  ;;  %v4648_v29 = vmul.f32 %v13064_v11, %v13064_v11 }
 0xc1e   : > { %v9549_v63 = vpop.f32.mrb[115].mxu0 }
 0xc1f   : > { %v4603_v48 = vadd.f32 %v9547_v43, %v4538_v18  ;;  %v4541_v44 = vadd.f32 %v9510_v6, %v13026_v21  ;;  %v9550_v45 = vadd.f32 %v9549_v63, %v9548_v40  ;;  %4659 = vadd.xlane.f32.xlu0 %v4647_v35  ;;  %v13087_v43 = vld [vmem:[#allocation16] ss:$0 sm:$0xff] }
 0xc21   : > { %v4606_v30 = vadd.f32 %v9550_v45, %v4541_v44  ;;  %4661 = vadd.xlane.f32.xlu1 %v4648_v29  ;;  %v13074_v57 = vadd.f32 %v4603_v48, %v12760_v26  ;;  %v13091_v44 = vld [vmem:[#allocation17] ss:$0 sm:$0xff] }
 0xc23   : > { %4631 = vadd.xlane.f32.xlu0 %v13074_v57  ;;  %v13079_v53 = vadd.f32 %v4606_v30, %v12763_v24  ;;  %v4649_v21 = vmul.f32 %v13074_v57, %v13074_v57 }
 0xc25   : > { %4633 = vadd.xlane.f32.xlu1 %v13079_v53  ;;  %v4650_v52 = vmul.f32 %v13079_v53, %v13079_v53 }
 0xc27   : > { %4663 = vadd.xlane.f32.xlu0 %v4649_v21 }
 0xc29   : > { %4665 = vadd.xlane.f32.xlu1 %v4650_v52 }
 0xc6d   : > { %v4620_v1 = vpop.xlane.xlu0 %4619 }
 0xc6e   : > { %v4635_v26 = vmul.f32 0.0078125, %v4620_v1 }
 0xc6f   : > { %v4622_v12 = vpop.xlane.xlu1 %4621 }
 0xc70   : > { %v4636_v14 = vmul.f32 0.0078125, %v4622_v12  ;;  %v4675_v42 = vmul.f32 %v4635_v26, %v4635_v26  ;;  %v4699_v60 = vsub.f32 %v13031_v2, %v4635_v26 }
 0xc71   : > { %v4652_v8 = vpop.xlane.xlu0 %4651 }
 0xc72   : > { %v4667_v55 = vmul.f32 0.0078125, %v4652_v8  ;;  %v4676_v24 = vmul.f32 %v4636_v14, %v4636_v14  ;;  %v4700_v40 = vsub.f32 %v13035_v31, %v4636_v14 }
 0xc73   : > { %v4654_v51 = vpop.xlane.xlu1 %4653 }
 0xc74   : > { %v4683_v16 = vsub.f32 %v4667_v55, %v4675_v42  ;;  %v4668_v39 = vmul.f32 0.0078125, %v4654_v51 }
 0xc76   : > { %v4691_v0 = vmax.f32 %v4683_v16, 0.0  ;;  %v4684_v22 = vsub.f32 %v4668_v39, %v4676_v24  ;;  %v4624_v9 = vpop.xlane.xlu0 %4623 }
 0xc77   : > { %v4637_v62 = vmul.f32 0.0078125, %v4624_v9 }
 0xc78   : > { %v4707_v23 = vadd.f32 1e-12, %v4691_v0  ;;  %v4692_v47 = vmax.f32 %v4684_v22, 0.0  ;;  %v4626_v33 = vpop.xlane.xlu1 %4625 }
 0xc79   : > { %v4638_v19 = vmul.f32 0.0078125, %v4626_v33  ;;  %v4677_v13 = vmul.f32 %v4637_v62, %v4637_v62  ;;  %v4701_v30 = vsub.f32 %v13045_v27, %v4637_v62 }
 0xc7a   : > { %10870 = vrsqrt.f32 %v4707_v23  ;;  %v4708_v49 = vadd.f32 1e-12, %v4692_v47  ;;  %v4656_v15 = vpop.xlane.xlu0 %4655 }
 0xc7b   : > { %v4669_v4 = vmul.f32 0.0078125, %v4656_v15  ;;  %v4678_v3 = vmul.f32 %v4638_v19, %v4638_v19  ;;  %v4702_v52 = vsub.f32 %v13049_v25, %v4638_v19 }
 0xc7c   : > { %10872 = vrsqrt.f32 %v4708_v49  ;;  %v4658_v10 = vpop.xlane.xlu1 %4657 }
 0xc7d   : > { %v4685_v46 = vsub.f32 %v4669_v4, %v4677_v13  ;;  %v4670_v54 = vmul.f32 0.0078125, %v4658_v10 }
 0xc7f   : > { %v4693_v38 = vmax.f32 %v4685_v46, 0.0  ;;  %v4686_v28 = vsub.f32 %v4670_v54, %v4678_v3 }
 0xc81   : > { %v4709_v20 = vadd.f32 1e-12, %v4693_v38  ;;  %v4694_v58 = vmax.f32 %v4686_v28, 0.0 }
 0xc83   : > { %10874 = vrsqrt.f32 %v4709_v20  ;;  %v4710_v18 = vadd.f32 1e-12, %v4694_v58 }
 0xc84   : > { %v10871_v34 = vpop.eup %10870 }
 0xc85   : > { %v4723_v6 = vmul.f32 %v10871_v34, %v4699_v60  ;;  %10876 = vrsqrt.f32 %v4710_v18 }
 0xc86   : > { %v10873_v35 = vpop.eup %10872 }
 0xc87   : > { %v4724_v63 = vmul.f32 %v10873_v35, %v4700_v40  ;;  %v4737_v48 = vmul.f32 %v13087_v43, %v4723_v6 }
 0xc89   : > { %v4738_v45 = vmul.f32 %v13087_v43, %v4724_v63  ;;  %v13095_v29 = vadd.f32 %v13091_v44, %v4737_v48 }
 0xc8b   : > { %v13098_v2 = vadd.f32 %v13091_v44, %v4738_v45 }
 0xc8d   : > { %v4759_v31 = vpack.c.bf16 %v13098_v2, %v13095_v29  ;;  %v10875_v21 = vpop.eup %10874 }
 0xc8e   : > { %v4725_v1 = vmul.f32 %v10875_v21, %v4701_v30 }
 0xc8f   : > { %4975 = vmatmul.mubr.bf16.vlgmr.msra.gmra.mrb[116].mxu1 %v4759_v31  ;;  %10005 = vmatprep.mubr.bf16.mxu0 %v4759_v31  ;;  %v10877_v26 = vpop.eup %10876 }
 0xc90   : > { %4984 = vmatprep.mubr.bf16.mxu1 %v14473_v61  ;;  %v4726_v12 = vmul.f32 %v10877_v26, %v4702_v52  ;;  %v4739_v14 = vmul.f32 %v13087_v43, %v4725_v1 }
 0xc92   : > { %v4740_v8 = vmul.f32 %v13087_v43, %v4726_v12  ;;  %v13108_v42 = vadd.f32 %v13091_v44, %v4739_v14 }
 0xc94   : > { %v13111_v27 = vadd.f32 %v13091_v44, %v4740_v8 }
 0xc96   : > { %v4760_v25 = vpack.c.bf16 %v13111_v27, %v13108_v42 }
 0xc98   : > { %4985 = vmatmul.mubr.bf16.gmra.mrb[120].mxu1 %v4760_v25  ;;  %10006 = vmatmul.mubr.bf16.vlgmr.msra.gmra.mrb[116].mxu0 %v4760_v25 }
 0xc99   : > { %4994 = vmatprep.mubr.bf16.mxu1 %v14473_v61 }
 0xca8   : > { %v4628_v55 = vpop.xlane.xlu0 %4627 }
 0xca9   : > { %v4639_v51 = vmul.f32 0.0078125, %v4628_v55 }
 0xcaa   : > { %v4630_v24 = vpop.xlane.xlu1 %4629 }
 0xcab   : > { %v4640_v16 = vmul.f32 0.0078125, %v4630_v24  ;;  %v4679_v0 = vmul.f32 %v4639_v51, %v4639_v51  ;;  %v4703_v48 = vsub.f32 %v13059_v17, %v4639_v51 }
 0xcac   : > { %v4660_v39 = vpop.xlane.xlu0 %4659 }
 0xcad   : > { %v4671_v22 = vmul.f32 0.0078125, %v4660_v39  ;;  %v4680_v23 = vmul.f32 %v4640_v16, %v4640_v16  ;;  %v4704_v30 = vsub.f32 %v13064_v11, %v4640_v16 }
 0xcae   : > { %v4662_v9 = vpop.xlane.xlu1 %4661 }
 0xcaf   : > { %v4687_v47 = vsub.f32 %v4671_v22, %v4679_v0  ;;  %v4672_v62 = vmul.f32 0.0078125, %v4662_v9 }
 0xcb0   : > { %v4632_v33 = vpop.xlane.xlu0 %4631 }
 0xcb1   : > { %v4695_v49 = vmax.f32 %v4687_v47, 0.0  ;;  %v4688_v19 = vsub.f32 %v4672_v62, %v4680_v23  ;;  %v4641_v15 = vmul.f32 0.0078125, %v4632_v33 }
 0xcb2   : > { %v4634_v13 = vpop.xlane.xlu1 %4633 }
 0xcb3   : > { %v4711_v4 = vadd.f32 1e-12, %v4695_v49  ;;  %v4696_v10 = vmax.f32 %v4688_v19, 0.0  ;;  %v4642_v3 = vmul.f32 0.0078125, %v4634_v13  ;;  %v4681_v38 = vmul.f32 %v4641_v15, %v4641_v15 }
 0xcb4   : > { %v4664_v46 = vpop.xlane.xlu0 %4663  ;;  %v4705_v12 = vsub.f32 %v13074_v57, %v4641_v15 }
 0xcb5   : > { %10878 = vrsqrt.f32 %v4711_v4  ;;  %v4712_v54 = vadd.f32 1e-12, %v4696_v10  ;;  %v4673_v28 = vmul.f32 0.0078125, %v4664_v46  ;;  %v4682_v58 = vmul.f32 %v4642_v3, %v4642_v3 }
 0xcb6   : > { %v4666_v20 = vpop.xlane.xlu1 %4665  ;;  %v4706_v25 = vsub.f32 %v13079_v53, %v4642_v3 }
 0xcb7   : > { %10880 = vrsqrt.f32 %v4712_v54  ;;  %v4689_v60 = vsub.f32 %v4673_v28, %v4681_v38  ;;  %v4674_v34 = vmul.f32 0.0078125, %v4666_v20 }
 0xcb9   : > { %v4697_v18 = vmax.f32 %v4689_v60, 0.0  ;;  %v4690_v40 = vsub.f32 %v4674_v34, %v4682_v58 }
 0xcbb   : > { %v4713_v6 = vadd.f32 1e-12, %v4697_v18  ;;  %v4698_v35 = vmax.f32 %v4690_v40, 0.0 }
 0xcbd   : > { %10882 = vrsqrt.f32 %v4713_v6  ;;  %v4714_v63 = vadd.f32 1e-12, %v4698_v35 }
 0xcbf   : > { %v10879_v45 = vpop.eup %10878  ;;  %10884 = vrsqrt.f32 %v4714_v63 }
 0xcc0   : > { %v4727_v31 = vmul.f32 %v10879_v45, %v4703_v48 }
 0xcc1   : > { %v10881_v21 = vpop.eup %10880 }
 0xcc2   : > { %v4728_v52 = vmul.f32 %v10881_v21, %v4704_v30  ;;  %v4741_v1 = vmul.f32 %v13087_v43, %v4727_v31 }
 0xcc4   : > { %v4742_v26 = vmul.f32 %v13087_v43, %v4728_v52  ;;  %v13122_v14 = vadd.f32 %v13091_v44, %v4741_v1 }
 0xcc6   : > { %v13125_v8 = vadd.f32 %v13091_v44, %v4742_v26 }
 0xcc7   : > { %v10883_v17 = vpop.eup %10882 }
 0xcc8   : > { %v4761_v11 = vpack.c.bf16 %v13125_v8, %v13122_v14  ;;  %v4729_v55 = vmul.f32 %v10883_v17, %v4705_v12 }
 0xcc9   : > { %v10885_v51 = vpop.eup %10884 }
 0xcca   : > { %4995 = vmatmul.mubr.bf16.gmra.mrb[124].mxu1 %v4761_v11  ;;  %10009 = vmatprep.mubr.bf16.mxu0 %v4761_v11  ;;  %v4730_v24 = vmul.f32 %v10885_v51, %v4706_v25  ;;  %v4743_v16 = vmul.f32 %v13087_v43, %v4729_v55 }
 0xccb   : > { %5004 = vmatprep.mubr.bf16.mxu1 %v14473_v61 }
 0xccc   : > { %v4744_v57 = vmul.f32 %v13087_v43, %v4730_v24  ;;  %v13134_v39 = vadd.f32 %v13091_v44, %v4743_v16  ;;  %v9137_v43 = vld [vmem:[%s14465_s5 + $0x3] sm:$0x7] }
 0xccd   : > { %v13149_v22 = vrot.slane %v9137_v43, %v14477_v56  ;;  %v13153_v33 = vrot.slane %v9137_v43, %v12085_v37  ;;  %v13161_v13 = vrot.slane %v9137_v43, %v12088_v41 }
 0xcce   : > { %v13137_v0 = vadd.f32 %v13091_v44, %v4744_v57 }
 0xcd0   : > { %v4762_v53 = vpack.c.bf16 %v13137_v0, %v13134_v39 }
 0xcd2   : > { %5005 = vmatmul.mubr.bf16.gmra.mrb[128].mxu1 %v4762_v53  ;;  %10010 = vmatmul.mubr.bf16.gmra.mrb[120].mxu0 %v4762_v53 }
 0xcd3   : > { %10015 = vmatprep.mubr.msk.bf16.mxu1 %vm11466_vm0, %v14472_v5  ;;  %10027 = vmatprep.mubr.msk.bf16.mxu0 %vm11466_vm0, %v14472_v5 }
 0xd62   : > { %v4976_v44 = vpop.f32.mrb[116].mxu1 }
 0xd63   : > { %v4978_v9 = vpop.f32.mrb[117].mxu1  ;;  %v4977_v4 = vadd.f32 %v4976_v44, %v13153_v33 }
 0xd64   : > { %v4979_v23 = vadd.f32 %v4978_v9, %v13149_v22  ;;  %v4980_v47 = vpop.f32.mrb[118].mxu1 }
 0xd65   : > { %v4982_v62 = vpop.f32.mrb[119].mxu1  ;;  %v13172_v20 = vpack.c.bf16 %v4977_v4, %v4977_v4  ;;  %v4981_v45 = vadd.f32 %v4980_v47, %v13153_v33 }
 0xd66   : > { %v13155_v49 = vpack.c.bf16 %v4979_v23, %v4979_v23  ;;  %v4983_v15 = vadd.f32 %v4982_v62, %v13149_v22 }
 0xd67   : > { %v13197_v52 = vpack.c.bf16 %v4981_v45, %v4981_v45 }
 0xd68   : > { %v5173_v19 = vsel %vm1458_vm1, %v13155_v49, 0  ;;  %v13165_v10 = vpack.c.bf16 %v4983_v15, %v4983_v15 }
 0xd69   : > { %10014 = vmatpush3.bf16.xpose.msra.mxu1 %v5173_v19 }
 0xd6a   : > { %10019 = vmatprep.subr.bf16.mxu1 %v14472_v5  ;;  %v5219_v35 = vsel %vm1458_vm1, %v13165_v10, 0 }
 0xd6b   : > { %v4986_v3 = vpop.f32.mrb[120].mxu1  ;;  %v10007_v46 = vpop.f32.mrb[116].mxu0 }
 0xd6c   : > { %v13168_v54 = vadd.f32 %v10007_v46, %v13161_v13  ;;  %v4988_v38 = vpop.f32.mrb[121].mxu1  ;;  %v13170_v28 = vpop.f32.mrb[117].mxu0  ;;  %v4987_v31 = vadd.f32 %v4986_v3, %v13153_v33 }
 0xd6d   : > { %v4989_v58 = vadd.f32 %v4988_v38, %v13149_v22  ;;  %v4990_v60 = vpop.f32.mrb[122].mxu1  ;;  %v10008_v34 = vpop.f32.mrb[118].mxu0 }
 0xd6e   : > { %v13176_v18 = vadd.f32 %v10008_v34, %v13161_v13  ;;  %v4992_v40 = vpop.f32.mrb[123].mxu1  ;;  %v13178_v6 = vpop.f32.mrb[119].mxu0  ;;  %v13199_v1 = vpack.c.bf16 %v4987_v31, %v4987_v31  ;;  %v4991_v12 = vadd.f32 %v4990_v60, %v13153_v33  ;;  %v5050_v31 = vadd.f32 %v13170_v28, %v13161_v13 }
 0xd6f   : > { %v13182_v63 = vpack.c.bf16 %v4989_v58, %v4989_v58  ;;  %v4993_v48 = vadd.f32 %v4992_v40, %v13149_v22 }
 0xd70   : > { %10016 = vmatmul.mubr.msk.bf16.vlgmr.msra.gmra.mrb[132].mxu1 %vm1458_vm1, %v13172_v20  ;;  %v13213_v17 = vpack.c.bf16 %v4991_v12, %v4991_v12 }
 0xd71   : > { %10020 = vmatpush3.bf16.xpose.msra.mxu1 %v5219_v35  ;;  %10021 = vmatprep.mubr.msk.bf16.mxu1 %vm11466_vm0, %v14472_v5  ;;  %v5265_v30 = vsel %vm1458_vm1, %v13182_v63, 0  ;;  %v13194_v21 = vpack.c.bf16 %v4993_v48, %v4993_v48 }
 0xd72   : > { %10031 = vmatprep.subr.bf16.mxu1 %v14472_v5  ;;  %10026 = vmatpush3.bf16.xpose.msra.mxu0 %v5265_v30 }
 0xd73   : > { %10037 = vmatprep.subr.bf16.mxu0 %v14472_v5  ;;  %v5311_v26 = vsel %vm1458_vm1, %v13194_v21, 0 }
 0xd78   : > { %10022 = vmatmul.mubr.msk.bf16.vlgmr.msra.gmra.mrb[136].mxu1 %vm1458_vm1, %v13197_v52 }
 0xd79   : > { %10032 = vmatpush3.bf16.xpose.msra.mxu1 %v5311_v26  ;;  %10033 = vmatprep.mubr.msk.bf16.mxu1 %vm11466_vm0, %v14472_v5 }
 0xd7a   : > { %10028 = vmatmul.mubr.msk.bf16.vlgmr.msra.gmra.mrb[124].mxu0 %vm1458_vm1, %v13199_v1  ;;  %10043 = vmatprep.subr.bf16.mxu1 %v14472_v5 }
 0xd7b   : > { %10039 = vmatprep.mubr.msk.bf16.mxu0 %vm11466_vm0, %v14472_v5 }
 0xd80   : > { %10034 = vmatmul.mubr.msk.bf16.vlgmr.msra.gmra.mrb[140].mxu1 %vm1458_vm1, %v13213_v17 }
 0xd81   : > { %10045 = vmatprep.mubr.msk.bf16.mxu1 %vm11466_vm0, %v14472_v5 }
 0xd9d   : > { %v4996_v25 = vpop.f32.mrb[124].mxu1 }
 0xd9e   : > { %v4998_v11 = vpop.f32.mrb[125].mxu1  ;;  %v4997_v44 = vadd.f32 %v4996_v25, %v13153_v33 }
 0xd9f   : > { %v4999_v55 = vadd.f32 %v4998_v11, %v13149_v22  ;;  %v5000_v51 = vpop.f32.mrb[126].mxu1 }
 0xda0   : > { %v5002_v24 = vpop.f32.mrb[127].mxu1  ;;  %v5001_v4 = vadd.f32 %v5000_v51, %v13153_v33  ;;  %v13243_v35 = vpack.c.bf16 %v4997_v44, %v4997_v44 }
 0xda1   : > { %v13220_v16 = vpack.c.bf16 %v4999_v55, %v4999_v55  ;;  %v5003_v57 = vadd.f32 %v5002_v24, %v13149_v22  ;;  %v13273_v55 = vpack.c.bf16 %v5050_v31, %v5050_v31 }
 0xda2   : > { %v13253_v26 = vpack.c.bf16 %v5001_v4, %v5001_v4 }
 0xda3   : > { %v5357_v53 = vsel %vm1458_vm1, %v13220_v16, 0  ;;  %v13225_v43 = vpack.c.bf16 %v5003_v57, %v5003_v57  ;;  %v5637_v24 = vsel %vm1927_vm2, %v13273_v55, 0 }
 0xda4   : > { %10038 = vmatpush3.bf16.xpose.msra.mxu0 %v5357_v53 }
 0xda5   : > { %v5403_v9 = vsel %vm1458_vm1, %v13225_v43, 0  ;;  %v5006_v23 = vpop.f32.mrb[128].mxu1  ;;  %v10011_v47 = vpop.f32.mrb[120].mxu0  ;;  %10049 = vmatprep.subr.bf16.mxu0 %v14472_v5 }
 0xda6   : > { %v13232_v62 = vadd.f32 %v10011_v47, %v13161_v13  ;;  %v5008_v19 = vpop.f32.mrb[129].mxu1  ;;  %v5065_v15 = vpop.f32.mrb[121].mxu0  ;;  %10044 = vmatpush3.bf16.xpose.msra.mxu1 %v5403_v9  ;;  %v5007_v11 = vadd.f32 %v5006_v23, %v13153_v33 }
 0xda7   : > { %v5009_v3 = vadd.f32 %v5008_v19, %v13149_v22  ;;  %v13237_v46 = vadd.f32 %v5065_v15, %v13161_v13  ;;  %v5010_v38 = vpop.f32.mrb[130].mxu1  ;;  %v10012_v58 = vpop.f32.mrb[122].mxu0  ;;  %10055 = vmatprep.subr.bf16.mxu1 %v14472_v5 }
 0xda8   : > { %v13241_v60 = vadd.f32 %v10012_v58, %v13161_v13  ;;  %v5012_v34 = vpop.f32.mrb[131].mxu1  ;;  %v5068_v40 = vpop.f32.mrb[123].mxu0  ;;  %v5011_v51 = vadd.f32 %v5010_v38, %v13153_v33 }
 0xda9   : > { %v13245_v48 = vpack.c.bf16 %v5009_v3, %v5009_v3  ;;  %v5013_v45 = vadd.f32 %v5012_v34, %v13149_v22  ;;  %v13249_v30 = vadd.f32 %v5068_v40, %v13161_v13  ;;  %v5053_v22 = vadd.f32 %v13178_v6, %v13161_v13 }
 0xdaa   : > { %v13279_v6 = vpack.c.bf16 %v5007_v11, %v5007_v11  ;;  %v13283_v57 = vpack.c.bf16 %v5011_v51, %v5011_v51 }
 0xdab   : > { %v5449_v12 = vsel %vm1458_vm1, %v13245_v48, 0  ;;  %v13257_v25 = vpack.c.bf16 %v5013_v45, %v5013_v45  ;;  %10040 = vmatmul.mubr.msk.bf16.vlgmr.msra.gmra.mrb[128].mxu0 %vm1458_vm1, %v13243_v35  ;;  %v13277_v13 = vpack.c.bf16 %v5053_v22, %v5053_v22 }
 0xdac   : > { %10050 = vmatpush3.bf16.xpose.msra.mxu0 %v5449_v12  ;;  %10051 = vmatprep.mubr.msk.bf16.mxu0 %vm11466_vm0, %v14472_v5 }
 0xdad   : > { %v5495_v28 = vsel %vm1458_vm1, %v13257_v25, 0  ;;  %10046 = vmatmul.mubr.msk.bf16.vlgmr.msra.gmra.mrb[144].mxu1 %vm1458_vm1, %v13253_v26  ;;  %10061 = vmatprep.subr.bf16.mxu0 %v14472_v5  ;;  %v5683_v33 = vsel %vm1927_vm2, %v13277_v13, 0 }
 0xdae   : > { %10056 = vmatpush3.bf16.xpose.msra.mxu1 %v5495_v28  ;;  %10057 = vmatprep.mubr.msk.bf16.mxu1 %vm11466_vm0, %v14472_v5 }
 0xdaf   : > { %10067 = vmatprep.subr.bf16.mxu1 %v14472_v5 }
 0xdb3   : > { %10052 = vmatmul.mubr.msk.bf16.vlgmr.msra.gmra.mrb[132].mxu0 %vm1458_vm1, %v13279_v6 }
 0xdb4   : > { %10062 = vmatpush3.bf16.msra.mxu0 %v5637_v24  ;;  %10063 = vmatprep.mubr.msk.bf16.mxu0 %vm11466_vm0, %v14472_v5 }
 0xdb5   : > { %10058 = vmatmul.mubr.msk.bf16.vlgmr.msra.gmra.mrb[148].mxu1 %vm1458_vm1, %v13283_v57  ;;  %10073 = vmatprep.subr.bf16.mxu0 %v14472_v5 }
 0xdb6   : > { %10068 = vmatpush3.bf16.msra.mxu1 %v5683_v33  ;;  %10069 = vmatprep.mubr.msk.bf16.mxu1 %vm11466_vm0, %v14472_v5 }
 0xdb7   : > { %10079 = vmatprep.subr.bf16.mxu1 %v14472_v5 }
 0xe43   : > { %v5209_v53 = vpop.f32.mrb[132].mxu1 }
 0xe44   : > { %v5210_v44 = vadd.f32 %v5209_v53, %v12241_v32  ;;  %v10017_v9 = vpop.f32.mrb[133].mxu1 }
 0xe45   : > { %v5212_v23 = vpop.f32.mrb[134].mxu1 }
 0xe46   : > { %v10018_v47 = vpop.f32.mrb[135].mxu1  ;;  %v5537_v19 = vsel %vm1827_vm4, %v5210_v44, -inf }
 0xe47   : > { %5538 = vmax.xlane.f32.xlu0 %v5537_v19 }
 0xe4b   : > { %v5255_v15 = vpop.f32.mrb[136].mxu1 }
 0xe4c   : > { %v5256_v4 = vadd.f32 %v5255_v15, %v12249_v7  ;;  %v10023_v3 = vpop.f32.mrb[137].mxu1 }
 0xe4d   : > { %v5301_v38 = vpop.f32.mrb[124].mxu0  ;;  %v5258_v58 = vpop.f32.mrb[138].mxu1 }
 0xe4e   : > { %v5302_v34 = vadd.f32 %v5301_v38, %v12252_v36  ;;  %v10029_v40 = vpop.f32.mrb[125].mxu0  ;;  %v10024_v45 = vpop.f32.mrb[139].mxu1  ;;  %v5540_v31 = vsel %vm1827_vm4, %v5256_v4, -inf  ;;  %v14478_v38 = vld [vmem:[#allocation32_spill] sm:$0xff] }
 0xe4f   : > { %v5304_v12 = vpop.f32.mrb[126].mxu0  ;;  %5541 = vmax.xlane.f32.xlu1 %v5540_v31 }
 0xe50   : > { %v10030_v22 = vpop.f32.mrb[127].mxu0  ;;  %v5543_v11 = vsel %vm1827_vm4, %v5302_v34, -inf }
 0xe51   : > { %5544 = vmax.xlane.f32.xlu0 %v5543_v11 }
 0xe53   : > { %v5347_v28 = vpop.f32.mrb[140].mxu1 }
 0xe54   : > { %v5348_v51 = vadd.f32 %v5347_v28, %v12265_v50  ;;  %v10035_v24 = vpop.f32.mrb[141].mxu1 }
 0xe55   : > { %v5350_v33 = vpop.f32.mrb[142].mxu1  ;;  %v14479_v24 = vld [vmem:[#allocation33_spill] sm:$0xff] }
 0xe56   : > { %v10036_v53 = vpop.f32.mrb[143].mxu1  ;;  %v5546_v9 = vsel %vm1827_vm4, %v5348_v51, -inf }
 0xe57   : > { %5547 = vmax.xlane.f32.xlu1 %v5546_v9 }
 0xe7e   : > { %v5393_v23 = vpop.f32.mrb[128].mxu0 }
 0xe7f   : > { %v5394_v47 = vadd.f32 %v5393_v23, %v12268_v59  ;;  %v10041_v19 = vpop.f32.mrb[129].mxu0 }
 0xe80   : > { %v5396_v15 = vpop.f32.mrb[130].mxu0  ;;  %v5439_v3 = vpop.f32.mrb[144].mxu1  ;;  %v14480_v19 = vld [vmem:[#allocation34_spill] sm:$0xff] }
 0xe81   : > { %v5440_v58 = vadd.f32 %v5439_v3, %v14478_v38  ;;  %v10042_v40 = vpop.f32.mrb[131].mxu0  ;;  %v10047_v45 = vpop.f32.mrb[145].mxu1  ;;  %v5549_v31 = vsel %vm1827_vm4, %v5394_v47, -inf }
 0xe82   : > { %5550 = vmax.xlane.f32.xlu0 %v5549_v31  ;;  %v5442_v12 = vpop.f32.mrb[146].mxu1 }
 0xe83   : > { %v10048_v22 = vpop.f32.mrb[147].mxu1  ;;  %v5552_v11 = vsel %vm1827_vm4, %v5440_v58, -inf }
 0xe84   : > { %5553 = vmax.xlane.f32.xlu1 %v5552_v11 }
 0xe86   : > { %v5485_v28 = vpop.f32.mrb[132].mxu0 }
 0xe87   : > { %v5486_v33 = vadd.f32 %v5485_v28, %v14479_v24  ;;  %v10053_v53 = vpop.f32.mrb[133].mxu0 }
 0xe88   : > { %v5488_v9 = vpop.f32.mrb[134].mxu0  ;;  %v5531_v23 = vpop.f32.mrb[148].mxu1 }
 0xe89   : > { %v13311_v15 = vadd.f32 %v5531_v23, %v14480_v19  ;;  %v10054_v3 = vpop.f32.mrb[135].mxu0  ;;  %v10059_v40 = vpop.f32.mrb[149].mxu1  ;;  %v5555_v45 = vsel %vm1827_vm4, %v5486_v33, -inf }
 0xe8a   : > { %v5534_v56 = vpop.f32.mrb[150].mxu1  ;;  %5556 = vmax.xlane.f32.xlu0 %v5555_v45 }
 0xe8b   : > { %v10060_v31 = vpop.f32.mrb[151].mxu1  ;;  %v5558_v12 = vsel %vm1827_vm4, %v13311_v15, -inf }
 0xe8c   : > { %5559 = vmax.xlane.f32.xlu1 %v5558_v12 }
 0xed4   : > { %v5539_v22 = vpop.xlane.xlu0 %5538 }
 0xed5   : > { %v5561_v11 = vsub.f32 %v5210_v44, %v5539_v22 }
 0xed7   : > { %v5569_v28 = vmul.f32 1.442695, %v5561_v11 }
 0xed9   : > { %10886 = vpow2.f32 %v5569_v28 }
 0xedc   : > { %v5542_v53 = vpop.xlane.xlu1 %5541 }
 0xedd   : > { %v5562_v9 = vsub.f32 %v5256_v4, %v5542_v53 }
 0xede   : > { %v5545_v41 = vpop.xlane.xlu0 %5544 }
 0xedf   : > { %v5563_v23 = vsub.f32 %v5302_v34, %v5545_v41  ;;  %v5571_v37 = vmul.f32 1.442695, %v5562_v9 }
 0xee1   : > { %v5573_v3 = vmul.f32 1.442695, %v5563_v23  ;;  %10888 = vpow2.f32 %v5571_v37 }
 0xee3   : > { %v13316_v40 = vpop.eup %10886  ;;  %10890 = vpow2.f32 %v5573_v3 }
 0xee4   : > { %v5548_v56 = vpop.xlane.xlu1 %5547  ;;  %v5585_v45 = vsel %vm1827_vm4, %v13316_v40, 0.0 }
 0xee5   : > { %v5564_v31 = vsub.f32 %v5348_v51, %v5548_v56  ;;  %5586 = vadd.xlane.f32.xlu0 %v5585_v45 }
 0xee7   : > { %v5575_v12 = vmul.f32 1.442695, %v5564_v31 }
 0xee9   : > { %10892 = vpow2.f32 %v5575_v12 }
 0xeeb   : > { %v13320_v44 = vpop.eup %10888 }
 0xeec   : > { %v5588_v4 = vsel %vm1827_vm4, %v13320_v44, 0.0 }
 0xeed   : > { %v13324_v41 = vpop.eup %10890  ;;  %5589 = vadd.xlane.f32.xlu1 %v5588_v4 }
 0xeee   : > { %v5591_v37 = vsel %vm1827_vm4, %v13324_v41, 0.0 }
 0xeef   : > { %5592 = vadd.xlane.f32.xlu0 %v5591_v37 }
 0xef3   : > { %v13328_v34 = vpop.eup %10892 }
 0xef4   : > { %v5594_v51 = vsel %vm1827_vm4, %v13328_v34, 0.0 }
 0xef5   : > { %5595 = vadd.xlane.f32.xlu1 %v5594_v51 }
 0xf0f   : > { %v5551_v22 = vpop.xlane.xlu0 %5550 }
 0xf10   : > { %v5565_v11 = vsub.f32 %v5394_v47, %v5551_v22 }
 0xf11   : > { %v5554_v28 = vpop.xlane.xlu1 %5553 }
 0xf12   : > { %v5577_v53 = vmul.f32 1.442695, %v5565_v11  ;;  %v5566_v9 = vsub.f32 %v5440_v58, %v5554_v28 }
 0xf14   : > { %10894 = vpow2.f32 %v5577_v53  ;;  %v5579_v23 = vmul.f32 1.442695, %v5566_v9 }
 0xf16   : > { %10896 = vpow2.f32 %v5579_v23 }
 0xf17   : > { %v5557_v3 = vpop.xlane.xlu0 %5556 }
 0xf18   : > { %v5567_v56 = vsub.f32 %v5486_v33, %v5557_v3  ;;  %v13427_v3 = vpack.c.bf16 %v13232_v62, %v13232_v62 }
 0xf19   : > { %v5560_v33 = vpop.xlane.xlu1 %5559 }
 0xf1a   : > { %v5581_v45 = vmul.f32 1.442695, %v5567_v56  ;;  %v5568_v51 = vsub.f32 %v13311_v15, %v5560_v33  ;;  %v5913_v33 = vsel %vm1927_vm2, %v13427_v3, 0 }
 0xf1c   : > { %10898 = vpow2.f32 %v5581_v45  ;;  %v5583_v22 = vmul.f32 1.442695, %v5568_v51 }
 0xf1e   : > { %v13332_v31 = vpop.eup %10894  ;;  %10900 = vpow2.f32 %v5583_v22 }
 0xf1f   : > { %v5597_v12 = vsel %vm1827_vm4, %v13332_v31, 0.0 }
 0xf20   : > { %v13336_v4 = vpop.eup %10896  ;;  %5598 = vadd.xlane.f32.xlu0 %v5597_v12  ;;  %v13432_v12 = vpack.c.bf16 %v13241_v60, %v13241_v60 }
 0xf21   : > { %v5600_v47 = vsel %vm1827_vm4, %v13336_v4, 0.0 }
 0xf22   : > { %5601 = vadd.xlane.f32.xlu1 %v5600_v47  ;;  %v5959_v62 = vsel %vm1927_vm2, %v13432_v12, 0 }
 0xf26   : > { %v13340_v58 = vpop.eup %10898 }
 0xf27   : > { %v5603_v37 = vsel %vm1827_vm4, %v13340_v58, 0.0 }
 0xf28   : > { %5604 = vadd.xlane.f32.xlu0 %v5603_v37 }
 0xf33   : > { %6057 = vrot.lane.b32.xlu1 %v13165_v10, %s11468_s29 }
 0xf37   : > { %6005 = vrot.lane.b32.xlu1 %v13172_v20, %s11468_s29 }
 0xf3e   : > { %6007 = vrot.lane.b32.xlu0 %v13155_v49, %s11468_s29  ;;  %v13363_v49 = vpop.eup %10900 }
 0xf3f   : > { %v5606_v10 = vsel %vm1827_vm4, %v13363_v49, 0.0 }
 0xf42   : > { %6107 = vrot.lane.b32.xlu0 %v13182_v63, %s11468_s29 }
 0xf46   : > { %6105 = vrot.lane.b32.xlu0 %v13199_v1, %s11468_s29 }
 0xf4a   : > { %6207 = vrot.lane.b32.xlu0 %v13220_v16, %s11468_s29 }
 0xf4e   : > { %6205 = vrot.lane.b32.xlu0 %v13243_v35, %s11468_s29 }
 0xf52   : > { %6307 = vrot.lane.b32.xlu0 %v13245_v48, %s11468_s29  ;;  %v13394_v48 = vpack.c.bf16 %v13176_v18, %v13176_v18 }
 0xf56   : > { %6305 = vrot.lane.b32.xlu0 %v13279_v6, %s11468_s29  ;;  %v13399_v6 = vpack.c.bf16 %v13237_v46, %v13237_v46 }
 0xf58   : > { %v5821_v18 = vsel %vm1927_vm2, %v13399_v6, 0 }
 0xf5b   : > { %5607 = vadd.xlane.f32.xlu1 %v5606_v10 }
 0xf6c   : > { %6055 = vrot.lane.b32.xlu1 %v13197_v52, %s11468_s29  ;;  %v13379_v52 = vpack.c.bf16 %v13168_v54, %v13168_v54 }
 0xf70   : > { %6157 = vrot.lane.b32.xlu1 %v13194_v21, %s11468_s29 }
 0xf72   : > { %v5587_v20 = vpop.xlane.xlu0 %5586 }
 0xf73   : > { %10902 = vrcp.f32 %v5587_v20 }
 0xf74   : > { %6155 = vrot.lane.b32.xlu1 %v13213_v17, %s11468_s29 }
 0xf78   : > { %6257 = vrot.lane.b32.xlu1 %v13225_v43, %s11468_s29  ;;  %v5729_v43 = vsel %vm1927_vm2, %v13379_v52, 0 }
 0xf7a   : > { %v5590_v63 = vpop.xlane.xlu1 %5589 }
 0xf7b   : > { %10904 = vrcp.f32 %v5590_v63 }
 0xf7c   : > { %v5593_v1 = vpop.xlane.xlu0 %5592  ;;  %6255 = vrot.lane.b32.xlu1 %v13253_v26, %s11468_s29 }
 0xf7d   : > { %v10903_v16 = vpop.eup %10902  ;;  %10906 = vrcp.f32 %v5593_v1 }
 0xf7e   : > { %v5617_v21 = vmul.f32 %v10903_v16, %v13316_v40 }
 0xf80   : > { %6357 = vrot.lane.b32.xlu1 %v13257_v25, %s11468_s29  ;;  %v5625_v17 = vpack.c.bf16 %v5617_v21, %v5617_v21 }
 0xf82   : > { %v5596_v35 = vpop.xlane.xlu1 %5595  ;;  %10064 = vmatmul.mubr.msk.bf16.vlgmr.msra.gmra.mrb[136].mxu0 %vm1827_vm4, %v5625_v17 }
 0xf83   : > { %10908 = vrcp.f32 %v5596_v35  ;;  %10074 = vmatpush3.bf16.msra.mxu0 %v5729_v43  ;;  %10075 = vmatprep.mubr.msk.bf16.mxu0 %vm11466_vm0, %v14472_v5 }
 0xf84   : > { %6355 = vrot.lane.b32.xlu1 %v13283_v57, %s11468_s29  ;;  %10085 = vmatprep.subr.bf16.mxu0 %v14472_v5  ;;  %v5775_v57 = vsel %vm1927_vm2, %v13394_v48, 0 }
 0xf85   : > { %v10905_v54 = vpop.eup %10904 }
 0xf86   : > { %v5618_v26 = vmul.f32 %v10905_v54, %v13320_v44  ;;  %v13415_v44 = vpack.c.bf16 %v13249_v30, %v13249_v30 }
 0xf87   : > { %v10907_v25 = vpop.eup %10906 }
 0xf88   : > { %v5619_v15 = vmul.f32 %v10907_v25, %v13324_v41  ;;  %v5626_v40 = vpack.c.bf16 %v5618_v26, %v5618_v26  ;;  %v5867_v53 = vsel %vm1927_vm2, %v13415_v44, 0 }
 0xf8a   : > { %10070 = vmatmul.mubr.msk.bf16.vlgmr.msra.gmra.mrb[152].mxu1 %vm1827_vm4, %v5626_v40  ;;  %v5627_v11 = vpack.c.bf16 %v5619_v15, %v5619_v15 }
 0xf8b   : > { %10080 = vmatpush3.bf16.msra.mxu1 %v5775_v57  ;;  %10081 = vmatprep.mubr.msk.bf16.mxu1 %vm11466_vm0, %v14472_v5 }
 0xf8c   : > { %10076 = vmatmul.mubr.msk.bf16.vlgmr.msra.gmra.mrb[140].mxu0 %vm1827_vm4, %v5627_v11  ;;  %10091 = vmatprep.subr.bf16.mxu1 %v14472_v5 }
 0xf8d   : > { %v10909_v46 = vpop.eup %10908  ;;  %10086 = vmatpush3.bf16.msra.mxu0 %v5821_v18  ;;  %10087 = vmatprep.mubr.msk.bf16.mxu0 %vm11466_vm0, %v14472_v5 }
 0xf8e   : > { %v5620_v41 = vmul.f32 %v10909_v46, %v13328_v34  ;;  %10097 = vmatprep.subr.bf16.mxu0 %v14472_v5 }
 0xf90   : > { %v5628_v28 = vpack.c.bf16 %v5620_v41, %v5620_v41 }
 0xf92   : > { %10082 = vmatmul.mubr.msk.bf16.vlgmr.msra.gmra.mrb[156].mxu1 %vm1827_vm4, %v5628_v28 }
 0xf93   : > { %10092 = vmatpush3.bf16.msra.mxu1 %v5867_v53  ;;  %10093 = vmatprep.mubr.msk.bf16.mxu1 %vm11466_vm0, %v14472_v5 }
 0xf94   : > { %10103 = vmatprep.subr.bf16.mxu1 %v14472_v5 }
 0xfad   : > { %v5599_v9 = vpop.xlane.xlu0 %5598 }
 0xfae   : > { %10910 = vrcp.f32 %v5599_v9 }
 0xfaf   : > { %v5602_v30 = vpop.xlane.xlu1 %5601 }
 0xfb0   : > { %10912 = vrcp.f32 %v5602_v30 }
 0xfb3   : > { %v6058_v63 = vpop.permute.xlu1 %6057 }
 0xfb4   : > { %v6063_v46 = vsel %vm1458_vm1, %v6058_v63, 0 }
 0xfb5   : > { %v5605_v23 = vpop.xlane.xlu0 %5604 }
 0xfb6   : > { %10914 = vrcp.f32 %v5605_v23 }
 0xfb7   : > { %v6006_v16 = vpop.permute.xlu1 %6005 }
 0xfb8   : > { %v10911_v34 = vpop.eup %10910 }
 0xfb9   : > { %v5621_v56 = vmul.f32 %v10911_v34, %v13332_v31  ;;  %v6008_v51 = vpop.permute.xlu0 %6007 }
 0xfba   : > { %v10913_v45 = vpop.eup %10912  ;;  %v6013_v20 = vsel %vm1458_vm1, %v6008_v51, 0 }
 0xfbb   : > { %v5622_v47 = vmul.f32 %v10913_v45, %v13336_v4  ;;  %v5629_v37 = vpack.c.bf16 %v5621_v56, %v5621_v56 }
 0xfbd   : > { %10088 = vmatmul.mubr.msk.bf16.vlgmr.msra.gmra.mrb[144].mxu0 %vm1827_vm4, %v5629_v37  ;;  %v5630_v22 = vpack.c.bf16 %v5622_v47, %v5622_v47  ;;  %v6108_v4 = vpop.permute.xlu0 %6107 }
 0xfbe   : > { %10098 = vmatpush3.bf16.msra.mxu0 %v5913_v33  ;;  %10099 = vmatprep.mubr.msk.bf16.mxu0 %vm11466_vm0, %v14472_v5  ;;  %v6113_v21 = vsel %vm1458_vm1, %v6108_v4, 0 }
 0xfbf   : > { %10094 = vmatmul.mubr.msk.bf16.vlgmr.msra.gmra.mrb[160].mxu1 %vm1827_vm4, %v5630_v22  ;;  %10109 = vmatprep.subr.bf16.mxu0 %v14472_v5 }
 0xfc0   : > { %v10915_v60 = vpop.eup %10914  ;;  %10104 = vmatpush3.bf16.msra.mxu1 %v5959_v62  ;;  %10105 = vmatprep.mubr.msk.bf16.mxu1 %vm11466_vm0, %v14472_v5 }
 0xfc1   : > { %v5623_v31 = vmul.f32 %v10915_v60, %v13340_v58  ;;  %10115 = vmatprep.subr.bf16.mxu1 %v14472_v5  ;;  %v6106_v1 = vpop.permute.xlu0 %6105 }
 0xfc3   : > { %v5631_v10 = vpack.c.bf16 %v5623_v31, %v5623_v31 }
 0xfc5   : > { %10100 = vmatmul.mubr.msk.bf16.vlgmr.msra.gmra.mrb[148].mxu0 %vm1827_vm4, %v5631_v10  ;;  %v6208_v58 = vpop.permute.xlu0 %6207 }
 0xfc6   : > { %10111 = vmatprep.mubr.msk.bf16.mxu0 %vm11466_vm0, %v14472_v5  ;;  %v6213_v43 = vsel %vm1458_vm1, %v6208_v58, 0 }
 0xfc7   : > { %10110 = vmatpush3.bf16.xpose.msra.mxu0 %v6013_v20 }
 0xfc8   : > { %10121 = vmatprep.subr.bf16.mxu0 %v14472_v5 }
 0xfc9   : > { %v6206_v17 = vpop.permute.xlu0 %6205 }
 0xfcd   : > { %v6308_v35 = vpop.permute.xlu0 %6307 }
 0xfce   : > { %10112 = vmatmul.mubr.msk.bf16.vlgmr.msra.gmra.mrb[152].mxu0 %vm1458_vm1, %v6006_v16  ;;  %v6313_v54 = vsel %vm1458_vm1, %v6308_v35, 0 }
 0xfcf   : > { %10122 = vmatpush3.bf16.xpose.msra.mxu0 %v6113_v21  ;;  %10123 = vmatprep.mubr.msk.bf16.mxu0 %vm11466_vm0, %v14472_v5 }
 0xfd0   : > { %10133 = vmatprep.subr.bf16.mxu0 %v14472_v5 }
 0xfd1   : > { %v6306_v26 = vpop.permute.xlu0 %6305 }
 0xfd6   : > { %10124 = vmatmul.mubr.msk.bf16.vlgmr.msra.gmra.mrb[156].mxu0 %vm1458_vm1, %v6106_v1 }
 0xfd7   : > { %10134 = vmatpush3.bf16.xpose.msra.mxu0 %v6213_v43  ;;  %10135 = vmatprep.mubr.msk.bf16.mxu0 %vm11466_vm0, %v14472_v5 }
 0xfd8   : > { %10145 = vmatprep.subr.bf16.mxu0 %v14472_v5 }
 0xfde   : > { %10136 = vmatmul.mubr.msk.bf16.vlgmr.msra.gmra.mrb[160].mxu0 %vm1458_vm1, %v6206_v17 }
 0xfdf   : > { %10146 = vmatpush3.bf16.xpose.msra.mxu0 %v6313_v54  ;;  %10147 = vmatprep.mubr.msk.bf16.mxu0 %vm11466_vm0, %v14472_v5 }
 0xfe0   : > { %10157 = vmatprep.subr.bf16.mxu0 %v14472_v5 }
 0xfe6   : > { %10148 = vmatmul.mubr.msk.bf16.vlgmr.msra.gmra.mrb[164].mxu0 %vm1458_vm1, %v6306_v26 }
 0xfe7   : > { %10159 = vmatprep.mubr.msk.bf16.mxu0 %vm11466_vm0, %v14472_v5 }
 0xfe8   : > { %v5608_v25 = vpop.xlane.xlu1 %5607 }
 0xfe9   : > { %10916 = vrcp.f32 %v5608_v25 }
 0xfec   : > { %v6056_v15 = vpop.permute.xlu1 %6055 }
 0xff0   : > { %v6158_v11 = vpop.permute.xlu1 %6157 }
 0xff1   : > { %v6163_v28 = vsel %vm1458_vm1, %v6158_v11, 0 }
 0xff3   : > { %v10917_v40 = vpop.eup %10916 }
 0xff4   : > { %v5624_v57 = vmul.f32 %v10917_v40, %v13363_v49  ;;  %v6156_v41 = vpop.permute.xlu1 %6155 }
 0xff6   : > { %v5632_v18 = vpack.c.bf16 %v5624_v57, %v5624_v57 }
 0xff8   : > { %10106 = vmatmul.mubr.msk.bf16.vlgmr.msra.gmra.mrb[164].mxu1 %vm1827_vm4, %v5632_v18  ;;  %v6258_v53 = vpop.permute.xlu1 %6257 }
 0xff9   : > { %10116 = vmatpush3.bf16.xpose.msra.mxu1 %v6063_v46  ;;  %10117 = vmatprep.mubr.msk.bf16.mxu1 %vm11466_vm0, %v14472_v5  ;;  %v6263_v9 = vsel %vm1458_vm1, %v6258_v53, 0 }
 0xffa   : > { %10127 = vmatprep.subr.bf16.mxu1 %v14472_v5 }
 0xffc   : > { %v6256_v49 = vpop.permute.xlu1 %6255 }
0x1000   : > { %10118 = vmatmul.mubr.msk.bf16.vlgmr.msra.gmra.mrb[168].mxu1 %vm1458_vm1, %v6056_v15  ;;  %v6358_v30 = vpop.permute.xlu1 %6357 }
0x1001   : > { %10128 = vmatpush3.bf16.xpose.msra.mxu1 %v6163_v28  ;;  %10129 = vmatprep.mubr.msk.bf16.mxu1 %vm11466_vm0, %v14472_v5  ;;  %v6363_v23 = vsel %vm1458_vm1, %v6358_v30, 0 }
0x1002   : > { %10139 = vmatprep.subr.bf16.mxu1 %v14472_v5 }
0x1004   : > { %v6356_v34 = vpop.permute.xlu1 %6355 }
0x1008   : > { %10130 = vmatmul.mubr.msk.bf16.vlgmr.msra.gmra.mrb[172].mxu1 %vm1458_vm1, %v6156_v41 }
0x1009   : > { %10140 = vmatpush3.bf16.xpose.msra.mxu1 %v6263_v9  ;;  %10141 = vmatprep.mubr.msk.bf16.mxu1 %vm11466_vm0, %v14472_v5 }
0x100a   : > { %10151 = vmatprep.subr.bf16.mxu1 %v14472_v5 }
0x1010   : > { %10142 = vmatmul.mubr.msk.bf16.vlgmr.msra.gmra.mrb[176].mxu1 %vm1458_vm1, %v6256_v49 }
0x1011   : > { %10152 = vmatpush3.bf16.xpose.msra.mxu1 %v6363_v23  ;;  %10153 = vmatprep.mubr.msk.bf16.mxu1 %vm11466_vm0, %v14472_v5 }
0x1012   : > { %10163 = vmatprep.subr.bf16.mxu1 %v14472_v5 }
0x1018   : > { %10154 = vmatmul.mubr.msk.bf16.vlgmr.msra.gmra.mrb[180].mxu1 %vm1458_vm1, %v6356_v34 }
0x1019   : > { %10165 = vmatprep.mubr.msk.bf16.mxu1 %vm11466_vm0, %v14472_v5 }
0x1055   : > { %v13495_v56 = vpop.f32.mrb[136].mxu0 }
0x1056   : > { %v10065_v45 = vpop.f32.mrb[137].mxu0 }
0x1057   : > { %v5676_v47 = vpop.f32.mrb[138].mxu0 }
0x1058   : > { %v10066_v37 = vpop.f32.mrb[139].mxu0 }
0x105d   : > { %v13497_v33 = vpop.f32.mrb[152].mxu1 }
0x105e   : > { %v6001_v51 = vpack.c.bf16 %v13497_v33, %v13495_v56  ;;  %v10071_v22 = vpop.f32.mrb[153].mxu1  ;;  %v9235_v56 = vld [vmem:[%s14351_s7 + $0x1] ss:$0 sm:$0xff] }
0x105f   : > { %v13501_v62 = vpop.f32.mrb[140].mxu0  ;;  %v5722_v60 = vpop.f32.mrb[154].mxu1 }
0x1060   : > { %v10077_v31 = vpop.f32.mrb[141].mxu0  ;;  %v10072_v4 = vpop.f32.mrb[155].mxu1 }
0x1061   : > { %v5768_v10 = vpop.f32.mrb[142].mxu0 }
0x1062   : > { %v10078_v20 = vpop.f32.mrb[143].mxu0 }
0x1065   : > { %v13503_v63 = vpop.f32.mrb[156].mxu1 }
0x1066   : > { %v6002_v1 = vpack.c.bf16 %v13503_v63, %v13501_v62  ;;  %v10083_v16 = vpop.f32.mrb[157].mxu1 }
0x1067   : > { %v5814_v21 = vpop.f32.mrb[158].mxu1 }
0x1068   : > { %v10084_v58 = vpop.f32.mrb[159].mxu1 }
0x1090   : > { %v13507_v17 = vpop.f32.mrb[144].mxu0 }
0x1091   : > { %v10089_v43 = vpop.f32.mrb[145].mxu0 }
0x1092   : > { %v5860_v35 = vpop.f32.mrb[146].mxu0  ;;  %v13509_v54 = vpop.f32.mrb[160].mxu1 }
0x1093   : > { %v6003_v26 = vpack.c.bf16 %v13509_v54, %v13507_v17  ;;  %v10090_v25 = vpop.f32.mrb[147].mxu0  ;;  %v10095_v15 = vpop.f32.mrb[161].mxu1 }
0x1094   : > { %v5906_v40 = vpop.f32.mrb[162].mxu1 }
0x1095   : > { %v10096_v57 = vpop.f32.mrb[163].mxu1 }
0x1098   : > { %v13513_v11 = vpop.f32.mrb[148].mxu0 }
0x1099   : > { %v10101_v18 = vpop.f32.mrb[149].mxu0 }
0x109a   : > { %v5952_v46 = vpop.f32.mrb[150].mxu0 }
0x109b   : > { %v10102_v41 = vpop.f32.mrb[151].mxu0 }
0x10a1   : > { %v6049_v28 = vpop.f32.mrb[152].mxu0 }
0x10a2   : > { %v13516_v53 = vadd.f32 %v6049_v28, %v12241_v32  ;;  %v10113_v49 = vpop.f32.mrb[153].mxu0 }
0x10a3   : > { %v6052_v9 = vpop.f32.mrb[154].mxu0 }
0x10a4   : > { %v10114_v30 = vpop.f32.mrb[155].mxu0  ;;  %v6405_v23 = vsel %vm1827_vm4, %v13516_v53, -inf }
0x10a5   : > { %6406 = vmax.xlane.f32.xlu0 %v6405_v23 }
0x10a9   : > { %v6149_v34 = vpop.f32.mrb[156].mxu0 }
0x10aa   : > { %v13521_v45 = vadd.f32 %v6149_v34, %v12252_v36  ;;  %v10125_v47 = vpop.f32.mrb[157].mxu0 }
0x10ab   : > { %v6152_v37 = vpop.f32.mrb[158].mxu0 }
0x10ac   : > { %v10126_v22 = vpop.f32.mrb[159].mxu0  ;;  %v6411_v60 = vsel %vm1827_vm4, %v13521_v45, -inf }
0x10ad   : > { %6412 = vmax.xlane.f32.xlu0 %v6411_v60 }
0x10b1   : > { %v6249_v32 = vpop.f32.mrb[160].mxu0 }
0x10b2   : > { %v10137_v31 = vpop.f32.mrb[161].mxu0  ;;  %v6250_v34 = vadd.f32 %v6249_v32, %v12268_v59 }
0x10b3   : > { %v6252_v4 = vpop.f32.mrb[162].mxu0 }
0x10b4   : > { %v10138_v10 = vpop.f32.mrb[163].mxu0  ;;  %v6417_v22 = vsel %vm1827_vm4, %v6250_v34, -inf }
0x10b9   : > { %v6349_v20 = vpop.f32.mrb[164].mxu0 }
0x10ba   : > { %v10149_v16 = vpop.f32.mrb[165].mxu0 }
0x10bb   : > { %v6352_v21 = vpop.f32.mrb[166].mxu0 }
0x10bc   : > { %v10150_v58 = vpop.f32.mrb[167].mxu0 }
0x10cb   : > { %v13525_v43 = vpop.f32.mrb[164].mxu1 }
0x10cc   : > { %v6004_v36 = vpack.c.bf16 %v13525_v43, %v13513_v11  ;;  %v10107_v35 = vpop.f32.mrb[165].mxu1 }
0x10cd   : > { %v5998_v25 = vpop.f32.mrb[166].mxu1 }
0x10ce   : > { %v10108_v15 = vpop.f32.mrb[167].mxu1 }
0x10d3   : > { %v6099_v40 = vpop.f32.mrb[168].mxu1 }
0x10d4   : > { %v6100_v57 = vadd.f32 %v6099_v40, %v12249_v7  ;;  %v10119_v18 = vpop.f32.mrb[169].mxu1  ;;  %v6350_v7 = vadd.f32 %v6349_v20, %v14479_v24 }
0x10d5   : > { %v6102_v46 = vpop.f32.mrb[170].mxu1 }
0x10d6   : > { %v10120_v41 = vpop.f32.mrb[171].mxu1  ;;  %v6408_v28 = vsel %vm1827_vm4, %v6100_v57, -inf  ;;  %v6423_v32 = vsel %vm1827_vm4, %v6350_v7, -inf }
0x10d7   : > { %6409 = vmax.xlane.f32.xlu1 %v6408_v28 }
0x10db   : > { %v6199_v49 = vpop.f32.mrb[172].mxu1 }
0x10dc   : > { %v13532_v9 = vadd.f32 %v6199_v49, %v12265_v50  ;;  %v10131_v30 = vpop.f32.mrb[173].mxu1 }
0x10dd   : > { %v6202_v23 = vpop.f32.mrb[174].mxu1 }
0x10de   : > { %v10132_v47 = vpop.f32.mrb[175].mxu1  ;;  %v6414_v37 = vsel %vm1827_vm4, %v13532_v9, -inf }
0x10df   : > { %6415 = vmax.xlane.f32.xlu0 %v6414_v37 }
0x10e3   : > { %v6299_v60 = vpop.f32.mrb[176].mxu1  ;;  %6418 = vmax.xlane.f32.xlu0 %v6417_v22 }
0x10e4   : > { %v13540_v31 = vadd.f32 %v6299_v60, %v14478_v38  ;;  %v10143_v50 = vpop.f32.mrb[177].mxu1 }
0x10e5   : > { %v6302_v4 = vpop.f32.mrb[178].mxu1 }
0x10e6   : > { %v10144_v10 = vpop.f32.mrb[179].mxu1  ;;  %v6420_v59 = vsel %vm1827_vm4, %v13540_v31, -inf }
0x10e7   : > { %6421 = vmax.xlane.f32.xlu1 %v6420_v59  ;;  %6424 = vmax.xlane.f32.xlu0 %v6423_v32 }
0x10eb   : > { %v6399_v16 = vpop.f32.mrb[180].mxu1 }
0x10ec   : > { %v10155_v21 = vpop.f32.mrb[181].mxu1  ;;  %v13552_v38 = vadd.f32 %v6399_v16, %v14480_v19 }
0x10ed   : > { %v6402_v24 = vpop.f32.mrb[182].mxu1 }
0x10ee   : > { %v10156_v20 = vpop.f32.mrb[183].mxu1  ;;  %v6426_v58 = vsel %vm1827_vm4, %v13552_v38, -inf }
0x10f8   : > { %6549 = vrot.lane.b32.xlu1 %v13277_v13, %s11468_s29 }
0x10fc   : > { %6597 = vrot.lane.b32.xlu1 %v13379_v52, %s11468_s29 }
0x10fd   : > { %6501 = vrot.lane.b32.xlu0 %v13273_v55, %s11468_s29 }
0x1120   : > { %6427 = vmax.xlane.f32.xlu1 %v6426_v58 }
0x1131   : > { %6645 = vrot.lane.b32.xlu1 %v13394_v48, %s11468_s29 }
0x1132   : > { %v6407_v35 = vpop.xlane.xlu0 %6406 }
0x1133   : > { %v6429_v25 = vsub.f32 %v13516_v53, %v6407_v35 }
0x1135   : > { %v6437_v13 = vmul.f32 1.442695, %v6429_v25 }
0x1137   : > { %10918 = vpow2.f32 %v6437_v13 }
0x113a   : > { %v6413_v15 = vpop.xlane.xlu0 %6412 }
0x113b   : > { %v6431_v52 = vsub.f32 %v13521_v45, %v6413_v15 }
0x113d   : > { %v6441_v40 = vmul.f32 1.442695, %v6431_v52 }
0x113f   : > { %10920 = vpow2.f32 %v6441_v40 }
0x1141   : > { %v13560_v55 = vpop.eup %10918 }
0x1142   : > { %v6453_v19 = vsel %vm1827_vm4, %v13560_v55, 0.0 }
0x1143   : > { %6454 = vadd.xlane.f32.xlu0 %v6453_v19 }
0x1149   : > { %v13564_v18 = vpop.eup %10920 }
0x114a   : > { %v6459_v48 = vsel %vm1827_vm4, %v13564_v18, 0.0 }
0x114b   : > { %6460 = vadd.xlane.f32.xlu0 %v6459_v48 }
0x1161   : > { %6693 = vrot.lane.b32.xlu0 %v13399_v6, %s11468_s29 }
0x1164   : > { %v6410_v53 = vpop.xlane.xlu1 %6409 }
0x1165   : > { %v6430_v46 = vsub.f32 %v6100_v57, %v6410_v53 }
0x1167   : > { %v6439_v45 = vmul.f32 1.442695, %v6430_v46 }
0x1169   : > { %10922 = vpow2.f32 %v6439_v45 }
0x116c   : > { %v6416_v41 = vpop.xlane.xlu0 %6415 }
0x116d   : > { %v6432_v16 = vsub.f32 %v13532_v9, %v6416_v41 }
0x116f   : > { %v6443_v21 = vmul.f32 1.442695, %v6432_v16 }
0x1170   : > { %v6419_v28 = vpop.xlane.xlu0 %6418 }
0x1171   : > { %v6433_v49 = vsub.f32 %v6250_v34, %v6419_v28 }
0x1173   : > { %v13570_v30 = vpop.eup %10922  ;;  %v6445_v23 = vmul.f32 1.442695, %v6433_v49 }
0x1174   : > { %v6422_v47 = vpop.xlane.xlu1 %6421  ;;  %v6425_v37 = vpop.xlane.xlu0 %6424  ;;  %v6456_v22 = vsel %vm1827_vm4, %v13570_v30, 0.0 }
0x1175   : > { %10924 = vpow2.f32 %v6445_v23  ;;  %v6435_v60 = vsub.f32 %v6350_v7, %v6425_v37  ;;  %6457 = vadd.xlane.f32.xlu1 %v6456_v22  ;;  %v6434_v24 = vsub.f32 %v13540_v31, %v6422_v47 }
0x1177   : > { %v6449_v50 = vmul.f32 1.442695, %v6435_v60  ;;  %v6447_v20 = vmul.f32 1.442695, %v6434_v24 }
0x1178   : > { %v6550_v6 = vpop.permute.xlu1 %6549  ;;  %v6502_v4 = vpop.permute.xlu0 %6501 }
0x1179   : > { %v6555_v57 = vsel %vm1927_vm2, %v6550_v6, 0  ;;  %v6507_v10 = vsel %vm1927_vm2, %v6502_v4, 0  ;;  %10926 = vpow2.f32 %v6449_v50 }
0x117a   : > { %10158 = vmatpush3.bf16.msra.mxu0 %v6507_v10  ;;  %10164 = vmatpush3.bf16.msra.mxu1 %v6555_v57  ;;  %10928 = vpow2.f32 %v6443_v21 }
0x117b   : > { %10169 = vmatprep.subr.bf16.mxu0 %v14472_v5  ;;  %10175 = vmatprep.subr.bf16.mxu1 %v14472_v5  ;;  %10930 = vpow2.f32 %v6447_v20 }
0x117c   : > { %v6598_v35 = vpop.permute.xlu1 %6597 }
0x117d   : > { %v6603_v46 = vsel %vm1927_vm2, %v6598_v35, 0 }
0x117f   : > { %v13578_v34 = vpop.eup %10924 }
0x1180   : > { %v6465_v7 = vsel %vm1827_vm4, %v13578_v34, 0.0 }
0x1181   : > { %6466 = vadd.xlane.f32.xlu0 %v6465_v7 }
0x1183   : > { %v13582_v59 = vpop.eup %10926 }
0x1184   : > { %v6471_v32 = vsel %vm1827_vm4, %v13582_v59, 0.0  ;;  %v13592_v58 = vpop.eup %10928 }
0x1185   : > { %6472 = vadd.xlane.f32.xlu0 %v6471_v32  ;;  %v6462_v25 = vsel %vm1827_vm4, %v13592_v58, 0.0  ;;  %v13596_v13 = vpop.eup %10930 }
0x1186   : > { %6741 = vrot.lane.b32.xlu1 %v13415_v44, %s11468_s29  ;;  %v6468_v9 = vsel %vm1827_vm4, %v13596_v13, 0.0 }
0x119b   : > { %6789 = vrot.lane.b32.xlu0 %v13427_v3, %s11468_s29 }
0x11aa   : > { %6463 = vadd.xlane.f32.xlu1 %v6462_v25 }
0x11ad   : > { %v6428_v44 = vpop.xlane.xlu1 %6427 }
0x11ae   : > { %v6436_v31 = vsub.f32 %v13552_v38, %v6428_v44  ;;  %6469 = vadd.xlane.f32.xlu1 %v6468_v9 }
0x11b0   : > { %v6451_v15 = vmul.f32 1.442695, %v6436_v31 }
0x11b2   : > { %10932 = vpow2.f32 %v6451_v15 }
0x11bc   : > { %v13601_v3 = vpop.eup %10932 }
0x11bd   : > { %v6474_v52 = vsel %vm1827_vm4, %v13601_v3, 0.0 }
0x11be   : > { %6475 = vadd.xlane.f32.xlu1 %v6474_v52 }
0x11cf   : > { %6837 = vrot.lane.b32.xlu1 %v13432_v12, %s11468_s29 }
0x11d0   : > { %v6455_v40 = vpop.xlane.xlu0 %6454 }
0x11d1   : > { %10934 = vrcp.f32 %v6455_v40 }
0x11d8   : > { %v6461_v19 = vpop.xlane.xlu0 %6460 }
0x11d9   : > { %10936 = vrcp.f32 %v6461_v19 }
0x11db   : > { %v10935_v48 = vpop.eup %10934 }
0x11dc   : > { %v6485_v53 = vmul.f32 %v10935_v48, %v13560_v55  ;;  %v6694_v41 = vpop.permute.xlu0 %6693  ;;  %v6646_v55 = vpop.permute.xlu1 %6645 }
0x11dd   : > { %v6699_v49 = vsel %vm1927_vm2, %v6694_v41, 0  ;;  %v6651_v60 = vsel %vm1927_vm2, %v6646_v55, 0 }
0x11de   : > { %v6493_v38 = vpack.c.bf16 %v6485_v53, %v6485_v53  ;;  %v10607_v53 = vld [vmem:[#allocation10 + $0x68] sm:$0xff]  }
0x11e0   : > { %10160 = vmatmul.mubr.msk.bf16.vlgmr.msra.gmra.mrb[168].mxu0 %vm1827_vm4, %v6493_v38  ;;  %v10608_v38 = vld [vmem:[#allocation10 + $0x70] sm:$0xff]  }
0x11e1   : > { %10170 = vmatpush3.bf16.msra.mxu0 %v6603_v46  ;;  %10171 = vmatprep.mubr.msk.bf16.mxu0 %vm11466_vm0, %v14472_v5  ;;  %v10609_v46 = vld [vmem:[#allocation10 + $0x78] sm:$0xff]  }
0x11e2   : > { %10181 = vmatprep.subr.bf16.mxu0 %v14472_v5 }
0x11e3   : > { %v10937_v45 = vpop.eup %10936 }
0x11e4   : > { %v6487_v12 = vmul.f32 %v10937_v45, %v13564_v18  ;;  %v10610_v45 = vld [vmem:[#allocation10 + $0x40] sm:$0xff]  }
0x11e6   : > { %v6495_v28 = vpack.c.bf16 %v6487_v12, %v6487_v12 }
0x11e8   : > { %10172 = vmatmul.mubr.msk.bf16.vlgmr.msra.gmra.mrb[172].mxu0 %vm1827_vm4, %v6495_v28 }
0x11e9   : > { %10182 = vmatpush3.bf16.msra.mxu0 %v6699_v49  ;;  %10183 = vmatprep.mubr.msk.bf16.mxu0 %vm11466_vm0, %v14472_v5 }
0x11ea   : > { %10193 = vmatprep.subr.bf16.mxu0 %v14472_v5 }
0x1202   : > { %v6458_v23 = vpop.xlane.xlu1 %6457 }
0x1203   : > { %10938 = vrcp.f32 %v6458_v23 }
0x1206   : > { %v6742_v21 = vpop.permute.xlu1 %6741 }
0x1207   : > { %v6747_v9 = vsel %vm1927_vm2, %v6742_v21, 0 }
0x120d   : > { %v10939_v47 = vpop.eup %10938 }
0x120e   : > { %v6486_v37 = vmul.f32 %v10939_v47, %v13570_v30  ;;  %v6467_v22 = vpop.xlane.xlu0 %6466 }
0x120f   : > { %10940 = vrcp.f32 %v6467_v22 }
0x1210   : > { %v6494_v18 = vpack.c.bf16 %v6486_v37, %v6486_v37 }
0x1212   : > { %10166 = vmatmul.mubr.msk.bf16.vlgmr.msra.gmra.mrb[184].mxu1 %vm1827_vm4, %v6494_v18  ;;  %v6473_v50 = vpop.xlane.xlu0 %6472 }
0x1213   : > { %10176 = vmatpush3.bf16.msra.mxu1 %v6651_v60  ;;  %10177 = vmatprep.mubr.msk.bf16.mxu1 %vm11466_vm0, %v14472_v5  ;;  %10942 = vrcp.f32 %v6473_v50 }
0x1214   : > { %10187 = vmatprep.subr.bf16.mxu1 %v14472_v5 }
0x1216   : > { %v6790_v57 = vpop.permute.xlu0 %6789 }
0x1217   : > { %v6795_v7 = vsel %vm1927_vm2, %v6790_v57, 0 }
0x1219   : > { %v10941_v6 = vpop.eup %10940 }
0x121a   : > { %v6489_v4 = vmul.f32 %v10941_v6, %v13578_v34 }
0x121c   : > { %v6497_v30 = vpack.c.bf16 %v6489_v4, %v6489_v4 }
0x121d   : > { %v10943_v10 = vpop.eup %10942 }
0x121e   : > { %10184 = vmatmul.mubr.msk.bf16.vlgmr.msra.gmra.mrb[176].mxu0 %vm1827_vm4, %v6497_v30  ;;  %v6491_v32 = vmul.f32 %v10943_v10, %v13582_v59 }
0x121f   : > { %10194 = vmatpush3.bf16.msra.mxu0 %v6795_v7  ;;  %10195 = vmatprep.mubr.msk.bf16.mxu0 %vm11466_vm0, %v14472_v5 }
0x1220   : > { %v6499_v16 = vpack.c.bf16 %v6491_v32, %v6491_v32 }
0x1226   : > { %10196 = vmatmul.mubr.msk.bf16.vlgmr.msra.gmra.mrb[180].mxu0 %vm1827_vm4, %v6499_v16 }
0x1237   : > { %v6464_v24 = vpop.xlane.xlu1 %6463 }
0x1238   : > { %10944 = vrcp.f32 %v6464_v24 }
0x123b   : > { %v6470_v34 = vpop.xlane.xlu1 %6469 }
0x123c   : > { %10946 = vrcp.f32 %v6470_v34 }
0x1242   : > { %v10945_v20 = vpop.eup %10944 }
0x1243   : > { %v6488_v35 = vmul.f32 %v10945_v20, %v13592_v58  ;;  %v10611_v20 = vld [vmem:[#allocation10 + $0x48] sm:$0xff]  }
0x1245   : > { %v6496_v25 = vpack.c.bf16 %v6488_v35, %v6488_v35 }
0x1246   : > { %v10947_v44 = vpop.eup %10946 }
0x1247   : > { %10178 = vmatmul.mubr.msk.bf16.vlgmr.msra.gmra.mrb[188].mxu1 %vm1827_vm4, %v6496_v25  ;;  %v6490_v59 = vmul.f32 %v10947_v44, %v13596_v13  ;;  %v10606_v13 = vld [vmem:[#allocation10 + $0x60] sm:$0xff]   ;;  %v10612_v44 = vld [vmem:[#allocation10 + $0x50] sm:$0xff]  }
0x1248   : > { %10188 = vmatpush3.bf16.msra.mxu1 %v6747_v9  ;;  %10189 = vmatprep.mubr.msk.bf16.mxu1 %vm11466_vm0, %v14472_v5 }
0x1249   : > { %10199 = vmatprep.subr.bf16.mxu1 %v14472_v5  ;;  %v6498_v15 = vpack.c.bf16 %v6490_v59, %v6490_v59  ;;  %10205 = vmatprep.subr.bf16.mxu0 %v10606_v13 }
0x124a   : > { %10206 = vmatpush3.bf16.msra.mxu0 %v10606_v13 }
0x124b   : > { %v6476_v31 = vpop.xlane.xlu1 %6475  ;;  %10207 = vmatprep.subr.bf16.mxu0 %v10607_v53 }
0x124c   : > { %10948 = vrcp.f32 %v6476_v31 }
0x124e   : > { %10208 = vmatpush3.bf16.msra.mxu0 %v10607_v53 }
0x124f   : > { %10190 = vmatmul.mubr.msk.bf16.vlgmr.msra.gmra.mrb[192].mxu1 %vm1827_vm4, %v6498_v15  ;;  %v6838_v58 = vpop.permute.xlu1 %6837  ;;  %10209 = vmatprep.subr.bf16.mxu0 %v10608_v38  ;;  %v10613_v15 = vld [vmem:[#allocation10 + $0x58] sm:$0xff]  }
0x1250   : > { %v6843_v52 = vsel %vm1927_vm2, %v6838_v58, 0  ;;  %10201 = vmatprep.mubr.msk.bf16.mxu1 %vm11466_vm0, %v14472_v5 }
0x1251   : > { %10200 = vmatpush3.bf16.msra.mxu1 %v6843_v52 }
0x1252   : > { %10210 = vmatpush3.bf16.msra.mxu0 %v10608_v38 }
0x1253   : > { %10211 = vmatprep.subr.bf16.mxu0 %v10609_v46 }
0x1256   : > { %v10949_v40 = vpop.eup %10948  ;;  %10212 = vmatpush3.bf16.msra.mxu0 %v10609_v46 }
0x1257   : > { %v6492_v19 = vmul.f32 %v10949_v40, %v13601_v3  ;;  %10221 = vmatprep.subr.bf16.mxu0 %v10610_v45 }
0x1259   : > { %v6500_v48 = vpack.c.bf16 %v6492_v19, %v6492_v19 }
0x125b   : > { %10202 = vmatmul.mubr.msk.bf16.vlgmr.msra.gmra.mrb[196].mxu1 %vm1827_vm4, %v6500_v48 }
0x125c   : > { %7511 = vmatprep.mubr.bf16.mxu1 %v14473_v61 }
0x12b3   : > { %v6543_v3 = vpop.f32.mrb[168].mxu0 }
0x12b4   : > { %v10161_v12 = vpop.f32.mrb[169].mxu0 }
0x12b5   : > { %v6546_v41 = vpop.f32.mrb[170].mxu0 }
0x12b6   : > { %v10162_v28 = vpop.f32.mrb[171].mxu0 }
0x12bb   : > { %v6639_v49 = vpop.f32.mrb[172].mxu0 }
0x12bc   : > { %v10173_v55 = vpop.f32.mrb[173].mxu0 }
0x12bd   : > { %v6642_v23 = vpop.f32.mrb[174].mxu0 }
0x12be   : > { %v10174_v47 = vpop.f32.mrb[175].mxu0 }
0x12e5   : > { %v6591_v37 = vpop.f32.mrb[184].mxu1 }
0x12e6   : > { %v6885_v22 = vpack.c.bf16 %v6591_v37, %v6543_v3  ;;  %v10167_v18 = vpop.f32.mrb[185].mxu1  ;;  %v10614_v37 = vld [vmem:[#allocation11 + $0x100] ss:$16 sps:$4 sm:$0xff]  }
0x12e7   : > { %v6594_v60 = vpop.f32.mrb[186].mxu1  ;;  %v10619_v18 = vld [vmem:[#allocation11 + $0x10c] ss:$16 sps:$4 sm:$0xff]  }
0x12e8   : > { %v10168_v50 = vpop.f32.mrb[187].mxu1  ;;  %10213 = vmatprep.mubr.msk.bf16.mxu0 %vm1458_vm1, %v6885_v22  ;;  %v10617_v22 = vld [vmem:[#allocation11 + $0x108] ss:$16 sps:$4 sm:$0xff]  }
0x12f1   : > { %v6735_v6 = vpop.f32.mrb[176].mxu0 }
0x12f2   : > { %v10185_v4 = vpop.f32.mrb[177].mxu0 }
0x12f3   : > { %v6738_v57 = vpop.f32.mrb[178].mxu0 }
0x12f4   : > { %v10186_v30 = vpop.f32.mrb[179].mxu0  ;;  %v10622_v57 = vld [vmem:[#allocation11 + $0x124] ss:$16 sps:$4 sm:$0xff]  }
0x12f5   : > { %v10623_v30 = vld [vmem:[#allocation11 + $0x128] ss:$16 sps:$4 sm:$0xff]  }
0x12f9   : > { %v6831_v10 = vpop.f32.mrb[180].mxu0 }
0x12fa   : > { %v10197_v7 = vpop.f32.mrb[181].mxu0 }
0x12fb   : > { %v6834_v32 = vpop.f32.mrb[182].mxu0 }
0x12fc   : > { %v10198_v16 = vpop.f32.mrb[183].mxu0  ;;  %v10626_v32 = vld [vmem:[#allocation11 + $0x140] ss:$16 sps:$4 sm:$0xff]  }
0x12fd   : > { %v10628_v16 = vld [vmem:[#allocation11 + $0x144] ss:$16 sps:$4 sm:$0xff]  }
0x131a   : > { %v6687_v21 = vpop.f32.mrb[188].mxu1 }
0x131b   : > { %v6886_v24 = vpack.c.bf16 %v6687_v21, %v6639_v49  ;;  %v10179_v34 = vpop.f32.mrb[189].mxu1  ;;  %v10629_v21 = vld [vmem:[#allocation11 + $0x148] ss:$16 sps:$4 sm:$0xff]  }
0x131c   : > { %v6690_v35 = vpop.f32.mrb[190].mxu1  ;;  %v10637_v34 = vld [vmem:[#allocation11 + $0x16c] ss:$16 sps:$4 sm:$0xff]  }
0x131d   : > { %v10180_v25 = vpop.f32.mrb[191].mxu1  ;;  %10214 = vmatmul.mubr.msk.bf16.vlgmr.msra.gmra.mrb[184].mxu0 %vm1458_vm1, %v6886_v24  ;;  %v10634_v24 = vld [vmem:[#allocation11 + $0x164] ss:$16 sps:$4 sm:$0xff]   ;;  %v10635_v35 = vld [vmem:[#allocation11 + $0x168] ss:$16 sps:$4 sm:$0xff]  }
0x131e   : > { %10222 = vmatpush3.bf16.msra.mxu0 %v10610_v45  ;;  %v10638_v25 = vld [vmem:[#allocation11 + $0x180] ss:$16 sps:$4 sm:$0xff]  }
0x131f   : > { %10223 = vmatprep.subr.bf16.mxu0 %v10611_v20 }
0x1322   : > { %v6783_v9 = vpop.f32.mrb[192].mxu1  ;;  %10224 = vmatpush3.bf16.msra.mxu0 %v10611_v20  ;;  %v10632_v20 = vld [vmem:[#allocation11 + $0x160] ss:$16 sps:$4 sm:$0xff]  }
0x1323   : > { %v6887_v59 = vpack.c.bf16 %v6783_v9, %v6735_v6  ;;  %v10191_v31 = vpop.f32.mrb[193].mxu1  ;;  %10225 = vmatprep.subr.bf16.mxu0 %v10612_v44  ;;  %v10641_v9 = vld [vmem:[#allocation11 + $0x188] ss:$16 sps:$4 sm:$0xff]  }
0x1324   : > { %v6786_v58 = vpop.f32.mrb[194].mxu1  ;;  %v10646_v31 = vld [vmem:[#allocation11 + $0x1a4] ss:$16 sps:$4 sm:$0xff]  }
0x1325   : > { %v10192_v52 = vpop.f32.mrb[195].mxu1  ;;  %10217 = vmatprep.mubr.msk.bf16.mxu0 %vm1458_vm1, %v6887_v59  ;;  %v10643_v59 = vld [vmem:[#allocation11 + $0x18c] ss:$16 sps:$4 sm:$0xff]   ;;  %v10644_v58 = vld [vmem:[#allocation11 + $0x1a0] ss:$16 sps:$4 sm:$0xff]  }
0x1326   : > { %10226 = vmatpush3.bf16.msra.mxu0 %v10612_v44  ;;  %v10640_v44 = vld [vmem:[#allocation11 + $0x184] ss:$16 sps:$4 sm:$0xff]   ;;  %v10647_v52 = vld [vmem:[#allocation11 + $0x1a8] ss:$16 sps:$4 sm:$0xff]  }
0x1327   : > { %10227 = vmatprep.subr.bf16.mxu0 %v10613_v15 }
0x132a   : > { %10228 = vmatpush3.bf16.msra.mxu0 %v10613_v15  ;;  %v10649_v15 = vld [vmem:[#allocation11 + $0x1ac] ss:$16 sps:$4 sm:$0xff]  }
0x132b   : > { %7552 = vmatprep.subr.bf16.mxu0 %v10619_v18 }
0x132e   : > { %v6879_v40 = vpop.f32.mrb[196].mxu1 }
0x132f   : > { %v6888_v19 = vpack.c.bf16 %v6879_v40, %v6831_v10  ;;  %v10203_v48 = vpop.f32.mrb[197].mxu1  ;;  %v10625_v10 = vld [vmem:[#allocation11 + $0x12c] ss:$16 sps:$4 sm:$0xff]   ;;  %v10650_v40 = vld [vmem:[#allocation11 + $0x1c0] ss:$16 sps:$4 sm:$0xff]  }
0x1330   : > { %v6882_v13 = vpop.f32.mrb[198].mxu1  ;;  %v10653_v48 = vld [vmem:[#allocation11 + $0x1c8] ss:$16 sps:$4 sm:$0xff]  }
0x1331   : > { %v10204_v53 = vpop.f32.mrb[199].mxu1  ;;  %10218 = vmatmul.mubr.msk.bf16.gmra.mrb[188].mxu0 %vm1458_vm1, %v6888_v19  ;;  %v10652_v19 = vld [vmem:[#allocation11 + $0x1c4] ss:$16 sps:$4 sm:$0xff]   ;;  %v10655_v13 = vld [vmem:[#allocation11 + $0x1cc] ss:$16 sps:$4 sm:$0xff]  }
0x1332   : > { %10229 = vmatprep.mubr.msk.bf16.mxu0 %vm1458_vm1, %v6001_v51  ;;  %v10658_v53 = vld [vmem:[#allocation11 + $0x1e4] ss:$16 sps:$4 sm:$0xff]  }
0x1339   : > { %10230 = vmatmul.mubr.msk.bf16.vlgmr.msra.gmra.mrb[184].mxu0 %vm1458_vm1, %v6002_v1 }
0x133a   : > { %10233 = vmatprep.mubr.msk.bf16.mxu0 %vm1458_vm1, %v6003_v26  ;;  %7553 = vmatpush1.bf16.msra.mxu0 %v10617_v22 }
0x133b   : > { %7554 = vmatprep.subr.bf16.mxu0 %v10625_v10 }
0x133e   : > { %7555 = vmatpush1.bf16.msra.mxu0 %v10623_v30 }
0x1341   : > { %10234 = vmatmul.mubr.msk.bf16.gmra.mrb[188].mxu0 %vm1458_vm1, %v6004_v36 }
0x1342   : > { %7584 = vmatprep.mubr.bf16.mxu0 %v14473_v61 }
0x140c   : > { %v10231_v33 = vpop.f32.mrb[184].mxu0 }
0x140d   : > { %v7060_v51 = vpop.f32.mrb[185].mxu0  ;;  %v7101_v3 = vadd.f32 %v10231_v33, %v9235_v56  ;;  %v10656_v33 = vld [vmem:[#allocation11 + $0x1e0] ss:$16 sps:$4 sm:$0xff]  }
0x140e   : > { %v7099_v62 = vadd.f32 %v9235_v56, %v7060_v51  ;;  %v10232_v63 = vpop.f32.mrb[186].mxu0  ;;  %v10659_v51 = vld [vmem:[#allocation11 + $0x1e8] ss:$16 sps:$4 sm:$0xff]  }
0x140f   : > { %v7063_v1 = vpop.f32.mrb[187].mxu0  ;;  %v7102_v26 = vadd.f32 %v10232_v63, %v9235_v56  ;;  %v13689_v28 = vadd.f32 %v7101_v3, %v13108_v42 }
0x1410   : > { %v13671_v17 = vadd.f32 %v7099_v62, %v13095_v29  ;;  %v7100_v54 = vadd.f32 %v9235_v56, %v7063_v1 }
0x1411   : > { %v13681_v46 = vadd.f32 %v7102_v26, %v13111_v27  ;;  %v7145_v55 = vmul.f32 %v13689_v28, %v13689_v28 }
0x1412   : > { %v13674_v11 = vadd.f32 %v7100_v54, %v13098_v2  ;;  %7119 = vadd.xlane.f32.xlu0 %v13671_v17  ;;  %v7143_v36 = vmul.f32 %v13671_v17, %v13671_v17 }
0x1413   : > { %v7146_v41 = vmul.f32 %v13681_v46, %v13681_v46 }
0x1414   : > { %7121 = vadd.xlane.f32.xlu1 %v13674_v11  ;;  %v10235_v43 = vpop.f32.mrb[188].mxu0  ;;  %v7144_v2 = vmul.f32 %v13674_v11, %v13674_v11 }
0x1415   : > { %v7076_v38 = vpop.f32.mrb[189].mxu0  ;;  %v7105_v50 = vadd.f32 %v10235_v43, %v9235_v56 }
0x1416   : > { %7151 = vadd.xlane.f32.xlu0 %v7143_v36  ;;  %v10236_v29 = vpop.f32.mrb[190].mxu0  ;;  %v7103_v49 = vadd.f32 %v9235_v56, %v7076_v38 }
0x1417   : > { %v7079_v45 = vpop.f32.mrb[191].mxu0  ;;  %v7106_v23 = vadd.f32 %v10236_v29, %v9235_v56  ;;  %v13713_v4 = vadd.f32 %v7105_v50, %v13134_v39  ;;  %v10631_v39 = vld [vmem:[#allocation11 + $0x14c] ss:$16 sps:$4 sm:$0xff]  }
0x1418   : > { %7125 = vadd.xlane.f32.xlu1 %v13681_v46  ;;  %v7104_v12 = vadd.f32 %v9235_v56, %v7079_v45  ;;  %v13701_v42 = vadd.f32 %v7103_v49, %v13122_v14  ;;  %7556 = vmatprep.subr.bf16.mxu0 %v10631_v39  ;;  %v10661_v56 = vld [vmem:[#allocation11 + $0x1ec] ss:$16 sps:$4 sm:$0xff]  }
0x1419   : > { %v13704_v60 = vadd.f32 %v7106_v23, %v13137_v0  ;;  %v10620_v0 = vld [vmem:[#allocation11 + $0x120] ss:$16 sps:$4 sm:$0xff]   ;;  %v7149_v7 = vmul.f32 %v13713_v4, %v13713_v4  ;;  %7557 = vmatpush1.bf16.msra.mxu0 %v10629_v21 }
0x141a   : > { %7153 = vadd.xlane.f32.xlu0 %v7144_v2  ;;  %v13692_v27 = vadd.f32 %v7104_v12, %v13125_v8  ;;  %v10616_v8 = vld [vmem:[#allocation11 + $0x104] ss:$16 sps:$4 sm:$0xff]   ;;  %v7147_v14 = vmul.f32 %v13701_v42, %v13701_v42  ;;  %7558 = vmatprep.subr.bf16.mxu0 %v10637_v34 }
0x141b   : > { %7479 = vmatprep.subr.bf16.mxu1 %v10616_v8  ;;  %v7150_v6 = vmul.f32 %v13704_v60, %v13704_v60 }
0x141c   : > { %7157 = vadd.xlane.f32.xlu1 %v7146_v41  ;;  %v7148_v47 = vmul.f32 %v13692_v27, %v13692_v27  ;;  %7480 = vmatpush1.bf16.msra.mxu1 %v10614_v37 }
0x141d   : > { %7481 = vmatprep.subr.bf16.mxu1 %v10622_v57  ;;  %7559 = vmatpush1.bf16.msra.mxu0 %v10635_v35 }
0x141e   : > { %7123 = vadd.xlane.f32.xlu0 %v13689_v28  ;;  %7560 = vmatprep.subr.bf16.mxu0 %v10643_v59 }
0x1420   : > { %7129 = vadd.xlane.f32.xlu1 %v13692_v27  ;;  %7482 = vmatpush1.bf16.msra.mxu1 %v10620_v0 }
0x1421   : > { %7483 = vmatprep.subr.bf16.mxu1 %v10628_v16  ;;  %7561 = vmatpush1.bf16.msra.mxu0 %v10641_v9 }
0x1422   : > { %7155 = vadd.xlane.f32.xlu0 %v7145_v55  ;;  %7562 = vmatprep.subr.bf16.mxu0 %v10649_v15 }
0x1424   : > { %7161 = vadd.xlane.f32.xlu1 %v7148_v47  ;;  %7484 = vmatpush1.bf16.msra.mxu1 %v10626_v32 }
0x1425   : > { %7485 = vmatprep.subr.bf16.mxu1 %v10634_v24  ;;  %7563 = vmatpush1.bf16.msra.mxu0 %v10647_v52 }
0x1426   : > { %7127 = vadd.xlane.f32.xlu0 %v13701_v42  ;;  %7564 = vmatprep.subr.bf16.mxu0 %v10655_v13 }
0x1428   : > { %7133 = vadd.xlane.f32.xlu1 %v13704_v60  ;;  %7486 = vmatpush1.bf16.msra.mxu1 %v10632_v20 }
0x1429   : > { %7487 = vmatprep.subr.bf16.mxu1 %v10640_v44  ;;  %7565 = vmatpush1.bf16.msra.mxu0 %v10653_v48 }
0x142a   : > { %7159 = vadd.xlane.f32.xlu0 %v7147_v14  ;;  %7566 = vmatprep.subr.bf16.mxu0 %v10661_v56 }
0x142c   : > { %7165 = vadd.xlane.f32.xlu1 %v7150_v6  ;;  %7488 = vmatpush1.bf16.msra.mxu1 %v10638_v25 }
0x142d   : > { %7489 = vmatprep.subr.bf16.mxu1 %v10646_v31  ;;  %7567 = vmatpush1.bf16.msra.mxu0 %v10659_v51 }
0x142e   : > { %7131 = vadd.xlane.f32.xlu0 %v13713_v4 }
0x1430   : > { %7490 = vmatpush1.bf16.msra.mxu1 %v10644_v58 }
0x1431   : > { %7491 = vmatprep.subr.bf16.mxu1 %v10652_v19 }
0x1432   : > { %7163 = vadd.xlane.f32.xlu0 %v7149_v7 }
0x1434   : > { %7492 = vmatpush1.bf16.msra.mxu1 %v10650_v40 }
0x1435   : > { %7493 = vmatprep.subr.bf16.mxu1 %v10658_v53  ;;  %v13740_v53 = vld [vmem:[%s14474_s16 + $0x1] ss:$0 sm:$0xff] }
0x1438   : > { %7494 = vmatpush1.bf16.msra.mxu1 %v10656_v33 }
0x149f   : > { %v7120_v62 = vpop.xlane.xlu0 %7119 }
0x14a0   : > { %v7135_v63 = vmul.f32 0.0078125, %v7120_v62 }
0x14a1   : > { %v7122_v1 = vpop.xlane.xlu1 %7121 }
0x14a2   : > { %v7175_v26 = vmul.f32 %v7135_v63, %v7135_v63  ;;  %v7136_v43 = vmul.f32 0.0078125, %v7122_v1  ;;  %v7199_v44 = vsub.f32 %v13671_v17, %v7135_v63 }
0x14a3   : > { %v7152_v54 = vpop.xlane.xlu0 %7151 }
0x14a4   : > { %v7167_v36 = vmul.f32 0.0078125, %v7152_v54  ;;  %v7176_v2 = vmul.f32 %v7136_v43, %v7136_v43  ;;  %v7200_v17 = vsub.f32 %v13674_v11, %v7136_v43  ;;  %v9239_v11 = vld [vmem:[%s14475_s4 + $0x1] ss:$0 sm:$0xff]  ;;  %s8762_s4 = sshll.u32 %s801_s2, 4  ;;  %s14302_s4 = int_to_ptr.vmem [resolvable:$true] %s8762_s4 }
0x14a5   : > { %v7126_v38 = vpop.xlane.xlu1 %7125  ;;  %s11356_s3 = scalar_lea.vmem %s14302_s4, 128  ;;  %p11363_p11 = scmp.lt.s32.totalorder %s14302_s4, %s11361_s25 }
0x14a6   : > { %v7183_v29 = vsub.f32 %v7167_v36, %v7175_v26  ;;  %v13718_v45 = vmul.f32 0.0078125, %v7126_v38  ;;  %p11357_p0 = scmp.ne.s32.totalorder %s14302_s4, %s11356_s3 }
0x14a7   : > { %v7154_v3 = vpop.xlane.xlu0 %7153 }
0x14a8   : > { %v7191_v12 = vmax.f32 %v7183_v29, 0.0  ;;  %v7168_v41 = vmul.f32 0.0078125, %v7154_v3  ;;  %v7178_v23 = vmul.f32 %v13718_v45, %v13718_v45  ;;  %v7202_v43 = vsub.f32 %v13681_v46, %v13718_v45  ;;  %p11358_p8 = pnand %p11357_p0, %p14525_p2 }
0x14a9   : > { %v7158_v49 = vpop.xlane.xlu1 %7157 }
0x14aa   : > { %v7207_v55 = vadd.f32 1e-12, %v7191_v12  ;;  %v7184_v47 = vsub.f32 %v7168_v41, %v7176_v2  ;;  %v7170_v37 = vmul.f32 0.0078125, %v7158_v49  ;;  %p11359_p6 = pneg %p11358_p8 }
0x14ab   : > { %v7124_v8 = vpop.xlane.xlu0 %7123 }
0x14ac   : > { %10950 = vrsqrt.f32 %v7207_v55  ;;  %v7192_v22 = vmax.f32 %v7184_v47, 0.0  ;;  %v7186_v18 = vsub.f32 %v7170_v37, %v7178_v23  ;;  %v13722_v50 = vmul.f32 0.0078125, %v7124_v8 }
0x14ad   : > { %v7130_v14 = vpop.xlane.xlu1 %7129 }
0x14ae   : > { %v7208_v6 = vadd.f32 1e-12, %v7192_v22  ;;  %v7194_v0 = vmax.f32 %v7186_v18, 0.0  ;;  %v13724_v57 = vmul.f32 0.0078125, %v7130_v14  ;;  %v7177_v7 = vmul.f32 %v13722_v50, %v13722_v50 }
0x14af   : > { %v7156_v30 = vpop.xlane.xlu0 %7155  ;;  %v7201_v18 = vsub.f32 %v13689_v28, %v13722_v50 }
0x14b0   : > { %10952 = vrsqrt.f32 %v7208_v6  ;;  %v7210_v10 = vadd.f32 1e-12, %v7194_v0  ;;  %v7169_v32 = vmul.f32 0.0078125, %v7156_v30  ;;  %v7180_v21 = vmul.f32 %v13724_v57, %v13724_v57 }
0x14b1   : > { %v7162_v16 = vpop.xlane.xlu1 %7161  ;;  %v7204_v28 = vsub.f32 %v13692_v27, %v13724_v57 }
0x14b2   : > { %10954 = vrsqrt.f32 %v7210_v10  ;;  %v7185_v39 = vsub.f32 %v7169_v32, %v7177_v7  ;;  %v7172_v24 = vmul.f32 0.0078125, %v7162_v16 }
0x14b3   : > { %v7128_v34 = vpop.xlane.xlu0 %7127 }
0x14b4   : > { %v7193_v20 = vmax.f32 %v7185_v39, 0.0  ;;  %v7188_v35 = vsub.f32 %v7172_v24, %v7180_v21  ;;  %v13730_v25 = vmul.f32 0.0078125, %v7128_v34 }
0x14b5   : > { %v7134_v9 = vpop.xlane.xlu1 %7133 }
0x14b6   : > { %v10951_v59 = vpop.eup %10950  ;;  %v7209_v31 = vadd.f32 1e-12, %v7193_v20  ;;  %v7196_v15 = vmax.f32 %v7188_v35, 0.0  ;;  %v13733_v58 = vmul.f32 0.0078125, %v7134_v9  ;;  %v7179_v48 = vmul.f32 %v13730_v25, %v13730_v25 }
0x14b7   : > { %v7160_v52 = vpop.xlane.xlu0 %7159  ;;  %v7223_v40 = vmul.f32 %v10951_v59, %v7199_v44  ;;  %v7203_v39 = vsub.f32 %v13701_v42, %v13730_v25 }
0x14b8   : > { %10956 = vrsqrt.f32 %v7209_v31  ;;  %v7212_v19 = vadd.f32 1e-12, %v7196_v15  ;;  %v7171_v13 = vmul.f32 0.0078125, %v7160_v52  ;;  %v7182_v51 = vmul.f32 %v13733_v58, %v13733_v58 }
0x14b9   : > { %v7166_v56 = vpop.xlane.xlu1 %7165  ;;  %v7237_v26 = vmul.f32 %v13740_v53, %v7223_v40  ;;  %v7206_v35 = vsub.f32 %v13704_v60, %v13733_v58 }
0x14ba   : > { %v10953_v33 = vpop.eup %10952  ;;  %10958 = vrsqrt.f32 %v7212_v19  ;;  %v7187_v62 = vsub.f32 %v7171_v13, %v7179_v48  ;;  %v7174_v63 = vmul.f32 0.0078125, %v7166_v56  ;;  %v10662_v48 = vld [vmem:[#allocation13 + $0x140] sm:$0xff]  }
0x14bb   : > { %v7132_v1 = vpop.xlane.xlu0 %7131  ;;  %v7224_v54 = vmul.f32 %v10953_v33, %v7200_v17  ;;  %v13752_v55 = vadd.f32 %v9239_v11, %v7237_v26  ;;  %v10663_v13 = vld [vmem:[#allocation13 + $0x1c0] sm:$0xff]   ;;  %9643 = vmatprep.subr.bf16.mxu1 %v10662_v48  ;;  %v10667_v33 = vld [vmem:[#allocation13 + $0x1c8] sm:$0xff]   ;;  %v10674_v26 = vld [vmem:[#allocation13 + $0x158] sm:$0xff]  }
0x14bc   : > { %v10955_v36 = vpop.eup %10954  ;;  %v7195_v38 = vmax.f32 %v7187_v62, 0.0  ;;  %v7190_v29 = vsub.f32 %v7174_v63, %v7182_v51  ;;  %v7141_v3 = vmul.f32 0.0078125, %v7132_v1  ;;  %v10664_v17 = vld [vmem:[#allocation13 + $0x100] sm:$0xff]   ;;  %9683 = vmatprep.subr.bf16.mxu0 %v10663_v13  ;;  %v10669_v51 = vld [vmem:[#allocation13 + $0x188] sm:$0xff]   ;;  %v10670_v62 = vld [vmem:[#allocation13 + $0x150] sm:$0xff]  }
0x14bd   : > { %v7238_v2 = vmul.f32 %v13740_v53, %v7224_v54  ;;  %14481 = vst [vmem:[#allocation32_spill] sm:$0xff] %v13752_v55  ;;  %v7226_v47 = vmul.f32 %v10955_v36, %v7202_v43  ;;  %v10665_v56 = vld [vmem:[#allocation13 + $0x180] sm:$0xff]   ;;  %v10671_v63 = vld [vmem:[#allocation13 + $0x1d0] sm:$0xff]   ;;  %v10675_v36 = vld [vmem:[#allocation13 + $0x1d8] sm:$0xff]  }
0x14be   : > { %v7211_v12 = vadd.f32 1e-12, %v7195_v38  ;;  %v7198_v41 = vmax.f32 %v7190_v29, 0.0  ;;  %v7181_v8 = vmul.f32 %v7141_v3, %v7141_v3  ;;  %v7205_v59 = vsub.f32 %v13713_v4, %v7141_v3  ;;  %v10672_v1 = vld [vmem:[#allocation13 + $0x110] sm:$0xff]   ;;  %v10676_v38 = vld [vmem:[#allocation13 + $0x118] sm:$0xff]   ;;  %v10678_v3 = vld [vmem:[#allocation13 + $0x160] sm:$0xff]  }
0x14bf   : > { %v7164_v49 = vpop.xlane.xlu0 %7163  ;;  %v13754_v23 = vadd.f32 %v9239_v11, %v7238_v2  ;;  %v7240_v0 = vmul.f32 %v13740_v53, %v7226_v47  ;;  %v10673_v54 = vld [vmem:[#allocation13 + $0x190] sm:$0xff]   ;;  %v10677_v29 = vld [vmem:[#allocation13 + $0x198] sm:$0xff]   ;;  %v10680_v43 = vld [vmem:[#allocation13 + $0x120] sm:$0xff]  }
0x14c0   : > { %10960 = vrsqrt.f32 %v7211_v12  ;;  %v7214_v37 = vadd.f32 1e-12, %v7198_v41  ;;  %v7173_v22 = vmul.f32 0.0078125, %v7164_v49  ;;  %v10681_v2 = vld [vmem:[#allocation13 + $0x1a0] sm:$0xff]   ;;  %v10682_v12 = vld [vmem:[#allocation13 + $0x168] sm:$0xff]  }
0x14c1   : > { %14482 = vst [vmem:[#allocation33_spill] sm:$0xff] %v13754_v23  ;;  %v7259_v46 = vpack.c.bf16 %v13754_v23, %v13752_v55  ;;  %v13768_v16 = vadd.f32 %v9239_v11, %v7240_v0  ;;  %v10683_v41 = vld [vmem:[#allocation13 + $0x1e8] sm:$0xff]   ;;  %v9240_v0 = vld [vmem:[%s14476_s6 + $0x4] sm:$0xf] }
0x14c2   : > { %v10957_v45 = vpop.eup %10956  ;;  %10962 = vrsqrt.f32 %v7214_v37  ;;  %v7189_v14 = vsub.f32 %v7173_v22, %v7181_v8  ;;  %v10684_v49 = vld [vmem:[#allocation13 + $0x128] sm:$0xff]   ;;  %v10686_v37 = vld [vmem:[#allocation13 + $0x170] sm:$0xff]  }
0x14c3   : > { %7512 = vmatmul.mubr.bf16.vlgmr.msra.gmra.mrb[200].mxu1 %v7259_v46  ;;  %7585 = vmatmul.mubr.bf16.vlgmr.msra.gmra.mrb[192].mxu0 %v7259_v46  ;;  %v7225_v6 = vmul.f32 %v10957_v45, %v7201_v18  ;;  %14484 = vst [vmem:[#allocation35_spill] sm:$0xff] %v13768_v16  ;;  %v10685_v47 = vld [vmem:[#allocation13 + $0x1a8] sm:$0xff]   ;;  %v10687_v8 = vld [vmem:[#allocation13 + $0x1f0] sm:$0xff]   ;;  %v10690_v46 = vld [vmem:[#allocation13 + $0x178] sm:$0xff]  }
0x14c4   : > { %v10959_v30 = vpop.eup %10958  ;;  %v7197_v10 = vmax.f32 %v7189_v14, 0.0  ;;  %7521 = vmatprep.mubr.bf16.mxu1 %v14473_v61  ;;  %7594 = vmatprep.mubr.bf16.mxu0 %v14473_v61  ;;  %v10688_v22 = vld [vmem:[#allocation13 + $0x130] sm:$0xff]   ;;  %v10691_v45 = vld [vmem:[#allocation13 + $0x1f8] sm:$0xff]  }
0x14c5   : > { %v7239_v50 = vmul.f32 %v13740_v53, %v7225_v6  ;;  %v7228_v21 = vmul.f32 %v10959_v30, %v7204_v28  ;;  %9644 = vmatpush3.bf16.msra.mxu1 %v10664_v17  ;;  %9684 = vmatpush3.bf16.msra.mxu0 %v10665_v56  ;;  %v10689_v18 = vld [vmem:[#allocation13 + $0x1b0] sm:$0xff]   ;;  %v10692_v14 = vld [vmem:[#allocation13 + $0x138] sm:$0xff]   ;;  %v14489_v30 = vld [vmem:[#allocation30_spill] sm:$0xff] }
0x14c6   : > { %v7213_v7 = vadd.f32 1e-12, %v7197_v10  ;;  %9685 = vmatprep.subr.bf16.mxu0 %v10667_v33  ;;  %v10693_v6 = vld [vmem:[#allocation13 + $0x1b8] sm:$0xff]   ;;  %v13803_v10 = vrot.slane %v9240_v0, %v14489_v30  ;;  %v14490_v28 = vld [vmem:[#allocation31_spill] sm:$0xff] }
0x14c7   : > { %v13766_v32 = vadd.f32 %v9239_v11, %v7239_v50  ;;  %v7242_v27 = vmul.f32 %v13740_v53, %v7228_v21  ;;  %v13806_v50 = vrot.slane %v9240_v0, %v14490_v28 }
0x14c8   : > { %10964 = vrsqrt.f32 %v7213_v7  ;;  %v14491_v7 = vld [vmem:[#allocation29_spill] sm:$0xff] }
0x14c9   : > { %14483 = vst [vmem:[#allocation34_spill] sm:$0xff] %v13766_v32  ;;  %v7260_v24 = vpack.c.bf16 %v13768_v16, %v13766_v32  ;;  %v13782_v25 = vadd.f32 %v9239_v11, %v7242_v27  ;;  %9686 = vmatpush3.bf16.msra.mxu0 %v10669_v51  ;;  %v13809_v21 = vrot.slane %v9240_v0, %v14491_v7 }
0x14ca   : > { %v10961_v34 = vpop.eup %10960  ;;  %9687 = vmatprep.subr.bf16.mxu0 %v10671_v63 }
0x14cb   : > { %7522 = vmatmul.mubr.bf16.gmra.mrb[204].mxu1 %v7260_v24  ;;  %7595 = vmatmul.mubr.bf16.gmra.mrb[196].mxu0 %v7260_v24  ;;  %v7227_v20 = vmul.f32 %v10961_v34, %v7203_v39  ;;  %14486 = vst [vmem:[#allocation37_spill] sm:$0xff] %v13782_v25  ;;  %v14492_v39 = vld [vmem:[#allocation28_spill] sm:$0xff] }
0x14cc   : > { %v10963_v57 = vpop.eup %10962  ;;  %7531 = vmatprep.mubr.bf16.mxu1 %v14473_v61  ;;  %7604 = vmatprep.mubr.bf16.mxu0 %v14473_v61  ;;  %v14493_v24 = vsub.s32 3, %v14492_v39 }
0x14cd   : > { %v7241_v44 = vmul.f32 %v13740_v53, %v7227_v20  ;;  %v7230_v9 = vmul.f32 %v10963_v57, %v7206_v35  ;;  %9688 = vmatpush3.bf16.msra.mxu0 %v10673_v54 }
0x14ce   : > { %9689 = vmatprep.subr.bf16.mxu0 %v10675_v36  ;;  %v13813_v34 = vrot.slane %v9240_v0, %v14493_v24 }
0x14cf   : > { %v13780_v42 = vadd.f32 %v9239_v11, %v7241_v44  ;;  %v7244_v40 = vmul.f32 %v13740_v53, %v7230_v9 }
0x14d1   : > { %14485 = vst [vmem:[#allocation36_spill] sm:$0xff] %v13780_v42  ;;  %v7261_v31 = vpack.c.bf16 %v13782_v25, %v13780_v42  ;;  %v13793_v19 = vadd.f32 %v9239_v11, %v7244_v40  ;;  %9690 = vmatpush3.bf16.msra.mxu0 %v10677_v29 }
0x14d2   : > { %v10965_v15 = vpop.eup %10964 }
0x14d3   : > { %7532 = vmatmul.mubr.bf16.gmra.mrb[208].mxu1 %v7261_v31  ;;  %7605 = vmatmul.mubr.bf16.gmra.mrb[200].mxu0 %v7261_v31  ;;  %v7229_v52 = vmul.f32 %v10965_v15, %v7205_v59  ;;  %14488 = vst [vmem:[#allocation39_spill] sm:$0xff] %v13793_v19 }
0x14d4   : > { %7541 = vmatprep.mubr.bf16.mxu1 %v14473_v61  ;;  %7614 = vmatprep.mubr.bf16.mxu0 %v14473_v61  ;;  %v10666_v61 = vld [vmem:[#allocation13 + $0x148] sm:$0xff]  }
0x14d5   : > { %v7243_v60 = vmul.f32 %v13740_v53, %v7229_v52  ;;  %v10668_v53 = vld [vmem:[#allocation13 + $0x108] sm:$0xff]   ;;  %9645 = vmatprep.subr.bf16.mxu1 %v10666_v61 }
0x14d6   : > { %9646 = vmatpush3.bf16.msra.mxu1 %v10668_v53 }
0x14d7   : > { %v13791_v58 = vadd.f32 %v9239_v11, %v7243_v60  ;;  %9647 = vmatprep.subr.bf16.mxu1 %v10670_v62  ;;  %v10679_v11 = vld [vmem:[#allocation13 + $0x1e0] sm:$0xff]  }
0x14d8   : > { %9691 = vmatprep.subr.bf16.mxu0 %v10679_v11 }
0x14d9   : > { %14487 = vst [vmem:[#allocation38_spill] sm:$0xff] %v13791_v58  ;;  %v7262_v4 = vpack.c.bf16 %v13793_v19, %v13791_v58  ;;  %9692 = vmatpush3.bf16.msra.mxu0 %v10681_v2 }
0x14da   : > { %9648 = vmatpush3.bf16.msra.mxu1 %v10672_v1  ;;  %9693 = vmatprep.subr.bf16.mxu0 %v10683_v41 }
0x14db   : > { %7542 = vmatmul.mubr.bf16.gmra.mrb[212].mxu1 %v7262_v4  ;;  %7615 = vmatmul.mubr.bf16.gmra.mrb[204].mxu0 %v7262_v4 }
0x14dc   : > { %9649 = vmatprep.subr.bf16.mxu1 %v10674_v26 }
0x14dd   : > { %9694 = vmatpush3.bf16.msra.mxu0 %v10685_v47 }
0x14de   : > { %9650 = vmatpush3.bf16.msra.mxu1 %v10676_v38  ;;  %9695 = vmatprep.subr.bf16.mxu0 %v10687_v8 }
0x14df   : > { %9651 = vmatprep.subr.bf16.mxu1 %v10678_v3 }
0x14e1   : > { %9696 = vmatpush3.bf16.msra.mxu0 %v10689_v18 }
0x14e2   : > { %9652 = vmatpush3.bf16.msra.mxu1 %v10680_v43  ;;  %9697 = vmatprep.subr.bf16.mxu0 %v10691_v45 }
0x14e3   : > { %9653 = vmatprep.subr.bf16.mxu1 %v10682_v12 }
0x14e5   : > { %9698 = vmatpush3.bf16.msra.mxu0 %v10693_v6 }
0x14e6   : > { %9654 = vmatpush3.bf16.msra.mxu1 %v10684_v49  ;;  %10257 = vmatprep.subr.bf16.mxu0 %v14472_v5 }
0x14e7   : > { %9655 = vmatprep.subr.bf16.mxu1 %v10686_v37 }
0x14ea   : > { %9656 = vmatpush3.bf16.msra.mxu1 %v10688_v22 }
0x14eb   : > { %9657 = vmatprep.subr.bf16.mxu1 %v10690_v46 }
0x14ee   : > { %9658 = vmatpush3.bf16.msra.mxu1 %v10692_v14 }
0x14ef   : > { %10237 = vmatprep.subr.bf16.mxu1 %v14472_v5 }
0x1596   : > { %v7513_v20 = vpop.f32.mrb[200].mxu1  ;;  %v7586_v27 = vpop.f32.mrb[192].mxu0 }
0x1597   : > { %v7514_v57 = vadd.f32 %v7513_v20, %v13803_v10  ;;  %v7587_v35 = vadd.f32 %v7586_v27, %v13806_v50  ;;  %v7515_v44 = vpop.f32.mrb[201].mxu1  ;;  %v7588_v9 = vpop.f32.mrb[193].mxu0 }
0x1598   : > { %v13818_v59 = vadd.f32 %v7515_v44, %v13809_v21  ;;  %v13821_v31 = vadd.f32 %v7588_v9, %v13813_v34  ;;  %v7517_v15 = vpop.f32.mrb[202].mxu1  ;;  %v7590_v52 = vpop.f32.mrb[194].mxu0 }
0x1599   : > { %v7657_v40 = vmul.f32 0.044715, %v7514_v57  ;;  %v7659_v60 = vmul.f32 0.044715, %v7587_v35  ;;  %v7518_v48 = vadd.f32 %v7517_v15, %v13803_v10  ;;  %v7591_v13 = vadd.f32 %v7590_v52, %v13806_v50  ;;  %v7519_v17 = vpop.f32.mrb[203].mxu1  ;;  %v7592_v56 = vpop.f32.mrb[195].mxu0 }
0x159a   : > { %v7658_v4 = vmul.f32 0.044715, %v13818_v59  ;;  %v7660_v53 = vmul.f32 0.044715, %v13821_v31  ;;  %v13828_v51 = vadd.f32 %v7519_v17, %v13809_v21  ;;  %v13831_v26 = vadd.f32 %v7592_v56, %v13813_v34 }
0x159b   : > { %v7689_v61 = vmul.f32 %v7657_v40, %v7514_v57  ;;  %v7691_v33 = vmul.f32 %v7659_v60, %v7587_v35  ;;  %v7661_v62 = vmul.f32 0.044715, %v7518_v48  ;;  %v7663_v54 = vmul.f32 0.044715, %v7591_v13 }
0x159c   : > { %v7690_v36 = vmul.f32 %v7658_v4, %v13818_v59  ;;  %v7692_v43 = vmul.f32 %v7660_v53, %v13821_v31  ;;  %v7662_v12 = vmul.f32 0.044715, %v13828_v51  ;;  %v13842_v45 = vmul.f32 0.5, %v7514_v57 }
0x159d   : > { %v7721_v63 = vmul.f32 %v7689_v61, %v7514_v57  ;;  %v7723_v1 = vmul.f32 %v7691_v33, %v7587_v35  ;;  %v7693_v38 = vmul.f32 %v7661_v62, %v7518_v48  ;;  %v7695_v2 = vmul.f32 %v7663_v54, %v7591_v13 }
0x159e   : > { %v7523_v29 = vpop.f32.mrb[204].mxu1  ;;  %v7596_v3 = vpop.f32.mrb[196].mxu0  ;;  %v13844_v14 = vmul.f32 0.5, %v7587_v35  ;;  %v7664_v0 = vmul.f32 0.044715, %v13831_v26  ;;  %v13847_v39 = vmul.f32 0.5, %v7518_v48  ;;  %v13857_v15 = vmul.f32 %v7690_v36, %v13818_v59 }
0x159f   : > { %v7753_v11 = vadd.f32 %v7721_v63, %v7514_v57  ;;  %v7525_v41 = vpop.f32.mrb[205].mxu1  ;;  %v7598_v49 = vpop.f32.mrb[197].mxu0  ;;  %v7755_v47 = vadd.f32 %v7723_v1, %v7587_v35  ;;  %v7725_v37 = vmul.f32 %v7693_v38, %v7518_v48  ;;  %v13837_v8 = vadd.f32 %v7523_v29, %v13803_v10 }
0x15a0   : > { %v13840_v22 = vadd.f32 %v7596_v3, %v13806_v50  ;;  %v7527_v18 = vpop.f32.mrb[206].mxu1  ;;  %v7600_v46 = vpop.f32.mrb[198].mxu0  ;;  %v7727_v6 = vmul.f32 %v7695_v2, %v7591_v13  ;;  %v13849_v20 = vmul.f32 0.5, %v7591_v13  ;;  %v13854_v57 = vadd.f32 %v7525_v41, %v13809_v21 }
0x15a1   : > { %v7529_v30 = vpop.f32.mrb[207].mxu1  ;;  %v7602_v28 = vpop.f32.mrb[199].mxu0  ;;  %v7785_v7 = vmul.f32 0.7978846, %v7753_v11  ;;  %v7757_v24 = vadd.f32 %v7725_v37, %v7518_v48  ;;  %v7665_v44 = vmul.f32 0.044715, %v13837_v8  ;;  %v13860_v52 = vmul.f32 %v7692_v43, %v13821_v31 }
0x15a2   : > { %14494 = vst [vmem:[#allocation30_spill] sm:$0xff] %v13840_v22  ;;  %v7759_v27 = vadd.f32 %v7727_v6, %v7591_v13  ;;  %v7667_v9 = vmul.f32 0.044715, %v13840_v22  ;;  %v7787_v35 = vmul.f32 0.7978846, %v7755_v47  ;;  %v7694_v40 = vmul.f32 %v7662_v12, %v13828_v51 }
0x15a3   : > { %v7696_v60 = vmul.f32 %v7664_v0, %v13831_v26  ;;  %v7666_v4 = vmul.f32 0.044715, %v13854_v57  ;;  %v13866_v48 = vadd.f32 %v7598_v49, %v13813_v34  ;;  %v13869_v13 = vadd.f32 %v7527_v18, %v13803_v10 }
0x15a4   : > { %10966 = vtanh.f32 %v7785_v7  ;;  %v7789_v17 = vmul.f32 0.7978846, %v7757_v24  ;;  %v7791_v56 = vmul.f32 0.7978846, %v7759_v27  ;;  %v13872_v61 = vadd.f32 %v7600_v46, %v13806_v50 }
0x15a5   : > { %14495 = vst [vmem:[#allocation31_spill] sm:$0xff] %v13869_v13  ;;  %v7697_v62 = vmul.f32 %v7665_v44, %v13837_v8  ;;  %v7699_v63 = vmul.f32 %v7667_v9, %v13840_v22  ;;  %v7668_v1 = vmul.f32 0.044715, %v13866_v48  ;;  %v7669_v54 = vmul.f32 0.044715, %v13869_v13 }
0x15a6   : > { %14496 = vst [vmem:[#allocation29_spill] sm:$0xff] %v13872_v61  ;;  %v7533_v33 = vpop.f32.mrb[208].mxu1  ;;  %v7606_v53 = vpop.f32.mrb[200].mxu0  ;;  %v7698_v29 = vmul.f32 %v7666_v4, %v13854_v57  ;;  %v7671_v3 = vmul.f32 0.044715, %v13872_v61  ;;  %v13881_v11 = vadd.f32 %v7529_v30, %v13809_v21  ;;  %v13884_v43 = vadd.f32 %v7602_v28, %v13813_v34 }
0x15a7   : > { %v7535_v36 = vpop.f32.mrb[209].mxu1  ;;  %v7608_v38 = vpop.f32.mrb[201].mxu0  ;;  %10968 = vtanh.f32 %v7787_v35  ;;  %v13887_v41 = vmul.f32 %v7694_v40, %v13828_v51  ;;  %v13890_v49 = vadd.f32 %v7533_v33, %v13803_v10  ;;  %v13893_v47 = vadd.f32 %v7606_v53, %v13806_v50 }
0x15a8   : > { %v7537_v2 = vpop.f32.mrb[210].mxu1  ;;  %v7610_v12 = vpop.f32.mrb[202].mxu0  ;;  %10970 = vtanh.f32 %v7789_v17  ;;  %v13896_v46 = vmul.f32 %v7696_v60, %v13831_v26  ;;  %v7700_v6 = vmul.f32 %v7668_v1, %v13866_v48  ;;  %v7670_v0 = vmul.f32 0.044715, %v13881_v11 }
0x15a9   : > { %v7539_v37 = vpop.f32.mrb[211].mxu1  ;;  %v7612_v18 = vpop.f32.mrb[203].mxu0  ;;  %v13901_v30 = vmul.f32 %v7697_v62, %v13837_v8  ;;  %v7701_v28 = vmul.f32 %v7669_v54, %v13869_v13  ;;  %v7672_v7 = vmul.f32 0.044715, %v13884_v43  ;;  %v13906_v24 = vadd.f32 %v7535_v36, %v13809_v21 }
0x15aa   : > { %10972 = vtanh.f32 %v7791_v56  ;;  %v13909_v27 = vmul.f32 %v7699_v63, %v13840_v22  ;;  %v13912_v44 = vmul.f32 %v7698_v29, %v13854_v57  ;;  %v7703_v9 = vmul.f32 %v7671_v3, %v13872_v61 }
0x15ab   : > { %14497 = vst [vmem:[#allocation28_spill] sm:$0xff] %v13901_v30  ;;  %v7673_v35 = vmul.f32 0.044715, %v13890_v49  ;;  %v7675_v40 = vmul.f32 0.044715, %v13893_v47  ;;  %v13918_v60 = vadd.f32 %v7608_v38, %v13813_v34  ;;  %v13921_v4 = vadd.f32 %v7537_v2, %v13803_v10 }
0x15ac   : > { %14498 = vst [vmem:[#allocation40_spill] sm:$0xff] %v13909_v27  ;;  %v13924_v17 = vmul.f32 %v7700_v6, %v13866_v48  ;;  %v7702_v56 = vmul.f32 %v7670_v0, %v13881_v11  ;;  %v7674_v33 = vmul.f32 0.044715, %v13906_v24  ;;  %v13929_v53 = vadd.f32 %v7610_v12, %v13806_v50 }
0x15ad   : > { %v13932_v1 = vmul.f32 %v7701_v28, %v13869_v13  ;;  %v7704_v54 = vmul.f32 %v7672_v7, %v13884_v43  ;;  %v7676_v36 = vmul.f32 0.044715, %v13918_v60  ;;  %v7677_v38 = vmul.f32 0.044715, %v13921_v4 }
0x15ae   : > { %v7543_v62 = vpop.f32.mrb[212].mxu1  ;;  %v7616_v63 = vpop.f32.mrb[204].mxu0  ;;  %v7679_v6 = vmul.f32 0.044715, %v13929_v53  ;;  %v13941_v12 = vadd.f32 %v7539_v37, %v13809_v21  ;;  %v13944_v0 = vadd.f32 %v7612_v18, %v13813_v34  ;;  %v13950_v58 = vmul.f32 %v7703_v9, %v13872_v61 }
0x15af   : > { %14499 = vst [vmem:[#allocation41_spill] sm:$0xff] %v13932_v1  ;;  %v7545_v29 = vpop.f32.mrb[213].mxu1  ;;  %v7618_v3 = vpop.f32.mrb[205].mxu0  ;;  %v13947_v28 = vadd.f32 %v7543_v62, %v13803_v10  ;;  %v7705_v25 = vmul.f32 %v7673_v35, %v13890_v49  ;;  %v7707_v42 = vmul.f32 %v7675_v40, %v13893_v47  ;;  %v13955_v16 = vadd.f32 %v7616_v63, %v13806_v50 }
0x15b0   : > { %v13937_v2 = vpop.eup %10966  ;;  %v7547_v7 = vpop.f32.mrb[214].mxu1  ;;  %14500 = vst [vmem:[#allocation42_spill] sm:$0xff] %v13950_v58  ;;  %v13958_v18 = vmul.f32 %v7702_v56, %v13881_v11  ;;  %v7678_v62 = vmul.f32 0.044715, %v13941_v12  ;;  %v7680_v23 = vmul.f32 0.044715, %v13944_v0  ;;  %v13964_v5 = vmul.f32 %v7704_v54, %v13884_v43 }
0x15b1   : > { %v7620_v19 = vpop.f32.mrb[206].mxu0  ;;  %14501 = vst [vmem:[#allocation43_spill] sm:$0xff] %v13955_v16  ;;  %v7549_v37 = vpop.f32.mrb[215].mxu1  ;;  %v7681_v55 = vmul.f32 0.044715, %v13947_v28  ;;  %v7706_v35 = vmul.f32 %v7674_v33, %v13906_v24  ;;  %v13969_v63 = vadd.f32 %v7545_v29, %v13809_v21  ;;  %v7708_v56 = vmul.f32 %v7676_v36, %v13918_v60 }
0x15b2   : > { %v7622_v32 = vpop.f32.mrb[207].mxu0  ;;  %v10969_v9 = vpop.eup %10968  ;;  %v7683_v40 = vmul.f32 0.044715, %v13955_v16  ;;  %v7709_v61 = vmul.f32 %v7677_v38, %v13921_v4  ;;  %v7711_v27 = vmul.f32 %v7679_v6, %v13929_v53  ;;  %v7710_v22 = vmul.f32 %v7678_v62, %v13941_v12 }
0x15b3   : > { %v10971_v58 = vpop.eup %10970  ;;  %v7712_v1 = vmul.f32 %v7680_v23, %v13944_v0  ;;  %v7682_v54 = vmul.f32 0.044715, %v13969_v63  ;;  %v13978_v33 = vadd.f32 %v7618_v3, %v13813_v34  ;;  %v13981_v13 = vadd.f32 %v7547_v7, %v13803_v10 }
0x15b4   : > { %v10973_v29 = vpop.eup %10972  ;;  %v13984_v30 = vmul.f32 %v7705_v25, %v13890_v49  ;;  %v13987_v36 = vmul.f32 %v7707_v42, %v13893_v47  ;;  %v7713_v38 = vmul.f32 %v7681_v55, %v13947_v28  ;;  %v13991_v6 = vadd.f32 %v7620_v19, %v13806_v50 }
0x15b5   : > { %v13994_v23 = vmul.f32 %v7706_v35, %v13906_v24  ;;  %v7715_v3 = vmul.f32 %v7683_v40, %v13955_v16  ;;  %v7714_v10 = vmul.f32 %v7682_v54, %v13969_v63  ;;  %v7684_v7 = vmul.f32 0.044715, %v13978_v33 }
0x15b6   : > { %v14000_v25 = vmul.f32 %v7708_v56, %v13918_v60  ;;  %v14003_v42 = vmul.f32 %v7709_v61, %v13921_v4  ;;  %v7685_v55 = vmul.f32 0.044715, %v13981_v13  ;;  %v7687_v19 = vmul.f32 0.044715, %v13991_v6 }
0x15b7   : > { %v14008_v50 = vmul.f32 %v7711_v27, %v13929_v53  ;;  %v14011_v62 = vmul.f32 %v7710_v22, %v13941_v12  ;;  %v14014_v35 = vmul.f32 %v7712_v1, %v13944_v0  ;;  %v14017_v40 = vadd.f32 %v7549_v37, %v13809_v21 }
0x15b8   : > { %v14020_v56 = vmul.f32 %v7713_v38, %v13947_v28  ;;  %v7716_v61 = vmul.f32 %v7684_v7, %v13978_v33  ;;  %v14024_v54 = vadd.f32 %v7622_v32, %v13813_v34  ;;  %v7754_v27 = vadd.f32 %v13857_v15, %v13818_v59 }
0x15b9   : > { %v14029_v22 = vmul.f32 %v7715_v3, %v13955_v16  ;;  %v14032_v1 = vmul.f32 %v7714_v10, %v13969_v63  ;;  %v14035_v21 = vmul.f32 0.5, %v13818_v59  ;;  %v7758_v37 = vadd.f32 %v13887_v41, %v13828_v51 }
0x15ba   : > { %v7717_v38 = vmul.f32 %v7685_v55, %v13981_v13  ;;  %v7719_v32 = vmul.f32 %v7687_v19, %v13991_v6  ;;  %v14042_v34 = vmul.f32 0.5, %v13828_v51  ;;  %v7786_v15 = vmul.f32 0.7978846, %v7754_v27 }
0x15bb   : > { %14502 = vst [vmem:[#allocation44_spill] sm:$0xff] %v14029_v22  ;;  %v7686_v3 = vmul.f32 0.044715, %v14017_v40  ;;  %v7790_v7 = vmul.f32 0.7978846, %v7758_v37  ;;  %v7756_v10 = vadd.f32 %v13860_v52, %v13821_v31  ;;  %v7760_v59 = vadd.f32 %v13896_v46, %v13831_v26 }
0x15bc   : > { %v14050_v22 = vmul.f32 %v7716_v61, %v13978_v33  ;;  %v7688_v41 = vmul.f32 0.044715, %v14024_v54  ;;  %10974 = vtanh.f32 %v7786_v15  ;;  %v7849_v55 = vadd.f32 1.0, %v13937_v2 }
0x15bd   : > { %10976 = vtanh.f32 %v7790_v7  ;;  %v7788_v51 = vmul.f32 0.7978846, %v7756_v10  ;;  %v7792_v19 = vmul.f32 0.7978846, %v7760_v59  ;;  %v7853_v27 = vadd.f32 1.0, %v10971_v58 }
0x15be   : > { %v14055_v37 = vmul.f32 %v7717_v38, %v13981_v13  ;;  %v14058_v52 = vmul.f32 0.5, %v13821_v31  ;;  %v7851_v16 = vadd.f32 1.0, %v10969_v9  ;;  %v7855_v46 = vadd.f32 1.0, %v10973_v29 }
0x15bf   : > { %10978 = vtanh.f32 %v7788_v51  ;;  %v14061_v61 = vmul.f32 %v7849_v55, %v13842_v45  ;;  %v14064_v15 = vmul.f32 %v7853_v27, %v13847_v39  ;;  %v7762_v2 = vadd.f32 %v13912_v44, %v13854_v57  ;;  %v14504_v55 = vld [vmem:[#allocation31_spill] sm:$0xff]  ;;  %v14505_v51 = vld [vmem:[#allocation41_spill] sm:$0xff]  ;;  %v14506_v27 = vld [vmem:[#allocation30_spill] sm:$0xff] }
0x15c0   : > { %10980 = vtanh.f32 %v7792_v19  ;;  %v14069_v58 = vmul.f32 %v7851_v16, %v13844_v14  ;;  %v14072_v38 = vmul.f32 %v7855_v46, %v13849_v20  ;;  %v7766_v31 = vadd.f32 %v13958_v18, %v13881_v11  ;;  %v14507_v46 = vld [vmem:[#allocation40_spill] sm:$0xff] }
0x15c1   : > { %v7718_v9 = vmul.f32 %v7686_v3, %v14017_v40  ;;  %v7720_v45 = vmul.f32 %v7688_v41, %v14024_v54  ;;  %v7913_v39 = vpack.c.bf16 %v14064_v15, %v14061_v61  ;;  %v7794_v29 = vmul.f32 0.7978846, %v7762_v2  ;;  %v14503_v3 = vld [vmem:[#allocation28_spill] sm:$0xff] }
0x15c2   : > { %v7915_v44 = vpack.c.bf16 %v14072_v38, %v14069_v58  ;;  %v7798_v7 = vmul.f32 0.7978846, %v7766_v31  ;;  %v7764_v16 = vadd.f32 %v13924_v17, %v13866_v48  ;;  %v7768_v14 = vadd.f32 %v13964_v5, %v13884_v43  ;;  %v14508_v31 = vld [vmem:[#allocation29_spill] sm:$0xff] }
0x15c3   : > { %v14087_v20 = vmul.f32 %v7719_v32, %v13991_v6  ;;  %v7632_v18 = vmul.f32 0.5, %v13831_v26  ;;  %10982 = vtanh.f32 %v7794_v29  ;;  %v7761_v10 = vadd.f32 %v14503_v3, %v13837_v8  ;;  %v14509_v29 = vld [vmem:[#allocation42_spill] sm:$0xff] }
0x15c4   : > { %10984 = vtanh.f32 %v7798_v7  ;;  %v7796_v59 = vmul.f32 0.7978846, %v7764_v16  ;;  %v7800_v41 = vmul.f32 0.7978846, %v7768_v14  ;;  %v7765_v19 = vadd.f32 %v14505_v51, %v14504_v55 }
0x15c5   : > { %v14095_v17 = vmul.f32 %v7718_v9, %v14017_v40  ;;  %v14098_v5 = vmul.f32 %v7720_v45, %v14024_v54  ;;  %v7793_v32 = vmul.f32 0.7978846, %v7761_v10  ;;  %v7763_v26 = vadd.f32 %v14507_v46, %v14506_v27 }
0x15c6   : > { %v10975_v61 = vpop.eup %10974  ;;  %v7634_v15 = vmul.f32 0.5, %v13854_v57  ;;  %10986 = vtanh.f32 %v7796_v59  ;;  %v7797_v2 = vmul.f32 0.7978846, %v7765_v19  ;;  %v7767_v7 = vadd.f32 %v14509_v29, %v14508_v31 }
0x15c7   : > { %v10977_v16 = vpop.eup %10976  ;;  %v7850_v14 = vadd.f32 1.0, %v10975_v61  ;;  %v7638_v9 = vmul.f32 0.5, %v13881_v11  ;;  %10988 = vtanh.f32 %v7800_v41  ;;  %v7795_v3 = vmul.f32 0.7978846, %v7763_v26 }
0x15c8   : > { %v7854_v45 = vadd.f32 1.0, %v10977_v16  ;;  %10990 = vtanh.f32 %v7793_v32  ;;  %v7799_v10 = vmul.f32 0.7978846, %v7767_v7  ;;  %v7770_v51 = vadd.f32 %v13994_v23, %v13906_v24 }
0x15c9   : > { %v10979_v46 = vpop.eup %10978  ;;  %v7882_v57 = vmul.f32 %v7850_v14, %v14035_v21  ;;  %v7636_v59 = vmul.f32 0.5, %v13866_v48  ;;  %10992 = vtanh.f32 %v7797_v2  ;;  %v7774_v19 = vadd.f32 %v14011_v62, %v13941_v12 }
0x15ca   : > { %v10981_v61 = vpop.eup %10980  ;;  %v7886_v11 = vmul.f32 %v7854_v45, %v14042_v34  ;;  %v7852_v41 = vadd.f32 1.0, %v10979_v46  ;;  %10994 = vtanh.f32 %v7795_v3  ;;  %v7802_v26 = vmul.f32 0.7978846, %v7770_v51 }
0x15cb   : > { %v7856_v32 = vadd.f32 1.0, %v10981_v61  ;;  %v7640_v29 = vmul.f32 0.5, %v13884_v43  ;;  %10996 = vtanh.f32 %v7799_v10  ;;  %v7806_v23 = vmul.f32 0.7978846, %v7774_v19 }
0x15cc   : > { %v7914_v7 = vpack.c.bf16 %v7886_v11, %v7882_v57  ;;  %v7633_v21 = vmul.f32 0.5, %v13837_v8  ;;  %10998 = vtanh.f32 %v7802_v26  ;;  %v7772_v48 = vadd.f32 %v14000_v25, %v13918_v60 }
0x15cd   : > { %v10983_v2 = vpop.eup %10982  ;;  %v7884_v62 = vmul.f32 %v7852_v41, %v14058_v52  ;;  %v7888_v16 = vmul.f32 %v7856_v32, %v7632_v18  ;;  %11000 = vtanh.f32 %v7806_v23  ;;  %v7776_v34 = vadd.f32 %v14014_v35, %v13944_v0 }
0x15ce   : > { %v10985_v14 = vpop.eup %10984  ;;  %8226 = vmatprep.mubr.bf16.mxu1 %v7914_v7  ;;  %v7858_v43 = vadd.f32 1.0, %v10983_v2  ;;  %v7637_v3 = vmul.f32 0.5, %v14504_v55  ;;  %v7804_v45 = vmul.f32 0.7978846, %v7772_v48  ;;  %v7769_v8 = vadd.f32 %v13984_v30, %v13890_v49 }
0x15cf   : > { %v7916_v10 = vpack.c.bf16 %v7888_v16, %v7884_v62  ;;  %8227 = vmatmul.mubr.bf16.vlgmr.msra.gmra.mrb[216].mxu1 %v7913_v39  ;;  %v7862_v25 = vadd.f32 1.0, %v10985_v14  ;;  %v7808_v51 = vmul.f32 0.7978846, %v7776_v34  ;;  %v7773_v52 = vadd.f32 %v14003_v42, %v13921_v4 }
0x15d0   : > { %v10987_v18 = vpop.eup %10986  ;;  %v7890_v46 = vmul.f32 %v7858_v43, %v7634_v15  ;;  %v7635_v35 = vmul.f32 0.5, %v14506_v27  ;;  %11002 = vtanh.f32 %v7804_v45  ;;  %v7801_v57 = vmul.f32 0.7978846, %v7769_v8 }
0x15d1   : > { %v10989_v19 = vpop.eup %10988  ;;  %8291 = vmatprep.mubr.bf16.mxu0 %v7916_v10  ;;  %v7894_v55 = vmul.f32 %v7862_v25, %v7638_v9  ;;  %v7860_v61 = vadd.f32 1.0, %v10987_v18  ;;  %11004 = vtanh.f32 %v7808_v51  ;;  %v7805_v11 = vmul.f32 0.7978846, %v7773_v52 }
0x15d2   : > { %v10991_v30 = vpop.eup %10990  ;;  %8292 = vmatmul.mubr.bf16.vlgmr.msra.gmra.mrb[208].mxu0 %v7915_v44  ;;  %v7864_v39 = vadd.f32 1.0, %v10989_v19  ;;  %v7639_v42 = vmul.f32 0.5, %v14508_v31  ;;  %11006 = vtanh.f32 %v7801_v57  ;;  %v7771_v27 = vadd.f32 %v13987_v36, %v13893_v47 }
0x15d3   : > { %v10993_v15 = vpop.eup %10992  ;;  %v7918_v41 = vpack.c.bf16 %v7894_v55, %v7890_v46  ;;  %v7892_v26 = vmul.f32 %v7860_v61, %v7636_v59  ;;  %v7857_v32 = vadd.f32 1.0, %v10991_v30  ;;  %11008 = vtanh.f32 %v7805_v11 }
0x15d4   : > { %v10995_v9 = vpop.eup %10994  ;;  %v7896_v23 = vmul.f32 %v7864_v39, %v7640_v29  ;;  %v7861_v7 = vadd.f32 1.0, %v10993_v15  ;;  %v7775_v48 = vadd.f32 %v14008_v50, %v13929_v53  ;;  %v7803_v58 = vmul.f32 0.7978846, %v7771_v27 }
0x15d5   : > { %v10997_v38 = vpop.eup %10996  ;;  %8234 = vmatprep.mubr.bf16.mxu1 %v7918_v41  ;;  %v7889_v44 = vmul.f32 %v7857_v32, %v7633_v21  ;;  %v7859_v31 = vadd.f32 1.0, %v10995_v9  ;;  %v7642_v2 = vmul.f32 0.5, %v13906_v24  ;;  %v7646_v36 = vmul.f32 0.5, %v13941_v12 }
0x15d6   : > { %v10999_v62 = vpop.eup %10998  ;;  %v7920_v16 = vpack.c.bf16 %v7896_v23, %v7892_v26  ;;  %v7893_v59 = vmul.f32 %v7861_v7, %v7637_v3  ;;  %v7863_v34 = vadd.f32 1.0, %v10997_v38  ;;  %v7807_v14 = vmul.f32 0.7978846, %v7775_v48  ;;  %v14510_v48 = vld [vmem:[#allocation43_spill] sm:$0xff] }
0x15d7   : > { %v11001_v43 = vpop.eup %11000  ;;  %v7891_v29 = vmul.f32 %v7859_v31, %v7635_v35  ;;  %v7866_v45 = vadd.f32 1.0, %v10999_v62  ;;  %11010 = vtanh.f32 %v7803_v58  ;;  %v7778_v50 = vadd.f32 %v14032_v1, %v13969_v63  ;;  %v14511_v58 = vld [vmem:[#allocation44_spill] sm:$0xff] }
0x15d8   : > { %8299 = vmatprep.mubr.bf16.mxu0 %v7920_v16  ;;  %v7917_v8 = vpack.c.bf16 %v7893_v59, %v7889_v44  ;;  %v7895_v21 = vmul.f32 %v7863_v34, %v7639_v42  ;;  %v7870_v10 = vadd.f32 1.0, %v11001_v43  ;;  %11012 = vtanh.f32 %v7807_v14 }
0x15d9   : > { %v7644_v24 = vmul.f32 0.5, %v13918_v60  ;;  %v7648_v12 = vmul.f32 0.5, %v13944_v0  ;;  %v7782_v3 = vadd.f32 %v14095_v17, %v14017_v40  ;;  %v7810_v25 = vmul.f32 0.7978846, %v7778_v50 }
0x15da   : > { %v11003_v51 = vpop.eup %11002  ;;  %8235 = vmatmul.mubr.bf16.gmra.mrb[220].mxu1 %v7917_v8  ;;  %v7919_v52 = vpack.c.bf16 %v7895_v21, %v7891_v29  ;;  %v7898_v18 = vmul.f32 %v7866_v45, %v7642_v2  ;;  %v7902_v46 = vmul.f32 %v7870_v10, %v7646_v36  ;;  %v7780_v1 = vadd.f32 %v14050_v22, %v13978_v33 }
0x15db   : > { %v11005_v35 = vpop.eup %11004  ;;  %v7868_v57 = vadd.f32 1.0, %v11003_v51  ;;  %v7814_v19 = vmul.f32 0.7978846, %v7782_v3  ;;  %11014 = vtanh.f32 %v7810_v25  ;;  %v7784_v60 = vadd.f32 %v14098_v5, %v14024_v54 }
0x15dc   : > { %v11007_v0 = vpop.eup %11006  ;;  %8300 = vmatmul.mubr.bf16.gmra.mrb[212].mxu0 %v7919_v52  ;;  %v7922_v55 = vpack.c.bf16 %v7902_v46, %v7898_v18  ;;  %v7872_v17 = vadd.f32 1.0, %v11005_v35  ;;  %v7641_v61 = vmul.f32 0.5, %v13890_v49  ;;  %v7812_v11 = vmul.f32 0.7978846, %v7780_v1 }
0x15dd   : > { %v11009_v30 = vpop.eup %11008  ;;  %v7645_v39 = vmul.f32 0.5, %v13921_v4  ;;  %v7865_v42 = vadd.f32 1.0, %v11007_v0  ;;  %11016 = vtanh.f32 %v7814_v19  ;;  %v7816_v22 = vmul.f32 0.7978846, %v7784_v60 }
0x15de   : > { %8242 = vmatprep.mubr.bf16.mxu1 %v7922_v55  ;;  %v7900_v27 = vmul.f32 %v7868_v57, %v7644_v24  ;;  %v7904_v15 = vmul.f32 %v7872_v17, %v7648_v12  ;;  %v7869_v41 = vadd.f32 1.0, %v11009_v30  ;;  %11018 = vtanh.f32 %v7812_v11 }
0x15df   : > { %11020 = vtanh.f32 %v7816_v22  ;;  %v7777_v5 = vadd.f32 %v14020_v56, %v13947_v28  ;;  %v7781_v26 = vadd.f32 %v14055_v37, %v13981_v13  ;;  %v7897_v32 = vmul.f32 %v7865_v42, %v7641_v61 }
0x15e0   : > { %v7924_v49 = vpack.c.bf16 %v7904_v15, %v7900_v27  ;;  %v7901_v9 = vmul.f32 %v7869_v41, %v7645_v39  ;;  %v7779_v38 = vadd.f32 %v14511_v58, %v14510_v48  ;;  %v7783_v44 = vadd.f32 %v14087_v20, %v13991_v6 }
0x15e1   : > { %v11011_v23 = vpop.eup %11010  ;;  %v7809_v4 = vmul.f32 0.7978846, %v7777_v5  ;;  %v7813_v7 = vmul.f32 0.7978846, %v7781_v26  ;;  %v7643_v56 = vmul.f32 0.5, %v13893_v47  ;;  %v7647_v36 = vmul.f32 0.5, %v13929_v53 }
0x15e2   : > { %v11013_v31 = vpop.eup %11012  ;;  %8307 = vmatprep.mubr.bf16.mxu0 %v7924_v49  ;;  %v7921_v2 = vpack.c.bf16 %v7901_v9, %v7897_v32  ;;  %v7867_v37 = vadd.f32 1.0, %v11011_v23  ;;  %v7811_v16 = vmul.f32 0.7978846, %v7779_v38  ;;  %v7815_v59 = vmul.f32 0.7978846, %v7783_v44 }
0x15e3   : > { %v7871_v62 = vadd.f32 1.0, %v11013_v31  ;;  %11022 = vtanh.f32 %v7809_v4  ;;  %v7650_v47 = vmul.f32 0.5, %v13969_v63  ;;  %v7654_v53 = vmul.f32 0.5, %v14017_v40 }
0x15e4   : > { %8243 = vmatmul.mubr.bf16.gmra.mrb[224].mxu1 %v7921_v2  ;;  %11024 = vtanh.f32 %v7813_v7  ;;  %v7899_v14 = vmul.f32 %v7867_v37, %v7643_v56  ;;  %v7652_v10 = vmul.f32 0.5, %v13978_v33  ;;  %v7656_v25 = vmul.f32 0.5, %v14024_v54  ;;  %v14513_v2 = vld [vmem:[#allocation32_spill] sm:$0xff] }
0x15e5   : > { %v11015_v34 = vpop.eup %11014  ;;  %v7903_v43 = vmul.f32 %v7871_v62, %v7647_v36  ;;  %11026 = vtanh.f32 %v7811_v16  ;;  %v7649_v19 = vmul.f32 0.5, %v13947_v28  ;;  %v7653_v60 = vmul.f32 0.5, %v13981_v13  ;;  %v14170_v28 = vld [vmem:[#allocation14 + $0x1] ss:$0 sm:$0xff] }
0x15e6   : > { %v7874_v29 = vadd.f32 1.0, %v11015_v34  ;;  %11028 = vtanh.f32 %v7815_v59  ;;  %v7651_v55 = vmul.f32 0.5, %v14510_v48  ;;  %v7655_v11 = vmul.f32 0.5, %v13991_v6  ;;  %v14514_v34 = vld [vmem:[#allocation33_spill] sm:$0xff] }
0x15e7   : > { %v11017_v20 = vpop.eup %11016  ;;  %v7923_v45 = vpack.c.bf16 %v7903_v43, %v7899_v14  ;;  %v14512_v15 = vmov 0.0  }
0x15e8   : > { %v11019_v50 = vpop.eup %11018  ;;  %v7878_v8 = vadd.f32 1.0, %v11017_v20  ;;  %v7906_v12 = vmul.f32 %v7874_v29, %v7650_v47 }
0x15e9   : > { %v11021_v21 = vpop.eup %11020  ;;  %8308 = vmatmul.mubr.bf16.gmra.mrb[216].mxu0 %v7923_v45  ;;  %v7876_v24 = vadd.f32 1.0, %v11019_v50 }
0x15ea   : > { %v7910_v3 = vmul.f32 %v7878_v8, %v7654_v53  ;;  %v7880_v51 = vadd.f32 1.0, %v11021_v21 }
0x15eb   : > { %v7908_v18 = vmul.f32 %v7876_v24, %v7652_v10 }
0x15ec   : > { %v7926_v52 = vpack.c.bf16 %v7910_v3, %v7906_v12  ;;  %v7912_v46 = vmul.f32 %v7880_v51, %v7656_v25  ;;  %v14515_v3 = vld [vmem:[#allocation34_spill] sm:$0xff] }
0x15ed   : > { %v11023_v1 = vpop.eup %11022 }
0x15ee   : > { %v11025_v35 = vpop.eup %11024  ;;  %8250 = vmatprep.mubr.bf16.mxu1 %v7926_v52  ;;  %v7928_v63 = vpack.c.bf16 %v7912_v46, %v7908_v18  ;;  %v7873_v57 = vadd.f32 1.0, %v11023_v1 }
0x15ef   : > { %v11027_v40 = vpop.eup %11026  ;;  %v7877_v33 = vadd.f32 1.0, %v11025_v35  ;;  %v14516_v35 = vld [vmem:[#allocation35_spill] sm:$0xff] }
0x15f0   : > { %v11029_v0 = vpop.eup %11028  ;;  %8315 = vmatprep.mubr.bf16.mxu0 %v7928_v63  ;;  %v7875_v54 = vadd.f32 1.0, %v11027_v40  ;;  %v7905_v17 = vmul.f32 %v7873_v57, %v7649_v19 }
0x15f1   : > { %v7909_v61 = vmul.f32 %v7877_v33, %v7653_v60  ;;  %v7879_v30 = vadd.f32 1.0, %v11029_v0 }
0x15f2   : > { %v7907_v42 = vmul.f32 %v7875_v54, %v7651_v55 }
0x15f3   : > { %v7925_v39 = vpack.c.bf16 %v7909_v61, %v7905_v17  ;;  %v7911_v22 = vmul.f32 %v7879_v30, %v7655_v11 }
0x15f5   : > { %8251 = vmatmul.mubr.bf16.gmra.mrb[228].mxu1 %v7925_v39  ;;  %v7927_v27 = vpack.c.bf16 %v7911_v22, %v7907_v42  ;;  %v14517_v22 = vld [vmem:[#allocation36_spill] sm:$0xff] }
0x15f6   : > { %10253 = vmatprep.mubr.msk.bf16.mxu1 %vm11466_vm0, %v14512_v15 }
0x15f7   : > { %8316 = vmatmul.mubr.bf16.gmra.mrb[220].mxu0 %v7927_v27 }
0x15f8   : > { %10273 = vmatprep.mubr.msk.bf16.mxu0 %vm11466_vm0, %v14512_v15 }
0x16a2   : > { %v9659_v13 = vpop.f32.mrb[216].mxu1 }
0x16a3   : > { %v9660_v41 = vpop.f32.mrb[217].mxu1 }
0x16a4   : > { %v9661_v5 = vadd.f32 %v9660_v41, %v9659_v13  ;;  %v9662_v26 = vpop.f32.mrb[218].mxu1  ;;  %v14518_v13 = vld [vmem:[#allocation37_spill] sm:$0xff] }
0x16a5   : > { %v9699_v6 = vpop.f32.mrb[208].mxu0  ;;  %v9663_v49 = vpop.f32.mrb[219].mxu1 }
0x16a6   : > { %v8229_v32 = vadd.f32 %v9661_v5, %v14170_v28  ;;  %v9700_v9 = vpop.f32.mrb[209].mxu0  ;;  %v9664_v23 = vadd.f32 %v9663_v49, %v9662_v26 }
0x16a7   : > { %v9701_v4 = vadd.f32 %v9700_v9, %v9699_v6  ;;  %v9702_v7 = vpop.f32.mrb[210].mxu0 }
0x16a8   : > { %v8232_v48 = vadd.f32 %v9664_v23, %v14170_v28  ;;  %v9703_v58 = vpop.f32.mrb[211].mxu0 }
0x16a9   : > { %v8294_v38 = vadd.f32 %v9701_v4, %v8229_v32  ;;  %v9704_v44 = vadd.f32 %v9703_v58, %v9702_v7 }
0x16ab   : > { %v8297_v31 = vadd.f32 %v9704_v44, %v8232_v48  ;;  %v14175_v56 = vadd.f32 %v8294_v38, %v14513_v2 }
0x16ad   : > { %v9665_v36 = vpop.f32.mrb[220].mxu1  ;;  %8336 = vadd.xlane.f32.xlu0 %v14175_v56  ;;  %v14179_v14 = vadd.f32 %v8297_v31, %v14514_v34  ;;  %v8360_v24 = vmul.f32 %v14175_v56, %v14175_v56  ;;  %v14520_v34 = vld [vmem:[#allocation39_spill] sm:$0xff] }
0x16ae   : > { %v9666_v37 = vpop.f32.mrb[221].mxu1 }
0x16af   : > { %v9705_v62 = vpop.f32.mrb[212].mxu0  ;;  %v9667_v16 = vadd.f32 %v9666_v37, %v9665_v36  ;;  %v9668_v59 = vpop.f32.mrb[222].mxu1  ;;  %v8361_v52 = vmul.f32 %v14179_v14, %v14179_v14 }
0x16b0   : > { %v9706_v43 = vpop.f32.mrb[213].mxu0  ;;  %v9669_v29 = vpop.f32.mrb[223].mxu1 }
0x16b1   : > { %v8237_v20 = vadd.f32 %v9667_v16, %v14170_v28  ;;  %v9707_v45 = vadd.f32 %v9706_v43, %v9705_v62  ;;  %v9708_v50 = vpop.f32.mrb[214].mxu0  ;;  %v9670_v47 = vadd.f32 %v9669_v29, %v9668_v59  ;;  %8338 = vadd.xlane.f32.xlu0 %v14179_v14  ;;  %v14519_v16 = vld [vmem:[#allocation38_spill] sm:$0xff] }
0x16b2   : > { %v9709_v53 = vpop.f32.mrb[215].mxu0 }
0x16b3   : > { %v8302_v8 = vadd.f32 %v9707_v45, %v8237_v20  ;;  %v8240_v21 = vadd.f32 %v9670_v47, %v14170_v28  ;;  %v9710_v10 = vadd.f32 %v9709_v53, %v9708_v50  ;;  %v10694_v20 = vld [vmem:[%s14521_s28] sm:$0xff]   ;;  %v10695_v45 = vld [vmem:[%s14521_s28 + $0x8] sm:$0xff]   ;;  %v10696_v50 = vld [vmem:[%s14521_s28 + $0x10] sm:$0xff]  }
0x16b4   : > { %10238 = vmatpush3.bf16.msra.mxu1 %v10694_v20  ;;  %v10697_v47 = vld [vmem:[%s14521_s28 + $0x18] sm:$0xff]   ;;  %v10698_v53 = vld [vmem:[%s14521_s28 + $0x20] sm:$0xff]  }
0x16b5   : > { %v8305_v12 = vadd.f32 %v9710_v10, %v8240_v21  ;;  %v14187_v25 = vadd.f32 %v8302_v8, %v14515_v3  ;;  %8368 = vadd.xlane.f32.xlu0 %v8360_v24  ;;  %10239 = vmatprep.subr.bf16.mxu1 %v14512_v15  ;;  %v10699_v8 = vld [vmem:[%s14521_s28 + $0x28] sm:$0xff]   ;;  %v10700_v10 = vld [vmem:[%s14521_s28 + $0x30] sm:$0xff]   ;;  %v10704_v3 = vld [vmem:[#allocation19 + $0x10] sm:$0xff]  }
0x16b6   : > { %v10702_v21 = vld [vmem:[#allocation19] sm:$0xff]   ;;  %v10703_v24 = vld [vmem:[#allocation19 + $0x8] sm:$0xff]  }
0x16b7   : > { %v9671_v51 = vpop.f32.mrb[224].mxu1  ;;  %8340 = vadd.xlane.f32.xlu1 %v14187_v25  ;;  %v14193_v63 = vadd.f32 %v8305_v12, %v14516_v35  ;;  %v8362_v19 = vmul.f32 %v14187_v25, %v14187_v25  ;;  %10258 = vmatpush3.bf16.msra.mxu0 %v10702_v21  ;;  %v10701_v12 = vld [vmem:[%s14521_s28 + $0x38] sm:$0xff]  }
0x16b8   : > { %v9672_v18 = vpop.f32.mrb[225].mxu1  ;;  %10240 = vmatpush3.bf16.msra.mxu1 %v10695_v45  ;;  %10259 = vmatprep.subr.bf16.mxu0 %v14512_v15 }
0x16b9   : > { %v9673_v46 = vadd.f32 %v9672_v18, %v9671_v51  ;;  %v9674_v1 = vpop.f32.mrb[226].mxu1  ;;  %8370 = vadd.xlane.f32.xlu0 %v8361_v52  ;;  %v8363_v55 = vmul.f32 %v14193_v63, %v14193_v63  ;;  %10241 = vmatprep.subr.bf16.mxu1 %v14512_v15  ;;  %v10705_v51 = vld [vmem:[#allocation19 + $0x18] sm:$0xff]   ;;  %v10706_v52 = vld [vmem:[#allocation19 + $0x20] sm:$0xff]   ;;  %v10707_v18 = vld [vmem:[#allocation19 + $0x28] sm:$0xff]  }
0x16ba   : > { %v9675_v57 = vpop.f32.mrb[227].mxu1 }
0x16bb   : > { %v9676_v40 = vadd.f32 %v9675_v57, %v9674_v1  ;;  %8342 = vadd.xlane.f32.xlu1 %v14193_v63  ;;  %v8245_v33 = vadd.f32 %v9673_v46, %v14170_v28  ;;  %10260 = vmatpush3.bf16.msra.mxu0 %v10703_v24 }
0x16bc   : > { %v9711_v60 = vpop.f32.mrb[216].mxu0  ;;  %10242 = vmatpush3.bf16.msra.mxu1 %v10696_v50  ;;  %10261 = vmatprep.subr.bf16.mxu0 %v14512_v15 }
0x16bd   : > { %v9712_v0 = vpop.f32.mrb[217].mxu0  ;;  %8372 = vadd.xlane.f32.xlu0 %v8362_v19  ;;  %v8248_v61 = vadd.f32 %v9676_v40, %v14170_v28  ;;  %10243 = vmatprep.subr.bf16.mxu1 %v14512_v15 }
0x16be   : > { %v9713_v54 = vadd.f32 %v9712_v0, %v9711_v60  ;;  %v9714_v17 = vpop.f32.mrb[218].mxu0 }
0x16bf   : > { %v9715_v11 = vpop.f32.mrb[219].mxu0  ;;  %8374 = vadd.xlane.f32.xlu1 %v8363_v55  ;;  %10262 = vmatpush3.bf16.msra.mxu0 %v10704_v3 }
0x16c0   : > { %v8310_v30 = vadd.f32 %v9713_v54, %v8245_v33  ;;  %v9716_v39 = vadd.f32 %v9715_v11, %v9714_v17  ;;  %10244 = vmatpush3.bf16.msra.mxu1 %v10697_v47  ;;  %10263 = vmatprep.subr.bf16.mxu0 %v14512_v15 }
0x16c1   : > { %10245 = vmatprep.subr.bf16.mxu1 %v14512_v15 }
0x16c2   : > { %v8313_v42 = vadd.f32 %v9716_v39, %v8248_v61  ;;  %v14203_v27 = vadd.f32 %v8310_v30, %v14517_v22 }
0x16c3   : > { %10264 = vmatpush3.bf16.msra.mxu0 %v10705_v51 }
0x16c4   : > { %8344 = vadd.xlane.f32.xlu1 %v14203_v27  ;;  %v14207_v41 = vadd.f32 %v8313_v42, %v14518_v13  ;;  %v8364_v9 = vmul.f32 %v14203_v27, %v14203_v27  ;;  %10246 = vmatpush3.bf16.msra.mxu1 %v10698_v53 }
0x16c5   : > { %10247 = vmatprep.subr.bf16.mxu1 %v14512_v15  ;;  %10265 = vmatprep.subr.bf16.mxu0 %v14512_v15 }
0x16c6   : > { %v8365_v37 = vmul.f32 %v14207_v41, %v14207_v41 }
0x16c7   : > { %10266 = vmatpush3.bf16.msra.mxu0 %v10706_v52 }
0x16c8   : > { %v9677_v5 = vpop.f32.mrb[228].mxu1  ;;  %8346 = vadd.xlane.f32.xlu1 %v14207_v41  ;;  %10248 = vmatpush3.bf16.msra.mxu1 %v10699_v8 }
0x16c9   : > { %v9678_v26 = vpop.f32.mrb[229].mxu1  ;;  %10249 = vmatprep.subr.bf16.mxu1 %v14512_v15  ;;  %10267 = vmatprep.subr.bf16.mxu0 %v14512_v15 }
0x16ca   : > { %v9717_v6 = vpop.f32.mrb[220].mxu0  ;;  %v9679_v49 = vadd.f32 %v9678_v26, %v9677_v5  ;;  %v9680_v32 = vpop.f32.mrb[230].mxu1 }
0x16cb   : > { %v9718_v23 = vpop.f32.mrb[221].mxu0  ;;  %v9681_v4 = vpop.f32.mrb[231].mxu1  ;;  %10268 = vmatpush3.bf16.msra.mxu0 %v10707_v18 }
0x16cc   : > { %v8253_v7 = vadd.f32 %v9679_v49, %v14170_v28  ;;  %v9719_v48 = vadd.f32 %v9718_v23, %v9717_v6  ;;  %v9720_v58 = vpop.f32.mrb[222].mxu0  ;;  %v9682_v38 = vadd.f32 %v9681_v4, %v9680_v32  ;;  %8376 = vadd.xlane.f32.xlu1 %v8364_v9  ;;  %10250 = vmatpush3.bf16.msra.mxu1 %v10700_v10 }
0x16cd   : > { %v9721_v44 = vpop.f32.mrb[223].mxu0  ;;  %10251 = vmatprep.subr.bf16.mxu1 %v14512_v15  ;;  %10269 = vmatprep.subr.bf16.mxu0 %v14512_v15 }
0x16ce   : > { %v8318_v31 = vadd.f32 %v9719_v48, %v8253_v7  ;;  %v8256_v2 = vadd.f32 %v9682_v38, %v14170_v28  ;;  %v9722_v36 = vadd.f32 %v9721_v44, %v9720_v58 }
0x16d0   : > { %v8321_v62 = vadd.f32 %v9722_v36, %v8256_v2  ;;  %v14217_v59 = vadd.f32 %v8318_v31, %v14519_v16  ;;  %8378 = vadd.xlane.f32.xlu1 %v8365_v37  ;;  %10252 = vmatpush3.bf16.msra.mxu1 %v10701_v12 }
0x16d2   : > { %8348 = vadd.xlane.f32.xlu0 %v14217_v59  ;;  %v14221_v43 = vadd.f32 %v8321_v62, %v14520_v34  ;;  %v8366_v28 = vmul.f32 %v14217_v59, %v14217_v59 }
0x16d4   : > { %v8367_v29 = vmul.f32 %v14221_v43, %v14221_v43 }
0x16d6   : > { %8350 = vadd.xlane.f32.xlu0 %v14221_v43  ;;  %8382 = vadd.xlane.f32.xlu1 %v8367_v29 }
0x16da   : > { %8380 = vadd.xlane.f32.xlu0 %v8366_v28 }
0x173a   : > { %v8337_v46 = vpop.xlane.xlu0 %8336 }
0x173b   : > { %v14267_v42 = vmul.f32 0.0078125, %v8337_v46 }
0x173d   : > { %v8392_v49 = vmul.f32 %v14267_v42, %v14267_v42 }
0x173e   : > { %v8339_v1 = vpop.xlane.xlu0 %8338 }
0x173f   : > { %v8353_v40 = vmul.f32 0.0078125, %v8339_v1 }
0x1741   : > { %v8393_v55 = vmul.f32 %v8353_v40, %v8353_v40  ;;  %v8417_v10 = vsub.f32 %v14179_v14, %v8353_v40 }
0x1742   : > { %v8369_v35 = vpop.xlane.xlu0 %8368 }
0x1743   : > { %v8384_v5 = vmul.f32 0.0078125, %v8369_v35 }
0x1744   : > { %v8341_v57 = vpop.xlane.xlu1 %8340 }
0x1745   : > { %v8354_v60 = vmul.f32 0.0078125, %v8341_v57  ;;  %v8400_v4 = vsub.f32 %v8384_v5, %v8392_v49 }
0x1746   : > { %v8371_v19 = vpop.xlane.xlu0 %8370 }
0x1747   : > { %v8385_v0 = vmul.f32 0.0078125, %v8371_v19  ;;  %v8394_v61 = vmul.f32 %v8354_v60, %v8354_v60  ;;  %v8408_v31 = vmax.f32 %v8400_v4, 0.0  ;;  %v8418_v1 = vsub.f32 %v14187_v25, %v8354_v60 }
0x1748   : > { %v8343_v33 = vpop.xlane.xlu1 %8342  ;;  %v8416_v25 = vsub.f32 %v14175_v56, %v14267_v42 }
0x1749   : > { %v14265_v17 = vmul.f32 0.0078125, %v8343_v33  ;;  %v8401_v11 = vsub.f32 %v8385_v0, %v8393_v55  ;;  %v8424_v16 = vadd.f32 1e-12, %v8408_v31 }
0x174a   : > { %v8373_v54 = vpop.xlane.xlu0 %8372 }
0x174b   : > { %v8386_v39 = vmul.f32 0.0078125, %v8373_v54  ;;  %v8395_v26 = vmul.f32 %v14265_v17, %v14265_v17  ;;  %v8409_v6 = vmax.f32 %v8401_v11, 0.0  ;;  %v9306_v54 = vld [vmem:[#allocation16 + $0x1] ss:$0 sm:$0xff]  ;;  %v8419_v14 = vsub.f32 %v14193_v63, %v14265_v17 }
0x174c   : > { %v8375_v30 = vpop.xlane.xlu1 %8374 }
0x174d   : > { %v8387_v22 = vmul.f32 0.0078125, %v8375_v30  ;;  %v8402_v13 = vsub.f32 %v8386_v39, %v8394_v61  ;;  %v8425_v7 = vadd.f32 1e-12, %v8409_v6 }
0x174f   : > { %v8403_v32 = vsub.f32 %v8387_v22, %v8395_v26  ;;  %v8410_v23 = vmax.f32 %v8402_v13, 0.0  ;;  %11030 = vrsqrt.f32 %v8425_v7  ;;  %v9307_v26 = vld [vmem:[#allocation17 + $0x1] ss:$0 sm:$0xff] }
0x1751   : > { %v8345_v9 = vpop.xlane.xlu1 %8344  ;;  %v8411_v48 = vmax.f32 %v8403_v32, 0.0  ;;  %v8426_v38 = vadd.f32 1e-12, %v8410_v23 }
0x1752   : > { %v8356_v44 = vmul.f32 0.0078125, %v8345_v9 }
0x1753   : > { %v8427_v2 = vadd.f32 1e-12, %v8411_v48  ;;  %11032 = vrsqrt.f32 %v8426_v38 }
0x1754   : > { %v8396_v37 = vmul.f32 %v8356_v44, %v8356_v44  ;;  %v8420_v49 = vsub.f32 %v14203_v27, %v8356_v44 }
0x1755   : > { %v8347_v58 = vpop.xlane.xlu1 %8346  ;;  %11034 = vrsqrt.f32 %v8427_v2 }
0x1756   : > { %v8357_v34 = vmul.f32 0.0078125, %v8347_v58  ;;  %11036 = vrsqrt.f32 %v8424_v16 }
0x1758   : > { %v8397_v50 = vmul.f32 %v8357_v34, %v8357_v34  ;;  %v8421_v56 = vsub.f32 %v14207_v41, %v8357_v34 }
0x1759   : > { %v8377_v36 = vpop.xlane.xlu1 %8376  ;;  %v11031_v21 = vpop.eup %11030 }
0x175a   : > { %v8388_v62 = vmul.f32 0.0078125, %v8377_v36  ;;  %v8441_v35 = vmul.f32 %v11031_v21, %v8417_v10 }
0x175c   : > { %v8404_v29 = vsub.f32 %v8388_v62, %v8396_v37  ;;  %v8455_v39 = vmul.f32 %v9306_v54, %v8441_v35 }
0x175d   : > { %v8379_v28 = vpop.xlane.xlu1 %8378  ;;  %v11033_v51 = vpop.eup %11032 }
0x175e   : > { %v8412_v20 = vmax.f32 %v8404_v29, 0.0  ;;  %v8389_v45 = vmul.f32 0.0078125, %v8379_v28  ;;  %v8442_v0 = vmul.f32 %v11033_v51, %v8418_v1  ;;  %v8469_v9 = vadd.f32 %v9307_v26, %v8455_v39 }
0x175f   : > { %v8349_v47 = vpop.xlane.xlu0 %8348  ;;  %v11035_v33 = vpop.eup %11034 }
0x1760   : > { %v8428_v53 = vadd.f32 1e-12, %v8412_v20  ;;  %v8405_v8 = vsub.f32 %v8389_v45, %v8397_v50  ;;  %v14274_v52 = vmul.f32 0.0078125, %v8349_v47  ;;  %v11037_v30 = vpop.eup %11036  ;;  %v8443_v60 = vmul.f32 %v11035_v33, %v8419_v14 }
0x1761   : > { %v8456_v5 = vmul.f32 %v9306_v54, %v8442_v0  ;;  %v8440_v6 = vmul.f32 %v11037_v30, %v8416_v25  ;;  %v8477_v31 = vpack.c.bf16 %v8469_v9, %v8469_v9 }
0x1762   : > { %11038 = vrsqrt.f32 %v8428_v53  ;;  %v8413_v12 = vmax.f32 %v8405_v8, 0.0  ;;  %v8398_v40 = vmul.f32 %v14274_v52, %v14274_v52  ;;  %v8457_v23 = vmul.f32 %v9306_v54, %v8443_v60 }
0x1763   : > { %v8351_v24 = vpop.xlane.xlu0 %8350  ;;  %v8383_v3 = vpop.xlane.xlu1 %8382  ;;  %v8470_v48 = vadd.f32 %v9307_v26, %v8456_v5  ;;  %v8454_v58 = vmul.f32 %v9306_v54, %v8440_v6  ;;  %v8516_v16 = vunpack.c.l.b16 %v8477_v31  ;;  %v8422_v34 = vsub.f32 %v14217_v59, %v14274_v52  ;;  %v10708_v5 = vld [vmem:[#allocation19 + $0x30] sm:$0xff]  }
0x1764   : > { %v8359_v18 = vmul.f32 0.0078125, %v8351_v24  ;;  %v8391_v46 = vmul.f32 0.0078125, %v8383_v3  ;;  %v8429_v57 = vadd.f32 1e-12, %v8413_v12  ;;  %v8471_v2 = vadd.f32 %v9307_v26, %v8457_v23  ;;  %10270 = vmatpush3.bf16.msra.mxu0 %v10708_v5  ;;  %v9308_v6 = vld [vmem:[%s14522_s26] ss:$0 sm:$0xff] }
0x1765   : > { %v8478_v37 = vpack.c.bf16 %v8470_v48, %v8470_v48  ;;  %v8468_v44 = vadd.f32 %v9307_v26, %v8454_v58  ;;  %v8523_v10 = vrot.slane %v8516_v16, 7  ;;  %10271 = vmatprep.subr.bf16.mxu0 %v14512_v15  ;;  %v9317_v15 = vld [vmem:[%s14523_s19] ss:$0 sm:$0xff]  ;;  %s14524_s26 = sld [smem:[#allocation59_spill]]  ;;  %s11362_s19 = scalar_lea.vmem %s11361_s25, 256 }
0x1766   : > { %v8399_v19 = vmul.f32 %v8359_v18, %v8359_v18  ;;  %11040 = vrsqrt.f32 %v8429_v57  ;;  %v8479_v29 = vpack.c.bf16 %v8471_v2, %v8471_v2  ;;  %v8423_v50 = vsub.f32 %v14221_v43, %v8359_v18  ;;  %p11364_p12 = scmp.lt.s32.totalorder %s11362_s19, %s11356_s3 }
0x1767   : > { %v8381_v55 = vpop.xlane.xlu0 %8380  ;;  %v8517_v20 = vunpack.c.l.b16 %v8478_v37  ;;  %v8476_v53 = vpack.c.bf16 %v8468_v44, %v8468_v44 }
0x1768   : > { %v8390_v61 = vmul.f32 0.0078125, %v8381_v55  ;;  %v8407_v11 = vsub.f32 %v8391_v46, %v8399_v19  ;;  %v8518_v24 = vunpack.c.l.b16 %v8479_v29  ;;  %p11365_p3 = por %p11364_p12, %p11363_p11 }
0x1769   : > { %v8526_v12 = vrot.slane %v8517_v20, 6  ;;  %v8515_v1 = vunpack.c.l.b16 %v8476_v53 }
0x176a   : > { %v8406_v22 = vsub.f32 %v8390_v61, %v8398_v40  ;;  %v8415_v13 = vmax.f32 %v8407_v11, 0.0  ;;  %v8529_v19 = vrot.slane %v8518_v24, 5  ;;  %p11366_p5 = pnand %p11365_p3, %p11359_p6 }
0x176b   : > { %v8525_v18 = vsel %vm8524_vm5, %v8523_v10, %v8515_v1  ;;  %s14300_s5 = scalar_lea.hbm %s14524_s26, %s9327_s21 }
0x176c   : > { %v8414_v32 = vmax.f32 %v8406_v22, 0.0  ;;  %v8431_v63 = vadd.f32 1e-12, %v8415_v13  ;;  %v11039_v17 = vpop.eup %11038  ;;  %v8528_v52 = vsel %vm8527_vm6, %v8526_v12, %v8525_v18 }
0x176d   : > { %v8444_v4 = vmul.f32 %v11039_v17, %v8420_v49  ;;  %v8531_v61 = vsel %vm8530_vm7, %v8529_v19, %v8528_v52 }
0x176e   : > { %v8430_v7 = vadd.f32 1e-12, %v8414_v32  ;;  %11042 = vrsqrt.f32 %v8431_v63 }
0x176f   : > { %v8458_v42 = vmul.f32 %v9306_v54, %v8444_v4 }
0x1770   : > { %11044 = vrsqrt.f32 %v8430_v7  ;;  %v11041_v38 = vpop.eup %11040 }
0x1771   : > { %v8445_v36 = vmul.f32 %v11041_v38, %v8421_v56  ;;  %v8472_v27 = vadd.f32 %v9307_v26, %v8458_v42 }
0x1773   : > { %v8459_v62 = vmul.f32 %v9306_v54, %v8445_v36  ;;  %v8480_v45 = vpack.c.bf16 %v8472_v27, %v8472_v27 }
0x1775   : > { %v8473_v28 = vadd.f32 %v9307_v26, %v8459_v62  ;;  %v8519_v3 = vunpack.c.l.b16 %v8480_v45 }
0x1777   : > { %v8481_v41 = vpack.c.bf16 %v8473_v28, %v8473_v28  ;;  %v8532_v33 = vrot.slane %v8519_v3, 4 }
0x1778   : > { %v11043_v47 = vpop.eup %11042 }
0x1779   : > { %v8447_v8 = vmul.f32 %v11043_v47, %v8423_v50  ;;  %v8520_v35 = vunpack.c.l.b16 %v8481_v41  ;;  %v8534_v30 = vsel %vm8533_vm8, %v8532_v33, %v8531_v61 }
0x177a   : > { %v11045_v21 = vpop.eup %11044 }
0x177b   : > { %v8446_v51 = vmul.f32 %v11045_v21, %v8422_v34  ;;  %v8461_v46 = vmul.f32 %v9306_v54, %v8447_v8  ;;  %v8535_v55 = vrot.slane %v8520_v35, 3 }
0x177d   : > { %v8460_v57 = vmul.f32 %v9306_v54, %v8446_v51  ;;  %v8475_v43 = vadd.f32 %v9307_v26, %v8461_v46  ;;  %v8537_v39 = vsel %vm8536_vm9, %v8535_v55, %v8534_v30 }
0x177f   : > { %v8474_v0 = vadd.f32 %v9307_v26, %v8460_v57  ;;  %v8483_v59 = vpack.c.bf16 %v8475_v43, %v8475_v43  ;;  %v10709_v26 = vld [vmem:[#allocation19 + $0x38] sm:$0xff]  }
0x1780   : > { %10272 = vmatpush3.bf16.msra.mxu0 %v10709_v26 }
0x1781   : > { %v8482_v14 = vpack.c.bf16 %v8474_v0, %v8474_v0  ;;  %v8522_v40 = vunpack.c.l.b16 %v8483_v59 }
0x1783   : > { %v8521_v11 = vunpack.c.l.b16 %v8482_v14  ;;  %v8541_v25 = vrot.slane %v8522_v40, 1 }
0x1785   : > { %v8538_v54 = vrot.slane %v8521_v11, 2 }
0x1787   : > { %v8540_v60 = vsel %vm8539_vm10, %v8538_v54, %v8537_v39 }
0x1788   : > { %v8543_v22 = vsel %vm8542_vm11, %v8541_v25, %v8540_v60 }
0x1789   : > { %v8544_v13 = vpack.c.b16 %v8543_v22, %v8543_v22 }
0x178b   : > { %10254 = vmatmul.mubr.bf16.vlgmr.msra.gmra.mrb[232].mxu1 %v8544_v13 }
0x185e   : > { %v8628_v49 = vpop.f32.mrb[232].mxu1 }
0x185f   : > { %v8629_v32 = vadd.f32 %v9308_v6, %v8628_v49  ;;  %v10255_v63 = vpop.f32.mrb[233].mxu1 }
0x1860   : > { %v8631_v17 = vpop.f32.mrb[234].mxu1 }
0x1861   : > { %v8634_v9 = vmax.f32 %v8629_v32, 0.0  ;;  %v10256_v23 = vpop.f32.mrb[235].mxu1 }
0x1863   : > { %v8635_v4 = vpack.c.bf16 %v8634_v9, %v8634_v9 }
0x1865   : > { %10274 = vmatmul.mubr.bf16.vlgmr.msra.gmra.mrb[224].mxu0 %v8635_v4 }
0x1938   : > { %v8741_v7 = vpop.f32.mrb[224].mxu0 }
0x1939   : > { %v8742_v48 = vadd.f32 %v9317_v15, %v8741_v7  ;;  %v10275_v58 = vpop.f32.mrb[225].mxu0 }
0x193a   : > { %v8744_v56 = vpop.f32.mrb[226].mxu0 }
0x193b   : > { %8747 = vst [vmem:[%s801_s2] sm:$0xff] %v8742_v48  ;;  %v10276_v42 = vpop.f32.mrb[227].mxu0 }
0x193c   : > { %11369 = shalt.err (!%p11366_p5)
}
0x193d   : > { %s11370_s2 = scalar_lea.hbm %s14300_s5, 128  ;;  %s11374_s0 = scalar_lea.hbm %s14524_s26, 256 }
0x193e   : > { %p11371_p9 = scmp.ne.s32.totalorder %s14300_s5, %s11370_s2  ;;  %p11375_p4 = scmp.lt.u32.totalorder %s14300_s5, %s14524_s26 }
0x193f   : > { %p11376_p1 = scmp.lt.u32.totalorder %s11374_s0, %s11370_s2  ;;  %p11378_p0 = scmp.lt.u32.totalorder %s11370_s2, %s14300_s5 }
0x1940   : > { %p11372_p7 = pnand %p11371_p9, %p14525_p2 }
0x1941   : > { %p11377_p13 = por %p11376_p1, %p11375_p4 }
0x1942   : > { %p11373_p10 = pneg %p11372_p7 }
0x1943   : > { %p11379_p8 = por %p11378_p0, %p11377_p13 }
0x1945   : > { %p11380_p6 = pnand %p11379_p8, %p11373_p10 }
0x1947   : > { %11383 = shalt.err (!%p11380_p6)
}
0x1948   : > { %10335 = dma.vmem_to_hbm [thread:$0]  (%p14525_p2), %s14302_s4, 128, %s14300_s5, %s8749_s8  }
0x1949 PF: > { %s8774_s3 = sand.u32 1, %s11430_s1   ;;  %p14526_p11 = scmp.ne.s32.totalorder %s14449_s11, 0 }
0x194a   : > { %p14527_p12 = scmp.ge.s32.totalorder %s11442_s24, 2  ;;  %s8775_s25 = scalar_lea.sflag [#allocation4], %s8774_s3 }
0x194c   : > { %p10373_p3 = pnand %p14527_p12, %p14526_p11 }
0x194e   : > { %11425 = dma.done.wait (!%p10373_p3), %s8775_s25, 128  }
0x194f   : > { %11427 = vsyncadd (!%p10373_p3), %s8775_s25, 4294967168  ;;  %p38_p5 = scmp.ge.s32.totalorder %s11850_s27, 4   ;;  %s14528_s1 = smov %s11434_s22 }
0x1950   : > { %s14529_s22 = smov %s11438_s23  ;;  %s14530_s23 = smov %s11862_s30 }
0x1951   : > { %s14531_s24 = smov %s11850_s27  ;;  %40 = sbr.rel (!%p38_p5) target bundleno = 26 (0x1a), region = 200 }
0x1958   :  { %8780 = vsyncpa [#allocation3], 1 }
0x1959   :  { %8782 = vsyncpa [#allocation3 + $0x1], 1 }
0x195a   :  { %8783 = vsyncpa [#allocation6], 1 }
0x195b   :  { %8784 = vsyncpa [#allocation9], 1 }
0x195c   :  { %8785 = vsyncpa [#allocation12], 1 }
0x195d   :  { %8786 = vsyncpa [#allocation15], 1 }
0x195e   :  { %8787 = vsyncpa [#allocation18], 1 }
0x195f   :  { %8788 = vsyncpa [#allocation4], 1 }
0x1960   :  { %8790 = vsyncpa [#allocation4 + $0x1], 1 }

</bundles_post_ra>
